<compile_context>
chip_gen: v5e
topology: v5e:2x2
jax: 0.10.0
libtpu: 0.0.40
codegen_flags: <defaults>
</compile_context>

<pallas_src>
import functools

import numpy as np
import jax
import jax.numpy as jnp
from jax import lax
from jax.experimental import pallas as pl
from jax.experimental.pallas import tpu as pltpu

LANE = 128
F32 = jnp.float32
BF16 = jnp.bfloat16
EPS = 1e-8


# ----------------------------------------------------------------------------
# Parameter packing: all weights -> (Nm,128,128) bf16 + (Nv,128) f32 + static layout
# ----------------------------------------------------------------------------
class Packer:
    def __init__(self, seed=0):
        self.rng = np.random.RandomState(seed)
        self.mats = []
        self.vecs = []

    def mat(self, cin, cout, scale):
        slab = np.zeros((LANE, LANE), np.float32)
        slab[:cin, :cout] = self.rng.randn(cin, cout).astype(np.float32) * scale
        self.mats.append(slab)
        return len(self.mats) - 1

    def vec(self, c, values=None, scale=None):
        v = np.zeros((LANE,), np.float32)
        if values is not None:
            v[:c] = values
        elif scale is not None:
            v[:c] = self.rng.randn(c).astype(np.float32) * scale
        self.vecs.append(v)
        return len(self.vecs) - 1

    def finalize(self):
        return (jnp.asarray(np.stack(self.mats)).astype(BF16),
                jnp.asarray(np.stack(self.vecs)))


def _dense_layout(pk, seg_cins, cout, k=1, norm=True, act=True):
    """Conv1d(sum(seg_cins)->cout, kernel k) [+ gLN + PReLU]; one slab per (tap, segment)."""
    assert cout <= LANE and all(c <= LANE for c in seg_cins)
    scale = 1.0 / np.sqrt(max(1, k * sum(seg_cins)))
    m0 = None
    for _ in range(k):
        for c in seg_cins:
            i = pk.mat(c, cout, scale)
            m0 = i if m0 is None else m0
    d = {'m': m0, 'nseg': len(seg_cins), 'k': k,
         'b': pk.vec(cout, scale=0.01), 'c': cout}
    if norm:
        d['g'] = pk.vec(cout, values=np.ones(cout, np.float32))
        d['beta'] = pk.vec(cout)
    if act:
        d['alpha'] = pk.vec(cout, values=np.full(cout, 0.25, np.float32))
    return d


def _dw_layout(pk, c, k):
    """Depthwise Conv1d(c->c, kernel k, groups=c) + gLN (no activation)."""
    scale = 1.0 / np.sqrt(k)
    w0 = None
    for _ in range(k):
        i = pk.vec(c, scale=scale)
        w0 = i if w0 is None else w0
    return {'w': w0, 'k': k, 'b': pk.vec(c, scale=0.01),
            'g': pk.vec(c, values=np.ones(c, np.float32)),
            'beta': pk.vec(c), 'c': c}


def _cnl_layout(pk, c):
    """Conv1d(c, c, 1, groups=c) -> PReLU (the *_concat_nonlinearities blocks)."""
    return {'w': pk.vec(c, scale=1.0), 'b': pk.vec(c, scale=0.01),
            'alpha': pk.vec(c, values=np.full(c, 0.25, np.float32))}


def _subnet_layout(pk, cin, hid, depth, k):
    d = {'hid': hid, 'depth': depth, 'k': k}
    d['mapper'] = _dense_layout(pk, [cin], hid)
    d['comp'] = [_dw_layout(pk, hid, k) for _ in range(depth)]
    d['down'] = [_dw_layout(pk, hid, k) for _ in range(depth)]   # down[0] unused (as in reference)
    d['fus'] = [_dense_layout(pk, [hid] * (2 if (i == 0 or i == depth - 1) else 3), hid)
                for i in range(depth)]
    d['cat'] = _dense_layout(pk, [hid] * depth, hid)
    d['head'] = _dense_layout(pk, [hid], cin, norm=False, act=False)
    return d


def build_params(cfg):
    pk = Packer(seed=0)
    lay = {}
    lay['a_pre_alpha'] = pk.vec(cfg['a_in'], values=np.full(cfg['a_in'], 0.25, np.float32))
    lay['a_pre'] = _dense_layout(pk, [cfg['a_in']], cfg['ab_in'], norm=False, act=False)
    lay['v_pre'] = _dense_layout(pk, [cfg['v_in']], cfg['vb_in'], k=3, norm=False, act=False)
    lay['mask_alpha'] = pk.vec(LANE, values=np.full(LANE, 0.25, np.float32))  # nn.PReLU() single param
    lay['mask'] = _dense_layout(pk, [cfg['ab_in']], cfg['num_speakers'] * cfg['a_in'],
                                norm=False, act=False)
    lay['a_blk'] = _subnet_layout(pk, cfg['ab_in'], cfg['ab_hid'], cfg['a_depth'], cfg['a_k'])
    lay['v_blk'] = [_subnet_layout(pk, cfg['vb_in'], cfg['vb_hid'], cfg['v_depth'], cfg['v_k'])
                    for _ in range(cfg['num_joint'])]
    lay['a_cnl'] = _cnl_layout(pk, cfg['ab_in'])
    lay['v_cnl'] = [_cnl_layout(pk, cfg['vb_in']) for _ in range(cfg['num_joint'])]
    lay['thal'] = [{'fa': _dense_layout(pk, [cfg['ab_in'], cfg['vb_in']], cfg['ab_in']),
                    'fv': _dense_layout(pk, [cfg['ab_in'], cfg['vb_in']], cfg['vb_in'])}
                   for _ in range(cfg['num_joint'])]
    mats, vecs = pk.finalize()
    return mats, vecs, lay


# ----------------------------------------------------------------------------
# The single fused kernel: whole FusionNetwork forward for one sample.
# ----------------------------------------------------------------------------
def _fusion_kernel(a_ref, v_ref, mats_ref, vecs_ref, o_ref, dw_scr, *, lay, cfg):

    def vec(i):                                    # (1, 128) f32
        return vecs_ref[i:i + 1, :]

    def mat(i):                                    # (128, 128) bf16
        return mats_ref[i]

    def prelu(y, alpha_i):
        return jnp.where(y >= 0.0, y, y * vec(alpha_i))

    def gln(y, d):
        # GlobalLayerNorm over (C_real, T), per-channel affine.  Padded lanes are
        # exactly zero on entry and get re-zeroed by the zero-padded gamma/beta.
        t = y.shape[0]
        c_real = d['c']
        inv = 1.0 / float(t * c_real)
        mean = jnp.sum(y) * inv
        yc = y - mean
        lane_mask = (lax.broadcasted_iota(jnp.int32, (1, LANE), 1) < c_real).astype(F32)
        var = jnp.sum(yc * yc * lane_mask) * inv       # centered second pass (stable)
        return yc * lax.rsqrt(var + EPS) * vec(d['g']) + vec(d['beta'])

    def dense(segs, d):
        # 1x1 dense ConvBlock over (possibly) channel-concatenated inputs: one weight
        # slab per 128-lane segment; the summed dots equal the packed contraction.
        assert len(segs) == d['nseg']
        acc = jnp.dot(segs[0].astype(BF16), mat(d['m']), preferred_element_type=F32)
        for s in range(1, len(segs)):
            acc = acc + jnp.dot(segs[s].astype(BF16), mat(d['m'] + s),
                                preferred_element_type=F32)
        y = acc + vec(d['b'])
        if 'g' in d:
            y = gln(y, d)
        if 'alpha' in d:
            y = prelu(y, d['alpha'])
        return y

    def dw_block(x, d, pad, stride):
        # Depthwise ConvBlock: K-tap depthwise conv (stride folded in) + bias + gLN.
        k = d['k']
        t_in = x.shape[0]
        t_out = (t_in + 2 * pad - k) // stride + 1
        if stride == 1:
            z = jnp.zeros((pad, LANE), F32)
            xp = jnp.concatenate([z, x, z], axis=0) if pad > 0 else x
            acc = xp[0:t_out, :] * vec(d['w'])
            for kk in range(1, k):
                acc = acc + xp[kk:kk + t_out, :] * vec(d['w'] + kk)
        else:
            # Padded input in a small VMEM scratch: only the pad rows are zeroed and
            # every tap is a strided read, so only t_out rows are ever computed.
            if pad > 0:
                dw_scr[0:pad, :] = jnp.zeros((pad, LANE), F32)
                dw_scr[pad + t_in:pad + t_in + pad, :] = jnp.zeros((pad, LANE), F32)
            dw_scr[pad:pad + t_in, :] = x
            acc = dw_scr[pl.ds(0, t_out, stride=stride), :] * vec(d['w'])
            for kk in range(1, k):
                acc = acc + dw_scr[pl.ds(kk, t_out, stride=stride), :] * vec(d['w'] + kk)
        return gln(acc + vec(d['b']), d)

    def interp(x, out_len):
        # F.interpolate(mode='nearest'): out[t] = x[(t * T_in) // T_out].  Exact row
        # selection via a tiny static 0/1 matmul (no integer division on the VPU).
        in_len = x.shape[0]
        if in_len == out_len:
            return x
        rows = lax.broadcasted_iota(jnp.int32, (out_len, in_len), 0)
        cols = lax.broadcasted_iota(jnp.int32, (out_len, in_len), 1)
        sel = jnp.logical_and(cols * out_len <= rows * in_len,
                              rows * in_len < (cols + 1) * out_len).astype(F32)
        return jnp.dot(sel, x, preferred_element_type=F32)

    def cnl(x_res, x_cur, d):
        # residual add + Conv1d(C, C, 1, groups=C) + PReLU, pure VPU.
        y = (x_res + x_cur) * vec(d['w']) + vec(d['b'])
        return jnp.where(y >= 0.0, y, y * vec(d['alpha']))

    def subnetwork(x, d, needs_residual):
        pad = (d['k'] - 1) // 2
        residual = x
        cur = dense([x], d['mapper'])
        comp = []
        for i in range(d['depth']):
            cur = dw_block(cur, d['comp'][i], pad, 1 if i == 0 else 2)
            comp.append(cur)
        fused = []
        for i in range(d['depth']):
            segs = []
            if i - 1 >= 0:
                segs.append(dw_block(comp[i - 1], d['down'][i], pad, 2))
            segs.append(comp[i])
            if i + 1 < d['depth']:
                segs.append(interp(comp[i + 1], comp[i].shape[0]))
            fused.append(dense(segs, d['fus'][i]))
        total_len = comp[0].shape[0]
        concat = dense([interp(f, total_len) for f in fused], d['cat'])
        out = dense([concat], d['head'])
        return out + residual if needs_residual else out

    def thalamic(a, v, d):
        a_i = interp(a, v.shape[0])
        v_i = interp(v, a.shape[0])
        return dense([a, v_i], d['fa']), dense([a_i, v], d['fv'])

    # ---------------- forward ----------------
    a_raw = a_ref[0]                               # (Ta, 128) f32, real lanes [0, a_in)
    v_raw = v_ref[0]                               # (Tv, 128) f32, real lanes [0, v_in)
    tv = v_raw.shape[0]

    # audio preprocessing: per-channel PReLU -> Conv1d(a_in, ab_in, 1)
    a_pre = dense([prelu(a_raw, lay['a_pre_alpha'])], lay['a_pre'])

    # video preprocessing: Conv1d(v_in, vb_in, 3, padding=1) as ONE dot with a
    # K*Cin-deep contraction (3 shifted slices lane-concatenated).
    z1 = jnp.zeros((1, LANE), F32)
    vp = jnp.concatenate([z1, v_raw, z1], axis=0)
    win = jnp.concatenate([vp[0:tv, :], vp[1:tv + 1, :], vp[2:tv + 2, :]],
                          axis=1).astype(BF16)
    w_vpre = jnp.concatenate([mat(lay['v_pre']['m'] + t) for t in range(3)], axis=0)
    v_pre = jnp.dot(win, w_vpre, preferred_element_type=F32) + vec(lay['v_pre']['b'])

    a_res, v_res = a_pre, v_pre

    # NOTE: the reference computes audio_block(a_pre) / video_blocks[0](v_pre) here and
    # immediately overwrites both with thalamic_networks[0](a_pre, v_pre); those
    # results are dead, so they are skipped (the returned mask is identical).
    cur_a, cur_v = thalamic(a_pre, v_pre, lay['thal'][0])

    for i in range(1, cfg['num_joint']):
        cur_a = subnetwork(cnl(a_res, cur_a, lay['a_cnl']), lay['a_blk'], True)
        cur_v = subnetwork(cnl(v_res, cur_v, lay['v_cnl'][i]), lay['v_blk'][i], False)
        cur_a, cur_v = thalamic(cur_a, cur_v, lay['thal'][i])

    for _ in range(cfg['num_audio']):
        cur_a = subnetwork(cnl(a_res, cur_a, lay['a_cnl']), lay['a_blk'], True)

    # mask estimator: PReLU -> Conv1d(ab_in, S*a_in, 1) -> ReLU
    m = dense([prelu(cur_a, lay['mask_alpha'])], lay['mask'])
    o_ref[0] = jnp.maximum(m, 0.0)


# ----------------------------------------------------------------------------
# Wrapper: layout glue outside, ONE pallas_call inside.
# ----------------------------------------------------------------------------
def make_forward(cfg, lay, B, Ta, Tv, n_mats, n_vecs):
    assert cfg['a_in'] <= LANE and cfg['v_in'] <= LANE
    kern = functools.partial(_fusion_kernel, lay=lay, cfg=cfg)

    call = pl.pallas_call(
        kern,
        out_shape=jax.ShapeDtypeStruct((B, Ta, LANE), F32),
        grid=(B,),
        in_specs=[
            pl.BlockSpec((1, Ta, LANE), lambda b: (b, 0, 0)),
            pl.BlockSpec((1, Tv, LANE), lambda b: (b, 0, 0)),
            pl.BlockSpec((n_mats, LANE, LANE), lambda b: (0, 0, 0)),
            pl.BlockSpec((n_vecs, LANE), lambda b: (0, 0)),
        ],
        out_specs=pl.BlockSpec((1, Ta, LANE), lambda b: (b, 0, 0)),
        scratch_shapes=[pltpu.VMEM((Ta + 8, LANE), F32)],   # padded depthwise buffer
        compiler_params=pltpu.CompilerParams(
            dimension_semantics=("parallel",)),   # one sample per TensorCore on v7x
    )

    S, a_in = cfg['num_speakers'], cfg['a_in']

    def fwd(mats, vecs, audio_nct, video_nct):
        # PyTorch (B, C, T) -> channels-last, zero-padded once to 128 lanes.
        audio = jnp.transpose(audio_nct, (0, 2, 1)).astype(F32)
        video = jnp.transpose(video_nct, (0, 2, 1)).astype(F32)
        audio = jnp.pad(audio, ((0, 0), (0, 0), (0, LANE - audio.shape[-1])))
        video = jnp.pad(video, ((0, 0), (0, 0), (0, LANE - video.shape[-1])))
        full = call(audio, video, mats, vecs)                 # (B, Ta, 128)
        mask = jnp.transpose(full[:, :, :S * a_in], (0, 2, 1))
        return mask.reshape(B, S, a_in, Ta), full

    return jax.jit(fwd)


# ----------------------------------------------------------------------------
# main
# ----------------------------------------------------------------------------
if __name__ == "__main__":
    cfg = dict(
        a_in=16, v_in=16,              # audio / video input channels
        num_speakers=2,
        num_joint=2, num_audio=1,      # joint / audio-only repeats
        ab_in=16, ab_hid=24, a_depth=3, a_k=5,   # audio GeneralSubnetwork
        vb_in=16, vb_hid=24, v_depth=2, v_k=3,   # video GeneralSubnetwork
    )
    B, Ta, Tv = 2, 16, 8

    mats, vecs, lay = build_params(cfg)
    fwd = make_forward(cfg, lay, B, Ta, Tv, mats.shape[0], vecs.shape[0])

    key = jax.random.PRNGKey(0)
    ka, kv = jax.random.split(key)
    audio = jax.random.normal(ka, (B, cfg['a_in'], Ta), jnp.float32)   # (B, C, T)
    video = jax.random.normal(kv, (B, cfg['v_in'], Tv), jnp.float32)   # (B, C, T)

    mask, full = jax.block_until_ready(fwd(mats, vecs, audio, video))

    assert mask.shape == (B, cfg['num_speakers'], cfg['a_in'], Ta)
    assert bool(jnp.all(jnp.isfinite(mask)))
    # padded-lane invariant: everything past the real mask channels is exactly zero
    pad_abs = float(jnp.max(jnp.abs(full[:, :, cfg['num_speakers'] * cfg['a_in']:])))
    assert pad_abs == 0.0, pad_abs
    print("KERNEL_OK")
</pallas_src>

<mosaic_0001>
module attributes {stable_mosaic.version = 11 : i64} {
  func.func @_fusion_kernel(%arg0: i32, %arg1: memref<1x16x128xf32, #tpu.memory_space<vmem>>, %arg2: memref<1x8x128xf32, #tpu.memory_space<vmem>>, %arg3: memref<41x128x128xbf16, #tpu.memory_space<vmem>>, %arg4: memref<181x128xf32, #tpu.memory_space<vmem>>, %arg5: memref<1x16x128xf32, #tpu.memory_space<vmem>>, %arg6: memref<24x128xf32, #tpu.memory_space<vmem>>) attributes {dimension_semantics = [#tpu.dimension_semantics<parallel>], iteration_bounds = array<i64: 2>, scalar_prefetch = 0 : i64, scratch_operands = 1 : i64, tpu.core_type = #tpu.core_type<tc>, window_params = [{transform_indices = @transform_0, window_bounds = array<i64: 1, 16, 128>}, {transform_indices = @transform_1, window_bounds = array<i64: 1, 8, 128>}, {pipeline_mode = #tpu.pipeline_mode<synchronous>, transform_indices = @transform_2, window_bounds = array<i64: 41, 128, 128>}, {pipeline_mode = #tpu.pipeline_mode<synchronous>, transform_indices = @transform_3, window_bounds = array<i64: 181, 128>}, {transform_indices = @transform_4, window_bounds = array<i64: 1, 16, 128>}]} {
    %c0 = arith.constant 0 : index
    %c0_0 = arith.constant 0 : index
    %c0_1 = arith.constant 0 : index
    %0 = vector.load %arg1[%c0, %c0_0, %c0_1] : memref<1x16x128xf32, #tpu.memory_space<vmem>>, vector<1x16x128xf32>
    %1 = vector.shape_cast %0 : vector<1x16x128xf32> to vector<16x128xf32>
    %c0_2 = arith.constant 0 : index
    %c0_3 = arith.constant 0 : index
    %c0_4 = arith.constant 0 : index
    %2 = vector.load %arg2[%c0_2, %c0_3, %c0_4] : memref<1x8x128xf32, #tpu.memory_space<vmem>>, vector<1x8x128xf32>
    %3 = vector.shape_cast %2 : vector<1x8x128xf32> to vector<8x128xf32>
    %cst = arith.constant 0.000000e+00 : f32
    %4 = vector.broadcast %cst : f32 to vector<16x128xf32>
    %5 = arith.cmpf oge, %1, %4 : vector<16x128xf32>
    %c0_5 = arith.constant 0 : index
    %c0_6 = arith.constant 0 : index
    %6 = vector.load %arg4[%c0_5, %c0_6] : memref<181x128xf32, #tpu.memory_space<vmem>>, vector<1x128xf32>
    %7 = vector.broadcast %6 : vector<1x128xf32> to vector<16x128xf32>
    %8 = arith.mulf %1, %7 : vector<16x128xf32>
    %9 = arith.select %5, %1, %8 : vector<16x128xi1>, vector<16x128xf32>
    %10 = arith.truncf %9 : vector<16x128xf32> to vector<16x128xbf16>
    %c0_7 = arith.constant 0 : index
    %c0_8 = arith.constant 0 : index
    %c0_9 = arith.constant 0 : index
    %11 = vector.load %arg3[%c0_7, %c0_8, %c0_9] : memref<41x128x128xbf16, #tpu.memory_space<vmem>>, vector<1x128x128xbf16>
    %12 = vector.shape_cast %11 : vector<1x128x128xbf16> to vector<128x128xbf16>
    %cst_10 = arith.constant dense<0.000000e+00> : vector<16x128xf32>
    %13 = tpu.matmul %10, %12, %cst_10 {dimension_numbers = #tpu.dot_dimension_numbers<[1], [0], [0], [1], [0, 0, 1, 1], [], []>} : vector<16x128xbf16>, vector<128x128xbf16>, vector<16x128xf32> -> vector<16x128xf32>
    %c1 = arith.constant 1 : index
    %c0_11 = arith.constant 0 : index
    %14 = vector.load %arg4[%c1, %c0_11] : memref<181x128xf32, #tpu.memory_space<vmem>>, vector<1x128xf32>
    %15 = vector.broadcast %14 : vector<1x128xf32> to vector<16x128xf32>
    %16 = arith.addf %13, %15 : vector<16x128xf32>
    %cst_12 = arith.constant 0.000000e+00 : f32
    %17 = vector.broadcast %cst_12 : f32 to vector<1x128xf32>
    %18 = tpu.concatenate %17, %3, %17 in 0 : vector<1x128xf32>, vector<8x128xf32>, vector<1x128xf32> -> vector<10x128xf32>
    %19 = vector.extract_strided_slice %18 {offsets = [0, 0], sizes = [8, 128], strides = [1, 1]} : vector<10x128xf32> to vector<8x128xf32>
    %20 = vector.extract_strided_slice %18 {offsets = [1, 0], sizes = [8, 128], strides = [1, 1]} : vector<10x128xf32> to vector<8x128xf32>
    %21 = vector.extract_strided_slice %18 {offsets = [2, 0], sizes = [8, 128], strides = [1, 1]} : vector<10x128xf32> to vector<8x128xf32>
    %22 = tpu.concatenate %19, %20, %21 in 1 : vector<8x128xf32>, vector<8x128xf32>, vector<8x128xf32> -> vector<8x384xf32>
    %23 = arith.truncf %22 : vector<8x384xf32> to vector<8x384xbf16>
    %c1_13 = arith.constant 1 : index
    %c0_14 = arith.constant 0 : index
    %c0_15 = arith.constant 0 : index
    %24 = vector.load %arg3[%c1_13, %c0_14, %c0_15] : memref<41x128x128xbf16, #tpu.memory_space<vmem>>, vector<1x128x128xbf16>
    %25 = vector.shape_cast %24 : vector<1x128x128xbf16> to vector<128x128xbf16>
    %c2 = arith.constant 2 : index
    %c0_16 = arith.constant 0 : index
    %c0_17 = arith.constant 0 : index
    %26 = vector.load %arg3[%c2, %c0_16, %c0_17] : memref<41x128x128xbf16, #tpu.memory_space<vmem>>, vector<1x128x128xbf16>
    %27 = vector.shape_cast %26 : vector<1x128x128xbf16> to vector<128x128xbf16>
    %c3 = arith.constant 3 : index
    %c0_18 = arith.constant 0 : index
    %c0_19 = arith.constant 0 : index
    %28 = vector.load %arg3[%c3, %c0_18, %c0_19] : memref<41x128x128xbf16, #tpu.memory_space<vmem>>, vector<1x128x128xbf16>
    %29 = vector.shape_cast %28 : vector<1x128x128xbf16> to vector<128x128xbf16>
    %30 = tpu.concatenate %25, %27, %29 in 0 : vector<128x128xbf16>, vector<128x128xbf16>, vector<128x128xbf16> -> vector<384x128xbf16>
    %cst_20 = arith.constant dense<0.000000e+00> : vector<8x128xf32>
    %31 = tpu.matmul %23, %30, %cst_20 {dimension_numbers = #tpu.dot_dimension_numbers<[1], [0], [0], [1], [0, 0, 1, 1], [], []>} : vector<8x384xbf16>, vector<384x128xbf16>, vector<8x128xf32> -> vector<8x128xf32>
    %c2_21 = arith.constant 2 : index
    %c0_22 = arith.constant 0 : index
    %32 = vector.load %arg4[%c2_21, %c0_22] : memref<181x128xf32, #tpu.memory_space<vmem>>, vector<1x128xf32>
    %33 = vector.broadcast %32 : vector<1x128xf32> to vector<8x128xf32>
    %34 = arith.addf %31, %33 : vector<8x128xf32>
    %35 = tpu.iota {dimensions = array<i32: 0>} : vector<8x16xi32>
    %36 = tpu.iota {dimensions = array<i32: 1>} : vector<8x16xi32>
    %c8_i32 = arith.constant 8 : i32
    %37 = vector.broadcast %c8_i32 : i32 to vector<8x16xi32>
    %38 = arith.muli %36, %37 : vector<8x16xi32>
    %c16_i32 = arith.constant 16 : i32
    %39 = vector.broadcast %c16_i32 : i32 to vector<8x16xi32>
    %40 = arith.muli %35, %39 : vector<8x16xi32>
    %41 = arith.cmpi sle, %38, %40 : vector<8x16xi32>
    %c16_i32_23 = arith.constant 16 : i32
    %42 = vector.broadcast %c16_i32_23 : i32 to vector<8x16xi32>
    %43 = arith.muli %35, %42 : vector<8x16xi32>
    %c1_i32 = arith.constant 1 : i32
    %44 = vector.broadcast %c1_i32 : i32 to vector<8x16xi32>
    %45 = arith.addi %36, %44 : vector<8x16xi32>
    %c8_i32_24 = arith.constant 8 : i32
    %46 = vector.broadcast %c8_i32_24 : i32 to vector<8x16xi32>
    %47 = arith.muli %45, %46 : vector<8x16xi32>
    %48 = arith.cmpi slt, %43, %47 : vector<8x16xi32>
    %49 = arith.andi %41, %48 : vector<8x16xi1>
    %50 = arith.extui %49 : vector<8x16xi1> to vector<8x16xi32>
    %51 = arith.sitofp %50 : vector<8x16xi32> to vector<8x16xf32>
    %cst_25 = arith.constant dense<0.000000e+00> : vector<8x128xf32>
    %52 = tpu.matmul %51, %16, %cst_25 {dimension_numbers = #tpu.dot_dimension_numbers<[1], [0], [0], [1], [0, 0, 1, 1], [], []>} : vector<8x16xf32>, vector<16x128xf32>, vector<8x128xf32> -> vector<8x128xf32>
    %53 = tpu.iota {dimensions = array<i32: 0>} : vector<16x8xi32>
    %54 = tpu.iota {dimensions = array<i32: 1>} : vector<16x8xi32>
    %c16_i32_26 = arith.constant 16 : i32
    %55 = vector.broadcast %c16_i32_26 : i32 to vector<16x8xi32>
    %56 = arith.muli %54, %55 : vector<16x8xi32>
    %c8_i32_27 = arith.constant 8 : i32
    %57 = vector.broadcast %c8_i32_27 : i32 to vector<16x8xi32>
    %58 = arith.muli %53, %57 : vector<16x8xi32>
    %59 = arith.cmpi sle, %56, %58 : vector<16x8xi32>
    %c8_i32_28 = arith.constant 8 : i32
    %60 = vector.broadcast %c8_i32_28 : i32 to vector<16x8xi32>
    %61 = arith.muli %53, %60 : vector<16x8xi32>
    %c1_i32_29 = arith.constant 1 : i32
    %62 = vector.broadcast %c1_i32_29 : i32 to vector<16x8xi32>
    %63 = arith.addi %54, %62 : vector<16x8xi32>
    %c16_i32_30 = arith.constant 16 : i32
    %64 = vector.broadcast %c16_i32_30 : i32 to vector<16x8xi32>
    %65 = arith.muli %63, %64 : vector<16x8xi32>
    %66 = arith.cmpi slt, %61, %65 : vector<16x8xi32>
    %67 = arith.andi %59, %66 : vector<16x8xi1>
    %68 = arith.extui %67 : vector<16x8xi1> to vector<16x8xi32>
    %69 = arith.sitofp %68 : vector<16x8xi32> to vector<16x8xf32>
    %cst_31 = arith.constant dense<0.000000e+00> : vector<16x128xf32>
    %70 = tpu.matmul %69, %34, %cst_31 {dimension_numbers = #tpu.dot_dimension_numbers<[1], [0], [0], [1], [0, 0, 1, 1], [], []>} : vector<16x8xf32>, vector<8x128xf32>, vector<16x128xf32> -> vector<16x128xf32>
    %71 = arith.truncf %16 : vector<16x128xf32> to vector<16x128xbf16>
    %c33 = arith.constant 33 : index
    %c0_32 = arith.constant 0 : index
    %c0_33 = arith.constant 0 : index
    %72 = vector.load %arg3[%c33, %c0_32, %c0_33] : memref<41x128x128xbf16, #tpu.memory_space<vmem>>, vector<1x128x128xbf16>
    %73 = vector.shape_cast %72 : vector<1x128x128xbf16> to vector<128x128xbf16>
    %cst_34 = arith.constant dense<0.000000e+00> : vector<16x128xf32>
    %74 = tpu.matmul %71, %73, %cst_34 {dimension_numbers = #tpu.dot_dimension_numbers<[1], [0], [0], [1], [0, 0, 1, 1], [], []>} : vector<16x128xbf16>, vector<128x128xbf16>, vector<16x128xf32> -> vector<16x128xf32>
    %75 = arith.truncf %70 : vector<16x128xf32> to vector<16x128xbf16>
    %c34 = arith.constant 34 : index
    %c0_35 = arith.constant 0 : index
    %c0_36 = arith.constant 0 : index
    %76 = vector.load %arg3[%c34, %c0_35, %c0_36] : memref<41x128x128xbf16, #tpu.memory_space<vmem>>, vector<1x128x128xbf16>
    %77 = vector.shape_cast %76 : vector<1x128x128xbf16> to vector<128x128xbf16>
    %cst_37 = arith.constant dense<0.000000e+00> : vector<16x128xf32>
    %78 = tpu.matmul %75, %77, %cst_37 {dimension_numbers = #tpu.dot_dimension_numbers<[1], [0], [0], [1], [0, 0, 1, 1], [], []>} : vector<16x128xbf16>, vector<128x128xbf16>, vector<16x128xf32> -> vector<16x128xf32>
    %79 = arith.addf %74, %78 : vector<16x128xf32>
    %c165 = arith.constant 165 : index
    %c0_38 = arith.constant 0 : index
    %80 = vector.load %arg4[%c165, %c0_38] : memref<181x128xf32, #tpu.memory_space<vmem>>, vector<1x128xf32>
    %81 = vector.broadcast %80 : vector<1x128xf32> to vector<16x128xf32>
    %82 = arith.addf %79, %81 : vector<16x128xf32>
    %83 = vector.shape_cast %82 : vector<16x128xf32> to vector<1x16x128xf32>
    %cst_39 = arith.constant dense<0.000000e+00> : vector<1xf32>
    %84 = vector.multi_reduction <add>, %83, %cst_39 [1, 2] : vector<1x16x128xf32> to vector<1xf32>
    %85 = vector.shape_cast %84 : vector<1xf32> to vector<1x1x1xf32>
    %86 = vector.extract %85[0, 0, 0] : f32 from vector<1x1x1xf32>
    %cst_40 = arith.constant 3.906250e-03 : f32
    %87 = arith.mulf %86, %cst_40 : f32
    %88 = vector.broadcast %87 : f32 to vector<16x128xf32>
    %89 = arith.subf %82, %88 : vector<16x128xf32>
    %90 = tpu.iota {dimensions = array<i32: 1>} : vector<1x128xi32>
    %c16_i32_41 = arith.constant 16 : i32
    %91 = vector.broadcast %c16_i32_41 : i32 to vector<1x128xi32>
    %92 = arith.cmpi slt, %90, %91 : vector<1x128xi32>
    %93 = arith.extui %92 : vector<1x128xi1> to vector<1x128xi32>
    %94 = arith.sitofp %93 : vector<1x128xi32> to vector<1x128xf32>
    %95 = arith.mulf %89, %89 : vector<16x128xf32>
    %96 = vector.broadcast %94 : vector<1x128xf32> to vector<16x128xf32>
    %97 = arith.mulf %95, %96 : vector<16x128xf32>
    %98 = vector.shape_cast %97 : vector<16x128xf32> to vector<1x16x128xf32>
    %cst_42 = arith.constant dense<0.000000e+00> : vector<1xf32>
    %99 = vector.multi_reduction <add>, %98, %cst_42 [1, 2] : vector<1x16x128xf32> to vector<1xf32>
    %100 = vector.shape_cast %99 : vector<1xf32> to vector<1x1x1xf32>
    %101 = vector.extract %100[0, 0, 0] : f32 from vector<1x1x1xf32>
    %cst_43 = arith.constant 3.906250e-03 : f32
    %102 = arith.mulf %101, %cst_43 : f32
    %cst_44 = arith.constant 9.99999993E-9 : f32
    %103 = arith.addf %102, %cst_44 : f32
    %104 = math.rsqrt %103 : f32
    %105 = vector.broadcast %104 : f32 to vector<16x128xf32>
    %106 = arith.mulf %89, %105 : vector<16x128xf32>
    %c166 = arith.constant 166 : index
    %c0_45 = arith.constant 0 : index
    %107 = vector.load %arg4[%c166, %c0_45] : memref<181x128xf32, #tpu.memory_space<vmem>>, vector<1x128xf32>
    %108 = vector.broadcast %107 : vector<1x128xf32> to vector<16x128xf32>
    %109 = arith.mulf %106, %108 : vector<16x128xf32>
    %c167 = arith.constant 167 : index
    %c0_46 = arith.constant 0 : index
    %110 = vector.load %arg4[%c167, %c0_46] : memref<181x128xf32, #tpu.memory_space<vmem>>, vector<1x128xf32>
    %111 = vector.broadcast %110 : vector<1x128xf32> to vector<16x128xf32>
    %112 = arith.addf %109, %111 : vector<16x128xf32>
    %cst_47 = arith.constant 0.000000e+00 : f32
    %113 = vector.broadcast %cst_47 : f32 to vector<16x128xf32>
    %114 = arith.cmpf oge, %112, %113 : vector<16x128xf32>
    %c168 = arith.constant 168 : index
    %c0_48 = arith.constant 0 : index
    %115 = vector.load %arg4[%c168, %c0_48] : memref<181x128xf32, #tpu.memory_space<vmem>>, vector<1x128xf32>
    %116 = vector.broadcast %115 : vector<1x128xf32> to vector<16x128xf32>
    %117 = arith.mulf %112, %116 : vector<16x128xf32>
    %118 = arith.select %114, %112, %117 : vector<16x128xi1>, vector<16x128xf32>
    %119 = arith.truncf %52 : vector<8x128xf32> to vector<8x128xbf16>
    %c35 = arith.constant 35 : index
    %c0_49 = arith.constant 0 : index
    %c0_50 = arith.constant 0 : index
    %120 = vector.load %arg3[%c35, %c0_49, %c0_50] : memref<41x128x128xbf16, #tpu.memory_space<vmem>>, vector<1x128x128xbf16>
    %121 = vector.shape_cast %120 : vector<1x128x128xbf16> to vector<128x128xbf16>
    %cst_51 = arith.constant dense<0.000000e+00> : vector<8x128xf32>
    %122 = tpu.matmul %119, %121, %cst_51 {dimension_numbers = #tpu.dot_dimension_numbers<[1], [0], [0], [1], [0, 0, 1, 1], [], []>} : vector<8x128xbf16>, vector<128x128xbf16>, vector<8x128xf32> -> vector<8x128xf32>
    %123 = arith.truncf %34 : vector<8x128xf32> to vector<8x128xbf16>
    %c36 = arith.constant 36 : index
    %c0_52 = arith.constant 0 : index
    %c0_53 = arith.constant 0 : index
    %124 = vector.load %arg3[%c36, %c0_52, %c0_53] : memref<41x128x128xbf16, #tpu.memory_space<vmem>>, vector<1x128x128xbf16>
    %125 = vector.shape_cast %124 : vector<1x128x128xbf16> to vector<128x128xbf16>
    %cst_54 = arith.constant dense<0.000000e+00> : vector<8x128xf32>
    %126 = tpu.matmul %123, %125, %cst_54 {dimension_numbers = #tpu.dot_dimension_numbers<[1], [0], [0], [1], [0, 0, 1, 1], [], []>} : vector<8x128xbf16>, vector<128x128xbf16>, vector<8x128xf32> -> vector<8x128xf32>
    %127 = arith.addf %122, %126 : vector<8x128xf32>
    %c169 = arith.constant 169 : index
    %c0_55 = arith.constant 0 : index
    %128 = vector.load %arg4[%c169, %c0_55] : memref<181x128xf32, #tpu.memory_space<vmem>>, vector<1x128xf32>
    %129 = vector.broadcast %128 : vector<1x128xf32> to vector<8x128xf32>
    %130 = arith.addf %127, %129 : vector<8x128xf32>
    %131 = vector.shape_cast %130 : vector<8x128xf32> to vector<1x8x128xf32>
    %cst_56 = arith.constant dense<0.000000e+00> : vector<1xf32>
    %132 = vector.multi_reduction <add>, %131, %cst_56 [1, 2] : vector<1x8x128xf32> to vector<1xf32>
    %133 = vector.shape_cast %132 : vector<1xf32> to vector<1x1x1xf32>
    %134 = vector.extract %133[0, 0, 0] : f32 from vector<1x1x1xf32>
    %cst_57 = arith.constant 7.812500e-03 : f32
    %135 = arith.mulf %134, %cst_57 : f32
    %136 = vector.broadcast %135 : f32 to vector<8x128xf32>
    %137 = arith.subf %130, %136 : vector<8x128xf32>
    %138 = tpu.iota {dimensions = array<i32: 1>} : vector<1x128xi32>
    %c16_i32_58 = arith.constant 16 : i32
    %139 = vector.broadcast %c16_i32_58 : i32 to vector<1x128xi32>
    %140 = arith.cmpi slt, %138, %139 : vector<1x128xi32>
    %141 = arith.extui %140 : vector<1x128xi1> to vector<1x128xi32>
    %142 = arith.sitofp %141 : vector<1x128xi32> to vector<1x128xf32>
    %143 = arith.mulf %137, %137 : vector<8x128xf32>
    %144 = vector.broadcast %142 : vector<1x128xf32> to vector<8x128xf32>
    %145 = arith.mulf %143, %144 : vector<8x128xf32>
    %146 = vector.shape_cast %145 : vector<8x128xf32> to vector<1x8x128xf32>
    %cst_59 = arith.constant dense<0.000000e+00> : vector<1xf32>
    %147 = vector.multi_reduction <add>, %146, %cst_59 [1, 2] : vector<1x8x128xf32> to vector<1xf32>
    %148 = vector.shape_cast %147 : vector<1xf32> to vector<1x1x1xf32>
    %149 = vector.extract %148[0, 0, 0] : f32 from vector<1x1x1xf32>
    %cst_60 = arith.constant 7.812500e-03 : f32
    %150 = arith.mulf %149, %cst_60 : f32
    %cst_61 = arith.constant 9.99999993E-9 : f32
    %151 = arith.addf %150, %cst_61 : f32
    %152 = math.rsqrt %151 : f32
    %153 = vector.broadcast %152 : f32 to vector<8x128xf32>
    %154 = arith.mulf %137, %153 : vector<8x128xf32>
    %c170 = arith.constant 170 : index
    %c0_62 = arith.constant 0 : index
    %155 = vector.load %arg4[%c170, %c0_62] : memref<181x128xf32, #tpu.memory_space<vmem>>, vector<1x128xf32>
    %156 = vector.broadcast %155 : vector<1x128xf32> to vector<8x128xf32>
    %157 = arith.mulf %154, %156 : vector<8x128xf32>
    %c171 = arith.constant 171 : index
    %c0_63 = arith.constant 0 : index
    %158 = vector.load %arg4[%c171, %c0_63] : memref<181x128xf32, #tpu.memory_space<vmem>>, vector<1x128xf32>
    %159 = vector.broadcast %158 : vector<1x128xf32> to vector<8x128xf32>
    %160 = arith.addf %157, %159 : vector<8x128xf32>
    %cst_64 = arith.constant 0.000000e+00 : f32
    %161 = vector.broadcast %cst_64 : f32 to vector<8x128xf32>
    %162 = arith.cmpf oge, %160, %161 : vector<8x128xf32>
    %c172 = arith.constant 172 : index
    %c0_65 = arith.constant 0 : index
    %163 = vector.load %arg4[%c172, %c0_65] : memref<181x128xf32, #tpu.memory_space<vmem>>, vector<1x128xf32>
    %164 = vector.broadcast %163 : vector<1x128xf32> to vector<8x128xf32>
    %165 = arith.mulf %160, %164 : vector<8x128xf32>
    %166 = arith.select %162, %160, %165 : vector<8x128xi1>, vector<8x128xf32>
    %167 = arith.addf %16, %118 : vector<16x128xf32>
    %c156 = arith.constant 156 : index
    %c0_66 = arith.constant 0 : index
    %168 = vector.load %arg4[%c156, %c0_66] : memref<181x128xf32, #tpu.memory_space<vmem>>, vector<1x128xf32>
    %169 = vector.broadcast %168 : vector<1x128xf32> to vector<16x128xf32>
    %170 = arith.mulf %167, %169 : vector<16x128xf32>
    %c157 = arith.constant 157 : index
    %c0_67 = arith.constant 0 : index
    %171 = vector.load %arg4[%c157, %c0_67] : memref<181x128xf32, #tpu.memory_space<vmem>>, vector<1x128xf32>
    %172 = vector.broadcast %171 : vector<1x128xf32> to vector<16x128xf32>
    %173 = arith.addf %170, %172 : vector<16x128xf32>
    %cst_68 = arith.constant 0.000000e+00 : f32
    %174 = vector.broadcast %cst_68 : f32 to vector<16x128xf32>
    %175 = arith.cmpf oge, %173, %174 : vector<16x128xf32>
    %c158 = arith.constant 158 : index
    %c0_69 = arith.constant 0 : index
    %176 = vector.load %arg4[%c158, %c0_69] : memref<181x128xf32, #tpu.memory_space<vmem>>, vector<1x128xf32>
    %177 = vector.broadcast %176 : vector<1x128xf32> to vector<16x128xf32>
    %178 = arith.mulf %173, %177 : vector<16x128xf32>
    %179 = arith.select %175, %173, %178 : vector<16x128xi1>, vector<16x128xf32>
    %180 = arith.truncf %179 : vector<16x128xf32> to vector<16x128xbf16>
    %c5 = arith.constant 5 : index
    %c0_70 = arith.constant 0 : index
    %c0_71 = arith.constant 0 : index
    %181 = vector.load %arg3[%c5, %c0_70, %c0_71] : memref<41x128x128xbf16, #tpu.memory_space<vmem>>, vector<1x128x128xbf16>
    %182 = vector.shape_cast %181 : vector<1x128x128xbf16> to vector<128x128xbf16>
    %cst_72 = arith.constant dense<0.000000e+00> : vector<16x128xf32>
    %183 = tpu.matmul %180, %182, %cst_72 {dimension_numbers = #tpu.dot_dimension_numbers<[1], [0], [0], [1], [0, 0, 1, 1], [], []>} : vector<16x128xbf16>, vector<128x128xbf16>, vector<16x128xf32> -> vector<16x128xf32>
    %c5_73 = arith.constant 5 : index
    %c0_74 = arith.constant 0 : index
    %184 = vector.load %arg4[%c5_73, %c0_74] : memref<181x128xf32, #tpu.memory_space<vmem>>, vector<1x128xf32>
    %185 = vector.broadcast %184 : vector<1x128xf32> to vector<16x128xf32>
    %186 = arith.addf %183, %185 : vector<16x128xf32>
    %187 = vector.shape_cast %186 : vector<16x128xf32> to vector<1x16x128xf32>
    %cst_75 = arith.constant dense<0.000000e+00> : vector<1xf32>
    %188 = vector.multi_reduction <add>, %187, %cst_75 [1, 2] : vector<1x16x128xf32> to vector<1xf32>
    %189 = vector.shape_cast %188 : vector<1xf32> to vector<1x1x1xf32>
    %190 = vector.extract %189[0, 0, 0] : f32 from vector<1x1x1xf32>
    %cst_76 = arith.constant 0.00260416674 : f32
    %191 = arith.mulf %190, %cst_76 : f32
    %192 = vector.broadcast %191 : f32 to vector<16x128xf32>
    %193 = arith.subf %186, %192 : vector<16x128xf32>
    %194 = tpu.iota {dimensions = array<i32: 1>} : vector<1x128xi32>
    %c24_i32 = arith.constant 24 : i32
    %195 = vector.broadcast %c24_i32 : i32 to vector<1x128xi32>
    %196 = arith.cmpi slt, %194, %195 : vector<1x128xi32>
    %197 = arith.extui %196 : vector<1x128xi1> to vector<1x128xi32>
    %198 = arith.sitofp %197 : vector<1x128xi32> to vector<1x128xf32>
    %199 = arith.mulf %193, %193 : vector<16x128xf32>
    %200 = vector.broadcast %198 : vector<1x128xf32> to vector<16x128xf32>
    %201 = arith.mulf %199, %200 : vector<16x128xf32>
    %202 = vector.shape_cast %201 : vector<16x128xf32> to vector<1x16x128xf32>
    %cst_77 = arith.constant dense<0.000000e+00> : vector<1xf32>
    %203 = vector.multi_reduction <add>, %202, %cst_77 [1, 2] : vector<1x16x128xf32> to vector<1xf32>
    %204 = vector.shape_cast %203 : vector<1xf32> to vector<1x1x1xf32>
    %205 = vector.extract %204[0, 0, 0] : f32 from vector<1x1x1xf32>
    %cst_78 = arith.constant 0.00260416674 : f32
    %206 = arith.mulf %205, %cst_78 : f32
    %cst_79 = arith.constant 9.99999993E-9 : f32
    %207 = arith.addf %206, %cst_79 : f32
    %208 = math.rsqrt %207 : f32
    %209 = vector.broadcast %208 : f32 to vector<16x128xf32>
    %210 = arith.mulf %193, %209 : vector<16x128xf32>
    %c6 = arith.constant 6 : index
    %c0_80 = arith.constant 0 : index
    %211 = vector.load %arg4[%c6, %c0_80] : memref<181x128xf32, #tpu.memory_space<vmem>>, vector<1x128xf32>
    %212 = vector.broadcast %211 : vector<1x128xf32> to vector<16x128xf32>
    %213 = arith.mulf %210, %212 : vector<16x128xf32>
    %c7 = arith.constant 7 : index
    %c0_81 = arith.constant 0 : index
    %214 = vector.load %arg4[%c7, %c0_81] : memref<181x128xf32, #tpu.memory_space<vmem>>, vector<1x128xf32>
    %215 = vector.broadcast %214 : vector<1x128xf32> to vector<16x128xf32>
    %216 = arith.addf %213, %215 : vector<16x128xf32>
    %cst_82 = arith.constant 0.000000e+00 : f32
    %217 = vector.broadcast %cst_82 : f32 to vector<16x128xf32>
    %218 = arith.cmpf oge, %216, %217 : vector<16x128xf32>
    %c8 = arith.constant 8 : index
    %c0_83 = arith.constant 0 : index
    %219 = vector.load %arg4[%c8, %c0_83] : memref<181x128xf32, #tpu.memory_space<vmem>>, vector<1x128xf32>
    %220 = vector.broadcast %219 : vector<1x128xf32> to vector<16x128xf32>
    %221 = arith.mulf %216, %220 : vector<16x128xf32>
    %222 = arith.select %218, %216, %221 : vector<16x128xi1>, vector<16x128xf32>
    %cst_84 = arith.constant 0.000000e+00 : f32
    %223 = vector.broadcast %cst_84 : f32 to vector<2x128xf32>
    %224 = tpu.concatenate %223, %222, %223 in 0 : vector<2x128xf32>, vector<16x128xf32>, vector<2x128xf32> -> vector<20x128xf32>
    %225 = vector.extract_strided_slice %224 {offsets = [0, 0], sizes = [16, 128], strides = [1, 1]} : vector<20x128xf32> to vector<16x128xf32>
    %c9 = arith.constant 9 : index
    %c0_85 = arith.constant 0 : index
    %226 = vector.load %arg4[%c9, %c0_85] : memref<181x128xf32, #tpu.memory_space<vmem>>, vector<1x128xf32>
    %227 = vector.broadcast %226 : vector<1x128xf32> to vector<16x128xf32>
    %228 = arith.mulf %225, %227 : vector<16x128xf32>
    %229 = vector.extract_strided_slice %224 {offsets = [1, 0], sizes = [16, 128], strides = [1, 1]} : vector<20x128xf32> to vector<16x128xf32>
    %c10 = arith.constant 10 : index
    %c0_86 = arith.constant 0 : index
    %230 = vector.load %arg4[%c10, %c0_86] : memref<181x128xf32, #tpu.memory_space<vmem>>, vector<1x128xf32>
    %231 = vector.broadcast %230 : vector<1x128xf32> to vector<16x128xf32>
    %232 = arith.mulf %229, %231 : vector<16x128xf32>
    %233 = arith.addf %228, %232 : vector<16x128xf32>
    %234 = vector.extract_strided_slice %224 {offsets = [2, 0], sizes = [16, 128], strides = [1, 1]} : vector<20x128xf32> to vector<16x128xf32>
    %c11 = arith.constant 11 : index
    %c0_87 = arith.constant 0 : index
    %235 = vector.load %arg4[%c11, %c0_87] : memref<181x128xf32, #tpu.memory_space<vmem>>, vector<1x128xf32>
    %236 = vector.broadcast %235 : vector<1x128xf32> to vector<16x128xf32>
    %237 = arith.mulf %234, %236 : vector<16x128xf32>
    %238 = arith.addf %233, %237 : vector<16x128xf32>
    %239 = vector.extract_strided_slice %224 {offsets = [3, 0], sizes = [16, 128], strides = [1, 1]} : vector<20x128xf32> to vector<16x128xf32>
    %c12 = arith.constant 12 : index
    %c0_88 = arith.constant 0 : index
    %240 = vector.load %arg4[%c12, %c0_88] : memref<181x128xf32, #tpu.memory_space<vmem>>, vector<1x128xf32>
    %241 = vector.broadcast %240 : vector<1x128xf32> to vector<16x128xf32>
    %242 = arith.mulf %239, %241 : vector<16x128xf32>
    %243 = arith.addf %238, %242 : vector<16x128xf32>
    %244 = vector.extract_strided_slice %224 {offsets = [4, 0], sizes = [16, 128], strides = [1, 1]} : vector<20x128xf32> to vector<16x128xf32>
    %c13 = arith.constant 13 : index
    %c0_89 = arith.constant 0 : index
    %245 = vector.load %arg4[%c13, %c0_89] : memref<181x128xf32, #tpu.memory_space<vmem>>, vector<1x128xf32>
    %246 = vector.broadcast %245 : vector<1x128xf32> to vector<16x128xf32>
    %247 = arith.mulf %244, %246 : vector<16x128xf32>
    %248 = arith.addf %243, %247 : vector<16x128xf32>
    %c14 = arith.constant 14 : index
    %c0_90 = arith.constant 0 : index
    %249 = vector.load %arg4[%c14, %c0_90] : memref<181x128xf32, #tpu.memory_space<vmem>>, vector<1x128xf32>
    %250 = vector.broadcast %249 : vector<1x128xf32> to vector<16x128xf32>
    %251 = arith.addf %248, %250 : vector<16x128xf32>
    %252 = vector.shape_cast %251 : vector<16x128xf32> to vector<1x16x128xf32>
    %cst_91 = arith.constant dense<0.000000e+00> : vector<1xf32>
    %253 = vector.multi_reduction <add>, %252, %cst_91 [1, 2] : vector<1x16x128xf32> to vector<1xf32>
    %254 = vector.shape_cast %253 : vector<1xf32> to vector<1x1x1xf32>
    %255 = vector.extract %254[0, 0, 0] : f32 from vector<1x1x1xf32>
    %cst_92 = arith.constant 0.00260416674 : f32
    %256 = arith.mulf %255, %cst_92 : f32
    %257 = vector.broadcast %256 : f32 to vector<16x128xf32>
    %258 = arith.subf %251, %257 : vector<16x128xf32>
    %259 = tpu.iota {dimensions = array<i32: 1>} : vector<1x128xi32>
    %c24_i32_93 = arith.constant 24 : i32
    %260 = vector.broadcast %c24_i32_93 : i32 to vector<1x128xi32>
    %261 = arith.cmpi slt, %259, %260 : vector<1x128xi32>
    %262 = arith.extui %261 : vector<1x128xi1> to vector<1x128xi32>
    %263 = arith.sitofp %262 : vector<1x128xi32> to vector<1x128xf32>
    %264 = arith.mulf %258, %258 : vector<16x128xf32>
    %265 = vector.broadcast %263 : vector<1x128xf32> to vector<16x128xf32>
    %266 = arith.mulf %264, %265 : vector<16x128xf32>
    %267 = vector.shape_cast %266 : vector<16x128xf32> to vector<1x16x128xf32>
    %cst_94 = arith.constant dense<0.000000e+00> : vector<1xf32>
    %268 = vector.multi_reduction <add>, %267, %cst_94 [1, 2] : vector<1x16x128xf32> to vector<1xf32>
    %269 = vector.shape_cast %268 : vector<1xf32> to vector<1x1x1xf32>
    %270 = vector.extract %269[0, 0, 0] : f32 from vector<1x1x1xf32>
    %cst_95 = arith.constant 0.00260416674 : f32
    %271 = arith.mulf %270, %cst_95 : f32
    %cst_96 = arith.constant 9.99999993E-9 : f32
    %272 = arith.addf %271, %cst_96 : f32
    %273 = math.rsqrt %272 : f32
    %274 = vector.broadcast %273 : f32 to vector<16x128xf32>
    %275 = arith.mulf %258, %274 : vector<16x128xf32>
    %c15 = arith.constant 15 : index
    %c0_97 = arith.constant 0 : index
    %276 = vector.load %arg4[%c15, %c0_97] : memref<181x128xf32, #tpu.memory_space<vmem>>, vector<1x128xf32>
    %277 = vector.broadcast %276 : vector<1x128xf32> to vector<16x128xf32>
    %278 = arith.mulf %275, %277 : vector<16x128xf32>
    %c16 = arith.constant 16 : index
    %c0_98 = arith.constant 0 : index
    %279 = vector.load %arg4[%c16, %c0_98] : memref<181x128xf32, #tpu.memory_space<vmem>>, vector<1x128xf32>
    %280 = vector.broadcast %279 : vector<1x128xf32> to vector<16x128xf32>
    %281 = arith.addf %278, %280 : vector<16x128xf32>
    %cst_99 = arith.constant 0.000000e+00 : f32
    %282 = vector.broadcast %cst_99 : f32 to vector<2x128xf32>
    %c0_100 = arith.constant 0 : index
    %c0_101 = arith.constant 0 : index
    %283 = vector.load %arg6[%c0_100, %c0_101] : memref<24x128xf32, #tpu.memory_space<vmem>>, vector<2x128xf32>
    tpu.vector_store %arg6[%c0_100, %c0_101], %282 {strides = array<i32>} : memref<24x128xf32, #tpu.memory_space<vmem>>, vector<2x128xf32>,
    %cst_102 = arith.constant 0.000000e+00 : f32
    %284 = vector.broadcast %cst_102 : f32 to vector<2x128xf32>
    %c18 = arith.constant 18 : index
    %c0_103 = arith.constant 0 : index
    %285 = vector.load %arg6[%c18, %c0_103] : memref<24x128xf32, #tpu.memory_space<vmem>>, vector<2x128xf32>
    tpu.vector_store %arg6[%c18, %c0_103], %284 {strides = array<i32>} : memref<24x128xf32, #tpu.memory_space<vmem>>, vector<2x128xf32>,
    %c2_104 = arith.constant 2 : index
    %c0_105 = arith.constant 0 : index
    %286 = vector.load %arg6[%c2_104, %c0_105] : memref<24x128xf32, #tpu.memory_space<vmem>>, vector<16x128xf32>
    tpu.vector_store %arg6[%c2_104, %c0_105], %281 {strides = array<i32>} : memref<24x128xf32, #tpu.memory_space<vmem>>, vector<16x128xf32>,
    %c0_106 = arith.constant 0 : index
    %c0_107 = arith.constant 0 : index
    %287 = tpu.strided_load %arg6[%c0_106, %c0_107] {strides = array<i32: 2, 1>} : memref<24x128xf32, #tpu.memory_space<vmem>>, vector<8x128xf32>
    %c17 = arith.constant 17 : index
    %c0_108 = arith.constant 0 : index
    %288 = vector.load %arg4[%c17, %c0_108] : memref<181x128xf32, #tpu.memory_space<vmem>>, vector<1x128xf32>
    %289 = vector.broadcast %288 : vector<1x128xf32> to vector<8x128xf32>
    %290 = arith.mulf %287, %289 : vector<8x128xf32>
    %c1_109 = arith.constant 1 : index
    %c0_110 = arith.constant 0 : index
    %291 = tpu.strided_load %arg6[%c1_109, %c0_110] {strides = array<i32: 2, 1>} : memref<24x128xf32, #tpu.memory_space<vmem>>, vector<8x128xf32>
    %c18_111 = arith.constant 18 : index
    %c0_112 = arith.constant 0 : index
    %292 = vector.load %arg4[%c18_111, %c0_112] : memref<181x128xf32, #tpu.memory_space<vmem>>, vector<1x128xf32>
    %293 = vector.broadcast %292 : vector<1x128xf32> to vector<8x128xf32>
    %294 = arith.mulf %291, %293 : vector<8x128xf32>
    %295 = arith.addf %290, %294 : vector<8x128xf32>
    %c2_113 = arith.constant 2 : index
    %c0_114 = arith.constant 0 : index
    %296 = tpu.strided_load %arg6[%c2_113, %c0_114] {strides = array<i32: 2, 1>} : memref<24x128xf32, #tpu.memory_space<vmem>>, vector<8x128xf32>
    %c19 = arith.constant 19 : index
    %c0_115 = arith.constant 0 : index
    %297 = vector.load %arg4[%c19, %c0_115] : memref<181x128xf32, #tpu.memory_space<vmem>>, vector<1x128xf32>
    %298 = vector.broadcast %297 : vector<1x128xf32> to vector<8x128xf32>
    %299 = arith.mulf %296, %298 : vector<8x128xf32>
    %300 = arith.addf %295, %299 : vector<8x128xf32>
    %c3_116 = arith.constant 3 : index
    %c0_117 = arith.constant 0 : index
    %301 = tpu.strided_load %arg6[%c3_116, %c0_117] {strides = array<i32: 2, 1>} : memref<24x128xf32, #tpu.memory_space<vmem>>, vector<8x128xf32>
    %c20 = arith.constant 20 : index
    %c0_118 = arith.constant 0 : index
    %302 = vector.load %arg4[%c20, %c0_118] : memref<181x128xf32, #tpu.memory_space<vmem>>, vector<1x128xf32>
    %303 = vector.broadcast %302 : vector<1x128xf32> to vector<8x128xf32>
    %304 = arith.mulf %301, %303 : vector<8x128xf32>
    %305 = arith.addf %300, %304 : vector<8x128xf32>
    %c4 = arith.constant 4 : index
    %c0_119 = arith.constant 0 : index
    %306 = tpu.strided_load %arg6[%c4, %c0_119] {strides = array<i32: 2, 1>} : memref<24x128xf32, #tpu.memory_space<vmem>>, vector<8x128xf32>
    %c21 = arith.constant 21 : index
    %c0_120 = arith.constant 0 : index
    %307 = vector.load %arg4[%c21, %c0_120] : memref<181x128xf32, #tpu.memory_space<vmem>>, vector<1x128xf32>
    %308 = vector.broadcast %307 : vector<1x128xf32> to vector<8x128xf32>
    %309 = arith.mulf %306, %308 : vector<8x128xf32>
    %310 = arith.addf %305, %309 : vector<8x128xf32>
    %c22 = arith.constant 22 : index
    %c0_121 = arith.constant 0 : index
    %311 = vector.load %arg4[%c22, %c0_121] : memref<181x128xf32, #tpu.memory_space<vmem>>, vector<1x128xf32>
    %312 = vector.broadcast %311 : vector<1x128xf32> to vector<8x128xf32>
    %313 = arith.addf %310, %312 : vector<8x128xf32>
    %314 = vector.shape_cast %313 : vector<8x128xf32> to vector<1x8x128xf32>
    %cst_122 = arith.constant dense<0.000000e+00> : vector<1xf32>
    %315 = vector.multi_reduction <add>, %314, %cst_122 [1, 2] : vector<1x8x128xf32> to vector<1xf32>
    %316 = vector.shape_cast %315 : vector<1xf32> to vector<1x1x1xf32>
    %317 = vector.extract %316[0, 0, 0] : f32 from vector<1x1x1xf32>
    %cst_123 = arith.constant 0.00520833349 : f32
    %318 = arith.mulf %317, %cst_123 : f32
    %319 = vector.broadcast %318 : f32 to vector<8x128xf32>
    %320 = arith.subf %313, %319 : vector<8x128xf32>
    %321 = tpu.iota {dimensions = array<i32: 1>} : vector<1x128xi32>
    %c24_i32_124 = arith.constant 24 : i32
    %322 = vector.broadcast %c24_i32_124 : i32 to vector<1x128xi32>
    %323 = arith.cmpi slt, %321, %322 : vector<1x128xi32>
    %324 = arith.extui %323 : vector<1x128xi1> to vector<1x128xi32>
    %325 = arith.sitofp %324 : vector<1x128xi32> to vector<1x128xf32>
    %326 = arith.mulf %320, %320 : vector<8x128xf32>
    %327 = vector.broadcast %325 : vector<1x128xf32> to vector<8x128xf32>
    %328 = arith.mulf %326, %327 : vector<8x128xf32>
    %329 = vector.shape_cast %328 : vector<8x128xf32> to vector<1x8x128xf32>
    %cst_125 = arith.constant dense<0.000000e+00> : vector<1xf32>
    %330 = vector.multi_reduction <add>, %329, %cst_125 [1, 2] : vector<1x8x128xf32> to vector<1xf32>
    %331 = vector.shape_cast %330 : vector<1xf32> to vector<1x1x1xf32>
    %332 = vector.extract %331[0, 0, 0] : f32 from vector<1x1x1xf32>
    %cst_126 = arith.constant 0.00520833349 : f32
    %333 = arith.mulf %332, %cst_126 : f32
    %cst_127 = arith.constant 9.99999993E-9 : f32
    %334 = arith.addf %333, %cst_127 : f32
    %335 = math.rsqrt %334 : f32
    %336 = vector.broadcast %335 : f32 to vector<8x128xf32>
    %337 = arith.mulf %320, %336 : vector<8x128xf32>
    %c23 = arith.constant 23 : index
    %c0_128 = arith.constant 0 : index
    %338 = vector.load %arg4[%c23, %c0_128] : memref<181x128xf32, #tpu.memory_space<vmem>>, vector<1x128xf32>
    %339 = vector.broadcast %338 : vector<1x128xf32> to vector<8x128xf32>
    %340 = arith.mulf %337, %339 : vector<8x128xf32>
    %c24 = arith.constant 24 : index
    %c0_129 = arith.constant 0 : index
    %341 = vector.load %arg4[%c24, %c0_129] : memref<181x128xf32, #tpu.memory_space<vmem>>, vector<1x128xf32>
    %342 = vector.broadcast %341 : vector<1x128xf32> to vector<8x128xf32>
    %343 = arith.addf %340, %342 : vector<8x128xf32>
    %cst_130 = arith.constant 0.000000e+00 : f32
    %344 = vector.broadcast %cst_130 : f32 to vector<2x128xf32>
    %c0_131 = arith.constant 0 : index
    %c0_132 = arith.constant 0 : index
    %345 = vector.load %arg6[%c0_131, %c0_132] : memref<24x128xf32, #tpu.memory_space<vmem>>, vector<2x128xf32>
    tpu.vector_store %arg6[%c0_131, %c0_132], %344 {strides = array<i32>} : memref<24x128xf32, #tpu.memory_space<vmem>>, vector<2x128xf32>,
    %cst_133 = arith.constant 0.000000e+00 : f32
    %346 = vector.broadcast %cst_133 : f32 to vector<2x128xf32>
    %c10_134 = arith.constant 10 : index
    %c0_135 = arith.constant 0 : index
    %347 = vector.load %arg6[%c10_134, %c0_135] : memref<24x128xf32, #tpu.memory_space<vmem>>, vector<2x128xf32>
    tpu.vector_store %arg6[%c10_134, %c0_135], %346 {strides = array<i32>} : memref<24x128xf32, #tpu.memory_space<vmem>>, vector<2x128xf32>,
    %c2_136 = arith.constant 2 : index
    %c0_137 = arith.constant 0 : index
    %348 = vector.load %arg6[%c2_136, %c0_137] : memref<24x128xf32, #tpu.memory_space<vmem>>, vector<8x128xf32>
    tpu.vector_store %arg6[%c2_136, %c0_137], %343 {strides = array<i32>} : memref<24x128xf32, #tpu.memory_space<vmem>>, vector<8x128xf32>,
    %c0_138 = arith.constant 0 : index
    %c0_139 = arith.constant 0 : index
    %349 = tpu.strided_load %arg6[%c0_138, %c0_139] {strides = array<i32: 2, 1>} : memref<24x128xf32, #tpu.memory_space<vmem>>, vector<4x128xf32>
    %c25 = arith.constant 25 : index
    %c0_140 = arith.constant 0 : index
    %350 = vector.load %arg4[%c25, %c0_140] : memref<181x128xf32, #tpu.memory_space<vmem>>, vector<1x128xf32>
    %351 = vector.broadcast %350 : vector<1x128xf32> to vector<4x128xf32>
    %352 = arith.mulf %349, %351 : vector<4x128xf32>
    %c1_141 = arith.constant 1 : index
    %c0_142 = arith.constant 0 : index
    %353 = tpu.strided_load %arg6[%c1_141, %c0_142] {strides = array<i32: 2, 1>} : memref<24x128xf32, #tpu.memory_space<vmem>>, vector<4x128xf32>
    %c26 = arith.constant 26 : index
    %c0_143 = arith.constant 0 : index
    %354 = vector.load %arg4[%c26, %c0_143] : memref<181x128xf32, #tpu.memory_space<vmem>>, vector<1x128xf32>
    %355 = vector.broadcast %354 : vector<1x128xf32> to vector<4x128xf32>
    %356 = arith.mulf %353, %355 : vector<4x128xf32>
    %357 = arith.addf %352, %356 : vector<4x128xf32>
    %c2_144 = arith.constant 2 : index
    %c0_145 = arith.constant 0 : index
    %358 = tpu.strided_load %arg6[%c2_144, %c0_145] {strides = array<i32: 2, 1>} : memref<24x128xf32, #tpu.memory_space<vmem>>, vector<4x128xf32>
    %c27 = arith.constant 27 : index
    %c0_146 = arith.constant 0 : index
    %359 = vector.load %arg4[%c27, %c0_146] : memref<181x128xf32, #tpu.memory_space<vmem>>, vector<1x128xf32>
    %360 = vector.broadcast %359 : vector<1x128xf32> to vector<4x128xf32>
    %361 = arith.mulf %358, %360 : vector<4x128xf32>
    %362 = arith.addf %357, %361 : vector<4x128xf32>
    %c3_147 = arith.constant 3 : index
    %c0_148 = arith.constant 0 : index
    %363 = tpu.strided_load %arg6[%c3_147, %c0_148] {strides = array<i32: 2, 1>} : memref<24x128xf32, #tpu.memory_space<vmem>>, vector<4x128xf32>
    %c28 = arith.constant 28 : index
    %c0_149 = arith.constant 0 : index
    %364 = vector.load %arg4[%c28, %c0_149] : memref<181x128xf32, #tpu.memory_space<vmem>>, vector<1x128xf32>
    %365 = vector.broadcast %364 : vector<1x128xf32> to vector<4x128xf32>
    %366 = arith.mulf %363, %365 : vector<4x128xf32>
    %367 = arith.addf %362, %366 : vector<4x128xf32>
    %c4_150 = arith.constant 4 : index
    %c0_151 = arith.constant 0 : index
    %368 = tpu.strided_load %arg6[%c4_150, %c0_151] {strides = array<i32: 2, 1>} : memref<24x128xf32, #tpu.memory_space<vmem>>, vector<4x128xf32>
    %c29 = arith.constant 29 : index
    %c0_152 = arith.constant 0 : index
    %369 = vector.load %arg4[%c29, %c0_152] : memref<181x128xf32, #tpu.memory_space<vmem>>, vector<1x128xf32>
    %370 = vector.broadcast %369 : vector<1x128xf32> to vector<4x128xf32>
    %371 = arith.mulf %368, %370 : vector<4x128xf32>
    %372 = arith.addf %367, %371 : vector<4x128xf32>
    %c30 = arith.constant 30 : index
    %c0_153 = arith.constant 0 : index
    %373 = vector.load %arg4[%c30, %c0_153] : memref<181x128xf32, #tpu.memory_space<vmem>>, vector<1x128xf32>
    %374 = vector.broadcast %373 : vector<1x128xf32> to vector<4x128xf32>
    %375 = arith.addf %372, %374 : vector<4x128xf32>
    %376 = vector.shape_cast %375 : vector<4x128xf32> to vector<1x4x128xf32>
    %cst_154 = arith.constant dense<0.000000e+00> : vector<1xf32>
    %377 = vector.multi_reduction <add>, %376, %cst_154 [1, 2] : vector<1x4x128xf32> to vector<1xf32>
    %378 = vector.shape_cast %377 : vector<1xf32> to vector<1x1x1xf32>
    %379 = vector.extract %378[0, 0, 0] : f32 from vector<1x1x1xf32>
    %cst_155 = arith.constant 0.010416667 : f32
    %380 = arith.mulf %379, %cst_155 : f32
    %381 = vector.broadcast %380 : f32 to vector<4x128xf32>
    %382 = arith.subf %375, %381 : vector<4x128xf32>
    %383 = tpu.iota {dimensions = array<i32: 1>} : vector<1x128xi32>
    %c24_i32_156 = arith.constant 24 : i32
    %384 = vector.broadcast %c24_i32_156 : i32 to vector<1x128xi32>
    %385 = arith.cmpi slt, %383, %384 : vector<1x128xi32>
    %386 = arith.extui %385 : vector<1x128xi1> to vector<1x128xi32>
    %387 = arith.sitofp %386 : vector<1x128xi32> to vector<1x128xf32>
    %388 = arith.mulf %382, %382 : vector<4x128xf32>
    %389 = vector.broadcast %387 : vector<1x128xf32> to vector<4x128xf32>
    %390 = arith.mulf %388, %389 : vector<4x128xf32>
    %391 = vector.shape_cast %390 : vector<4x128xf32> to vector<1x4x128xf32>
    %cst_157 = arith.constant dense<0.000000e+00> : vector<1xf32>
    %392 = vector.multi_reduction <add>, %391, %cst_157 [1, 2] : vector<1x4x128xf32> to vector<1xf32>
    %393 = vector.shape_cast %392 : vector<1xf32> to vector<1x1x1xf32>
    %394 = vector.extract %393[0, 0, 0] : f32 from vector<1x1x1xf32>
    %cst_158 = arith.constant 0.010416667 : f32
    %395 = arith.mulf %394, %cst_158 : f32
    %cst_159 = arith.constant 9.99999993E-9 : f32
    %396 = arith.addf %395, %cst_159 : f32
    %397 = math.rsqrt %396 : f32
    %398 = vector.broadcast %397 : f32 to vector<4x128xf32>
    %399 = arith.mulf %382, %398 : vector<4x128xf32>
    %c31 = arith.constant 31 : index
    %c0_160 = arith.constant 0 : index
    %400 = vector.load %arg4[%c31, %c0_160] : memref<181x128xf32, #tpu.memory_space<vmem>>, vector<1x128xf32>
    %401 = vector.broadcast %400 : vector<1x128xf32> to vector<4x128xf32>
    %402 = arith.mulf %399, %401 : vector<4x128xf32>
    %c32 = arith.constant 32 : index
    %c0_161 = arith.constant 0 : index
    %403 = vector.load %arg4[%c32, %c0_161] : memref<181x128xf32, #tpu.memory_space<vmem>>, vector<1x128xf32>
    %404 = vector.broadcast %403 : vector<1x128xf32> to vector<4x128xf32>
    %405 = arith.addf %402, %404 : vector<4x128xf32>
    %406 = tpu.iota {dimensions = array<i32: 0>} : vector<16x8xi32>
    %407 = tpu.iota {dimensions = array<i32: 1>} : vector<16x8xi32>
    %c16_i32_162 = arith.constant 16 : i32
    %408 = vector.broadcast %c16_i32_162 : i32 to vector<16x8xi32>
    %409 = arith.muli %407, %408 : vector<16x8xi32>
    %c8_i32_163 = arith.constant 8 : i32
    %410 = vector.broadcast %c8_i32_163 : i32 to vector<16x8xi32>
    %411 = arith.muli %406, %410 : vector<16x8xi32>
    %412 = arith.cmpi sle, %409, %411 : vector<16x8xi32>
    %c8_i32_164 = arith.constant 8 : i32
    %413 = vector.broadcast %c8_i32_164 : i32 to vector<16x8xi32>
    %414 = arith.muli %406, %413 : vector<16x8xi32>
    %c1_i32_165 = arith.constant 1 : i32
    %415 = vector.broadcast %c1_i32_165 : i32 to vector<16x8xi32>
    %416 = arith.addi %407, %415 : vector<16x8xi32>
    %c16_i32_166 = arith.constant 16 : i32
    %417 = vector.broadcast %c16_i32_166 : i32 to vector<16x8xi32>
    %418 = arith.muli %416, %417 : vector<16x8xi32>
    %419 = arith.cmpi slt, %414, %418 : vector<16x8xi32>
    %420 = arith.andi %412, %419 : vector<16x8xi1>
    %421 = arith.extui %420 : vector<16x8xi1> to vector<16x8xi32>
    %422 = arith.sitofp %421 : vector<16x8xi32> to vector<16x8xf32>
    %cst_167 = arith.constant dense<0.000000e+00> : vector<16x128xf32>
    %423 = tpu.matmul %422, %343, %cst_167 {dimension_numbers = #tpu.dot_dimension_numbers<[1], [0], [0], [1], [0, 0, 1, 1], [], []>} : vector<16x8xf32>, vector<8x128xf32>, vector<16x128xf32> -> vector<16x128xf32>
    %424 = arith.truncf %281 : vector<16x128xf32> to vector<16x128xbf16>
    %c6_168 = arith.constant 6 : index
    %c0_169 = arith.constant 0 : index
    %c0_170 = arith.constant 0 : index
    %425 = vector.load %arg3[%c6_168, %c0_169, %c0_170] : memref<41x128x128xbf16, #tpu.memory_space<vmem>>, vector<1x128x128xbf16>
    %426 = vector.shape_cast %425 : vector<1x128x128xbf16> to vector<128x128xbf16>
    %cst_171 = arith.constant dense<0.000000e+00> : vector<16x128xf32>
    %427 = tpu.matmul %424, %426, %cst_171 {dimension_numbers = #tpu.dot_dimension_numbers<[1], [0], [0], [1], [0, 0, 1, 1], [], []>} : vector<16x128xbf16>, vector<128x128xbf16>, vector<16x128xf32> -> vector<16x128xf32>
    %428 = arith.truncf %423 : vector<16x128xf32> to vector<16x128xbf16>
    %c7_172 = arith.constant 7 : index
    %c0_173 = arith.constant 0 : index
    %c0_174 = arith.constant 0 : index
    %429 = vector.load %arg3[%c7_172, %c0_173, %c0_174] : memref<41x128x128xbf16, #tpu.memory_space<vmem>>, vector<1x128x128xbf16>
    %430 = vector.shape_cast %429 : vector<1x128x128xbf16> to vector<128x128xbf16>
    %cst_175 = arith.constant dense<0.000000e+00> : vector<16x128xf32>
    %431 = tpu.matmul %428, %430, %cst_175 {dimension_numbers = #tpu.dot_dimension_numbers<[1], [0], [0], [1], [0, 0, 1, 1], [], []>} : vector<16x128xbf16>, vector<128x128xbf16>, vector<16x128xf32> -> vector<16x128xf32>
    %432 = arith.addf %427, %431 : vector<16x128xf32>
    %c57 = arith.constant 57 : index
    %c0_176 = arith.constant 0 : index
    %433 = vector.load %arg4[%c57, %c0_176] : memref<181x128xf32, #tpu.memory_space<vmem>>, vector<1x128xf32>
    %434 = vector.broadcast %433 : vector<1x128xf32> to vector<16x128xf32>
    %435 = arith.addf %432, %434 : vector<16x128xf32>
    %436 = vector.shape_cast %435 : vector<16x128xf32> to vector<1x16x128xf32>
    %cst_177 = arith.constant dense<0.000000e+00> : vector<1xf32>
    %437 = vector.multi_reduction <add>, %436, %cst_177 [1, 2] : vector<1x16x128xf32> to vector<1xf32>
    %438 = vector.shape_cast %437 : vector<1xf32> to vector<1x1x1xf32>
    %439 = vector.extract %438[0, 0, 0] : f32 from vector<1x1x1xf32>
    %cst_178 = arith.constant 0.00260416674 : f32
    %440 = arith.mulf %439, %cst_178 : f32
    %441 = vector.broadcast %440 : f32 to vector<16x128xf32>
    %442 = arith.subf %435, %441 : vector<16x128xf32>
    %443 = tpu.iota {dimensions = array<i32: 1>} : vector<1x128xi32>
    %c24_i32_179 = arith.constant 24 : i32
    %444 = vector.broadcast %c24_i32_179 : i32 to vector<1x128xi32>
    %445 = arith.cmpi slt, %443, %444 : vector<1x128xi32>
    %446 = arith.extui %445 : vector<1x128xi1> to vector<1x128xi32>
    %447 = arith.sitofp %446 : vector<1x128xi32> to vector<1x128xf32>
    %448 = arith.mulf %442, %442 : vector<16x128xf32>
    %449 = vector.broadcast %447 : vector<1x128xf32> to vector<16x128xf32>
    %450 = arith.mulf %448, %449 : vector<16x128xf32>
    %451 = vector.shape_cast %450 : vector<16x128xf32> to vector<1x16x128xf32>
    %cst_180 = arith.constant dense<0.000000e+00> : vector<1xf32>
    %452 = vector.multi_reduction <add>, %451, %cst_180 [1, 2] : vector<1x16x128xf32> to vector<1xf32>
    %453 = vector.shape_cast %452 : vector<1xf32> to vector<1x1x1xf32>
    %454 = vector.extract %453[0, 0, 0] : f32 from vector<1x1x1xf32>
    %cst_181 = arith.constant 0.00260416674 : f32
    %455 = arith.mulf %454, %cst_181 : f32
    %cst_182 = arith.constant 9.99999993E-9 : f32
    %456 = arith.addf %455, %cst_182 : f32
    %457 = math.rsqrt %456 : f32
    %458 = vector.broadcast %457 : f32 to vector<16x128xf32>
    %459 = arith.mulf %442, %458 : vector<16x128xf32>
    %c58 = arith.constant 58 : index
    %c0_183 = arith.constant 0 : index
    %460 = vector.load %arg4[%c58, %c0_183] : memref<181x128xf32, #tpu.memory_space<vmem>>, vector<1x128xf32>
    %461 = vector.broadcast %460 : vector<1x128xf32> to vector<16x128xf32>
    %462 = arith.mulf %459, %461 : vector<16x128xf32>
    %c59 = arith.constant 59 : index
    %c0_184 = arith.constant 0 : index
    %463 = vector.load %arg4[%c59, %c0_184] : memref<181x128xf32, #tpu.memory_space<vmem>>, vector<1x128xf32>
    %464 = vector.broadcast %463 : vector<1x128xf32> to vector<16x128xf32>
    %465 = arith.addf %462, %464 : vector<16x128xf32>
    %cst_185 = arith.constant 0.000000e+00 : f32
    %466 = vector.broadcast %cst_185 : f32 to vector<16x128xf32>
    %467 = arith.cmpf oge, %465, %466 : vector<16x128xf32>
    %c60 = arith.constant 60 : index
    %c0_186 = arith.constant 0 : index
    %468 = vector.load %arg4[%c60, %c0_186] : memref<181x128xf32, #tpu.memory_space<vmem>>, vector<1x128xf32>
    %469 = vector.broadcast %468 : vector<1x128xf32> to vector<16x128xf32>
    %470 = arith.mulf %465, %469 : vector<16x128xf32>
    %471 = arith.select %467, %465, %470 : vector<16x128xi1>, vector<16x128xf32>
    %cst_187 = arith.constant 0.000000e+00 : f32
    %472 = vector.broadcast %cst_187 : f32 to vector<2x128xf32>
    %c0_188 = arith.constant 0 : index
    %c0_189 = arith.constant 0 : index
    %473 = vector.load %arg6[%c0_188, %c0_189] : memref<24x128xf32, #tpu.memory_space<vmem>>, vector<2x128xf32>
    tpu.vector_store %arg6[%c0_188, %c0_189], %472 {strides = array<i32>} : memref<24x128xf32, #tpu.memory_space<vmem>>, vector<2x128xf32>,
    %cst_190 = arith.constant 0.000000e+00 : f32
    %474 = vector.broadcast %cst_190 : f32 to vector<2x128xf32>
    %c18_191 = arith.constant 18 : index
    %c0_192 = arith.constant 0 : index
    %475 = vector.load %arg6[%c18_191, %c0_192] : memref<24x128xf32, #tpu.memory_space<vmem>>, vector<2x128xf32>
    tpu.vector_store %arg6[%c18_191, %c0_192], %474 {strides = array<i32>} : memref<24x128xf32, #tpu.memory_space<vmem>>, vector<2x128xf32>,
    %c2_193 = arith.constant 2 : index
    %c0_194 = arith.constant 0 : index
    %476 = vector.load %arg6[%c2_193, %c0_194] : memref<24x128xf32, #tpu.memory_space<vmem>>, vector<16x128xf32>
    tpu.vector_store %arg6[%c2_193, %c0_194], %281 {strides = array<i32>} : memref<24x128xf32, #tpu.memory_space<vmem>>, vector<16x128xf32>,
    %c0_195 = arith.constant 0 : index
    %c0_196 = arith.constant 0 : index
    %477 = tpu.strided_load %arg6[%c0_195, %c0_196] {strides = array<i32: 2, 1>} : memref<24x128xf32, #tpu.memory_space<vmem>>, vector<8x128xf32>
    %c41 = arith.constant 41 : index
    %c0_197 = arith.constant 0 : index
    %478 = vector.load %arg4[%c41, %c0_197] : memref<181x128xf32, #tpu.memory_space<vmem>>, vector<1x128xf32>
    %479 = vector.broadcast %478 : vector<1x128xf32> to vector<8x128xf32>
    %480 = arith.mulf %477, %479 : vector<8x128xf32>
    %c1_198 = arith.constant 1 : index
    %c0_199 = arith.constant 0 : index
    %481 = tpu.strided_load %arg6[%c1_198, %c0_199] {strides = array<i32: 2, 1>} : memref<24x128xf32, #tpu.memory_space<vmem>>, vector<8x128xf32>
    %c42 = arith.constant 42 : index
    %c0_200 = arith.constant 0 : index
    %482 = vector.load %arg4[%c42, %c0_200] : memref<181x128xf32, #tpu.memory_space<vmem>>, vector<1x128xf32>
    %483 = vector.broadcast %482 : vector<1x128xf32> to vector<8x128xf32>
    %484 = arith.mulf %481, %483 : vector<8x128xf32>
    %485 = arith.addf %480, %484 : vector<8x128xf32>
    %c2_201 = arith.constant 2 : index
    %c0_202 = arith.constant 0 : index
    %486 = tpu.strided_load %arg6[%c2_201, %c0_202] {strides = array<i32: 2, 1>} : memref<24x128xf32, #tpu.memory_space<vmem>>, vector<8x128xf32>
    %c43 = arith.constant 43 : index
    %c0_203 = arith.constant 0 : index
    %487 = vector.load %arg4[%c43, %c0_203] : memref<181x128xf32, #tpu.memory_space<vmem>>, vector<1x128xf32>
    %488 = vector.broadcast %487 : vector<1x128xf32> to vector<8x128xf32>
    %489 = arith.mulf %486, %488 : vector<8x128xf32>
    %490 = arith.addf %485, %489 : vector<8x128xf32>
    %c3_204 = arith.constant 3 : index
    %c0_205 = arith.constant 0 : index
    %491 = tpu.strided_load %arg6[%c3_204, %c0_205] {strides = array<i32: 2, 1>} : memref<24x128xf32, #tpu.memory_space<vmem>>, vector<8x128xf32>
    %c44 = arith.constant 44 : index
    %c0_206 = arith.constant 0 : index
    %492 = vector.load %arg4[%c44, %c0_206] : memref<181x128xf32, #tpu.memory_space<vmem>>, vector<1x128xf32>
    %493 = vector.broadcast %492 : vector<1x128xf32> to vector<8x128xf32>
    %494 = arith.mulf %491, %493 : vector<8x128xf32>
    %495 = arith.addf %490, %494 : vector<8x128xf32>
    %c4_207 = arith.constant 4 : index
    %c0_208 = arith.constant 0 : index
    %496 = tpu.strided_load %arg6[%c4_207, %c0_208] {strides = array<i32: 2, 1>} : memref<24x128xf32, #tpu.memory_space<vmem>>, vector<8x128xf32>
    %c45 = arith.constant 45 : index
    %c0_209 = arith.constant 0 : index
    %497 = vector.load %arg4[%c45, %c0_209] : memref<181x128xf32, #tpu.memory_space<vmem>>, vector<1x128xf32>
    %498 = vector.broadcast %497 : vector<1x128xf32> to vector<8x128xf32>
    %499 = arith.mulf %496, %498 : vector<8x128xf32>
    %500 = arith.addf %495, %499 : vector<8x128xf32>
    %c46 = arith.constant 46 : index
    %c0_210 = arith.constant 0 : index
    %501 = vector.load %arg4[%c46, %c0_210] : memref<181x128xf32, #tpu.memory_space<vmem>>, vector<1x128xf32>
    %502 = vector.broadcast %501 : vector<1x128xf32> to vector<8x128xf32>
    %503 = arith.addf %500, %502 : vector<8x128xf32>
    %504 = vector.shape_cast %503 : vector<8x128xf32> to vector<1x8x128xf32>
    %cst_211 = arith.constant dense<0.000000e+00> : vector<1xf32>
    %505 = vector.multi_reduction <add>, %504, %cst_211 [1, 2] : vector<1x8x128xf32> to vector<1xf32>
    %506 = vector.shape_cast %505 : vector<1xf32> to vector<1x1x1xf32>
    %507 = vector.extract %506[0, 0, 0] : f32 from vector<1x1x1xf32>
    %cst_212 = arith.constant 0.00520833349 : f32
    %508 = arith.mulf %507, %cst_212 : f32
    %509 = vector.broadcast %508 : f32 to vector<8x128xf32>
    %510 = arith.subf %503, %509 : vector<8x128xf32>
    %511 = tpu.iota {dimensions = array<i32: 1>} : vector<1x128xi32>
    %c24_i32_213 = arith.constant 24 : i32
    %512 = vector.broadcast %c24_i32_213 : i32 to vector<1x128xi32>
    %513 = arith.cmpi slt, %511, %512 : vector<1x128xi32>
    %514 = arith.extui %513 : vector<1x128xi1> to vector<1x128xi32>
    %515 = arith.sitofp %514 : vector<1x128xi32> to vector<1x128xf32>
    %516 = arith.mulf %510, %510 : vector<8x128xf32>
    %517 = vector.broadcast %515 : vector<1x128xf32> to vector<8x128xf32>
    %518 = arith.mulf %516, %517 : vector<8x128xf32>
    %519 = vector.shape_cast %518 : vector<8x128xf32> to vector<1x8x128xf32>
    %cst_214 = arith.constant dense<0.000000e+00> : vector<1xf32>
    %520 = vector.multi_reduction <add>, %519, %cst_214 [1, 2] : vector<1x8x128xf32> to vector<1xf32>
    %521 = vector.shape_cast %520 : vector<1xf32> to vector<1x1x1xf32>
    %522 = vector.extract %521[0, 0, 0] : f32 from vector<1x1x1xf32>
    %cst_215 = arith.constant 0.00520833349 : f32
    %523 = arith.mulf %522, %cst_215 : f32
    %cst_216 = arith.constant 9.99999993E-9 : f32
    %524 = arith.addf %523, %cst_216 : f32
    %525 = math.rsqrt %524 : f32
    %526 = vector.broadcast %525 : f32 to vector<8x128xf32>
    %527 = arith.mulf %510, %526 : vector<8x128xf32>
    %c47 = arith.constant 47 : index
    %c0_217 = arith.constant 0 : index
    %528 = vector.load %arg4[%c47, %c0_217] : memref<181x128xf32, #tpu.memory_space<vmem>>, vector<1x128xf32>
    %529 = vector.broadcast %528 : vector<1x128xf32> to vector<8x128xf32>
    %530 = arith.mulf %527, %529 : vector<8x128xf32>
    %c48 = arith.constant 48 : index
    %c0_218 = arith.constant 0 : index
    %531 = vector.load %arg4[%c48, %c0_218] : memref<181x128xf32, #tpu.memory_space<vmem>>, vector<1x128xf32>
    %532 = vector.broadcast %531 : vector<1x128xf32> to vector<8x128xf32>
    %533 = arith.addf %530, %532 : vector<8x128xf32>
    %534 = tpu.iota {dimensions = array<i32: 0>} : vector<8x4xi32>
    %535 = tpu.iota {dimensions = array<i32: 1>} : vector<8x4xi32>
    %c8_i32_219 = arith.constant 8 : i32
    %536 = vector.broadcast %c8_i32_219 : i32 to vector<8x4xi32>
    %537 = arith.muli %535, %536 : vector<8x4xi32>
    %c4_i32 = arith.constant 4 : i32
    %538 = vector.broadcast %c4_i32 : i32 to vector<8x4xi32>
    %539 = arith.muli %534, %538 : vector<8x4xi32>
    %540 = arith.cmpi sle, %537, %539 : vector<8x4xi32>
    %c4_i32_220 = arith.constant 4 : i32
    %541 = vector.broadcast %c4_i32_220 : i32 to vector<8x4xi32>
    %542 = arith.muli %534, %541 : vector<8x4xi32>
    %c1_i32_221 = arith.constant 1 : i32
    %543 = vector.broadcast %c1_i32_221 : i32 to vector<8x4xi32>
    %544 = arith.addi %535, %543 : vector<8x4xi32>
    %c8_i32_222 = arith.constant 8 : i32
    %545 = vector.broadcast %c8_i32_222 : i32 to vector<8x4xi32>
    %546 = arith.muli %544, %545 : vector<8x4xi32>
    %547 = arith.cmpi slt, %542, %546 : vector<8x4xi32>
    %548 = arith.andi %540, %547 : vector<8x4xi1>
    %549 = arith.extui %548 : vector<8x4xi1> to vector<8x4xi32>
    %550 = arith.sitofp %549 : vector<8x4xi32> to vector<8x4xf32>
    %cst_223 = arith.constant dense<0.000000e+00> : vector<8x128xf32>
    %551 = tpu.matmul %550, %405, %cst_223 {dimension_numbers = #tpu.dot_dimension_numbers<[1], [0], [0], [1], [0, 0, 1, 1], [], []>} : vector<8x4xf32>, vector<4x128xf32>, vector<8x128xf32> -> vector<8x128xf32>
    %552 = arith.truncf %533 : vector<8x128xf32> to vector<8x128xbf16>
    %c8_224 = arith.constant 8 : index
    %c0_225 = arith.constant 0 : index
    %c0_226 = arith.constant 0 : index
    %553 = vector.load %arg3[%c8_224, %c0_225, %c0_226] : memref<41x128x128xbf16, #tpu.memory_space<vmem>>, vector<1x128x128xbf16>
    %554 = vector.shape_cast %553 : vector<1x128x128xbf16> to vector<128x128xbf16>
    %cst_227 = arith.constant dense<0.000000e+00> : vector<8x128xf32>
    %555 = tpu.matmul %552, %554, %cst_227 {dimension_numbers = #tpu.dot_dimension_numbers<[1], [0], [0], [1], [0, 0, 1, 1], [], []>} : vector<8x128xbf16>, vector<128x128xbf16>, vector<8x128xf32> -> vector<8x128xf32>
    %556 = arith.truncf %343 : vector<8x128xf32> to vector<8x128xbf16>
    %c9_228 = arith.constant 9 : index
    %c0_229 = arith.constant 0 : index
    %c0_230 = arith.constant 0 : index
    %557 = vector.load %arg3[%c9_228, %c0_229, %c0_230] : memref<41x128x128xbf16, #tpu.memory_space<vmem>>, vector<1x128x128xbf16>
    %558 = vector.shape_cast %557 : vector<1x128x128xbf16> to vector<128x128xbf16>
    %cst_231 = arith.constant dense<0.000000e+00> : vector<8x128xf32>
    %559 = tpu.matmul %556, %558, %cst_231 {dimension_numbers = #tpu.dot_dimension_numbers<[1], [0], [0], [1], [0, 0, 1, 1], [], []>} : vector<8x128xbf16>, vector<128x128xbf16>, vector<8x128xf32> -> vector<8x128xf32>
    %560 = arith.addf %555, %559 : vector<8x128xf32>
    %561 = arith.truncf %551 : vector<8x128xf32> to vector<8x128xbf16>
    %c10_232 = arith.constant 10 : index
    %c0_233 = arith.constant 0 : index
    %c0_234 = arith.constant 0 : index
    %562 = vector.load %arg3[%c10_232, %c0_233, %c0_234] : memref<41x128x128xbf16, #tpu.memory_space<vmem>>, vector<1x128x128xbf16>
    %563 = vector.shape_cast %562 : vector<1x128x128xbf16> to vector<128x128xbf16>
    %cst_235 = arith.constant dense<0.000000e+00> : vector<8x128xf32>
    %564 = tpu.matmul %561, %563, %cst_235 {dimension_numbers = #tpu.dot_dimension_numbers<[1], [0], [0], [1], [0, 0, 1, 1], [], []>} : vector<8x128xbf16>, vector<128x128xbf16>, vector<8x128xf32> -> vector<8x128xf32>
    %565 = arith.addf %560, %564 : vector<8x128xf32>
    %c61 = arith.constant 61 : index
    %c0_236 = arith.constant 0 : index
    %566 = vector.load %arg4[%c61, %c0_236] : memref<181x128xf32, #tpu.memory_space<vmem>>, vector<1x128xf32>
    %567 = vector.broadcast %566 : vector<1x128xf32> to vector<8x128xf32>
    %568 = arith.addf %565, %567 : vector<8x128xf32>
    %569 = vector.shape_cast %568 : vector<8x128xf32> to vector<1x8x128xf32>
    %cst_237 = arith.constant dense<0.000000e+00> : vector<1xf32>
    %570 = vector.multi_reduction <add>, %569, %cst_237 [1, 2] : vector<1x8x128xf32> to vector<1xf32>
    %571 = vector.shape_cast %570 : vector<1xf32> to vector<1x1x1xf32>
    %572 = vector.extract %571[0, 0, 0] : f32 from vector<1x1x1xf32>
    %cst_238 = arith.constant 0.00520833349 : f32
    %573 = arith.mulf %572, %cst_238 : f32
    %574 = vector.broadcast %573 : f32 to vector<8x128xf32>
    %575 = arith.subf %568, %574 : vector<8x128xf32>
    %576 = tpu.iota {dimensions = array<i32: 1>} : vector<1x128xi32>
    %c24_i32_239 = arith.constant 24 : i32
    %577 = vector.broadcast %c24_i32_239 : i32 to vector<1x128xi32>
    %578 = arith.cmpi slt, %576, %577 : vector<1x128xi32>
    %579 = arith.extui %578 : vector<1x128xi1> to vector<1x128xi32>
    %580 = arith.sitofp %579 : vector<1x128xi32> to vector<1x128xf32>
    %581 = arith.mulf %575, %575 : vector<8x128xf32>
    %582 = vector.broadcast %580 : vector<1x128xf32> to vector<8x128xf32>
    %583 = arith.mulf %581, %582 : vector<8x128xf32>
    %584 = vector.shape_cast %583 : vector<8x128xf32> to vector<1x8x128xf32>
    %cst_240 = arith.constant dense<0.000000e+00> : vector<1xf32>
    %585 = vector.multi_reduction <add>, %584, %cst_240 [1, 2] : vector<1x8x128xf32> to vector<1xf32>
    %586 = vector.shape_cast %585 : vector<1xf32> to vector<1x1x1xf32>
    %587 = vector.extract %586[0, 0, 0] : f32 from vector<1x1x1xf32>
    %cst_241 = arith.constant 0.00520833349 : f32
    %588 = arith.mulf %587, %cst_241 : f32
    %cst_242 = arith.constant 9.99999993E-9 : f32
    %589 = arith.addf %588, %cst_242 : f32
    %590 = math.rsqrt %589 : f32
    %591 = vector.broadcast %590 : f32 to vector<8x128xf32>
    %592 = arith.mulf %575, %591 : vector<8x128xf32>
    %c62 = arith.constant 62 : index
    %c0_243 = arith.constant 0 : index
    %593 = vector.load %arg4[%c62, %c0_243] : memref<181x128xf32, #tpu.memory_space<vmem>>, vector<1x128xf32>
    %594 = vector.broadcast %593 : vector<1x128xf32> to vector<8x128xf32>
    %595 = arith.mulf %592, %594 : vector<8x128xf32>
    %c63 = arith.constant 63 : index
    %c0_244 = arith.constant 0 : index
    %596 = vector.load %arg4[%c63, %c0_244] : memref<181x128xf32, #tpu.memory_space<vmem>>, vector<1x128xf32>
    %597 = vector.broadcast %596 : vector<1x128xf32> to vector<8x128xf32>
    %598 = arith.addf %595, %597 : vector<8x128xf32>
    %cst_245 = arith.constant 0.000000e+00 : f32
    %599 = vector.broadcast %cst_245 : f32 to vector<8x128xf32>
    %600 = arith.cmpf oge, %598, %599 : vector<8x128xf32>
    %c64 = arith.constant 64 : index
    %c0_246 = arith.constant 0 : index
    %601 = vector.load %arg4[%c64, %c0_246] : memref<181x128xf32, #tpu.memory_space<vmem>>, vector<1x128xf32>
    %602 = vector.broadcast %601 : vector<1x128xf32> to vector<8x128xf32>
    %603 = arith.mulf %598, %602 : vector<8x128xf32>
    %604 = arith.select %600, %598, %603 : vector<8x128xi1>, vector<8x128xf32>
    %cst_247 = arith.constant 0.000000e+00 : f32
    %605 = vector.broadcast %cst_247 : f32 to vector<2x128xf32>
    %c0_248 = arith.constant 0 : index
    %c0_249 = arith.constant 0 : index
    %606 = vector.load %arg6[%c0_248, %c0_249] : memref<24x128xf32, #tpu.memory_space<vmem>>, vector<2x128xf32>
    tpu.vector_store %arg6[%c0_248, %c0_249], %605 {strides = array<i32>} : memref<24x128xf32, #tpu.memory_space<vmem>>, vector<2x128xf32>,
    %cst_250 = arith.constant 0.000000e+00 : f32
    %607 = vector.broadcast %cst_250 : f32 to vector<2x128xf32>
    %c10_251 = arith.constant 10 : index
    %c0_252 = arith.constant 0 : index
    %608 = vector.load %arg6[%c10_251, %c0_252] : memref<24x128xf32, #tpu.memory_space<vmem>>, vector<2x128xf32>
    tpu.vector_store %arg6[%c10_251, %c0_252], %607 {strides = array<i32>} : memref<24x128xf32, #tpu.memory_space<vmem>>, vector<2x128xf32>,
    %c2_253 = arith.constant 2 : index
    %c0_254 = arith.constant 0 : index
    %609 = vector.load %arg6[%c2_253, %c0_254] : memref<24x128xf32, #tpu.memory_space<vmem>>, vector<8x128xf32>
    tpu.vector_store %arg6[%c2_253, %c0_254], %343 {strides = array<i32>} : memref<24x128xf32, #tpu.memory_space<vmem>>, vector<8x128xf32>,
    %c0_255 = arith.constant 0 : index
    %c0_256 = arith.constant 0 : index
    %610 = tpu.strided_load %arg6[%c0_255, %c0_256] {strides = array<i32: 2, 1>} : memref<24x128xf32, #tpu.memory_space<vmem>>, vector<4x128xf32>
    %c49 = arith.constant 49 : index
    %c0_257 = arith.constant 0 : index
    %611 = vector.load %arg4[%c49, %c0_257] : memref<181x128xf32, #tpu.memory_space<vmem>>, vector<1x128xf32>
    %612 = vector.broadcast %611 : vector<1x128xf32> to vector<4x128xf32>
    %613 = arith.mulf %610, %612 : vector<4x128xf32>
    %c1_258 = arith.constant 1 : index
    %c0_259 = arith.constant 0 : index
    %614 = tpu.strided_load %arg6[%c1_258, %c0_259] {strides = array<i32: 2, 1>} : memref<24x128xf32, #tpu.memory_space<vmem>>, vector<4x128xf32>
    %c50 = arith.constant 50 : index
    %c0_260 = arith.constant 0 : index
    %615 = vector.load %arg4[%c50, %c0_260] : memref<181x128xf32, #tpu.memory_space<vmem>>, vector<1x128xf32>
    %616 = vector.broadcast %615 : vector<1x128xf32> to vector<4x128xf32>
    %617 = arith.mulf %614, %616 : vector<4x128xf32>
    %618 = arith.addf %613, %617 : vector<4x128xf32>
    %c2_261 = arith.constant 2 : index
    %c0_262 = arith.constant 0 : index
    %619 = tpu.strided_load %arg6[%c2_261, %c0_262] {strides = array<i32: 2, 1>} : memref<24x128xf32, #tpu.memory_space<vmem>>, vector<4x128xf32>
    %c51 = arith.constant 51 : index
    %c0_263 = arith.constant 0 : index
    %620 = vector.load %arg4[%c51, %c0_263] : memref<181x128xf32, #tpu.memory_space<vmem>>, vector<1x128xf32>
    %621 = vector.broadcast %620 : vector<1x128xf32> to vector<4x128xf32>
    %622 = arith.mulf %619, %621 : vector<4x128xf32>
    %623 = arith.addf %618, %622 : vector<4x128xf32>
    %c3_264 = arith.constant 3 : index
    %c0_265 = arith.constant 0 : index
    %624 = tpu.strided_load %arg6[%c3_264, %c0_265] {strides = array<i32: 2, 1>} : memref<24x128xf32, #tpu.memory_space<vmem>>, vector<4x128xf32>
    %c52 = arith.constant 52 : index
    %c0_266 = arith.constant 0 : index
    %625 = vector.load %arg4[%c52, %c0_266] : memref<181x128xf32, #tpu.memory_space<vmem>>, vector<1x128xf32>
    %626 = vector.broadcast %625 : vector<1x128xf32> to vector<4x128xf32>
    %627 = arith.mulf %624, %626 : vector<4x128xf32>
    %628 = arith.addf %623, %627 : vector<4x128xf32>
    %c4_267 = arith.constant 4 : index
    %c0_268 = arith.constant 0 : index
    %629 = tpu.strided_load %arg6[%c4_267, %c0_268] {strides = array<i32: 2, 1>} : memref<24x128xf32, #tpu.memory_space<vmem>>, vector<4x128xf32>
    %c53 = arith.constant 53 : index
    %c0_269 = arith.constant 0 : index
    %630 = vector.load %arg4[%c53, %c0_269] : memref<181x128xf32, #tpu.memory_space<vmem>>, vector<1x128xf32>
    %631 = vector.broadcast %630 : vector<1x128xf32> to vector<4x128xf32>
    %632 = arith.mulf %629, %631 : vector<4x128xf32>
    %633 = arith.addf %628, %632 : vector<4x128xf32>
    %c54 = arith.constant 54 : index
    %c0_270 = arith.constant 0 : index
    %634 = vector.load %arg4[%c54, %c0_270] : memref<181x128xf32, #tpu.memory_space<vmem>>, vector<1x128xf32>
    %635 = vector.broadcast %634 : vector<1x128xf32> to vector<4x128xf32>
    %636 = arith.addf %633, %635 : vector<4x128xf32>
    %637 = vector.shape_cast %636 : vector<4x128xf32> to vector<1x4x128xf32>
    %cst_271 = arith.constant dense<0.000000e+00> : vector<1xf32>
    %638 = vector.multi_reduction <add>, %637, %cst_271 [1, 2] : vector<1x4x128xf32> to vector<1xf32>
    %639 = vector.shape_cast %638 : vector<1xf32> to vector<1x1x1xf32>
    %640 = vector.extract %639[0, 0, 0] : f32 from vector<1x1x1xf32>
    %cst_272 = arith.constant 0.010416667 : f32
    %641 = arith.mulf %640, %cst_272 : f32
    %642 = vector.broadcast %641 : f32 to vector<4x128xf32>
    %643 = arith.subf %636, %642 : vector<4x128xf32>
    %644 = tpu.iota {dimensions = array<i32: 1>} : vector<1x128xi32>
    %c24_i32_273 = arith.constant 24 : i32
    %645 = vector.broadcast %c24_i32_273 : i32 to vector<1x128xi32>
    %646 = arith.cmpi slt, %644, %645 : vector<1x128xi32>
    %647 = arith.extui %646 : vector<1x128xi1> to vector<1x128xi32>
    %648 = arith.sitofp %647 : vector<1x128xi32> to vector<1x128xf32>
    %649 = arith.mulf %643, %643 : vector<4x128xf32>
    %650 = vector.broadcast %648 : vector<1x128xf32> to vector<4x128xf32>
    %651 = arith.mulf %649, %650 : vector<4x128xf32>
    %652 = vector.shape_cast %651 : vector<4x128xf32> to vector<1x4x128xf32>
    %cst_274 = arith.constant dense<0.000000e+00> : vector<1xf32>
    %653 = vector.multi_reduction <add>, %652, %cst_274 [1, 2] : vector<1x4x128xf32> to vector<1xf32>
    %654 = vector.shape_cast %653 : vector<1xf32> to vector<1x1x1xf32>
    %655 = vector.extract %654[0, 0, 0] : f32 from vector<1x1x1xf32>
    %cst_275 = arith.constant 0.010416667 : f32
    %656 = arith.mulf %655, %cst_275 : f32
    %cst_276 = arith.constant 9.99999993E-9 : f32
    %657 = arith.addf %656, %cst_276 : f32
    %658 = math.rsqrt %657 : f32
    %659 = vector.broadcast %658 : f32 to vector<4x128xf32>
    %660 = arith.mulf %643, %659 : vector<4x128xf32>
    %c55 = arith.constant 55 : index
    %c0_277 = arith.constant 0 : index
    %661 = vector.load %arg4[%c55, %c0_277] : memref<181x128xf32, #tpu.memory_space<vmem>>, vector<1x128xf32>
    %662 = vector.broadcast %661 : vector<1x128xf32> to vector<4x128xf32>
    %663 = arith.mulf %660, %662 : vector<4x128xf32>
    %c56 = arith.constant 56 : index
    %c0_278 = arith.constant 0 : index
    %664 = vector.load %arg4[%c56, %c0_278] : memref<181x128xf32, #tpu.memory_space<vmem>>, vector<1x128xf32>
    %665 = vector.broadcast %664 : vector<1x128xf32> to vector<4x128xf32>
    %666 = arith.addf %663, %665 : vector<4x128xf32>
    %667 = arith.truncf %666 : vector<4x128xf32> to vector<4x128xbf16>
    %c11_279 = arith.constant 11 : index
    %c0_280 = arith.constant 0 : index
    %c0_281 = arith.constant 0 : index
    %668 = vector.load %arg3[%c11_279, %c0_280, %c0_281] : memref<41x128x128xbf16, #tpu.memory_space<vmem>>, vector<1x128x128xbf16>
    %669 = vector.shape_cast %668 : vector<1x128x128xbf16> to vector<128x128xbf16>
    %cst_282 = arith.constant dense<0.000000e+00> : vector<4x128xf32>
    %670 = tpu.matmul %667, %669, %cst_282 {dimension_numbers = #tpu.dot_dimension_numbers<[1], [0], [0], [1], [0, 0, 1, 1], [], []>} : vector<4x128xbf16>, vector<128x128xbf16>, vector<4x128xf32> -> vector<4x128xf32>
    %671 = arith.truncf %405 : vector<4x128xf32> to vector<4x128xbf16>
    %c12_283 = arith.constant 12 : index
    %c0_284 = arith.constant 0 : index
    %c0_285 = arith.constant 0 : index
    %672 = vector.load %arg3[%c12_283, %c0_284, %c0_285] : memref<41x128x128xbf16, #tpu.memory_space<vmem>>, vector<1x128x128xbf16>
    %673 = vector.shape_cast %672 : vector<1x128x128xbf16> to vector<128x128xbf16>
    %cst_286 = arith.constant dense<0.000000e+00> : vector<4x128xf32>
    %674 = tpu.matmul %671, %673, %cst_286 {dimension_numbers = #tpu.dot_dimension_numbers<[1], [0], [0], [1], [0, 0, 1, 1], [], []>} : vector<4x128xbf16>, vector<128x128xbf16>, vector<4x128xf32> -> vector<4x128xf32>
    %675 = arith.addf %670, %674 : vector<4x128xf32>
    %c65 = arith.constant 65 : index
    %c0_287 = arith.constant 0 : index
    %676 = vector.load %arg4[%c65, %c0_287] : memref<181x128xf32, #tpu.memory_space<vmem>>, vector<1x128xf32>
    %677 = vector.broadcast %676 : vector<1x128xf32> to vector<4x128xf32>
    %678 = arith.addf %675, %677 : vector<4x128xf32>
    %679 = vector.shape_cast %678 : vector<4x128xf32> to vector<1x4x128xf32>
    %cst_288 = arith.constant dense<0.000000e+00> : vector<1xf32>
    %680 = vector.multi_reduction <add>, %679, %cst_288 [1, 2] : vector<1x4x128xf32> to vector<1xf32>
    %681 = vector.shape_cast %680 : vector<1xf32> to vector<1x1x1xf32>
    %682 = vector.extract %681[0, 0, 0] : f32 from vector<1x1x1xf32>
    %cst_289 = arith.constant 0.010416667 : f32
    %683 = arith.mulf %682, %cst_289 : f32
    %684 = vector.broadcast %683 : f32 to vector<4x128xf32>
    %685 = arith.subf %678, %684 : vector<4x128xf32>
    %686 = tpu.iota {dimensions = array<i32: 1>} : vector<1x128xi32>
    %c24_i32_290 = arith.constant 24 : i32
    %687 = vector.broadcast %c24_i32_290 : i32 to vector<1x128xi32>
    %688 = arith.cmpi slt, %686, %687 : vector<1x128xi32>
    %689 = arith.extui %688 : vector<1x128xi1> to vector<1x128xi32>
    %690 = arith.sitofp %689 : vector<1x128xi32> to vector<1x128xf32>
    %691 = arith.mulf %685, %685 : vector<4x128xf32>
    %692 = vector.broadcast %690 : vector<1x128xf32> to vector<4x128xf32>
    %693 = arith.mulf %691, %692 : vector<4x128xf32>
    %694 = vector.shape_cast %693 : vector<4x128xf32> to vector<1x4x128xf32>
    %cst_291 = arith.constant dense<0.000000e+00> : vector<1xf32>
    %695 = vector.multi_reduction <add>, %694, %cst_291 [1, 2] : vector<1x4x128xf32> to vector<1xf32>
    %696 = vector.shape_cast %695 : vector<1xf32> to vector<1x1x1xf32>
    %697 = vector.extract %696[0, 0, 0] : f32 from vector<1x1x1xf32>
    %cst_292 = arith.constant 0.010416667 : f32
    %698 = arith.mulf %697, %cst_292 : f32
    %cst_293 = arith.constant 9.99999993E-9 : f32
    %699 = arith.addf %698, %cst_293 : f32
    %700 = math.rsqrt %699 : f32
    %701 = vector.broadcast %700 : f32 to vector<4x128xf32>
    %702 = arith.mulf %685, %701 : vector<4x128xf32>
    %c66 = arith.constant 66 : index
    %c0_294 = arith.constant 0 : index
    %703 = vector.load %arg4[%c66, %c0_294] : memref<181x128xf32, #tpu.memory_space<vmem>>, vector<1x128xf32>
    %704 = vector.broadcast %703 : vector<1x128xf32> to vector<4x128xf32>
    %705 = arith.mulf %702, %704 : vector<4x128xf32>
    %c67 = arith.constant 67 : index
    %c0_295 = arith.constant 0 : index
    %706 = vector.load %arg4[%c67, %c0_295] : memref<181x128xf32, #tpu.memory_space<vmem>>, vector<1x128xf32>
    %707 = vector.broadcast %706 : vector<1x128xf32> to vector<4x128xf32>
    %708 = arith.addf %705, %707 : vector<4x128xf32>
    %cst_296 = arith.constant 0.000000e+00 : f32
    %709 = vector.broadcast %cst_296 : f32 to vector<4x128xf32>
    %710 = arith.cmpf oge, %708, %709 : vector<4x128xf32>
    %c68 = arith.constant 68 : index
    %c0_297 = arith.constant 0 : index
    %711 = vector.load %arg4[%c68, %c0_297] : memref<181x128xf32, #tpu.memory_space<vmem>>, vector<1x128xf32>
    %712 = vector.broadcast %711 : vector<1x128xf32> to vector<4x128xf32>
    %713 = arith.mulf %708, %712 : vector<4x128xf32>
    %714 = arith.select %710, %708, %713 : vector<4x128xi1>, vector<4x128xf32>
    %715 = tpu.iota {dimensions = array<i32: 0>} : vector<16x8xi32>
    %716 = tpu.iota {dimensions = array<i32: 1>} : vector<16x8xi32>
    %c16_i32_298 = arith.constant 16 : i32
    %717 = vector.broadcast %c16_i32_298 : i32 to vector<16x8xi32>
    %718 = arith.muli %716, %717 : vector<16x8xi32>
    %c8_i32_299 = arith.constant 8 : i32
    %719 = vector.broadcast %c8_i32_299 : i32 to vector<16x8xi32>
    %720 = arith.muli %715, %719 : vector<16x8xi32>
    %721 = arith.cmpi sle, %718, %720 : vector<16x8xi32>
    %c8_i32_300 = arith.constant 8 : i32
    %722 = vector.broadcast %c8_i32_300 : i32 to vector<16x8xi32>
    %723 = arith.muli %715, %722 : vector<16x8xi32>
    %c1_i32_301 = arith.constant 1 : i32
    %724 = vector.broadcast %c1_i32_301 : i32 to vector<16x8xi32>
    %725 = arith.addi %716, %724 : vector<16x8xi32>
    %c16_i32_302 = arith.constant 16 : i32
    %726 = vector.broadcast %c16_i32_302 : i32 to vector<16x8xi32>
    %727 = arith.muli %725, %726 : vector<16x8xi32>
    %728 = arith.cmpi slt, %723, %727 : vector<16x8xi32>
    %729 = arith.andi %721, %728 : vector<16x8xi1>
    %730 = arith.extui %729 : vector<16x8xi1> to vector<16x8xi32>
    %731 = arith.sitofp %730 : vector<16x8xi32> to vector<16x8xf32>
    %cst_303 = arith.constant dense<0.000000e+00> : vector<16x128xf32>
    %732 = tpu.matmul %731, %604, %cst_303 {dimension_numbers = #tpu.dot_dimension_numbers<[1], [0], [0], [1], [0, 0, 1, 1], [], []>} : vector<16x8xf32>, vector<8x128xf32>, vector<16x128xf32> -> vector<16x128xf32>
    %733 = tpu.iota {dimensions = array<i32: 0>} : vector<16x4xi32>
    %734 = tpu.iota {dimensions = array<i32: 1>} : vector<16x4xi32>
    %c16_i32_304 = arith.constant 16 : i32
    %735 = vector.broadcast %c16_i32_304 : i32 to vector<16x4xi32>
    %736 = arith.muli %734, %735 : vector<16x4xi32>
    %c4_i32_305 = arith.constant 4 : i32
    %737 = vector.broadcast %c4_i32_305 : i32 to vector<16x4xi32>
    %738 = arith.muli %733, %737 : vector<16x4xi32>
    %739 = arith.cmpi sle, %736, %738 : vector<16x4xi32>
    %c4_i32_306 = arith.constant 4 : i32
    %740 = vector.broadcast %c4_i32_306 : i32 to vector<16x4xi32>
    %741 = arith.muli %733, %740 : vector<16x4xi32>
    %c1_i32_307 = arith.constant 1 : i32
    %742 = vector.broadcast %c1_i32_307 : i32 to vector<16x4xi32>
    %743 = arith.addi %734, %742 : vector<16x4xi32>
    %c16_i32_308 = arith.constant 16 : i32
    %744 = vector.broadcast %c16_i32_308 : i32 to vector<16x4xi32>
    %745 = arith.muli %743, %744 : vector<16x4xi32>
    %746 = arith.cmpi slt, %741, %745 : vector<16x4xi32>
    %747 = arith.andi %739, %746 : vector<16x4xi1>
    %748 = arith.extui %747 : vector<16x4xi1> to vector<16x4xi32>
    %749 = arith.sitofp %748 : vector<16x4xi32> to vector<16x4xf32>
    %cst_309 = arith.constant dense<0.000000e+00> : vector<16x128xf32>
    %750 = tpu.matmul %749, %714, %cst_309 {dimension_numbers = #tpu.dot_dimension_numbers<[1], [0], [0], [1], [0, 0, 1, 1], [], []>} : vector<16x4xf32>, vector<4x128xf32>, vector<16x128xf32> -> vector<16x128xf32>
    %751 = arith.truncf %471 : vector<16x128xf32> to vector<16x128xbf16>
    %c13_310 = arith.constant 13 : index
    %c0_311 = arith.constant 0 : index
    %c0_312 = arith.constant 0 : index
    %752 = vector.load %arg3[%c13_310, %c0_311, %c0_312] : memref<41x128x128xbf16, #tpu.memory_space<vmem>>, vector<1x128x128xbf16>
    %753 = vector.shape_cast %752 : vector<1x128x128xbf16> to vector<128x128xbf16>
    %cst_313 = arith.constant dense<0.000000e+00> : vector<16x128xf32>
    %754 = tpu.matmul %751, %753, %cst_313 {dimension_numbers = #tpu.dot_dimension_numbers<[1], [0], [0], [1], [0, 0, 1, 1], [], []>} : vector<16x128xbf16>, vector<128x128xbf16>, vector<16x128xf32> -> vector<16x128xf32>
    %755 = arith.truncf %732 : vector<16x128xf32> to vector<16x128xbf16>
    %c14_314 = arith.constant 14 : index
    %c0_315 = arith.constant 0 : index
    %c0_316 = arith.constant 0 : index
    %756 = vector.load %arg3[%c14_314, %c0_315, %c0_316] : memref<41x128x128xbf16, #tpu.memory_space<vmem>>, vector<1x128x128xbf16>
    %757 = vector.shape_cast %756 : vector<1x128x128xbf16> to vector<128x128xbf16>
    %cst_317 = arith.constant dense<0.000000e+00> : vector<16x128xf32>
    %758 = tpu.matmul %755, %757, %cst_317 {dimension_numbers = #tpu.dot_dimension_numbers<[1], [0], [0], [1], [0, 0, 1, 1], [], []>} : vector<16x128xbf16>, vector<128x128xbf16>, vector<16x128xf32> -> vector<16x128xf32>
    %759 = arith.addf %754, %758 : vector<16x128xf32>
    %760 = arith.truncf %750 : vector<16x128xf32> to vector<16x128xbf16>
    %c15_318 = arith.constant 15 : index
    %c0_319 = arith.constant 0 : index
    %c0_320 = arith.constant 0 : index
    %761 = vector.load %arg3[%c15_318, %c0_319, %c0_320] : memref<41x128x128xbf16, #tpu.memory_space<vmem>>, vector<1x128x128xbf16>
    %762 = vector.shape_cast %761 : vector<1x128x128xbf16> to vector<128x128xbf16>
    %cst_321 = arith.constant dense<0.000000e+00> : vector<16x128xf32>
    %763 = tpu.matmul %760, %762, %cst_321 {dimension_numbers = #tpu.dot_dimension_numbers<[1], [0], [0], [1], [0, 0, 1, 1], [], []>} : vector<16x128xbf16>, vector<128x128xbf16>, vector<16x128xf32> -> vector<16x128xf32>
    %764 = arith.addf %759, %763 : vector<16x128xf32>
    %c69 = arith.constant 69 : index
    %c0_322 = arith.constant 0 : index
    %765 = vector.load %arg4[%c69, %c0_322] : memref<181x128xf32, #tpu.memory_space<vmem>>, vector<1x128xf32>
    %766 = vector.broadcast %765 : vector<1x128xf32> to vector<16x128xf32>
    %767 = arith.addf %764, %766 : vector<16x128xf32>
    %768 = vector.shape_cast %767 : vector<16x128xf32> to vector<1x16x128xf32>
    %cst_323 = arith.constant dense<0.000000e+00> : vector<1xf32>
    %769 = vector.multi_reduction <add>, %768, %cst_323 [1, 2] : vector<1x16x128xf32> to vector<1xf32>
    %770 = vector.shape_cast %769 : vector<1xf32> to vector<1x1x1xf32>
    %771 = vector.extract %770[0, 0, 0] : f32 from vector<1x1x1xf32>
    %cst_324 = arith.constant 0.00260416674 : f32
    %772 = arith.mulf %771, %cst_324 : f32
    %773 = vector.broadcast %772 : f32 to vector<16x128xf32>
    %774 = arith.subf %767, %773 : vector<16x128xf32>
    %775 = tpu.iota {dimensions = array<i32: 1>} : vector<1x128xi32>
    %c24_i32_325 = arith.constant 24 : i32
    %776 = vector.broadcast %c24_i32_325 : i32 to vector<1x128xi32>
    %777 = arith.cmpi slt, %775, %776 : vector<1x128xi32>
    %778 = arith.extui %777 : vector<1x128xi1> to vector<1x128xi32>
    %779 = arith.sitofp %778 : vector<1x128xi32> to vector<1x128xf32>
    %780 = arith.mulf %774, %774 : vector<16x128xf32>
    %781 = vector.broadcast %779 : vector<1x128xf32> to vector<16x128xf32>
    %782 = arith.mulf %780, %781 : vector<16x128xf32>
    %783 = vector.shape_cast %782 : vector<16x128xf32> to vector<1x16x128xf32>
    %cst_326 = arith.constant dense<0.000000e+00> : vector<1xf32>
    %784 = vector.multi_reduction <add>, %783, %cst_326 [1, 2] : vector<1x16x128xf32> to vector<1xf32>
    %785 = vector.shape_cast %784 : vector<1xf32> to vector<1x1x1xf32>
    %786 = vector.extract %785[0, 0, 0] : f32 from vector<1x1x1xf32>
    %cst_327 = arith.constant 0.00260416674 : f32
    %787 = arith.mulf %786, %cst_327 : f32
    %cst_328 = arith.constant 9.99999993E-9 : f32
    %788 = arith.addf %787, %cst_328 : f32
    %789 = math.rsqrt %788 : f32
    %790 = vector.broadcast %789 : f32 to vector<16x128xf32>
    %791 = arith.mulf %774, %790 : vector<16x128xf32>
    %c70 = arith.constant 70 : index
    %c0_329 = arith.constant 0 : index
    %792 = vector.load %arg4[%c70, %c0_329] : memref<181x128xf32, #tpu.memory_space<vmem>>, vector<1x128xf32>
    %793 = vector.broadcast %792 : vector<1x128xf32> to vector<16x128xf32>
    %794 = arith.mulf %791, %793 : vector<16x128xf32>
    %c71 = arith.constant 71 : index
    %c0_330 = arith.constant 0 : index
    %795 = vector.load %arg4[%c71, %c0_330] : memref<181x128xf32, #tpu.memory_space<vmem>>, vector<1x128xf32>
    %796 = vector.broadcast %795 : vector<1x128xf32> to vector<16x128xf32>
    %797 = arith.addf %794, %796 : vector<16x128xf32>
    %cst_331 = arith.constant 0.000000e+00 : f32
    %798 = vector.broadcast %cst_331 : f32 to vector<16x128xf32>
    %799 = arith.cmpf oge, %797, %798 : vector<16x128xf32>
    %c72 = arith.constant 72 : index
    %c0_332 = arith.constant 0 : index
    %800 = vector.load %arg4[%c72, %c0_332] : memref<181x128xf32, #tpu.memory_space<vmem>>, vector<1x128xf32>
    %801 = vector.broadcast %800 : vector<1x128xf32> to vector<16x128xf32>
    %802 = arith.mulf %797, %801 : vector<16x128xf32>
    %803 = arith.select %799, %797, %802 : vector<16x128xi1>, vector<16x128xf32>
    %804 = arith.truncf %803 : vector<16x128xf32> to vector<16x128xbf16>
    %c16_333 = arith.constant 16 : index
    %c0_334 = arith.constant 0 : index
    %c0_335 = arith.constant 0 : index
    %805 = vector.load %arg3[%c16_333, %c0_334, %c0_335] : memref<41x128x128xbf16, #tpu.memory_space<vmem>>, vector<1x128x128xbf16>
    %806 = vector.shape_cast %805 : vector<1x128x128xbf16> to vector<128x128xbf16>
    %cst_336 = arith.constant dense<0.000000e+00> : vector<16x128xf32>
    %807 = tpu.matmul %804, %806, %cst_336 {dimension_numbers = #tpu.dot_dimension_numbers<[1], [0], [0], [1], [0, 0, 1, 1], [], []>} : vector<16x128xbf16>, vector<128x128xbf16>, vector<16x128xf32> -> vector<16x128xf32>
    %c73 = arith.constant 73 : index
    %c0_337 = arith.constant 0 : index
    %808 = vector.load %arg4[%c73, %c0_337] : memref<181x128xf32, #tpu.memory_space<vmem>>, vector<1x128xf32>
    %809 = vector.broadcast %808 : vector<1x128xf32> to vector<16x128xf32>
    %810 = arith.addf %807, %809 : vector<16x128xf32>
    %811 = arith.addf %810, %179 : vector<16x128xf32>
    %812 = arith.addf %34, %166 : vector<8x128xf32>
    %c162 = arith.constant 162 : index
    %c0_338 = arith.constant 0 : index
    %813 = vector.load %arg4[%c162, %c0_338] : memref<181x128xf32, #tpu.memory_space<vmem>>, vector<1x128xf32>
    %814 = vector.broadcast %813 : vector<1x128xf32> to vector<8x128xf32>
    %815 = arith.mulf %812, %814 : vector<8x128xf32>
    %c163 = arith.constant 163 : index
    %c0_339 = arith.constant 0 : index
    %816 = vector.load %arg4[%c163, %c0_339] : memref<181x128xf32, #tpu.memory_space<vmem>>, vector<1x128xf32>
    %817 = vector.broadcast %816 : vector<1x128xf32> to vector<8x128xf32>
    %818 = arith.addf %815, %817 : vector<8x128xf32>
    %cst_340 = arith.constant 0.000000e+00 : f32
    %819 = vector.broadcast %cst_340 : f32 to vector<8x128xf32>
    %820 = arith.cmpf oge, %818, %819 : vector<8x128xf32>
    %c164 = arith.constant 164 : index
    %c0_341 = arith.constant 0 : index
    %821 = vector.load %arg4[%c164, %c0_341] : memref<181x128xf32, #tpu.memory_space<vmem>>, vector<1x128xf32>
    %822 = vector.broadcast %821 : vector<1x128xf32> to vector<8x128xf32>
    %823 = arith.mulf %818, %822 : vector<8x128xf32>
    %824 = arith.select %820, %818, %823 : vector<8x128xi1>, vector<8x128xf32>
    %825 = arith.truncf %824 : vector<8x128xf32> to vector<8x128xbf16>
    %c25_342 = arith.constant 25 : index
    %c0_343 = arith.constant 0 : index
    %c0_344 = arith.constant 0 : index
    %826 = vector.load %arg3[%c25_342, %c0_343, %c0_344] : memref<41x128x128xbf16, #tpu.memory_space<vmem>>, vector<1x128x128xbf16>
    %827 = vector.shape_cast %826 : vector<1x128x128xbf16> to vector<128x128xbf16>
    %cst_345 = arith.constant dense<0.000000e+00> : vector<8x128xf32>
    %828 = tpu.matmul %825, %827, %cst_345 {dimension_numbers = #tpu.dot_dimension_numbers<[1], [0], [0], [1], [0, 0, 1, 1], [], []>} : vector<8x128xbf16>, vector<128x128xbf16>, vector<8x128xf32> -> vector<8x128xf32>
    %c115 = arith.constant 115 : index
    %c0_346 = arith.constant 0 : index
    %829 = vector.load %arg4[%c115, %c0_346] : memref<181x128xf32, #tpu.memory_space<vmem>>, vector<1x128xf32>
    %830 = vector.broadcast %829 : vector<1x128xf32> to vector<8x128xf32>
    %831 = arith.addf %828, %830 : vector<8x128xf32>
    %832 = vector.shape_cast %831 : vector<8x128xf32> to vector<1x8x128xf32>
    %cst_347 = arith.constant dense<0.000000e+00> : vector<1xf32>
    %833 = vector.multi_reduction <add>, %832, %cst_347 [1, 2] : vector<1x8x128xf32> to vector<1xf32>
    %834 = vector.shape_cast %833 : vector<1xf32> to vector<1x1x1xf32>
    %835 = vector.extract %834[0, 0, 0] : f32 from vector<1x1x1xf32>
    %cst_348 = arith.constant 0.00520833349 : f32
    %836 = arith.mulf %835, %cst_348 : f32
    %837 = vector.broadcast %836 : f32 to vector<8x128xf32>
    %838 = arith.subf %831, %837 : vector<8x128xf32>
    %839 = tpu.iota {dimensions = array<i32: 1>} : vector<1x128xi32>
    %c24_i32_349 = arith.constant 24 : i32
    %840 = vector.broadcast %c24_i32_349 : i32 to vector<1x128xi32>
    %841 = arith.cmpi slt, %839, %840 : vector<1x128xi32>
    %842 = arith.extui %841 : vector<1x128xi1> to vector<1x128xi32>
    %843 = arith.sitofp %842 : vector<1x128xi32> to vector<1x128xf32>
    %844 = arith.mulf %838, %838 : vector<8x128xf32>
    %845 = vector.broadcast %843 : vector<1x128xf32> to vector<8x128xf32>
    %846 = arith.mulf %844, %845 : vector<8x128xf32>
    %847 = vector.shape_cast %846 : vector<8x128xf32> to vector<1x8x128xf32>
    %cst_350 = arith.constant dense<0.000000e+00> : vector<1xf32>
    %848 = vector.multi_reduction <add>, %847, %cst_350 [1, 2] : vector<1x8x128xf32> to vector<1xf32>
    %849 = vector.shape_cast %848 : vector<1xf32> to vector<1x1x1xf32>
    %850 = vector.extract %849[0, 0, 0] : f32 from vector<1x1x1xf32>
    %cst_351 = arith.constant 0.00520833349 : f32
    %851 = arith.mulf %850, %cst_351 : f32
    %cst_352 = arith.constant 9.99999993E-9 : f32
    %852 = arith.addf %851, %cst_352 : f32
    %853 = math.rsqrt %852 : f32
    %854 = vector.broadcast %853 : f32 to vector<8x128xf32>
    %855 = arith.mulf %838, %854 : vector<8x128xf32>
    %c116 = arith.constant 116 : index
    %c0_353 = arith.constant 0 : index
    %856 = vector.load %arg4[%c116, %c0_353] : memref<181x128xf32, #tpu.memory_space<vmem>>, vector<1x128xf32>
    %857 = vector.broadcast %856 : vector<1x128xf32> to vector<8x128xf32>
    %858 = arith.mulf %855, %857 : vector<8x128xf32>
    %c117 = arith.constant 117 : index
    %c0_354 = arith.constant 0 : index
    %859 = vector.load %arg4[%c117, %c0_354] : memref<181x128xf32, #tpu.memory_space<vmem>>, vector<1x128xf32>
    %860 = vector.broadcast %859 : vector<1x128xf32> to vector<8x128xf32>
    %861 = arith.addf %858, %860 : vector<8x128xf32>
    %cst_355 = arith.constant 0.000000e+00 : f32
    %862 = vector.broadcast %cst_355 : f32 to vector<8x128xf32>
    %863 = arith.cmpf oge, %861, %862 : vector<8x128xf32>
    %c118 = arith.constant 118 : index
    %c0_356 = arith.constant 0 : index
    %864 = vector.load %arg4[%c118, %c0_356] : memref<181x128xf32, #tpu.memory_space<vmem>>, vector<1x128xf32>
    %865 = vector.broadcast %864 : vector<1x128xf32> to vector<8x128xf32>
    %866 = arith.mulf %861, %865 : vector<8x128xf32>
    %867 = arith.select %863, %861, %866 : vector<8x128xi1>, vector<8x128xf32>
    %cst_357 = arith.constant 0.000000e+00 : f32
    %868 = vector.broadcast %cst_357 : f32 to vector<1x128xf32>
    %869 = tpu.concatenate %868, %867, %868 in 0 : vector<1x128xf32>, vector<8x128xf32>, vector<1x128xf32> -> vector<10x128xf32>
    %870 = vector.extract_strided_slice %869 {offsets = [0, 0], sizes = [8, 128], strides = [1, 1]} : vector<10x128xf32> to vector<8x128xf32>
    %c119 = arith.constant 119 : index
    %c0_358 = arith.constant 0 : index
    %871 = vector.load %arg4[%c119, %c0_358] : memref<181x128xf32, #tpu.memory_space<vmem>>, vector<1x128xf32>
    %872 = vector.broadcast %871 : vector<1x128xf32> to vector<8x128xf32>
    %873 = arith.mulf %870, %872 : vector<8x128xf32>
    %874 = vector.extract_strided_slice %869 {offsets = [1, 0], sizes = [8, 128], strides = [1, 1]} : vector<10x128xf32> to vector<8x128xf32>
    %c120 = arith.constant 120 : index
    %c0_359 = arith.constant 0 : index
    %875 = vector.load %arg4[%c120, %c0_359] : memref<181x128xf32, #tpu.memory_space<vmem>>, vector<1x128xf32>
    %876 = vector.broadcast %875 : vector<1x128xf32> to vector<8x128xf32>
    %877 = arith.mulf %874, %876 : vector<8x128xf32>
    %878 = arith.addf %873, %877 : vector<8x128xf32>
    %879 = vector.extract_strided_slice %869 {offsets = [2, 0], sizes = [8, 128], strides = [1, 1]} : vector<10x128xf32> to vector<8x128xf32>
    %c121 = arith.constant 121 : index
    %c0_360 = arith.constant 0 : index
    %880 = vector.load %arg4[%c121, %c0_360] : memref<181x128xf32, #tpu.memory_space<vmem>>, vector<1x128xf32>
    %881 = vector.broadcast %880 : vector<1x128xf32> to vector<8x128xf32>
    %882 = arith.mulf %879, %881 : vector<8x128xf32>
    %883 = arith.addf %878, %882 : vector<8x128xf32>
    %c122 = arith.constant 122 : index
    %c0_361 = arith.constant 0 : index
    %884 = vector.load %arg4[%c122, %c0_361] : memref<181x128xf32, #tpu.memory_space<vmem>>, vector<1x128xf32>
    %885 = vector.broadcast %884 : vector<1x128xf32> to vector<8x128xf32>
    %886 = arith.addf %883, %885 : vector<8x128xf32>
    %887 = vector.shape_cast %886 : vector<8x128xf32> to vector<1x8x128xf32>
    %cst_362 = arith.constant dense<0.000000e+00> : vector<1xf32>
    %888 = vector.multi_reduction <add>, %887, %cst_362 [1, 2] : vector<1x8x128xf32> to vector<1xf32>
    %889 = vector.shape_cast %888 : vector<1xf32> to vector<1x1x1xf32>
    %890 = vector.extract %889[0, 0, 0] : f32 from vector<1x1x1xf32>
    %cst_363 = arith.constant 0.00520833349 : f32
    %891 = arith.mulf %890, %cst_363 : f32
    %892 = vector.broadcast %891 : f32 to vector<8x128xf32>
    %893 = arith.subf %886, %892 : vector<8x128xf32>
    %894 = tpu.iota {dimensions = array<i32: 1>} : vector<1x128xi32>
    %c24_i32_364 = arith.constant 24 : i32
    %895 = vector.broadcast %c24_i32_364 : i32 to vector<1x128xi32>
    %896 = arith.cmpi slt, %894, %895 : vector<1x128xi32>
    %897 = arith.extui %896 : vector<1x128xi1> to vector<1x128xi32>
    %898 = arith.sitofp %897 : vector<1x128xi32> to vector<1x128xf32>
    %899 = arith.mulf %893, %893 : vector<8x128xf32>
    %900 = vector.broadcast %898 : vector<1x128xf32> to vector<8x128xf32>
    %901 = arith.mulf %899, %900 : vector<8x128xf32>
    %902 = vector.shape_cast %901 : vector<8x128xf32> to vector<1x8x128xf32>
    %cst_365 = arith.constant dense<0.000000e+00> : vector<1xf32>
    %903 = vector.multi_reduction <add>, %902, %cst_365 [1, 2] : vector<1x8x128xf32> to vector<1xf32>
    %904 = vector.shape_cast %903 : vector<1xf32> to vector<1x1x1xf32>
    %905 = vector.extract %904[0, 0, 0] : f32 from vector<1x1x1xf32>
    %cst_366 = arith.constant 0.00520833349 : f32
    %906 = arith.mulf %905, %cst_366 : f32
    %cst_367 = arith.constant 9.99999993E-9 : f32
    %907 = arith.addf %906, %cst_367 : f32
    %908 = math.rsqrt %907 : f32
    %909 = vector.broadcast %908 : f32 to vector<8x128xf32>
    %910 = arith.mulf %893, %909 : vector<8x128xf32>
    %c123 = arith.constant 123 : index
    %c0_368 = arith.constant 0 : index
    %911 = vector.load %arg4[%c123, %c0_368] : memref<181x128xf32, #tpu.memory_space<vmem>>, vector<1x128xf32>
    %912 = vector.broadcast %911 : vector<1x128xf32> to vector<8x128xf32>
    %913 = arith.mulf %910, %912 : vector<8x128xf32>
    %c124 = arith.constant 124 : index
    %c0_369 = arith.constant 0 : index
    %914 = vector.load %arg4[%c124, %c0_369] : memref<181x128xf32, #tpu.memory_space<vmem>>, vector<1x128xf32>
    %915 = vector.broadcast %914 : vector<1x128xf32> to vector<8x128xf32>
    %916 = arith.addf %913, %915 : vector<8x128xf32>
    %cst_370 = arith.constant 0.000000e+00 : f32
    %917 = vector.broadcast %cst_370 : f32 to vector<1x128xf32>
    %c0_371 = arith.constant 0 : index
    %c0_372 = arith.constant 0 : index
    %918 = vector.load %arg6[%c0_371, %c0_372] : memref<24x128xf32, #tpu.memory_space<vmem>>, vector<1x128xf32>
    tpu.vector_store %arg6[%c0_371, %c0_372], %917 {strides = array<i32>} : memref<24x128xf32, #tpu.memory_space<vmem>>, vector<1x128xf32>,
    %cst_373 = arith.constant 0.000000e+00 : f32
    %919 = vector.broadcast %cst_373 : f32 to vector<1x128xf32>
    %c9_374 = arith.constant 9 : index
    %c0_375 = arith.constant 0 : index
    %920 = vector.load %arg6[%c9_374, %c0_375] : memref<24x128xf32, #tpu.memory_space<vmem>>, vector<1x128xf32>
    tpu.vector_store %arg6[%c9_374, %c0_375], %919 {strides = array<i32>} : memref<24x128xf32, #tpu.memory_space<vmem>>, vector<1x128xf32>,
    %c1_376 = arith.constant 1 : index
    %c0_377 = arith.constant 0 : index
    %921 = vector.load %arg6[%c1_376, %c0_377] : memref<24x128xf32, #tpu.memory_space<vmem>>, vector<8x128xf32>
    tpu.vector_store %arg6[%c1_376, %c0_377], %916 {strides = array<i32>} : memref<24x128xf32, #tpu.memory_space<vmem>>, vector<8x128xf32>,
    %c0_378 = arith.constant 0 : index
    %c0_379 = arith.constant 0 : index
    %922 = tpu.strided_load %arg6[%c0_378, %c0_379] {strides = array<i32: 2, 1>} : memref<24x128xf32, #tpu.memory_space<vmem>>, vector<4x128xf32>
    %c125 = arith.constant 125 : index
    %c0_380 = arith.constant 0 : index
    %923 = vector.load %arg4[%c125, %c0_380] : memref<181x128xf32, #tpu.memory_space<vmem>>, vector<1x128xf32>
    %924 = vector.broadcast %923 : vector<1x128xf32> to vector<4x128xf32>
    %925 = arith.mulf %922, %924 : vector<4x128xf32>
    %c1_381 = arith.constant 1 : index
    %c0_382 = arith.constant 0 : index
    %926 = tpu.strided_load %arg6[%c1_381, %c0_382] {strides = array<i32: 2, 1>} : memref<24x128xf32, #tpu.memory_space<vmem>>, vector<4x128xf32>
    %c126 = arith.constant 126 : index
    %c0_383 = arith.constant 0 : index
    %927 = vector.load %arg4[%c126, %c0_383] : memref<181x128xf32, #tpu.memory_space<vmem>>, vector<1x128xf32>
    %928 = vector.broadcast %927 : vector<1x128xf32> to vector<4x128xf32>
    %929 = arith.mulf %926, %928 : vector<4x128xf32>
    %930 = arith.addf %925, %929 : vector<4x128xf32>
    %c2_384 = arith.constant 2 : index
    %c0_385 = arith.constant 0 : index
    %931 = tpu.strided_load %arg6[%c2_384, %c0_385] {strides = array<i32: 2, 1>} : memref<24x128xf32, #tpu.memory_space<vmem>>, vector<4x128xf32>
    %c127 = arith.constant 127 : index
    %c0_386 = arith.constant 0 : index
    %932 = vector.load %arg4[%c127, %c0_386] : memref<181x128xf32, #tpu.memory_space<vmem>>, vector<1x128xf32>
    %933 = vector.broadcast %932 : vector<1x128xf32> to vector<4x128xf32>
    %934 = arith.mulf %931, %933 : vector<4x128xf32>
    %935 = arith.addf %930, %934 : vector<4x128xf32>
    %c128 = arith.constant 128 : index
    %c0_387 = arith.constant 0 : index
    %936 = vector.load %arg4[%c128, %c0_387] : memref<181x128xf32, #tpu.memory_space<vmem>>, vector<1x128xf32>
    %937 = vector.broadcast %936 : vector<1x128xf32> to vector<4x128xf32>
    %938 = arith.addf %935, %937 : vector<4x128xf32>
    %939 = vector.shape_cast %938 : vector<4x128xf32> to vector<1x4x128xf32>
    %cst_388 = arith.constant dense<0.000000e+00> : vector<1xf32>
    %940 = vector.multi_reduction <add>, %939, %cst_388 [1, 2] : vector<1x4x128xf32> to vector<1xf32>
    %941 = vector.shape_cast %940 : vector<1xf32> to vector<1x1x1xf32>
    %942 = vector.extract %941[0, 0, 0] : f32 from vector<1x1x1xf32>
    %cst_389 = arith.constant 0.010416667 : f32
    %943 = arith.mulf %942, %cst_389 : f32
    %944 = vector.broadcast %943 : f32 to vector<4x128xf32>
    %945 = arith.subf %938, %944 : vector<4x128xf32>
    %946 = tpu.iota {dimensions = array<i32: 1>} : vector<1x128xi32>
    %c24_i32_390 = arith.constant 24 : i32
    %947 = vector.broadcast %c24_i32_390 : i32 to vector<1x128xi32>
    %948 = arith.cmpi slt, %946, %947 : vector<1x128xi32>
    %949 = arith.extui %948 : vector<1x128xi1> to vector<1x128xi32>
    %950 = arith.sitofp %949 : vector<1x128xi32> to vector<1x128xf32>
    %951 = arith.mulf %945, %945 : vector<4x128xf32>
    %952 = vector.broadcast %950 : vector<1x128xf32> to vector<4x128xf32>
    %953 = arith.mulf %951, %952 : vector<4x128xf32>
    %954 = vector.shape_cast %953 : vector<4x128xf32> to vector<1x4x128xf32>
    %cst_391 = arith.constant dense<0.000000e+00> : vector<1xf32>
    %955 = vector.multi_reduction <add>, %954, %cst_391 [1, 2] : vector<1x4x128xf32> to vector<1xf32>
    %956 = vector.shape_cast %955 : vector<1xf32> to vector<1x1x1xf32>
    %957 = vector.extract %956[0, 0, 0] : f32 from vector<1x1x1xf32>
    %cst_392 = arith.constant 0.010416667 : f32
    %958 = arith.mulf %957, %cst_392 : f32
    %cst_393 = arith.constant 9.99999993E-9 : f32
    %959 = arith.addf %958, %cst_393 : f32
    %960 = math.rsqrt %959 : f32
    %961 = vector.broadcast %960 : f32 to vector<4x128xf32>
    %962 = arith.mulf %945, %961 : vector<4x128xf32>
    %c129 = arith.constant 129 : index
    %c0_394 = arith.constant 0 : index
    %963 = vector.load %arg4[%c129, %c0_394] : memref<181x128xf32, #tpu.memory_space<vmem>>, vector<1x128xf32>
    %964 = vector.broadcast %963 : vector<1x128xf32> to vector<4x128xf32>
    %965 = arith.mulf %962, %964 : vector<4x128xf32>
    %c130 = arith.constant 130 : index
    %c0_395 = arith.constant 0 : index
    %966 = vector.load %arg4[%c130, %c0_395] : memref<181x128xf32, #tpu.memory_space<vmem>>, vector<1x128xf32>
    %967 = vector.broadcast %966 : vector<1x128xf32> to vector<4x128xf32>
    %968 = arith.addf %965, %967 : vector<4x128xf32>
    %969 = tpu.iota {dimensions = array<i32: 0>} : vector<8x4xi32>
    %970 = tpu.iota {dimensions = array<i32: 1>} : vector<8x4xi32>
    %c8_i32_396 = arith.constant 8 : i32
    %971 = vector.broadcast %c8_i32_396 : i32 to vector<8x4xi32>
    %972 = arith.muli %970, %971 : vector<8x4xi32>
    %c4_i32_397 = arith.constant 4 : i32
    %973 = vector.broadcast %c4_i32_397 : i32 to vector<8x4xi32>
    %974 = arith.muli %969, %973 : vector<8x4xi32>
    %975 = arith.cmpi sle, %972, %974 : vector<8x4xi32>
    %c4_i32_398 = arith.constant 4 : i32
    %976 = vector.broadcast %c4_i32_398 : i32 to vector<8x4xi32>
    %977 = arith.muli %969, %976 : vector<8x4xi32>
    %c1_i32_399 = arith.constant 1 : i32
    %978 = vector.broadcast %c1_i32_399 : i32 to vector<8x4xi32>
    %979 = arith.addi %970, %978 : vector<8x4xi32>
    %c8_i32_400 = arith.constant 8 : i32
    %980 = vector.broadcast %c8_i32_400 : i32 to vector<8x4xi32>
    %981 = arith.muli %979, %980 : vector<8x4xi32>
    %982 = arith.cmpi slt, %977, %981 : vector<8x4xi32>
    %983 = arith.andi %975, %982 : vector<8x4xi1>
    %984 = arith.extui %983 : vector<8x4xi1> to vector<8x4xi32>
    %985 = arith.sitofp %984 : vector<8x4xi32> to vector<8x4xf32>
    %cst_401 = arith.constant dense<0.000000e+00> : vector<8x128xf32>
    %986 = tpu.matmul %985, %968, %cst_401 {dimension_numbers = #tpu.dot_dimension_numbers<[1], [0], [0], [1], [0, 0, 1, 1], [], []>} : vector<8x4xf32>, vector<4x128xf32>, vector<8x128xf32> -> vector<8x128xf32>
    %987 = arith.truncf %916 : vector<8x128xf32> to vector<8x128xbf16>
    %c26_402 = arith.constant 26 : index
    %c0_403 = arith.constant 0 : index
    %c0_404 = arith.constant 0 : index
    %988 = vector.load %arg3[%c26_402, %c0_403, %c0_404] : memref<41x128x128xbf16, #tpu.memory_space<vmem>>, vector<1x128x128xbf16>
    %989 = vector.shape_cast %988 : vector<1x128x128xbf16> to vector<128x128xbf16>
    %cst_405 = arith.constant dense<0.000000e+00> : vector<8x128xf32>
    %990 = tpu.matmul %987, %989, %cst_405 {dimension_numbers = #tpu.dot_dimension_numbers<[1], [0], [0], [1], [0, 0, 1, 1], [], []>} : vector<8x128xbf16>, vector<128x128xbf16>, vector<8x128xf32> -> vector<8x128xf32>
    %991 = arith.truncf %986 : vector<8x128xf32> to vector<8x128xbf16>
    %c27_406 = arith.constant 27 : index
    %c0_407 = arith.constant 0 : index
    %c0_408 = arith.constant 0 : index
    %992 = vector.load %arg3[%c27_406, %c0_407, %c0_408] : memref<41x128x128xbf16, #tpu.memory_space<vmem>>, vector<1x128x128xbf16>
    %993 = vector.shape_cast %992 : vector<1x128x128xbf16> to vector<128x128xbf16>
    %cst_409 = arith.constant dense<0.000000e+00> : vector<8x128xf32>
    %994 = tpu.matmul %991, %993, %cst_409 {dimension_numbers = #tpu.dot_dimension_numbers<[1], [0], [0], [1], [0, 0, 1, 1], [], []>} : vector<8x128xbf16>, vector<128x128xbf16>, vector<8x128xf32> -> vector<8x128xf32>
    %995 = arith.addf %990, %994 : vector<8x128xf32>
    %c143 = arith.constant 143 : index
    %c0_410 = arith.constant 0 : index
    %996 = vector.load %arg4[%c143, %c0_410] : memref<181x128xf32, #tpu.memory_space<vmem>>, vector<1x128xf32>
    %997 = vector.broadcast %996 : vector<1x128xf32> to vector<8x128xf32>
    %998 = arith.addf %995, %997 : vector<8x128xf32>
    %999 = vector.shape_cast %998 : vector<8x128xf32> to vector<1x8x128xf32>
    %cst_411 = arith.constant dense<0.000000e+00> : vector<1xf32>
    %1000 = vector.multi_reduction <add>, %999, %cst_411 [1, 2] : vector<1x8x128xf32> to vector<1xf32>
    %1001 = vector.shape_cast %1000 : vector<1xf32> to vector<1x1x1xf32>
    %1002 = vector.extract %1001[0, 0, 0] : f32 from vector<1x1x1xf32>
    %cst_412 = arith.constant 0.00520833349 : f32
    %1003 = arith.mulf %1002, %cst_412 : f32
    %1004 = vector.broadcast %1003 : f32 to vector<8x128xf32>
    %1005 = arith.subf %998, %1004 : vector<8x128xf32>
    %1006 = tpu.iota {dimensions = array<i32: 1>} : vector<1x128xi32>
    %c24_i32_413 = arith.constant 24 : i32
    %1007 = vector.broadcast %c24_i32_413 : i32 to vector<1x128xi32>
    %1008 = arith.cmpi slt, %1006, %1007 : vector<1x128xi32>
    %1009 = arith.extui %1008 : vector<1x128xi1> to vector<1x128xi32>
    %1010 = arith.sitofp %1009 : vector<1x128xi32> to vector<1x128xf32>
    %1011 = arith.mulf %1005, %1005 : vector<8x128xf32>
    %1012 = vector.broadcast %1010 : vector<1x128xf32> to vector<8x128xf32>
    %1013 = arith.mulf %1011, %1012 : vector<8x128xf32>
    %1014 = vector.shape_cast %1013 : vector<8x128xf32> to vector<1x8x128xf32>
    %cst_414 = arith.constant dense<0.000000e+00> : vector<1xf32>
    %1015 = vector.multi_reduction <add>, %1014, %cst_414 [1, 2] : vector<1x8x128xf32> to vector<1xf32>
    %1016 = vector.shape_cast %1015 : vector<1xf32> to vector<1x1x1xf32>
    %1017 = vector.extract %1016[0, 0, 0] : f32 from vector<1x1x1xf32>
    %cst_415 = arith.constant 0.00520833349 : f32
    %1018 = arith.mulf %1017, %cst_415 : f32
    %cst_416 = arith.constant 9.99999993E-9 : f32
    %1019 = arith.addf %1018, %cst_416 : f32
    %1020 = math.rsqrt %1019 : f32
    %1021 = vector.broadcast %1020 : f32 to vector<8x128xf32>
    %1022 = arith.mulf %1005, %1021 : vector<8x128xf32>
    %c144 = arith.constant 144 : index
    %c0_417 = arith.constant 0 : index
    %1023 = vector.load %arg4[%c144, %c0_417] : memref<181x128xf32, #tpu.memory_space<vmem>>, vector<1x128xf32>
    %1024 = vector.broadcast %1023 : vector<1x128xf32> to vector<8x128xf32>
    %1025 = arith.mulf %1022, %1024 : vector<8x128xf32>
    %c145 = arith.constant 145 : index
    %c0_418 = arith.constant 0 : index
    %1026 = vector.load %arg4[%c145, %c0_418] : memref<181x128xf32, #tpu.memory_space<vmem>>, vector<1x128xf32>
    %1027 = vector.broadcast %1026 : vector<1x128xf32> to vector<8x128xf32>
    %1028 = arith.addf %1025, %1027 : vector<8x128xf32>
    %cst_419 = arith.constant 0.000000e+00 : f32
    %1029 = vector.broadcast %cst_419 : f32 to vector<8x128xf32>
    %1030 = arith.cmpf oge, %1028, %1029 : vector<8x128xf32>
    %c146 = arith.constant 146 : index
    %c0_420 = arith.constant 0 : index
    %1031 = vector.load %arg4[%c146, %c0_420] : memref<181x128xf32, #tpu.memory_space<vmem>>, vector<1x128xf32>
    %1032 = vector.broadcast %1031 : vector<1x128xf32> to vector<8x128xf32>
    %1033 = arith.mulf %1028, %1032 : vector<8x128xf32>
    %1034 = arith.select %1030, %1028, %1033 : vector<8x128xi1>, vector<8x128xf32>
    %cst_421 = arith.constant 0.000000e+00 : f32
    %1035 = vector.broadcast %cst_421 : f32 to vector<1x128xf32>
    %c0_422 = arith.constant 0 : index
    %c0_423 = arith.constant 0 : index
    %1036 = vector.load %arg6[%c0_422, %c0_423] : memref<24x128xf32, #tpu.memory_space<vmem>>, vector<1x128xf32>
    tpu.vector_store %arg6[%c0_422, %c0_423], %1035 {strides = array<i32>} : memref<24x128xf32, #tpu.memory_space<vmem>>, vector<1x128xf32>,
    %cst_424 = arith.constant 0.000000e+00 : f32
    %1037 = vector.broadcast %cst_424 : f32 to vector<1x128xf32>
    %c9_425 = arith.constant 9 : index
    %c0_426 = arith.constant 0 : index
    %1038 = vector.load %arg6[%c9_425, %c0_426] : memref<24x128xf32, #tpu.memory_space<vmem>>, vector<1x128xf32>
    tpu.vector_store %arg6[%c9_425, %c0_426], %1037 {strides = array<i32>} : memref<24x128xf32, #tpu.memory_space<vmem>>, vector<1x128xf32>,
    %c1_427 = arith.constant 1 : index
    %c0_428 = arith.constant 0 : index
    %1039 = vector.load %arg6[%c1_427, %c0_428] : memref<24x128xf32, #tpu.memory_space<vmem>>, vector<8x128xf32>
    tpu.vector_store %arg6[%c1_427, %c0_428], %916 {strides = array<i32>} : memref<24x128xf32, #tpu.memory_space<vmem>>, vector<8x128xf32>,
    %c0_429 = arith.constant 0 : index
    %c0_430 = arith.constant 0 : index
    %1040 = tpu.strided_load %arg6[%c0_429, %c0_430] {strides = array<i32: 2, 1>} : memref<24x128xf32, #tpu.memory_space<vmem>>, vector<4x128xf32>
    %c137 = arith.constant 137 : index
    %c0_431 = arith.constant 0 : index
    %1041 = vector.load %arg4[%c137, %c0_431] : memref<181x128xf32, #tpu.memory_space<vmem>>, vector<1x128xf32>
    %1042 = vector.broadcast %1041 : vector<1x128xf32> to vector<4x128xf32>
    %1043 = arith.mulf %1040, %1042 : vector<4x128xf32>
    %c1_432 = arith.constant 1 : index
    %c0_433 = arith.constant 0 : index
    %1044 = tpu.strided_load %arg6[%c1_432, %c0_433] {strides = array<i32: 2, 1>} : memref<24x128xf32, #tpu.memory_space<vmem>>, vector<4x128xf32>
    %c138 = arith.constant 138 : index
    %c0_434 = arith.constant 0 : index
    %1045 = vector.load %arg4[%c138, %c0_434] : memref<181x128xf32, #tpu.memory_space<vmem>>, vector<1x128xf32>
    %1046 = vector.broadcast %1045 : vector<1x128xf32> to vector<4x128xf32>
    %1047 = arith.mulf %1044, %1046 : vector<4x128xf32>
    %1048 = arith.addf %1043, %1047 : vector<4x128xf32>
    %c2_435 = arith.constant 2 : index
    %c0_436 = arith.constant 0 : index
    %1049 = tpu.strided_load %arg6[%c2_435, %c0_436] {strides = array<i32: 2, 1>} : memref<24x128xf32, #tpu.memory_space<vmem>>, vector<4x128xf32>
    %c139 = arith.constant 139 : index
    %c0_437 = arith.constant 0 : index
    %1050 = vector.load %arg4[%c139, %c0_437] : memref<181x128xf32, #tpu.memory_space<vmem>>, vector<1x128xf32>
    %1051 = vector.broadcast %1050 : vector<1x128xf32> to vector<4x128xf32>
    %1052 = arith.mulf %1049, %1051 : vector<4x128xf32>
    %1053 = arith.addf %1048, %1052 : vector<4x128xf32>
    %c140 = arith.constant 140 : index
    %c0_438 = arith.constant 0 : index
    %1054 = vector.load %arg4[%c140, %c0_438] : memref<181x128xf32, #tpu.memory_space<vmem>>, vector<1x128xf32>
    %1055 = vector.broadcast %1054 : vector<1x128xf32> to vector<4x128xf32>
    %1056 = arith.addf %1053, %1055 : vector<4x128xf32>
    %1057 = vector.shape_cast %1056 : vector<4x128xf32> to vector<1x4x128xf32>
    %cst_439 = arith.constant dense<0.000000e+00> : vector<1xf32>
    %1058 = vector.multi_reduction <add>, %1057, %cst_439 [1, 2] : vector<1x4x128xf32> to vector<1xf32>
    %1059 = vector.shape_cast %1058 : vector<1xf32> to vector<1x1x1xf32>
    %1060 = vector.extract %1059[0, 0, 0] : f32 from vector<1x1x1xf32>
    %cst_440 = arith.constant 0.010416667 : f32
    %1061 = arith.mulf %1060, %cst_440 : f32
    %1062 = vector.broadcast %1061 : f32 to vector<4x128xf32>
    %1063 = arith.subf %1056, %1062 : vector<4x128xf32>
    %1064 = tpu.iota {dimensions = array<i32: 1>} : vector<1x128xi32>
    %c24_i32_441 = arith.constant 24 : i32
    %1065 = vector.broadcast %c24_i32_441 : i32 to vector<1x128xi32>
    %1066 = arith.cmpi slt, %1064, %1065 : vector<1x128xi32>
    %1067 = arith.extui %1066 : vector<1x128xi1> to vector<1x128xi32>
    %1068 = arith.sitofp %1067 : vector<1x128xi32> to vector<1x128xf32>
    %1069 = arith.mulf %1063, %1063 : vector<4x128xf32>
    %1070 = vector.broadcast %1068 : vector<1x128xf32> to vector<4x128xf32>
    %1071 = arith.mulf %1069, %1070 : vector<4x128xf32>
    %1072 = vector.shape_cast %1071 : vector<4x128xf32> to vector<1x4x128xf32>
    %cst_442 = arith.constant dense<0.000000e+00> : vector<1xf32>
    %1073 = vector.multi_reduction <add>, %1072, %cst_442 [1, 2] : vector<1x4x128xf32> to vector<1xf32>
    %1074 = vector.shape_cast %1073 : vector<1xf32> to vector<1x1x1xf32>
    %1075 = vector.extract %1074[0, 0, 0] : f32 from vector<1x1x1xf32>
    %cst_443 = arith.constant 0.010416667 : f32
    %1076 = arith.mulf %1075, %cst_443 : f32
    %cst_444 = arith.constant 9.99999993E-9 : f32
    %1077 = arith.addf %1076, %cst_444 : f32
    %1078 = math.rsqrt %1077 : f32
    %1079 = vector.broadcast %1078 : f32 to vector<4x128xf32>
    %1080 = arith.mulf %1063, %1079 : vector<4x128xf32>
    %c141 = arith.constant 141 : index
    %c0_445 = arith.constant 0 : index
    %1081 = vector.load %arg4[%c141, %c0_445] : memref<181x128xf32, #tpu.memory_space<vmem>>, vector<1x128xf32>
    %1082 = vector.broadcast %1081 : vector<1x128xf32> to vector<4x128xf32>
    %1083 = arith.mulf %1080, %1082 : vector<4x128xf32>
    %c142 = arith.constant 142 : index
    %c0_446 = arith.constant 0 : index
    %1084 = vector.load %arg4[%c142, %c0_446] : memref<181x128xf32, #tpu.memory_space<vmem>>, vector<1x128xf32>
    %1085 = vector.broadcast %1084 : vector<1x128xf32> to vector<4x128xf32>
    %1086 = arith.addf %1083, %1085 : vector<4x128xf32>
    %1087 = arith.truncf %1086 : vector<4x128xf32> to vector<4x128xbf16>
    %c28_447 = arith.constant 28 : index
    %c0_448 = arith.constant 0 : index
    %c0_449 = arith.constant 0 : index
    %1088 = vector.load %arg3[%c28_447, %c0_448, %c0_449] : memref<41x128x128xbf16, #tpu.memory_space<vmem>>, vector<1x128x128xbf16>
    %1089 = vector.shape_cast %1088 : vector<1x128x128xbf16> to vector<128x128xbf16>
    %cst_450 = arith.constant dense<0.000000e+00> : vector<4x128xf32>
    %1090 = tpu.matmul %1087, %1089, %cst_450 {dimension_numbers = #tpu.dot_dimension_numbers<[1], [0], [0], [1], [0, 0, 1, 1], [], []>} : vector<4x128xbf16>, vector<128x128xbf16>, vector<4x128xf32> -> vector<4x128xf32>
    %1091 = arith.truncf %968 : vector<4x128xf32> to vector<4x128xbf16>
    %c29_451 = arith.constant 29 : index
    %c0_452 = arith.constant 0 : index
    %c0_453 = arith.constant 0 : index
    %1092 = vector.load %arg3[%c29_451, %c0_452, %c0_453] : memref<41x128x128xbf16, #tpu.memory_space<vmem>>, vector<1x128x128xbf16>
    %1093 = vector.shape_cast %1092 : vector<1x128x128xbf16> to vector<128x128xbf16>
    %cst_454 = arith.constant dense<0.000000e+00> : vector<4x128xf32>
    %1094 = tpu.matmul %1091, %1093, %cst_454 {dimension_numbers = #tpu.dot_dimension_numbers<[1], [0], [0], [1], [0, 0, 1, 1], [], []>} : vector<4x128xbf16>, vector<128x128xbf16>, vector<4x128xf32> -> vector<4x128xf32>
    %1095 = arith.addf %1090, %1094 : vector<4x128xf32>
    %c147 = arith.constant 147 : index
    %c0_455 = arith.constant 0 : index
    %1096 = vector.load %arg4[%c147, %c0_455] : memref<181x128xf32, #tpu.memory_space<vmem>>, vector<1x128xf32>
    %1097 = vector.broadcast %1096 : vector<1x128xf32> to vector<4x128xf32>
    %1098 = arith.addf %1095, %1097 : vector<4x128xf32>
    %1099 = vector.shape_cast %1098 : vector<4x128xf32> to vector<1x4x128xf32>
    %cst_456 = arith.constant dense<0.000000e+00> : vector<1xf32>
    %1100 = vector.multi_reduction <add>, %1099, %cst_456 [1, 2] : vector<1x4x128xf32> to vector<1xf32>
    %1101 = vector.shape_cast %1100 : vector<1xf32> to vector<1x1x1xf32>
    %1102 = vector.extract %1101[0, 0, 0] : f32 from vector<1x1x1xf32>
    %cst_457 = arith.constant 0.010416667 : f32
    %1103 = arith.mulf %1102, %cst_457 : f32
    %1104 = vector.broadcast %1103 : f32 to vector<4x128xf32>
    %1105 = arith.subf %1098, %1104 : vector<4x128xf32>
    %1106 = tpu.iota {dimensions = array<i32: 1>} : vector<1x128xi32>
    %c24_i32_458 = arith.constant 24 : i32
    %1107 = vector.broadcast %c24_i32_458 : i32 to vector<1x128xi32>
    %1108 = arith.cmpi slt, %1106, %1107 : vector<1x128xi32>
    %1109 = arith.extui %1108 : vector<1x128xi1> to vector<1x128xi32>
    %1110 = arith.sitofp %1109 : vector<1x128xi32> to vector<1x128xf32>
    %1111 = arith.mulf %1105, %1105 : vector<4x128xf32>
    %1112 = vector.broadcast %1110 : vector<1x128xf32> to vector<4x128xf32>
    %1113 = arith.mulf %1111, %1112 : vector<4x128xf32>
    %1114 = vector.shape_cast %1113 : vector<4x128xf32> to vector<1x4x128xf32>
    %cst_459 = arith.constant dense<0.000000e+00> : vector<1xf32>
    %1115 = vector.multi_reduction <add>, %1114, %cst_459 [1, 2] : vector<1x4x128xf32> to vector<1xf32>
    %1116 = vector.shape_cast %1115 : vector<1xf32> to vector<1x1x1xf32>
    %1117 = vector.extract %1116[0, 0, 0] : f32 from vector<1x1x1xf32>
    %cst_460 = arith.constant 0.010416667 : f32
    %1118 = arith.mulf %1117, %cst_460 : f32
    %cst_461 = arith.constant 9.99999993E-9 : f32
    %1119 = arith.addf %1118, %cst_461 : f32
    %1120 = math.rsqrt %1119 : f32
    %1121 = vector.broadcast %1120 : f32 to vector<4x128xf32>
    %1122 = arith.mulf %1105, %1121 : vector<4x128xf32>
    %c148 = arith.constant 148 : index
    %c0_462 = arith.constant 0 : index
    %1123 = vector.load %arg4[%c148, %c0_462] : memref<181x128xf32, #tpu.memory_space<vmem>>, vector<1x128xf32>
    %1124 = vector.broadcast %1123 : vector<1x128xf32> to vector<4x128xf32>
    %1125 = arith.mulf %1122, %1124 : vector<4x128xf32>
    %c149 = arith.constant 149 : index
    %c0_463 = arith.constant 0 : index
    %1126 = vector.load %arg4[%c149, %c0_463] : memref<181x128xf32, #tpu.memory_space<vmem>>, vector<1x128xf32>
    %1127 = vector.broadcast %1126 : vector<1x128xf32> to vector<4x128xf32>
    %1128 = arith.addf %1125, %1127 : vector<4x128xf32>
    %cst_464 = arith.constant 0.000000e+00 : f32
    %1129 = vector.broadcast %cst_464 : f32 to vector<4x128xf32>
    %1130 = arith.cmpf oge, %1128, %1129 : vector<4x128xf32>
    %c150 = arith.constant 150 : index
    %c0_465 = arith.constant 0 : index
    %1131 = vector.load %arg4[%c150, %c0_465] : memref<181x128xf32, #tpu.memory_space<vmem>>, vector<1x128xf32>
    %1132 = vector.broadcast %1131 : vector<1x128xf32> to vector<4x128xf32>
    %1133 = arith.mulf %1128, %1132 : vector<4x128xf32>
    %1134 = arith.select %1130, %1128, %1133 : vector<4x128xi1>, vector<4x128xf32>
    %1135 = tpu.iota {dimensions = array<i32: 0>} : vector<8x4xi32>
    %1136 = tpu.iota {dimensions = array<i32: 1>} : vector<8x4xi32>
    %c8_i32_466 = arith.constant 8 : i32
    %1137 = vector.broadcast %c8_i32_466 : i32 to vector<8x4xi32>
    %1138 = arith.muli %1136, %1137 : vector<8x4xi32>
    %c4_i32_467 = arith.constant 4 : i32
    %1139 = vector.broadcast %c4_i32_467 : i32 to vector<8x4xi32>
    %1140 = arith.muli %1135, %1139 : vector<8x4xi32>
    %1141 = arith.cmpi sle, %1138, %1140 : vector<8x4xi32>
    %c4_i32_468 = arith.constant 4 : i32
    %1142 = vector.broadcast %c4_i32_468 : i32 to vector<8x4xi32>
    %1143 = arith.muli %1135, %1142 : vector<8x4xi32>
    %c1_i32_469 = arith.constant 1 : i32
    %1144 = vector.broadcast %c1_i32_469 : i32 to vector<8x4xi32>
    %1145 = arith.addi %1136, %1144 : vector<8x4xi32>
    %c8_i32_470 = arith.constant 8 : i32
    %1146 = vector.broadcast %c8_i32_470 : i32 to vector<8x4xi32>
    %1147 = arith.muli %1145, %1146 : vector<8x4xi32>
    %1148 = arith.cmpi slt, %1143, %1147 : vector<8x4xi32>
    %1149 = arith.andi %1141, %1148 : vector<8x4xi1>
    %1150 = arith.extui %1149 : vector<8x4xi1> to vector<8x4xi32>
    %1151 = arith.sitofp %1150 : vector<8x4xi32> to vector<8x4xf32>
    %cst_471 = arith.constant dense<0.000000e+00> : vector<8x128xf32>
    %1152 = tpu.matmul %1151, %1134, %cst_471 {dimension_numbers = #tpu.dot_dimension_numbers<[1], [0], [0], [1], [0, 0, 1, 1], [], []>} : vector<8x4xf32>, vector<4x128xf32>, vector<8x128xf32> -> vector<8x128xf32>
    %1153 = arith.truncf %1034 : vector<8x128xf32> to vector<8x128xbf16>
    %c30_472 = arith.constant 30 : index
    %c0_473 = arith.constant 0 : index
    %c0_474 = arith.constant 0 : index
    %1154 = vector.load %arg3[%c30_472, %c0_473, %c0_474] : memref<41x128x128xbf16, #tpu.memory_space<vmem>>, vector<1x128x128xbf16>
    %1155 = vector.shape_cast %1154 : vector<1x128x128xbf16> to vector<128x128xbf16>
    %cst_475 = arith.constant dense<0.000000e+00> : vector<8x128xf32>
    %1156 = tpu.matmul %1153, %1155, %cst_475 {dimension_numbers = #tpu.dot_dimension_numbers<[1], [0], [0], [1], [0, 0, 1, 1], [], []>} : vector<8x128xbf16>, vector<128x128xbf16>, vector<8x128xf32> -> vector<8x128xf32>
    %1157 = arith.truncf %1152 : vector<8x128xf32> to vector<8x128xbf16>
    %c31_476 = arith.constant 31 : index
    %c0_477 = arith.constant 0 : index
    %c0_478 = arith.constant 0 : index
    %1158 = vector.load %arg3[%c31_476, %c0_477, %c0_478] : memref<41x128x128xbf16, #tpu.memory_space<vmem>>, vector<1x128x128xbf16>
    %1159 = vector.shape_cast %1158 : vector<1x128x128xbf16> to vector<128x128xbf16>
    %cst_479 = arith.constant dense<0.000000e+00> : vector<8x128xf32>
    %1160 = tpu.matmul %1157, %1159, %cst_479 {dimension_numbers = #tpu.dot_dimension_numbers<[1], [0], [0], [1], [0, 0, 1, 1], [], []>} : vector<8x128xbf16>, vector<128x128xbf16>, vector<8x128xf32> -> vector<8x128xf32>
    %1161 = arith.addf %1156, %1160 : vector<8x128xf32>
    %c151 = arith.constant 151 : index
    %c0_480 = arith.constant 0 : index
    %1162 = vector.load %arg4[%c151, %c0_480] : memref<181x128xf32, #tpu.memory_space<vmem>>, vector<1x128xf32>
    %1163 = vector.broadcast %1162 : vector<1x128xf32> to vector<8x128xf32>
    %1164 = arith.addf %1161, %1163 : vector<8x128xf32>
    %1165 = vector.shape_cast %1164 : vector<8x128xf32> to vector<1x8x128xf32>
    %cst_481 = arith.constant dense<0.000000e+00> : vector<1xf32>
    %1166 = vector.multi_reduction <add>, %1165, %cst_481 [1, 2] : vector<1x8x128xf32> to vector<1xf32>
    %1167 = vector.shape_cast %1166 : vector<1xf32> to vector<1x1x1xf32>
    %1168 = vector.extract %1167[0, 0, 0] : f32 from vector<1x1x1xf32>
    %cst_482 = arith.constant 0.00520833349 : f32
    %1169 = arith.mulf %1168, %cst_482 : f32
    %1170 = vector.broadcast %1169 : f32 to vector<8x128xf32>
    %1171 = arith.subf %1164, %1170 : vector<8x128xf32>
    %1172 = tpu.iota {dimensions = array<i32: 1>} : vector<1x128xi32>
    %c24_i32_483 = arith.constant 24 : i32
    %1173 = vector.broadcast %c24_i32_483 : i32 to vector<1x128xi32>
    %1174 = arith.cmpi slt, %1172, %1173 : vector<1x128xi32>
    %1175 = arith.extui %1174 : vector<1x128xi1> to vector<1x128xi32>
    %1176 = arith.sitofp %1175 : vector<1x128xi32> to vector<1x128xf32>
    %1177 = arith.mulf %1171, %1171 : vector<8x128xf32>
    %1178 = vector.broadcast %1176 : vector<1x128xf32> to vector<8x128xf32>
    %1179 = arith.mulf %1177, %1178 : vector<8x128xf32>
    %1180 = vector.shape_cast %1179 : vector<8x128xf32> to vector<1x8x128xf32>
    %cst_484 = arith.constant dense<0.000000e+00> : vector<1xf32>
    %1181 = vector.multi_reduction <add>, %1180, %cst_484 [1, 2] : vector<1x8x128xf32> to vector<1xf32>
    %1182 = vector.shape_cast %1181 : vector<1xf32> to vector<1x1x1xf32>
    %1183 = vector.extract %1182[0, 0, 0] : f32 from vector<1x1x1xf32>
    %cst_485 = arith.constant 0.00520833349 : f32
    %1184 = arith.mulf %1183, %cst_485 : f32
    %cst_486 = arith.constant 9.99999993E-9 : f32
    %1185 = arith.addf %1184, %cst_486 : f32
    %1186 = math.rsqrt %1185 : f32
    %1187 = vector.broadcast %1186 : f32 to vector<8x128xf32>
    %1188 = arith.mulf %1171, %1187 : vector<8x128xf32>
    %c152 = arith.constant 152 : index
    %c0_487 = arith.constant 0 : index
    %1189 = vector.load %arg4[%c152, %c0_487] : memref<181x128xf32, #tpu.memory_space<vmem>>, vector<1x128xf32>
    %1190 = vector.broadcast %1189 : vector<1x128xf32> to vector<8x128xf32>
    %1191 = arith.mulf %1188, %1190 : vector<8x128xf32>
    %c153 = arith.constant 153 : index
    %c0_488 = arith.constant 0 : index
    %1192 = vector.load %arg4[%c153, %c0_488] : memref<181x128xf32, #tpu.memory_space<vmem>>, vector<1x128xf32>
    %1193 = vector.broadcast %1192 : vector<1x128xf32> to vector<8x128xf32>
    %1194 = arith.addf %1191, %1193 : vector<8x128xf32>
    %cst_489 = arith.constant 0.000000e+00 : f32
    %1195 = vector.broadcast %cst_489 : f32 to vector<8x128xf32>
    %1196 = arith.cmpf oge, %1194, %1195 : vector<8x128xf32>
    %c154 = arith.constant 154 : index
    %c0_490 = arith.constant 0 : index
    %1197 = vector.load %arg4[%c154, %c0_490] : memref<181x128xf32, #tpu.memory_space<vmem>>, vector<1x128xf32>
    %1198 = vector.broadcast %1197 : vector<1x128xf32> to vector<8x128xf32>
    %1199 = arith.mulf %1194, %1198 : vector<8x128xf32>
    %1200 = arith.select %1196, %1194, %1199 : vector<8x128xi1>, vector<8x128xf32>
    %1201 = arith.truncf %1200 : vector<8x128xf32> to vector<8x128xbf16>
    %c32_491 = arith.constant 32 : index
    %c0_492 = arith.constant 0 : index
    %c0_493 = arith.constant 0 : index
    %1202 = vector.load %arg3[%c32_491, %c0_492, %c0_493] : memref<41x128x128xbf16, #tpu.memory_space<vmem>>, vector<1x128x128xbf16>
    %1203 = vector.shape_cast %1202 : vector<1x128x128xbf16> to vector<128x128xbf16>
    %cst_494 = arith.constant dense<0.000000e+00> : vector<8x128xf32>
    %1204 = tpu.matmul %1201, %1203, %cst_494 {dimension_numbers = #tpu.dot_dimension_numbers<[1], [0], [0], [1], [0, 0, 1, 1], [], []>} : vector<8x128xbf16>, vector<128x128xbf16>, vector<8x128xf32> -> vector<8x128xf32>
    %c155 = arith.constant 155 : index
    %c0_495 = arith.constant 0 : index
    %1205 = vector.load %arg4[%c155, %c0_495] : memref<181x128xf32, #tpu.memory_space<vmem>>, vector<1x128xf32>
    %1206 = vector.broadcast %1205 : vector<1x128xf32> to vector<8x128xf32>
    %1207 = arith.addf %1204, %1206 : vector<8x128xf32>
    %1208 = tpu.iota {dimensions = array<i32: 0>} : vector<16x8xi32>
    %1209 = tpu.iota {dimensions = array<i32: 1>} : vector<16x8xi32>
    %c16_i32_496 = arith.constant 16 : i32
    %1210 = vector.broadcast %c16_i32_496 : i32 to vector<16x8xi32>
    %1211 = arith.muli %1209, %1210 : vector<16x8xi32>
    %c8_i32_497 = arith.constant 8 : i32
    %1212 = vector.broadcast %c8_i32_497 : i32 to vector<16x8xi32>
    %1213 = arith.muli %1208, %1212 : vector<16x8xi32>
    %1214 = arith.cmpi sle, %1211, %1213 : vector<16x8xi32>
    %c8_i32_498 = arith.constant 8 : i32
    %1215 = vector.broadcast %c8_i32_498 : i32 to vector<16x8xi32>
    %1216 = arith.muli %1208, %1215 : vector<16x8xi32>
    %c1_i32_499 = arith.constant 1 : i32
    %1217 = vector.broadcast %c1_i32_499 : i32 to vector<16x8xi32>
    %1218 = arith.addi %1209, %1217 : vector<16x8xi32>
    %c16_i32_500 = arith.constant 16 : i32
    %1219 = vector.broadcast %c16_i32_500 : i32 to vector<16x8xi32>
    %1220 = arith.muli %1218, %1219 : vector<16x8xi32>
    %1221 = arith.cmpi slt, %1216, %1220 : vector<16x8xi32>
    %1222 = arith.andi %1214, %1221 : vector<16x8xi1>
    %1223 = arith.extui %1222 : vector<16x8xi1> to vector<16x8xi32>
    %1224 = arith.sitofp %1223 : vector<16x8xi32> to vector<16x8xf32>
    %cst_501 = arith.constant dense<0.000000e+00> : vector<16x128xf32>
    %1225 = tpu.matmul %1224, %1207, %cst_501 {dimension_numbers = #tpu.dot_dimension_numbers<[1], [0], [0], [1], [0, 0, 1, 1], [], []>} : vector<16x8xf32>, vector<8x128xf32>, vector<16x128xf32> -> vector<16x128xf32>
    %1226 = arith.truncf %811 : vector<16x128xf32> to vector<16x128xbf16>
    %c37 = arith.constant 37 : index
    %c0_502 = arith.constant 0 : index
    %c0_503 = arith.constant 0 : index
    %1227 = vector.load %arg3[%c37, %c0_502, %c0_503] : memref<41x128x128xbf16, #tpu.memory_space<vmem>>, vector<1x128x128xbf16>
    %1228 = vector.shape_cast %1227 : vector<1x128x128xbf16> to vector<128x128xbf16>
    %cst_504 = arith.constant dense<0.000000e+00> : vector<16x128xf32>
    %1229 = tpu.matmul %1226, %1228, %cst_504 {dimension_numbers = #tpu.dot_dimension_numbers<[1], [0], [0], [1], [0, 0, 1, 1], [], []>} : vector<16x128xbf16>, vector<128x128xbf16>, vector<16x128xf32> -> vector<16x128xf32>
    %1230 = arith.truncf %1225 : vector<16x128xf32> to vector<16x128xbf16>
    %c38 = arith.constant 38 : index
    %c0_505 = arith.constant 0 : index
    %c0_506 = arith.constant 0 : index
    %1231 = vector.load %arg3[%c38, %c0_505, %c0_506] : memref<41x128x128xbf16, #tpu.memory_space<vmem>>, vector<1x128x128xbf16>
    %1232 = vector.shape_cast %1231 : vector<1x128x128xbf16> to vector<128x128xbf16>
    %cst_507 = arith.constant dense<0.000000e+00> : vector<16x128xf32>
    %1233 = tpu.matmul %1230, %1232, %cst_507 {dimension_numbers = #tpu.dot_dimension_numbers<[1], [0], [0], [1], [0, 0, 1, 1], [], []>} : vector<16x128xbf16>, vector<128x128xbf16>, vector<16x128xf32> -> vector<16x128xf32>
    %1234 = arith.addf %1229, %1233 : vector<16x128xf32>
    %c173 = arith.constant 173 : index
    %c0_508 = arith.constant 0 : index
    %1235 = vector.load %arg4[%c173, %c0_508] : memref<181x128xf32, #tpu.memory_space<vmem>>, vector<1x128xf32>
    %1236 = vector.broadcast %1235 : vector<1x128xf32> to vector<16x128xf32>
    %1237 = arith.addf %1234, %1236 : vector<16x128xf32>
    %1238 = vector.shape_cast %1237 : vector<16x128xf32> to vector<1x16x128xf32>
    %cst_509 = arith.constant dense<0.000000e+00> : vector<1xf32>
    %1239 = vector.multi_reduction <add>, %1238, %cst_509 [1, 2] : vector<1x16x128xf32> to vector<1xf32>
    %1240 = vector.shape_cast %1239 : vector<1xf32> to vector<1x1x1xf32>
    %1241 = vector.extract %1240[0, 0, 0] : f32 from vector<1x1x1xf32>
    %cst_510 = arith.constant 3.906250e-03 : f32
    %1242 = arith.mulf %1241, %cst_510 : f32
    %1243 = vector.broadcast %1242 : f32 to vector<16x128xf32>
    %1244 = arith.subf %1237, %1243 : vector<16x128xf32>
    %1245 = tpu.iota {dimensions = array<i32: 1>} : vector<1x128xi32>
    %c16_i32_511 = arith.constant 16 : i32
    %1246 = vector.broadcast %c16_i32_511 : i32 to vector<1x128xi32>
    %1247 = arith.cmpi slt, %1245, %1246 : vector<1x128xi32>
    %1248 = arith.extui %1247 : vector<1x128xi1> to vector<1x128xi32>
    %1249 = arith.sitofp %1248 : vector<1x128xi32> to vector<1x128xf32>
    %1250 = arith.mulf %1244, %1244 : vector<16x128xf32>
    %1251 = vector.broadcast %1249 : vector<1x128xf32> to vector<16x128xf32>
    %1252 = arith.mulf %1250, %1251 : vector<16x128xf32>
    %1253 = vector.shape_cast %1252 : vector<16x128xf32> to vector<1x16x128xf32>
    %cst_512 = arith.constant dense<0.000000e+00> : vector<1xf32>
    %1254 = vector.multi_reduction <add>, %1253, %cst_512 [1, 2] : vector<1x16x128xf32> to vector<1xf32>
    %1255 = vector.shape_cast %1254 : vector<1xf32> to vector<1x1x1xf32>
    %1256 = vector.extract %1255[0, 0, 0] : f32 from vector<1x1x1xf32>
    %cst_513 = arith.constant 3.906250e-03 : f32
    %1257 = arith.mulf %1256, %cst_513 : f32
    %cst_514 = arith.constant 9.99999993E-9 : f32
    %1258 = arith.addf %1257, %cst_514 : f32
    %1259 = math.rsqrt %1258 : f32
    %1260 = vector.broadcast %1259 : f32 to vector<16x128xf32>
    %1261 = arith.mulf %1244, %1260 : vector<16x128xf32>
    %c174 = arith.constant 174 : index
    %c0_515 = arith.constant 0 : index
    %1262 = vector.load %arg4[%c174, %c0_515] : memref<181x128xf32, #tpu.memory_space<vmem>>, vector<1x128xf32>
    %1263 = vector.broadcast %1262 : vector<1x128xf32> to vector<16x128xf32>
    %1264 = arith.mulf %1261, %1263 : vector<16x128xf32>
    %c175 = arith.constant 175 : index
    %c0_516 = arith.constant 0 : index
    %1265 = vector.load %arg4[%c175, %c0_516] : memref<181x128xf32, #tpu.memory_space<vmem>>, vector<1x128xf32>
    %1266 = vector.broadcast %1265 : vector<1x128xf32> to vector<16x128xf32>
    %1267 = arith.addf %1264, %1266 : vector<16x128xf32>
    %cst_517 = arith.constant 0.000000e+00 : f32
    %1268 = vector.broadcast %cst_517 : f32 to vector<16x128xf32>
    %1269 = arith.cmpf oge, %1267, %1268 : vector<16x128xf32>
    %c176 = arith.constant 176 : index
    %c0_518 = arith.constant 0 : index
    %1270 = vector.load %arg4[%c176, %c0_518] : memref<181x128xf32, #tpu.memory_space<vmem>>, vector<1x128xf32>
    %1271 = vector.broadcast %1270 : vector<1x128xf32> to vector<16x128xf32>
    %1272 = arith.mulf %1267, %1271 : vector<16x128xf32>
    %1273 = arith.select %1269, %1267, %1272 : vector<16x128xi1>, vector<16x128xf32>
    %1274 = arith.addf %16, %1273 : vector<16x128xf32>
    %c156_519 = arith.constant 156 : index
    %c0_520 = arith.constant 0 : index
    %1275 = vector.load %arg4[%c156_519, %c0_520] : memref<181x128xf32, #tpu.memory_space<vmem>>, vector<1x128xf32>
    %1276 = vector.broadcast %1275 : vector<1x128xf32> to vector<16x128xf32>
    %1277 = arith.mulf %1274, %1276 : vector<16x128xf32>
    %c157_521 = arith.constant 157 : index
    %c0_522 = arith.constant 0 : index
    %1278 = vector.load %arg4[%c157_521, %c0_522] : memref<181x128xf32, #tpu.memory_space<vmem>>, vector<1x128xf32>
    %1279 = vector.broadcast %1278 : vector<1x128xf32> to vector<16x128xf32>
    %1280 = arith.addf %1277, %1279 : vector<16x128xf32>
    %cst_523 = arith.constant 0.000000e+00 : f32
    %1281 = vector.broadcast %cst_523 : f32 to vector<16x128xf32>
    %1282 = arith.cmpf oge, %1280, %1281 : vector<16x128xf32>
    %c158_524 = arith.constant 158 : index
    %c0_525 = arith.constant 0 : index
    %1283 = vector.load %arg4[%c158_524, %c0_525] : memref<181x128xf32, #tpu.memory_space<vmem>>, vector<1x128xf32>
    %1284 = vector.broadcast %1283 : vector<1x128xf32> to vector<16x128xf32>
    %1285 = arith.mulf %1280, %1284 : vector<16x128xf32>
    %1286 = arith.select %1282, %1280, %1285 : vector<16x128xi1>, vector<16x128xf32>
    %1287 = arith.truncf %1286 : vector<16x128xf32> to vector<16x128xbf16>
    %c5_526 = arith.constant 5 : index
    %c0_527 = arith.constant 0 : index
    %c0_528 = arith.constant 0 : index
    %1288 = vector.load %arg3[%c5_526, %c0_527, %c0_528] : memref<41x128x128xbf16, #tpu.memory_space<vmem>>, vector<1x128x128xbf16>
    %1289 = vector.shape_cast %1288 : vector<1x128x128xbf16> to vector<128x128xbf16>
    %cst_529 = arith.constant dense<0.000000e+00> : vector<16x128xf32>
    %1290 = tpu.matmul %1287, %1289, %cst_529 {dimension_numbers = #tpu.dot_dimension_numbers<[1], [0], [0], [1], [0, 0, 1, 1], [], []>} : vector<16x128xbf16>, vector<128x128xbf16>, vector<16x128xf32> -> vector<16x128xf32>
    %c5_530 = arith.constant 5 : index
    %c0_531 = arith.constant 0 : index
    %1291 = vector.load %arg4[%c5_530, %c0_531] : memref<181x128xf32, #tpu.memory_space<vmem>>, vector<1x128xf32>
    %1292 = vector.broadcast %1291 : vector<1x128xf32> to vector<16x128xf32>
    %1293 = arith.addf %1290, %1292 : vector<16x128xf32>
    %1294 = vector.shape_cast %1293 : vector<16x128xf32> to vector<1x16x128xf32>
    %cst_532 = arith.constant dense<0.000000e+00> : vector<1xf32>
    %1295 = vector.multi_reduction <add>, %1294, %cst_532 [1, 2] : vector<1x16x128xf32> to vector<1xf32>
    %1296 = vector.shape_cast %1295 : vector<1xf32> to vector<1x1x1xf32>
    %1297 = vector.extract %1296[0, 0, 0] : f32 from vector<1x1x1xf32>
    %cst_533 = arith.constant 0.00260416674 : f32
    %1298 = arith.mulf %1297, %cst_533 : f32
    %1299 = vector.broadcast %1298 : f32 to vector<16x128xf32>
    %1300 = arith.subf %1293, %1299 : vector<16x128xf32>
    %1301 = tpu.iota {dimensions = array<i32: 1>} : vector<1x128xi32>
    %c24_i32_534 = arith.constant 24 : i32
    %1302 = vector.broadcast %c24_i32_534 : i32 to vector<1x128xi32>
    %1303 = arith.cmpi slt, %1301, %1302 : vector<1x128xi32>
    %1304 = arith.extui %1303 : vector<1x128xi1> to vector<1x128xi32>
    %1305 = arith.sitofp %1304 : vector<1x128xi32> to vector<1x128xf32>
    %1306 = arith.mulf %1300, %1300 : vector<16x128xf32>
    %1307 = vector.broadcast %1305 : vector<1x128xf32> to vector<16x128xf32>
    %1308 = arith.mulf %1306, %1307 : vector<16x128xf32>
    %1309 = vector.shape_cast %1308 : vector<16x128xf32> to vector<1x16x128xf32>
    %cst_535 = arith.constant dense<0.000000e+00> : vector<1xf32>
    %1310 = vector.multi_reduction <add>, %1309, %cst_535 [1, 2] : vector<1x16x128xf32> to vector<1xf32>
    %1311 = vector.shape_cast %1310 : vector<1xf32> to vector<1x1x1xf32>
    %1312 = vector.extract %1311[0, 0, 0] : f32 from vector<1x1x1xf32>
    %cst_536 = arith.constant 0.00260416674 : f32
    %1313 = arith.mulf %1312, %cst_536 : f32
    %cst_537 = arith.constant 9.99999993E-9 : f32
    %1314 = arith.addf %1313, %cst_537 : f32
    %1315 = math.rsqrt %1314 : f32
    %1316 = vector.broadcast %1315 : f32 to vector<16x128xf32>
    %1317 = arith.mulf %1300, %1316 : vector<16x128xf32>
    %c6_538 = arith.constant 6 : index
    %c0_539 = arith.constant 0 : index
    %1318 = vector.load %arg4[%c6_538, %c0_539] : memref<181x128xf32, #tpu.memory_space<vmem>>, vector<1x128xf32>
    %1319 = vector.broadcast %1318 : vector<1x128xf32> to vector<16x128xf32>
    %1320 = arith.mulf %1317, %1319 : vector<16x128xf32>
    %c7_540 = arith.constant 7 : index
    %c0_541 = arith.constant 0 : index
    %1321 = vector.load %arg4[%c7_540, %c0_541] : memref<181x128xf32, #tpu.memory_space<vmem>>, vector<1x128xf32>
    %1322 = vector.broadcast %1321 : vector<1x128xf32> to vector<16x128xf32>
    %1323 = arith.addf %1320, %1322 : vector<16x128xf32>
    %cst_542 = arith.constant 0.000000e+00 : f32
    %1324 = vector.broadcast %cst_542 : f32 to vector<16x128xf32>
    %1325 = arith.cmpf oge, %1323, %1324 : vector<16x128xf32>
    %c8_543 = arith.constant 8 : index
    %c0_544 = arith.constant 0 : index
    %1326 = vector.load %arg4[%c8_543, %c0_544] : memref<181x128xf32, #tpu.memory_space<vmem>>, vector<1x128xf32>
    %1327 = vector.broadcast %1326 : vector<1x128xf32> to vector<16x128xf32>
    %1328 = arith.mulf %1323, %1327 : vector<16x128xf32>
    %1329 = arith.select %1325, %1323, %1328 : vector<16x128xi1>, vector<16x128xf32>
    %cst_545 = arith.constant 0.000000e+00 : f32
    %1330 = vector.broadcast %cst_545 : f32 to vector<2x128xf32>
    %1331 = tpu.concatenate %1330, %1329, %1330 in 0 : vector<2x128xf32>, vector<16x128xf32>, vector<2x128xf32> -> vector<20x128xf32>
    %1332 = vector.extract_strided_slice %1331 {offsets = [0, 0], sizes = [16, 128], strides = [1, 1]} : vector<20x128xf32> to vector<16x128xf32>
    %c9_546 = arith.constant 9 : index
    %c0_547 = arith.constant 0 : index
    %1333 = vector.load %arg4[%c9_546, %c0_547] : memref<181x128xf32, #tpu.memory_space<vmem>>, vector<1x128xf32>
    %1334 = vector.broadcast %1333 : vector<1x128xf32> to vector<16x128xf32>
    %1335 = arith.mulf %1332, %1334 : vector<16x128xf32>
    %1336 = vector.extract_strided_slice %1331 {offsets = [1, 0], sizes = [16, 128], strides = [1, 1]} : vector<20x128xf32> to vector<16x128xf32>
    %c10_548 = arith.constant 10 : index
    %c0_549 = arith.constant 0 : index
    %1337 = vector.load %arg4[%c10_548, %c0_549] : memref<181x128xf32, #tpu.memory_space<vmem>>, vector<1x128xf32>
    %1338 = vector.broadcast %1337 : vector<1x128xf32> to vector<16x128xf32>
    %1339 = arith.mulf %1336, %1338 : vector<16x128xf32>
    %1340 = arith.addf %1335, %1339 : vector<16x128xf32>
    %1341 = vector.extract_strided_slice %1331 {offsets = [2, 0], sizes = [16, 128], strides = [1, 1]} : vector<20x128xf32> to vector<16x128xf32>
    %c11_550 = arith.constant 11 : index
    %c0_551 = arith.constant 0 : index
    %1342 = vector.load %arg4[%c11_550, %c0_551] : memref<181x128xf32, #tpu.memory_space<vmem>>, vector<1x128xf32>
    %1343 = vector.broadcast %1342 : vector<1x128xf32> to vector<16x128xf32>
    %1344 = arith.mulf %1341, %1343 : vector<16x128xf32>
    %1345 = arith.addf %1340, %1344 : vector<16x128xf32>
    %1346 = vector.extract_strided_slice %1331 {offsets = [3, 0], sizes = [16, 128], strides = [1, 1]} : vector<20x128xf32> to vector<16x128xf32>
    %c12_552 = arith.constant 12 : index
    %c0_553 = arith.constant 0 : index
    %1347 = vector.load %arg4[%c12_552, %c0_553] : memref<181x128xf32, #tpu.memory_space<vmem>>, vector<1x128xf32>
    %1348 = vector.broadcast %1347 : vector<1x128xf32> to vector<16x128xf32>
    %1349 = arith.mulf %1346, %1348 : vector<16x128xf32>
    %1350 = arith.addf %1345, %1349 : vector<16x128xf32>
    %1351 = vector.extract_strided_slice %1331 {offsets = [4, 0], sizes = [16, 128], strides = [1, 1]} : vector<20x128xf32> to vector<16x128xf32>
    %c13_554 = arith.constant 13 : index
    %c0_555 = arith.constant 0 : index
    %1352 = vector.load %arg4[%c13_554, %c0_555] : memref<181x128xf32, #tpu.memory_space<vmem>>, vector<1x128xf32>
    %1353 = vector.broadcast %1352 : vector<1x128xf32> to vector<16x128xf32>
    %1354 = arith.mulf %1351, %1353 : vector<16x128xf32>
    %1355 = arith.addf %1350, %1354 : vector<16x128xf32>
    %c14_556 = arith.constant 14 : index
    %c0_557 = arith.constant 0 : index
    %1356 = vector.load %arg4[%c14_556, %c0_557] : memref<181x128xf32, #tpu.memory_space<vmem>>, vector<1x128xf32>
    %1357 = vector.broadcast %1356 : vector<1x128xf32> to vector<16x128xf32>
    %1358 = arith.addf %1355, %1357 : vector<16x128xf32>
    %1359 = vector.shape_cast %1358 : vector<16x128xf32> to vector<1x16x128xf32>
    %cst_558 = arith.constant dense<0.000000e+00> : vector<1xf32>
    %1360 = vector.multi_reduction <add>, %1359, %cst_558 [1, 2] : vector<1x16x128xf32> to vector<1xf32>
    %1361 = vector.shape_cast %1360 : vector<1xf32> to vector<1x1x1xf32>
    %1362 = vector.extract %1361[0, 0, 0] : f32 from vector<1x1x1xf32>
    %cst_559 = arith.constant 0.00260416674 : f32
    %1363 = arith.mulf %1362, %cst_559 : f32
    %1364 = vector.broadcast %1363 : f32 to vector<16x128xf32>
    %1365 = arith.subf %1358, %1364 : vector<16x128xf32>
    %1366 = tpu.iota {dimensions = array<i32: 1>} : vector<1x128xi32>
    %c24_i32_560 = arith.constant 24 : i32
    %1367 = vector.broadcast %c24_i32_560 : i32 to vector<1x128xi32>
    %1368 = arith.cmpi slt, %1366, %1367 : vector<1x128xi32>
    %1369 = arith.extui %1368 : vector<1x128xi1> to vector<1x128xi32>
    %1370 = arith.sitofp %1369 : vector<1x128xi32> to vector<1x128xf32>
    %1371 = arith.mulf %1365, %1365 : vector<16x128xf32>
    %1372 = vector.broadcast %1370 : vector<1x128xf32> to vector<16x128xf32>
    %1373 = arith.mulf %1371, %1372 : vector<16x128xf32>
    %1374 = vector.shape_cast %1373 : vector<16x128xf32> to vector<1x16x128xf32>
    %cst_561 = arith.constant dense<0.000000e+00> : vector<1xf32>
    %1375 = vector.multi_reduction <add>, %1374, %cst_561 [1, 2] : vector<1x16x128xf32> to vector<1xf32>
    %1376 = vector.shape_cast %1375 : vector<1xf32> to vector<1x1x1xf32>
    %1377 = vector.extract %1376[0, 0, 0] : f32 from vector<1x1x1xf32>
    %cst_562 = arith.constant 0.00260416674 : f32
    %1378 = arith.mulf %1377, %cst_562 : f32
    %cst_563 = arith.constant 9.99999993E-9 : f32
    %1379 = arith.addf %1378, %cst_563 : f32
    %1380 = math.rsqrt %1379 : f32
    %1381 = vector.broadcast %1380 : f32 to vector<16x128xf32>
    %1382 = arith.mulf %1365, %1381 : vector<16x128xf32>
    %c15_564 = arith.constant 15 : index
    %c0_565 = arith.constant 0 : index
    %1383 = vector.load %arg4[%c15_564, %c0_565] : memref<181x128xf32, #tpu.memory_space<vmem>>, vector<1x128xf32>
    %1384 = vector.broadcast %1383 : vector<1x128xf32> to vector<16x128xf32>
    %1385 = arith.mulf %1382, %1384 : vector<16x128xf32>
    %c16_566 = arith.constant 16 : index
    %c0_567 = arith.constant 0 : index
    %1386 = vector.load %arg4[%c16_566, %c0_567] : memref<181x128xf32, #tpu.memory_space<vmem>>, vector<1x128xf32>
    %1387 = vector.broadcast %1386 : vector<1x128xf32> to vector<16x128xf32>
    %1388 = arith.addf %1385, %1387 : vector<16x128xf32>
    %cst_568 = arith.constant 0.000000e+00 : f32
    %1389 = vector.broadcast %cst_568 : f32 to vector<2x128xf32>
    %c0_569 = arith.constant 0 : index
    %c0_570 = arith.constant 0 : index
    %1390 = vector.load %arg6[%c0_569, %c0_570] : memref<24x128xf32, #tpu.memory_space<vmem>>, vector<2x128xf32>
    tpu.vector_store %arg6[%c0_569, %c0_570], %1389 {strides = array<i32>} : memref<24x128xf32, #tpu.memory_space<vmem>>, vector<2x128xf32>,
    %cst_571 = arith.constant 0.000000e+00 : f32
    %1391 = vector.broadcast %cst_571 : f32 to vector<2x128xf32>
    %c18_572 = arith.constant 18 : index
    %c0_573 = arith.constant 0 : index
    %1392 = vector.load %arg6[%c18_572, %c0_573] : memref<24x128xf32, #tpu.memory_space<vmem>>, vector<2x128xf32>
    tpu.vector_store %arg6[%c18_572, %c0_573], %1391 {strides = array<i32>} : memref<24x128xf32, #tpu.memory_space<vmem>>, vector<2x128xf32>,
    %c2_574 = arith.constant 2 : index
    %c0_575 = arith.constant 0 : index
    %1393 = vector.load %arg6[%c2_574, %c0_575] : memref<24x128xf32, #tpu.memory_space<vmem>>, vector<16x128xf32>
    tpu.vector_store %arg6[%c2_574, %c0_575], %1388 {strides = array<i32>} : memref<24x128xf32, #tpu.memory_space<vmem>>, vector<16x128xf32>,
    %c0_576 = arith.constant 0 : index
    %c0_577 = arith.constant 0 : index
    %1394 = tpu.strided_load %arg6[%c0_576, %c0_577] {strides = array<i32: 2, 1>} : memref<24x128xf32, #tpu.memory_space<vmem>>, vector<8x128xf32>
    %c17_578 = arith.constant 17 : index
    %c0_579 = arith.constant 0 : index
    %1395 = vector.load %arg4[%c17_578, %c0_579] : memref<181x128xf32, #tpu.memory_space<vmem>>, vector<1x128xf32>
    %1396 = vector.broadcast %1395 : vector<1x128xf32> to vector<8x128xf32>
    %1397 = arith.mulf %1394, %1396 : vector<8x128xf32>
    %c1_580 = arith.constant 1 : index
    %c0_581 = arith.constant 0 : index
    %1398 = tpu.strided_load %arg6[%c1_580, %c0_581] {strides = array<i32: 2, 1>} : memref<24x128xf32, #tpu.memory_space<vmem>>, vector<8x128xf32>
    %c18_582 = arith.constant 18 : index
    %c0_583 = arith.constant 0 : index
    %1399 = vector.load %arg4[%c18_582, %c0_583] : memref<181x128xf32, #tpu.memory_space<vmem>>, vector<1x128xf32>
    %1400 = vector.broadcast %1399 : vector<1x128xf32> to vector<8x128xf32>
    %1401 = arith.mulf %1398, %1400 : vector<8x128xf32>
    %1402 = arith.addf %1397, %1401 : vector<8x128xf32>
    %c2_584 = arith.constant 2 : index
    %c0_585 = arith.constant 0 : index
    %1403 = tpu.strided_load %arg6[%c2_584, %c0_585] {strides = array<i32: 2, 1>} : memref<24x128xf32, #tpu.memory_space<vmem>>, vector<8x128xf32>
    %c19_586 = arith.constant 19 : index
    %c0_587 = arith.constant 0 : index
    %1404 = vector.load %arg4[%c19_586, %c0_587] : memref<181x128xf32, #tpu.memory_space<vmem>>, vector<1x128xf32>
    %1405 = vector.broadcast %1404 : vector<1x128xf32> to vector<8x128xf32>
    %1406 = arith.mulf %1403, %1405 : vector<8x128xf32>
    %1407 = arith.addf %1402, %1406 : vector<8x128xf32>
    %c3_588 = arith.constant 3 : index
    %c0_589 = arith.constant 0 : index
    %1408 = tpu.strided_load %arg6[%c3_588, %c0_589] {strides = array<i32: 2, 1>} : memref<24x128xf32, #tpu.memory_space<vmem>>, vector<8x128xf32>
    %c20_590 = arith.constant 20 : index
    %c0_591 = arith.constant 0 : index
    %1409 = vector.load %arg4[%c20_590, %c0_591] : memref<181x128xf32, #tpu.memory_space<vmem>>, vector<1x128xf32>
    %1410 = vector.broadcast %1409 : vector<1x128xf32> to vector<8x128xf32>
    %1411 = arith.mulf %1408, %1410 : vector<8x128xf32>
    %1412 = arith.addf %1407, %1411 : vector<8x128xf32>
    %c4_592 = arith.constant 4 : index
    %c0_593 = arith.constant 0 : index
    %1413 = tpu.strided_load %arg6[%c4_592, %c0_593] {strides = array<i32: 2, 1>} : memref<24x128xf32, #tpu.memory_space<vmem>>, vector<8x128xf32>
    %c21_594 = arith.constant 21 : index
    %c0_595 = arith.constant 0 : index
    %1414 = vector.load %arg4[%c21_594, %c0_595] : memref<181x128xf32, #tpu.memory_space<vmem>>, vector<1x128xf32>
    %1415 = vector.broadcast %1414 : vector<1x128xf32> to vector<8x128xf32>
    %1416 = arith.mulf %1413, %1415 : vector<8x128xf32>
    %1417 = arith.addf %1412, %1416 : vector<8x128xf32>
    %c22_596 = arith.constant 22 : index
    %c0_597 = arith.constant 0 : index
    %1418 = vector.load %arg4[%c22_596, %c0_597] : memref<181x128xf32, #tpu.memory_space<vmem>>, vector<1x128xf32>
    %1419 = vector.broadcast %1418 : vector<1x128xf32> to vector<8x128xf32>
    %1420 = arith.addf %1417, %1419 : vector<8x128xf32>
    %1421 = vector.shape_cast %1420 : vector<8x128xf32> to vector<1x8x128xf32>
    %cst_598 = arith.constant dense<0.000000e+00> : vector<1xf32>
    %1422 = vector.multi_reduction <add>, %1421, %cst_598 [1, 2] : vector<1x8x128xf32> to vector<1xf32>
    %1423 = vector.shape_cast %1422 : vector<1xf32> to vector<1x1x1xf32>
    %1424 = vector.extract %1423[0, 0, 0] : f32 from vector<1x1x1xf32>
    %cst_599 = arith.constant 0.00520833349 : f32
    %1425 = arith.mulf %1424, %cst_599 : f32
    %1426 = vector.broadcast %1425 : f32 to vector<8x128xf32>
    %1427 = arith.subf %1420, %1426 : vector<8x128xf32>
    %1428 = tpu.iota {dimensions = array<i32: 1>} : vector<1x128xi32>
    %c24_i32_600 = arith.constant 24 : i32
    %1429 = vector.broadcast %c24_i32_600 : i32 to vector<1x128xi32>
    %1430 = arith.cmpi slt, %1428, %1429 : vector<1x128xi32>
    %1431 = arith.extui %1430 : vector<1x128xi1> to vector<1x128xi32>
    %1432 = arith.sitofp %1431 : vector<1x128xi32> to vector<1x128xf32>
    %1433 = arith.mulf %1427, %1427 : vector<8x128xf32>
    %1434 = vector.broadcast %1432 : vector<1x128xf32> to vector<8x128xf32>
    %1435 = arith.mulf %1433, %1434 : vector<8x128xf32>
    %1436 = vector.shape_cast %1435 : vector<8x128xf32> to vector<1x8x128xf32>
    %cst_601 = arith.constant dense<0.000000e+00> : vector<1xf32>
    %1437 = vector.multi_reduction <add>, %1436, %cst_601 [1, 2] : vector<1x8x128xf32> to vector<1xf32>
    %1438 = vector.shape_cast %1437 : vector<1xf32> to vector<1x1x1xf32>
    %1439 = vector.extract %1438[0, 0, 0] : f32 from vector<1x1x1xf32>
    %cst_602 = arith.constant 0.00520833349 : f32
    %1440 = arith.mulf %1439, %cst_602 : f32
    %cst_603 = arith.constant 9.99999993E-9 : f32
    %1441 = arith.addf %1440, %cst_603 : f32
    %1442 = math.rsqrt %1441 : f32
    %1443 = vector.broadcast %1442 : f32 to vector<8x128xf32>
    %1444 = arith.mulf %1427, %1443 : vector<8x128xf32>
    %c23_604 = arith.constant 23 : index
    %c0_605 = arith.constant 0 : index
    %1445 = vector.load %arg4[%c23_604, %c0_605] : memref<181x128xf32, #tpu.memory_space<vmem>>, vector<1x128xf32>
    %1446 = vector.broadcast %1445 : vector<1x128xf32> to vector<8x128xf32>
    %1447 = arith.mulf %1444, %1446 : vector<8x128xf32>
    %c24_606 = arith.constant 24 : index
    %c0_607 = arith.constant 0 : index
    %1448 = vector.load %arg4[%c24_606, %c0_607] : memref<181x128xf32, #tpu.memory_space<vmem>>, vector<1x128xf32>
    %1449 = vector.broadcast %1448 : vector<1x128xf32> to vector<8x128xf32>
    %1450 = arith.addf %1447, %1449 : vector<8x128xf32>
    %cst_608 = arith.constant 0.000000e+00 : f32
    %1451 = vector.broadcast %cst_608 : f32 to vector<2x128xf32>
    %c0_609 = arith.constant 0 : index
    %c0_610 = arith.constant 0 : index
    %1452 = vector.load %arg6[%c0_609, %c0_610] : memref<24x128xf32, #tpu.memory_space<vmem>>, vector<2x128xf32>
    tpu.vector_store %arg6[%c0_609, %c0_610], %1451 {strides = array<i32>} : memref<24x128xf32, #tpu.memory_space<vmem>>, vector<2x128xf32>,
    %cst_611 = arith.constant 0.000000e+00 : f32
    %1453 = vector.broadcast %cst_611 : f32 to vector<2x128xf32>
    %c10_612 = arith.constant 10 : index
    %c0_613 = arith.constant 0 : index
    %1454 = vector.load %arg6[%c10_612, %c0_613] : memref<24x128xf32, #tpu.memory_space<vmem>>, vector<2x128xf32>
    tpu.vector_store %arg6[%c10_612, %c0_613], %1453 {strides = array<i32>} : memref<24x128xf32, #tpu.memory_space<vmem>>, vector<2x128xf32>,
    %c2_614 = arith.constant 2 : index
    %c0_615 = arith.constant 0 : index
    %1455 = vector.load %arg6[%c2_614, %c0_615] : memref<24x128xf32, #tpu.memory_space<vmem>>, vector<8x128xf32>
    tpu.vector_store %arg6[%c2_614, %c0_615], %1450 {strides = array<i32>} : memref<24x128xf32, #tpu.memory_space<vmem>>, vector<8x128xf32>,
    %c0_616 = arith.constant 0 : index
    %c0_617 = arith.constant 0 : index
    %1456 = tpu.strided_load %arg6[%c0_616, %c0_617] {strides = array<i32: 2, 1>} : memref<24x128xf32, #tpu.memory_space<vmem>>, vector<4x128xf32>
    %c25_618 = arith.constant 25 : index
    %c0_619 = arith.constant 0 : index
    %1457 = vector.load %arg4[%c25_618, %c0_619] : memref<181x128xf32, #tpu.memory_space<vmem>>, vector<1x128xf32>
    %1458 = vector.broadcast %1457 : vector<1x128xf32> to vector<4x128xf32>
    %1459 = arith.mulf %1456, %1458 : vector<4x128xf32>
    %c1_620 = arith.constant 1 : index
    %c0_621 = arith.constant 0 : index
    %1460 = tpu.strided_load %arg6[%c1_620, %c0_621] {strides = array<i32: 2, 1>} : memref<24x128xf32, #tpu.memory_space<vmem>>, vector<4x128xf32>
    %c26_622 = arith.constant 26 : index
    %c0_623 = arith.constant 0 : index
    %1461 = vector.load %arg4[%c26_622, %c0_623] : memref<181x128xf32, #tpu.memory_space<vmem>>, vector<1x128xf32>
    %1462 = vector.broadcast %1461 : vector<1x128xf32> to vector<4x128xf32>
    %1463 = arith.mulf %1460, %1462 : vector<4x128xf32>
    %1464 = arith.addf %1459, %1463 : vector<4x128xf32>
    %c2_624 = arith.constant 2 : index
    %c0_625 = arith.constant 0 : index
    %1465 = tpu.strided_load %arg6[%c2_624, %c0_625] {strides = array<i32: 2, 1>} : memref<24x128xf32, #tpu.memory_space<vmem>>, vector<4x128xf32>
    %c27_626 = arith.constant 27 : index
    %c0_627 = arith.constant 0 : index
    %1466 = vector.load %arg4[%c27_626, %c0_627] : memref<181x128xf32, #tpu.memory_space<vmem>>, vector<1x128xf32>
    %1467 = vector.broadcast %1466 : vector<1x128xf32> to vector<4x128xf32>
    %1468 = arith.mulf %1465, %1467 : vector<4x128xf32>
    %1469 = arith.addf %1464, %1468 : vector<4x128xf32>
    %c3_628 = arith.constant 3 : index
    %c0_629 = arith.constant 0 : index
    %1470 = tpu.strided_load %arg6[%c3_628, %c0_629] {strides = array<i32: 2, 1>} : memref<24x128xf32, #tpu.memory_space<vmem>>, vector<4x128xf32>
    %c28_630 = arith.constant 28 : index
    %c0_631 = arith.constant 0 : index
    %1471 = vector.load %arg4[%c28_630, %c0_631] : memref<181x128xf32, #tpu.memory_space<vmem>>, vector<1x128xf32>
    %1472 = vector.broadcast %1471 : vector<1x128xf32> to vector<4x128xf32>
    %1473 = arith.mulf %1470, %1472 : vector<4x128xf32>
    %1474 = arith.addf %1469, %1473 : vector<4x128xf32>
    %c4_632 = arith.constant 4 : index
    %c0_633 = arith.constant 0 : index
    %1475 = tpu.strided_load %arg6[%c4_632, %c0_633] {strides = array<i32: 2, 1>} : memref<24x128xf32, #tpu.memory_space<vmem>>, vector<4x128xf32>
    %c29_634 = arith.constant 29 : index
    %c0_635 = arith.constant 0 : index
    %1476 = vector.load %arg4[%c29_634, %c0_635] : memref<181x128xf32, #tpu.memory_space<vmem>>, vector<1x128xf32>
    %1477 = vector.broadcast %1476 : vector<1x128xf32> to vector<4x128xf32>
    %1478 = arith.mulf %1475, %1477 : vector<4x128xf32>
    %1479 = arith.addf %1474, %1478 : vector<4x128xf32>
    %c30_636 = arith.constant 30 : index
    %c0_637 = arith.constant 0 : index
    %1480 = vector.load %arg4[%c30_636, %c0_637] : memref<181x128xf32, #tpu.memory_space<vmem>>, vector<1x128xf32>
    %1481 = vector.broadcast %1480 : vector<1x128xf32> to vector<4x128xf32>
    %1482 = arith.addf %1479, %1481 : vector<4x128xf32>
    %1483 = vector.shape_cast %1482 : vector<4x128xf32> to vector<1x4x128xf32>
    %cst_638 = arith.constant dense<0.000000e+00> : vector<1xf32>
    %1484 = vector.multi_reduction <add>, %1483, %cst_638 [1, 2] : vector<1x4x128xf32> to vector<1xf32>
    %1485 = vector.shape_cast %1484 : vector<1xf32> to vector<1x1x1xf32>
    %1486 = vector.extract %1485[0, 0, 0] : f32 from vector<1x1x1xf32>
    %cst_639 = arith.constant 0.010416667 : f32
    %1487 = arith.mulf %1486, %cst_639 : f32
    %1488 = vector.broadcast %1487 : f32 to vector<4x128xf32>
    %1489 = arith.subf %1482, %1488 : vector<4x128xf32>
    %1490 = tpu.iota {dimensions = array<i32: 1>} : vector<1x128xi32>
    %c24_i32_640 = arith.constant 24 : i32
    %1491 = vector.broadcast %c24_i32_640 : i32 to vector<1x128xi32>
    %1492 = arith.cmpi slt, %1490, %1491 : vector<1x128xi32>
    %1493 = arith.extui %1492 : vector<1x128xi1> to vector<1x128xi32>
    %1494 = arith.sitofp %1493 : vector<1x128xi32> to vector<1x128xf32>
    %1495 = arith.mulf %1489, %1489 : vector<4x128xf32>
    %1496 = vector.broadcast %1494 : vector<1x128xf32> to vector<4x128xf32>
    %1497 = arith.mulf %1495, %1496 : vector<4x128xf32>
    %1498 = vector.shape_cast %1497 : vector<4x128xf32> to vector<1x4x128xf32>
    %cst_641 = arith.constant dense<0.000000e+00> : vector<1xf32>
    %1499 = vector.multi_reduction <add>, %1498, %cst_641 [1, 2] : vector<1x4x128xf32> to vector<1xf32>
    %1500 = vector.shape_cast %1499 : vector<1xf32> to vector<1x1x1xf32>
    %1501 = vector.extract %1500[0, 0, 0] : f32 from vector<1x1x1xf32>
    %cst_642 = arith.constant 0.010416667 : f32
    %1502 = arith.mulf %1501, %cst_642 : f32
    %cst_643 = arith.constant 9.99999993E-9 : f32
    %1503 = arith.addf %1502, %cst_643 : f32
    %1504 = math.rsqrt %1503 : f32
    %1505 = vector.broadcast %1504 : f32 to vector<4x128xf32>
    %1506 = arith.mulf %1489, %1505 : vector<4x128xf32>
    %c31_644 = arith.constant 31 : index
    %c0_645 = arith.constant 0 : index
    %1507 = vector.load %arg4[%c31_644, %c0_645] : memref<181x128xf32, #tpu.memory_space<vmem>>, vector<1x128xf32>
    %1508 = vector.broadcast %1507 : vector<1x128xf32> to vector<4x128xf32>
    %1509 = arith.mulf %1506, %1508 : vector<4x128xf32>
    %c32_646 = arith.constant 32 : index
    %c0_647 = arith.constant 0 : index
    %1510 = vector.load %arg4[%c32_646, %c0_647] : memref<181x128xf32, #tpu.memory_space<vmem>>, vector<1x128xf32>
    %1511 = vector.broadcast %1510 : vector<1x128xf32> to vector<4x128xf32>
    %1512 = arith.addf %1509, %1511 : vector<4x128xf32>
    %1513 = tpu.iota {dimensions = array<i32: 0>} : vector<16x8xi32>
    %1514 = tpu.iota {dimensions = array<i32: 1>} : vector<16x8xi32>
    %c16_i32_648 = arith.constant 16 : i32
    %1515 = vector.broadcast %c16_i32_648 : i32 to vector<16x8xi32>
    %1516 = arith.muli %1514, %1515 : vector<16x8xi32>
    %c8_i32_649 = arith.constant 8 : i32
    %1517 = vector.broadcast %c8_i32_649 : i32 to vector<16x8xi32>
    %1518 = arith.muli %1513, %1517 : vector<16x8xi32>
    %1519 = arith.cmpi sle, %1516, %1518 : vector<16x8xi32>
    %c8_i32_650 = arith.constant 8 : i32
    %1520 = vector.broadcast %c8_i32_650 : i32 to vector<16x8xi32>
    %1521 = arith.muli %1513, %1520 : vector<16x8xi32>
    %c1_i32_651 = arith.constant 1 : i32
    %1522 = vector.broadcast %c1_i32_651 : i32 to vector<16x8xi32>
    %1523 = arith.addi %1514, %1522 : vector<16x8xi32>
    %c16_i32_652 = arith.constant 16 : i32
    %1524 = vector.broadcast %c16_i32_652 : i32 to vector<16x8xi32>
    %1525 = arith.muli %1523, %1524 : vector<16x8xi32>
    %1526 = arith.cmpi slt, %1521, %1525 : vector<16x8xi32>
    %1527 = arith.andi %1519, %1526 : vector<16x8xi1>
    %1528 = arith.extui %1527 : vector<16x8xi1> to vector<16x8xi32>
    %1529 = arith.sitofp %1528 : vector<16x8xi32> to vector<16x8xf32>
    %cst_653 = arith.constant dense<0.000000e+00> : vector<16x128xf32>
    %1530 = tpu.matmul %1529, %1450, %cst_653 {dimension_numbers = #tpu.dot_dimension_numbers<[1], [0], [0], [1], [0, 0, 1, 1], [], []>} : vector<16x8xf32>, vector<8x128xf32>, vector<16x128xf32> -> vector<16x128xf32>
    %1531 = arith.truncf %1388 : vector<16x128xf32> to vector<16x128xbf16>
    %c6_654 = arith.constant 6 : index
    %c0_655 = arith.constant 0 : index
    %c0_656 = arith.constant 0 : index
    %1532 = vector.load %arg3[%c6_654, %c0_655, %c0_656] : memref<41x128x128xbf16, #tpu.memory_space<vmem>>, vector<1x128x128xbf16>
    %1533 = vector.shape_cast %1532 : vector<1x128x128xbf16> to vector<128x128xbf16>
    %cst_657 = arith.constant dense<0.000000e+00> : vector<16x128xf32>
    %1534 = tpu.matmul %1531, %1533, %cst_657 {dimension_numbers = #tpu.dot_dimension_numbers<[1], [0], [0], [1], [0, 0, 1, 1], [], []>} : vector<16x128xbf16>, vector<128x128xbf16>, vector<16x128xf32> -> vector<16x128xf32>
    %1535 = arith.truncf %1530 : vector<16x128xf32> to vector<16x128xbf16>
    %c7_658 = arith.constant 7 : index
    %c0_659 = arith.constant 0 : index
    %c0_660 = arith.constant 0 : index
    %1536 = vector.load %arg3[%c7_658, %c0_659, %c0_660] : memref<41x128x128xbf16, #tpu.memory_space<vmem>>, vector<1x128x128xbf16>
    %1537 = vector.shape_cast %1536 : vector<1x128x128xbf16> to vector<128x128xbf16>
    %cst_661 = arith.constant dense<0.000000e+00> : vector<16x128xf32>
    %1538 = tpu.matmul %1535, %1537, %cst_661 {dimension_numbers = #tpu.dot_dimension_numbers<[1], [0], [0], [1], [0, 0, 1, 1], [], []>} : vector<16x128xbf16>, vector<128x128xbf16>, vector<16x128xf32> -> vector<16x128xf32>
    %1539 = arith.addf %1534, %1538 : vector<16x128xf32>
    %c57_662 = arith.constant 57 : index
    %c0_663 = arith.constant 0 : index
    %1540 = vector.load %arg4[%c57_662, %c0_663] : memref<181x128xf32, #tpu.memory_space<vmem>>, vector<1x128xf32>
    %1541 = vector.broadcast %1540 : vector<1x128xf32> to vector<16x128xf32>
    %1542 = arith.addf %1539, %1541 : vector<16x128xf32>
    %1543 = vector.shape_cast %1542 : vector<16x128xf32> to vector<1x16x128xf32>
    %cst_664 = arith.constant dense<0.000000e+00> : vector<1xf32>
    %1544 = vector.multi_reduction <add>, %1543, %cst_664 [1, 2] : vector<1x16x128xf32> to vector<1xf32>
    %1545 = vector.shape_cast %1544 : vector<1xf32> to vector<1x1x1xf32>
    %1546 = vector.extract %1545[0, 0, 0] : f32 from vector<1x1x1xf32>
    %cst_665 = arith.constant 0.00260416674 : f32
    %1547 = arith.mulf %1546, %cst_665 : f32
    %1548 = vector.broadcast %1547 : f32 to vector<16x128xf32>
    %1549 = arith.subf %1542, %1548 : vector<16x128xf32>
    %1550 = tpu.iota {dimensions = array<i32: 1>} : vector<1x128xi32>
    %c24_i32_666 = arith.constant 24 : i32
    %1551 = vector.broadcast %c24_i32_666 : i32 to vector<1x128xi32>
    %1552 = arith.cmpi slt, %1550, %1551 : vector<1x128xi32>
    %1553 = arith.extui %1552 : vector<1x128xi1> to vector<1x128xi32>
    %1554 = arith.sitofp %1553 : vector<1x128xi32> to vector<1x128xf32>
    %1555 = arith.mulf %1549, %1549 : vector<16x128xf32>
    %1556 = vector.broadcast %1554 : vector<1x128xf32> to vector<16x128xf32>
    %1557 = arith.mulf %1555, %1556 : vector<16x128xf32>
    %1558 = vector.shape_cast %1557 : vector<16x128xf32> to vector<1x16x128xf32>
    %cst_667 = arith.constant dense<0.000000e+00> : vector<1xf32>
    %1559 = vector.multi_reduction <add>, %1558, %cst_667 [1, 2] : vector<1x16x128xf32> to vector<1xf32>
    %1560 = vector.shape_cast %1559 : vector<1xf32> to vector<1x1x1xf32>
    %1561 = vector.extract %1560[0, 0, 0] : f32 from vector<1x1x1xf32>
    %cst_668 = arith.constant 0.00260416674 : f32
    %1562 = arith.mulf %1561, %cst_668 : f32
    %cst_669 = arith.constant 9.99999993E-9 : f32
    %1563 = arith.addf %1562, %cst_669 : f32
    %1564 = math.rsqrt %1563 : f32
    %1565 = vector.broadcast %1564 : f32 to vector<16x128xf32>
    %1566 = arith.mulf %1549, %1565 : vector<16x128xf32>
    %c58_670 = arith.constant 58 : index
    %c0_671 = arith.constant 0 : index
    %1567 = vector.load %arg4[%c58_670, %c0_671] : memref<181x128xf32, #tpu.memory_space<vmem>>, vector<1x128xf32>
    %1568 = vector.broadcast %1567 : vector<1x128xf32> to vector<16x128xf32>
    %1569 = arith.mulf %1566, %1568 : vector<16x128xf32>
    %c59_672 = arith.constant 59 : index
    %c0_673 = arith.constant 0 : index
    %1570 = vector.load %arg4[%c59_672, %c0_673] : memref<181x128xf32, #tpu.memory_space<vmem>>, vector<1x128xf32>
    %1571 = vector.broadcast %1570 : vector<1x128xf32> to vector<16x128xf32>
    %1572 = arith.addf %1569, %1571 : vector<16x128xf32>
    %cst_674 = arith.constant 0.000000e+00 : f32
    %1573 = vector.broadcast %cst_674 : f32 to vector<16x128xf32>
    %1574 = arith.cmpf oge, %1572, %1573 : vector<16x128xf32>
    %c60_675 = arith.constant 60 : index
    %c0_676 = arith.constant 0 : index
    %1575 = vector.load %arg4[%c60_675, %c0_676] : memref<181x128xf32, #tpu.memory_space<vmem>>, vector<1x128xf32>
    %1576 = vector.broadcast %1575 : vector<1x128xf32> to vector<16x128xf32>
    %1577 = arith.mulf %1572, %1576 : vector<16x128xf32>
    %1578 = arith.select %1574, %1572, %1577 : vector<16x128xi1>, vector<16x128xf32>
    %cst_677 = arith.constant 0.000000e+00 : f32
    %1579 = vector.broadcast %cst_677 : f32 to vector<2x128xf32>
    %c0_678 = arith.constant 0 : index
    %c0_679 = arith.constant 0 : index
    %1580 = vector.load %arg6[%c0_678, %c0_679] : memref<24x128xf32, #tpu.memory_space<vmem>>, vector<2x128xf32>
    tpu.vector_store %arg6[%c0_678, %c0_679], %1579 {strides = array<i32>} : memref<24x128xf32, #tpu.memory_space<vmem>>, vector<2x128xf32>,
    %cst_680 = arith.constant 0.000000e+00 : f32
    %1581 = vector.broadcast %cst_680 : f32 to vector<2x128xf32>
    %c18_681 = arith.constant 18 : index
    %c0_682 = arith.constant 0 : index
    %1582 = vector.load %arg6[%c18_681, %c0_682] : memref<24x128xf32, #tpu.memory_space<vmem>>, vector<2x128xf32>
    tpu.vector_store %arg6[%c18_681, %c0_682], %1581 {strides = array<i32>} : memref<24x128xf32, #tpu.memory_space<vmem>>, vector<2x128xf32>,
    %c2_683 = arith.constant 2 : index
    %c0_684 = arith.constant 0 : index
    %1583 = vector.load %arg6[%c2_683, %c0_684] : memref<24x128xf32, #tpu.memory_space<vmem>>, vector<16x128xf32>
    tpu.vector_store %arg6[%c2_683, %c0_684], %1388 {strides = array<i32>} : memref<24x128xf32, #tpu.memory_space<vmem>>, vector<16x128xf32>,
    %c0_685 = arith.constant 0 : index
    %c0_686 = arith.constant 0 : index
    %1584 = tpu.strided_load %arg6[%c0_685, %c0_686] {strides = array<i32: 2, 1>} : memref<24x128xf32, #tpu.memory_space<vmem>>, vector<8x128xf32>
    %c41_687 = arith.constant 41 : index
    %c0_688 = arith.constant 0 : index
    %1585 = vector.load %arg4[%c41_687, %c0_688] : memref<181x128xf32, #tpu.memory_space<vmem>>, vector<1x128xf32>
    %1586 = vector.broadcast %1585 : vector<1x128xf32> to vector<8x128xf32>
    %1587 = arith.mulf %1584, %1586 : vector<8x128xf32>
    %c1_689 = arith.constant 1 : index
    %c0_690 = arith.constant 0 : index
    %1588 = tpu.strided_load %arg6[%c1_689, %c0_690] {strides = array<i32: 2, 1>} : memref<24x128xf32, #tpu.memory_space<vmem>>, vector<8x128xf32>
    %c42_691 = arith.constant 42 : index
    %c0_692 = arith.constant 0 : index
    %1589 = vector.load %arg4[%c42_691, %c0_692] : memref<181x128xf32, #tpu.memory_space<vmem>>, vector<1x128xf32>
    %1590 = vector.broadcast %1589 : vector<1x128xf32> to vector<8x128xf32>
    %1591 = arith.mulf %1588, %1590 : vector<8x128xf32>
    %1592 = arith.addf %1587, %1591 : vector<8x128xf32>
    %c2_693 = arith.constant 2 : index
    %c0_694 = arith.constant 0 : index
    %1593 = tpu.strided_load %arg6[%c2_693, %c0_694] {strides = array<i32: 2, 1>} : memref<24x128xf32, #tpu.memory_space<vmem>>, vector<8x128xf32>
    %c43_695 = arith.constant 43 : index
    %c0_696 = arith.constant 0 : index
    %1594 = vector.load %arg4[%c43_695, %c0_696] : memref<181x128xf32, #tpu.memory_space<vmem>>, vector<1x128xf32>
    %1595 = vector.broadcast %1594 : vector<1x128xf32> to vector<8x128xf32>
    %1596 = arith.mulf %1593, %1595 : vector<8x128xf32>
    %1597 = arith.addf %1592, %1596 : vector<8x128xf32>
    %c3_697 = arith.constant 3 : index
    %c0_698 = arith.constant 0 : index
    %1598 = tpu.strided_load %arg6[%c3_697, %c0_698] {strides = array<i32: 2, 1>} : memref<24x128xf32, #tpu.memory_space<vmem>>, vector<8x128xf32>
    %c44_699 = arith.constant 44 : index
    %c0_700 = arith.constant 0 : index
    %1599 = vector.load %arg4[%c44_699, %c0_700] : memref<181x128xf32, #tpu.memory_space<vmem>>, vector<1x128xf32>
    %1600 = vector.broadcast %1599 : vector<1x128xf32> to vector<8x128xf32>
    %1601 = arith.mulf %1598, %1600 : vector<8x128xf32>
    %1602 = arith.addf %1597, %1601 : vector<8x128xf32>
    %c4_701 = arith.constant 4 : index
    %c0_702 = arith.constant 0 : index
    %1603 = tpu.strided_load %arg6[%c4_701, %c0_702] {strides = array<i32: 2, 1>} : memref<24x128xf32, #tpu.memory_space<vmem>>, vector<8x128xf32>
    %c45_703 = arith.constant 45 : index
    %c0_704 = arith.constant 0 : index
    %1604 = vector.load %arg4[%c45_703, %c0_704] : memref<181x128xf32, #tpu.memory_space<vmem>>, vector<1x128xf32>
    %1605 = vector.broadcast %1604 : vector<1x128xf32> to vector<8x128xf32>
    %1606 = arith.mulf %1603, %1605 : vector<8x128xf32>
    %1607 = arith.addf %1602, %1606 : vector<8x128xf32>
    %c46_705 = arith.constant 46 : index
    %c0_706 = arith.constant 0 : index
    %1608 = vector.load %arg4[%c46_705, %c0_706] : memref<181x128xf32, #tpu.memory_space<vmem>>, vector<1x128xf32>
    %1609 = vector.broadcast %1608 : vector<1x128xf32> to vector<8x128xf32>
    %1610 = arith.addf %1607, %1609 : vector<8x128xf32>
    %1611 = vector.shape_cast %1610 : vector<8x128xf32> to vector<1x8x128xf32>
    %cst_707 = arith.constant dense<0.000000e+00> : vector<1xf32>
    %1612 = vector.multi_reduction <add>, %1611, %cst_707 [1, 2] : vector<1x8x128xf32> to vector<1xf32>
    %1613 = vector.shape_cast %1612 : vector<1xf32> to vector<1x1x1xf32>
    %1614 = vector.extract %1613[0, 0, 0] : f32 from vector<1x1x1xf32>
    %cst_708 = arith.constant 0.00520833349 : f32
    %1615 = arith.mulf %1614, %cst_708 : f32
    %1616 = vector.broadcast %1615 : f32 to vector<8x128xf32>
    %1617 = arith.subf %1610, %1616 : vector<8x128xf32>
    %1618 = tpu.iota {dimensions = array<i32: 1>} : vector<1x128xi32>
    %c24_i32_709 = arith.constant 24 : i32
    %1619 = vector.broadcast %c24_i32_709 : i32 to vector<1x128xi32>
    %1620 = arith.cmpi slt, %1618, %1619 : vector<1x128xi32>
    %1621 = arith.extui %1620 : vector<1x128xi1> to vector<1x128xi32>
    %1622 = arith.sitofp %1621 : vector<1x128xi32> to vector<1x128xf32>
    %1623 = arith.mulf %1617, %1617 : vector<8x128xf32>
    %1624 = vector.broadcast %1622 : vector<1x128xf32> to vector<8x128xf32>
    %1625 = arith.mulf %1623, %1624 : vector<8x128xf32>
    %1626 = vector.shape_cast %1625 : vector<8x128xf32> to vector<1x8x128xf32>
    %cst_710 = arith.constant dense<0.000000e+00> : vector<1xf32>
    %1627 = vector.multi_reduction <add>, %1626, %cst_710 [1, 2] : vector<1x8x128xf32> to vector<1xf32>
    %1628 = vector.shape_cast %1627 : vector<1xf32> to vector<1x1x1xf32>
    %1629 = vector.extract %1628[0, 0, 0] : f32 from vector<1x1x1xf32>
    %cst_711 = arith.constant 0.00520833349 : f32
    %1630 = arith.mulf %1629, %cst_711 : f32
    %cst_712 = arith.constant 9.99999993E-9 : f32
    %1631 = arith.addf %1630, %cst_712 : f32
    %1632 = math.rsqrt %1631 : f32
    %1633 = vector.broadcast %1632 : f32 to vector<8x128xf32>
    %1634 = arith.mulf %1617, %1633 : vector<8x128xf32>
    %c47_713 = arith.constant 47 : index
    %c0_714 = arith.constant 0 : index
    %1635 = vector.load %arg4[%c47_713, %c0_714] : memref<181x128xf32, #tpu.memory_space<vmem>>, vector<1x128xf32>
    %1636 = vector.broadcast %1635 : vector<1x128xf32> to vector<8x128xf32>
    %1637 = arith.mulf %1634, %1636 : vector<8x128xf32>
    %c48_715 = arith.constant 48 : index
    %c0_716 = arith.constant 0 : index
    %1638 = vector.load %arg4[%c48_715, %c0_716] : memref<181x128xf32, #tpu.memory_space<vmem>>, vector<1x128xf32>
    %1639 = vector.broadcast %1638 : vector<1x128xf32> to vector<8x128xf32>
    %1640 = arith.addf %1637, %1639 : vector<8x128xf32>
    %1641 = tpu.iota {dimensions = array<i32: 0>} : vector<8x4xi32>
    %1642 = tpu.iota {dimensions = array<i32: 1>} : vector<8x4xi32>
    %c8_i32_717 = arith.constant 8 : i32
    %1643 = vector.broadcast %c8_i32_717 : i32 to vector<8x4xi32>
    %1644 = arith.muli %1642, %1643 : vector<8x4xi32>
    %c4_i32_718 = arith.constant 4 : i32
    %1645 = vector.broadcast %c4_i32_718 : i32 to vector<8x4xi32>
    %1646 = arith.muli %1641, %1645 : vector<8x4xi32>
    %1647 = arith.cmpi sle, %1644, %1646 : vector<8x4xi32>
    %c4_i32_719 = arith.constant 4 : i32
    %1648 = vector.broadcast %c4_i32_719 : i32 to vector<8x4xi32>
    %1649 = arith.muli %1641, %1648 : vector<8x4xi32>
    %c1_i32_720 = arith.constant 1 : i32
    %1650 = vector.broadcast %c1_i32_720 : i32 to vector<8x4xi32>
    %1651 = arith.addi %1642, %1650 : vector<8x4xi32>
    %c8_i32_721 = arith.constant 8 : i32
    %1652 = vector.broadcast %c8_i32_721 : i32 to vector<8x4xi32>
    %1653 = arith.muli %1651, %1652 : vector<8x4xi32>
    %1654 = arith.cmpi slt, %1649, %1653 : vector<8x4xi32>
    %1655 = arith.andi %1647, %1654 : vector<8x4xi1>
    %1656 = arith.extui %1655 : vector<8x4xi1> to vector<8x4xi32>
    %1657 = arith.sitofp %1656 : vector<8x4xi32> to vector<8x4xf32>
    %cst_722 = arith.constant dense<0.000000e+00> : vector<8x128xf32>
    %1658 = tpu.matmul %1657, %1512, %cst_722 {dimension_numbers = #tpu.dot_dimension_numbers<[1], [0], [0], [1], [0, 0, 1, 1], [], []>} : vector<8x4xf32>, vector<4x128xf32>, vector<8x128xf32> -> vector<8x128xf32>
    %1659 = arith.truncf %1640 : vector<8x128xf32> to vector<8x128xbf16>
    %c8_723 = arith.constant 8 : index
    %c0_724 = arith.constant 0 : index
    %c0_725 = arith.constant 0 : index
    %1660 = vector.load %arg3[%c8_723, %c0_724, %c0_725] : memref<41x128x128xbf16, #tpu.memory_space<vmem>>, vector<1x128x128xbf16>
    %1661 = vector.shape_cast %1660 : vector<1x128x128xbf16> to vector<128x128xbf16>
    %cst_726 = arith.constant dense<0.000000e+00> : vector<8x128xf32>
    %1662 = tpu.matmul %1659, %1661, %cst_726 {dimension_numbers = #tpu.dot_dimension_numbers<[1], [0], [0], [1], [0, 0, 1, 1], [], []>} : vector<8x128xbf16>, vector<128x128xbf16>, vector<8x128xf32> -> vector<8x128xf32>
    %1663 = arith.truncf %1450 : vector<8x128xf32> to vector<8x128xbf16>
    %c9_727 = arith.constant 9 : index
    %c0_728 = arith.constant 0 : index
    %c0_729 = arith.constant 0 : index
    %1664 = vector.load %arg3[%c9_727, %c0_728, %c0_729] : memref<41x128x128xbf16, #tpu.memory_space<vmem>>, vector<1x128x128xbf16>
    %1665 = vector.shape_cast %1664 : vector<1x128x128xbf16> to vector<128x128xbf16>
    %cst_730 = arith.constant dense<0.000000e+00> : vector<8x128xf32>
    %1666 = tpu.matmul %1663, %1665, %cst_730 {dimension_numbers = #tpu.dot_dimension_numbers<[1], [0], [0], [1], [0, 0, 1, 1], [], []>} : vector<8x128xbf16>, vector<128x128xbf16>, vector<8x128xf32> -> vector<8x128xf32>
    %1667 = arith.addf %1662, %1666 : vector<8x128xf32>
    %1668 = arith.truncf %1658 : vector<8x128xf32> to vector<8x128xbf16>
    %c10_731 = arith.constant 10 : index
    %c0_732 = arith.constant 0 : index
    %c0_733 = arith.constant 0 : index
    %1669 = vector.load %arg3[%c10_731, %c0_732, %c0_733] : memref<41x128x128xbf16, #tpu.memory_space<vmem>>, vector<1x128x128xbf16>
    %1670 = vector.shape_cast %1669 : vector<1x128x128xbf16> to vector<128x128xbf16>
    %cst_734 = arith.constant dense<0.000000e+00> : vector<8x128xf32>
    %1671 = tpu.matmul %1668, %1670, %cst_734 {dimension_numbers = #tpu.dot_dimension_numbers<[1], [0], [0], [1], [0, 0, 1, 1], [], []>} : vector<8x128xbf16>, vector<128x128xbf16>, vector<8x128xf32> -> vector<8x128xf32>
    %1672 = arith.addf %1667, %1671 : vector<8x128xf32>
    %c61_735 = arith.constant 61 : index
    %c0_736 = arith.constant 0 : index
    %1673 = vector.load %arg4[%c61_735, %c0_736] : memref<181x128xf32, #tpu.memory_space<vmem>>, vector<1x128xf32>
    %1674 = vector.broadcast %1673 : vector<1x128xf32> to vector<8x128xf32>
    %1675 = arith.addf %1672, %1674 : vector<8x128xf32>
    %1676 = vector.shape_cast %1675 : vector<8x128xf32> to vector<1x8x128xf32>
    %cst_737 = arith.constant dense<0.000000e+00> : vector<1xf32>
    %1677 = vector.multi_reduction <add>, %1676, %cst_737 [1, 2] : vector<1x8x128xf32> to vector<1xf32>
    %1678 = vector.shape_cast %1677 : vector<1xf32> to vector<1x1x1xf32>
    %1679 = vector.extract %1678[0, 0, 0] : f32 from vector<1x1x1xf32>
    %cst_738 = arith.constant 0.00520833349 : f32
    %1680 = arith.mulf %1679, %cst_738 : f32
    %1681 = vector.broadcast %1680 : f32 to vector<8x128xf32>
    %1682 = arith.subf %1675, %1681 : vector<8x128xf32>
    %1683 = tpu.iota {dimensions = array<i32: 1>} : vector<1x128xi32>
    %c24_i32_739 = arith.constant 24 : i32
    %1684 = vector.broadcast %c24_i32_739 : i32 to vector<1x128xi32>
    %1685 = arith.cmpi slt, %1683, %1684 : vector<1x128xi32>
    %1686 = arith.extui %1685 : vector<1x128xi1> to vector<1x128xi32>
    %1687 = arith.sitofp %1686 : vector<1x128xi32> to vector<1x128xf32>
    %1688 = arith.mulf %1682, %1682 : vector<8x128xf32>
    %1689 = vector.broadcast %1687 : vector<1x128xf32> to vector<8x128xf32>
    %1690 = arith.mulf %1688, %1689 : vector<8x128xf32>
    %1691 = vector.shape_cast %1690 : vector<8x128xf32> to vector<1x8x128xf32>
    %cst_740 = arith.constant dense<0.000000e+00> : vector<1xf32>
    %1692 = vector.multi_reduction <add>, %1691, %cst_740 [1, 2] : vector<1x8x128xf32> to vector<1xf32>
    %1693 = vector.shape_cast %1692 : vector<1xf32> to vector<1x1x1xf32>
    %1694 = vector.extract %1693[0, 0, 0] : f32 from vector<1x1x1xf32>
    %cst_741 = arith.constant 0.00520833349 : f32
    %1695 = arith.mulf %1694, %cst_741 : f32
    %cst_742 = arith.constant 9.99999993E-9 : f32
    %1696 = arith.addf %1695, %cst_742 : f32
    %1697 = math.rsqrt %1696 : f32
    %1698 = vector.broadcast %1697 : f32 to vector<8x128xf32>
    %1699 = arith.mulf %1682, %1698 : vector<8x128xf32>
    %c62_743 = arith.constant 62 : index
    %c0_744 = arith.constant 0 : index
    %1700 = vector.load %arg4[%c62_743, %c0_744] : memref<181x128xf32, #tpu.memory_space<vmem>>, vector<1x128xf32>
    %1701 = vector.broadcast %1700 : vector<1x128xf32> to vector<8x128xf32>
    %1702 = arith.mulf %1699, %1701 : vector<8x128xf32>
    %c63_745 = arith.constant 63 : index
    %c0_746 = arith.constant 0 : index
    %1703 = vector.load %arg4[%c63_745, %c0_746] : memref<181x128xf32, #tpu.memory_space<vmem>>, vector<1x128xf32>
    %1704 = vector.broadcast %1703 : vector<1x128xf32> to vector<8x128xf32>
    %1705 = arith.addf %1702, %1704 : vector<8x128xf32>
    %cst_747 = arith.constant 0.000000e+00 : f32
    %1706 = vector.broadcast %cst_747 : f32 to vector<8x128xf32>
    %1707 = arith.cmpf oge, %1705, %1706 : vector<8x128xf32>
    %c64_748 = arith.constant 64 : index
    %c0_749 = arith.constant 0 : index
    %1708 = vector.load %arg4[%c64_748, %c0_749] : memref<181x128xf32, #tpu.memory_space<vmem>>, vector<1x128xf32>
    %1709 = vector.broadcast %1708 : vector<1x128xf32> to vector<8x128xf32>
    %1710 = arith.mulf %1705, %1709 : vector<8x128xf32>
    %1711 = arith.select %1707, %1705, %1710 : vector<8x128xi1>, vector<8x128xf32>
    %cst_750 = arith.constant 0.000000e+00 : f32
    %1712 = vector.broadcast %cst_750 : f32 to vector<2x128xf32>
    %c0_751 = arith.constant 0 : index
    %c0_752 = arith.constant 0 : index
    %1713 = vector.load %arg6[%c0_751, %c0_752] : memref<24x128xf32, #tpu.memory_space<vmem>>, vector<2x128xf32>
    tpu.vector_store %arg6[%c0_751, %c0_752], %1712 {strides = array<i32>} : memref<24x128xf32, #tpu.memory_space<vmem>>, vector<2x128xf32>,
    %cst_753 = arith.constant 0.000000e+00 : f32
    %1714 = vector.broadcast %cst_753 : f32 to vector<2x128xf32>
    %c10_754 = arith.constant 10 : index
    %c0_755 = arith.constant 0 : index
    %1715 = vector.load %arg6[%c10_754, %c0_755] : memref<24x128xf32, #tpu.memory_space<vmem>>, vector<2x128xf32>
    tpu.vector_store %arg6[%c10_754, %c0_755], %1714 {strides = array<i32>} : memref<24x128xf32, #tpu.memory_space<vmem>>, vector<2x128xf32>,
    %c2_756 = arith.constant 2 : index
    %c0_757 = arith.constant 0 : index
    %1716 = vector.load %arg6[%c2_756, %c0_757] : memref<24x128xf32, #tpu.memory_space<vmem>>, vector<8x128xf32>
    tpu.vector_store %arg6[%c2_756, %c0_757], %1450 {strides = array<i32>} : memref<24x128xf32, #tpu.memory_space<vmem>>, vector<8x128xf32>,
    %c0_758 = arith.constant 0 : index
    %c0_759 = arith.constant 0 : index
    %1717 = tpu.strided_load %arg6[%c0_758, %c0_759] {strides = array<i32: 2, 1>} : memref<24x128xf32, #tpu.memory_space<vmem>>, vector<4x128xf32>
    %c49_760 = arith.constant 49 : index
    %c0_761 = arith.constant 0 : index
    %1718 = vector.load %arg4[%c49_760, %c0_761] : memref<181x128xf32, #tpu.memory_space<vmem>>, vector<1x128xf32>
    %1719 = vector.broadcast %1718 : vector<1x128xf32> to vector<4x128xf32>
    %1720 = arith.mulf %1717, %1719 : vector<4x128xf32>
    %c1_762 = arith.constant 1 : index
    %c0_763 = arith.constant 0 : index
    %1721 = tpu.strided_load %arg6[%c1_762, %c0_763] {strides = array<i32: 2, 1>} : memref<24x128xf32, #tpu.memory_space<vmem>>, vector<4x128xf32>
    %c50_764 = arith.constant 50 : index
    %c0_765 = arith.constant 0 : index
    %1722 = vector.load %arg4[%c50_764, %c0_765] : memref<181x128xf32, #tpu.memory_space<vmem>>, vector<1x128xf32>
    %1723 = vector.broadcast %1722 : vector<1x128xf32> to vector<4x128xf32>
    %1724 = arith.mulf %1721, %1723 : vector<4x128xf32>
    %1725 = arith.addf %1720, %1724 : vector<4x128xf32>
    %c2_766 = arith.constant 2 : index
    %c0_767 = arith.constant 0 : index
    %1726 = tpu.strided_load %arg6[%c2_766, %c0_767] {strides = array<i32: 2, 1>} : memref<24x128xf32, #tpu.memory_space<vmem>>, vector<4x128xf32>
    %c51_768 = arith.constant 51 : index
    %c0_769 = arith.constant 0 : index
    %1727 = vector.load %arg4[%c51_768, %c0_769] : memref<181x128xf32, #tpu.memory_space<vmem>>, vector<1x128xf32>
    %1728 = vector.broadcast %1727 : vector<1x128xf32> to vector<4x128xf32>
    %1729 = arith.mulf %1726, %1728 : vector<4x128xf32>
    %1730 = arith.addf %1725, %1729 : vector<4x128xf32>
    %c3_770 = arith.constant 3 : index
    %c0_771 = arith.constant 0 : index
    %1731 = tpu.strided_load %arg6[%c3_770, %c0_771] {strides = array<i32: 2, 1>} : memref<24x128xf32, #tpu.memory_space<vmem>>, vector<4x128xf32>
    %c52_772 = arith.constant 52 : index
    %c0_773 = arith.constant 0 : index
    %1732 = vector.load %arg4[%c52_772, %c0_773] : memref<181x128xf32, #tpu.memory_space<vmem>>, vector<1x128xf32>
    %1733 = vector.broadcast %1732 : vector<1x128xf32> to vector<4x128xf32>
    %1734 = arith.mulf %1731, %1733 : vector<4x128xf32>
    %1735 = arith.addf %1730, %1734 : vector<4x128xf32>
    %c4_774 = arith.constant 4 : index
    %c0_775 = arith.constant 0 : index
    %1736 = tpu.strided_load %arg6[%c4_774, %c0_775] {strides = array<i32: 2, 1>} : memref<24x128xf32, #tpu.memory_space<vmem>>, vector<4x128xf32>
    %c53_776 = arith.constant 53 : index
    %c0_777 = arith.constant 0 : index
    %1737 = vector.load %arg4[%c53_776, %c0_777] : memref<181x128xf32, #tpu.memory_space<vmem>>, vector<1x128xf32>
    %1738 = vector.broadcast %1737 : vector<1x128xf32> to vector<4x128xf32>
    %1739 = arith.mulf %1736, %1738 : vector<4x128xf32>
    %1740 = arith.addf %1735, %1739 : vector<4x128xf32>
    %c54_778 = arith.constant 54 : index
    %c0_779 = arith.constant 0 : index
    %1741 = vector.load %arg4[%c54_778, %c0_779] : memref<181x128xf32, #tpu.memory_space<vmem>>, vector<1x128xf32>
    %1742 = vector.broadcast %1741 : vector<1x128xf32> to vector<4x128xf32>
    %1743 = arith.addf %1740, %1742 : vector<4x128xf32>
    %1744 = vector.shape_cast %1743 : vector<4x128xf32> to vector<1x4x128xf32>
    %cst_780 = arith.constant dense<0.000000e+00> : vector<1xf32>
    %1745 = vector.multi_reduction <add>, %1744, %cst_780 [1, 2] : vector<1x4x128xf32> to vector<1xf32>
    %1746 = vector.shape_cast %1745 : vector<1xf32> to vector<1x1x1xf32>
    %1747 = vector.extract %1746[0, 0, 0] : f32 from vector<1x1x1xf32>
    %cst_781 = arith.constant 0.010416667 : f32
    %1748 = arith.mulf %1747, %cst_781 : f32
    %1749 = vector.broadcast %1748 : f32 to vector<4x128xf32>
    %1750 = arith.subf %1743, %1749 : vector<4x128xf32>
    %1751 = tpu.iota {dimensions = array<i32: 1>} : vector<1x128xi32>
    %c24_i32_782 = arith.constant 24 : i32
    %1752 = vector.broadcast %c24_i32_782 : i32 to vector<1x128xi32>
    %1753 = arith.cmpi slt, %1751, %1752 : vector<1x128xi32>
    %1754 = arith.extui %1753 : vector<1x128xi1> to vector<1x128xi32>
    %1755 = arith.sitofp %1754 : vector<1x128xi32> to vector<1x128xf32>
    %1756 = arith.mulf %1750, %1750 : vector<4x128xf32>
    %1757 = vector.broadcast %1755 : vector<1x128xf32> to vector<4x128xf32>
    %1758 = arith.mulf %1756, %1757 : vector<4x128xf32>
    %1759 = vector.shape_cast %1758 : vector<4x128xf32> to vector<1x4x128xf32>
    %cst_783 = arith.constant dense<0.000000e+00> : vector<1xf32>
    %1760 = vector.multi_reduction <add>, %1759, %cst_783 [1, 2] : vector<1x4x128xf32> to vector<1xf32>
    %1761 = vector.shape_cast %1760 : vector<1xf32> to vector<1x1x1xf32>
    %1762 = vector.extract %1761[0, 0, 0] : f32 from vector<1x1x1xf32>
    %cst_784 = arith.constant 0.010416667 : f32
    %1763 = arith.mulf %1762, %cst_784 : f32
    %cst_785 = arith.constant 9.99999993E-9 : f32
    %1764 = arith.addf %1763, %cst_785 : f32
    %1765 = math.rsqrt %1764 : f32
    %1766 = vector.broadcast %1765 : f32 to vector<4x128xf32>
    %1767 = arith.mulf %1750, %1766 : vector<4x128xf32>
    %c55_786 = arith.constant 55 : index
    %c0_787 = arith.constant 0 : index
    %1768 = vector.load %arg4[%c55_786, %c0_787] : memref<181x128xf32, #tpu.memory_space<vmem>>, vector<1x128xf32>
    %1769 = vector.broadcast %1768 : vector<1x128xf32> to vector<4x128xf32>
    %1770 = arith.mulf %1767, %1769 : vector<4x128xf32>
    %c56_788 = arith.constant 56 : index
    %c0_789 = arith.constant 0 : index
    %1771 = vector.load %arg4[%c56_788, %c0_789] : memref<181x128xf32, #tpu.memory_space<vmem>>, vector<1x128xf32>
    %1772 = vector.broadcast %1771 : vector<1x128xf32> to vector<4x128xf32>
    %1773 = arith.addf %1770, %1772 : vector<4x128xf32>
    %1774 = arith.truncf %1773 : vector<4x128xf32> to vector<4x128xbf16>
    %c11_790 = arith.constant 11 : index
    %c0_791 = arith.constant 0 : index
    %c0_792 = arith.constant 0 : index
    %1775 = vector.load %arg3[%c11_790, %c0_791, %c0_792] : memref<41x128x128xbf16, #tpu.memory_space<vmem>>, vector<1x128x128xbf16>
    %1776 = vector.shape_cast %1775 : vector<1x128x128xbf16> to vector<128x128xbf16>
    %cst_793 = arith.constant dense<0.000000e+00> : vector<4x128xf32>
    %1777 = tpu.matmul %1774, %1776, %cst_793 {dimension_numbers = #tpu.dot_dimension_numbers<[1], [0], [0], [1], [0, 0, 1, 1], [], []>} : vector<4x128xbf16>, vector<128x128xbf16>, vector<4x128xf32> -> vector<4x128xf32>
    %1778 = arith.truncf %1512 : vector<4x128xf32> to vector<4x128xbf16>
    %c12_794 = arith.constant 12 : index
    %c0_795 = arith.constant 0 : index
    %c0_796 = arith.constant 0 : index
    %1779 = vector.load %arg3[%c12_794, %c0_795, %c0_796] : memref<41x128x128xbf16, #tpu.memory_space<vmem>>, vector<1x128x128xbf16>
    %1780 = vector.shape_cast %1779 : vector<1x128x128xbf16> to vector<128x128xbf16>
    %cst_797 = arith.constant dense<0.000000e+00> : vector<4x128xf32>
    %1781 = tpu.matmul %1778, %1780, %cst_797 {dimension_numbers = #tpu.dot_dimension_numbers<[1], [0], [0], [1], [0, 0, 1, 1], [], []>} : vector<4x128xbf16>, vector<128x128xbf16>, vector<4x128xf32> -> vector<4x128xf32>
    %1782 = arith.addf %1777, %1781 : vector<4x128xf32>
    %c65_798 = arith.constant 65 : index
    %c0_799 = arith.constant 0 : index
    %1783 = vector.load %arg4[%c65_798, %c0_799] : memref<181x128xf32, #tpu.memory_space<vmem>>, vector<1x128xf32>
    %1784 = vector.broadcast %1783 : vector<1x128xf32> to vector<4x128xf32>
    %1785 = arith.addf %1782, %1784 : vector<4x128xf32>
    %1786 = vector.shape_cast %1785 : vector<4x128xf32> to vector<1x4x128xf32>
    %cst_800 = arith.constant dense<0.000000e+00> : vector<1xf32>
    %1787 = vector.multi_reduction <add>, %1786, %cst_800 [1, 2] : vector<1x4x128xf32> to vector<1xf32>
    %1788 = vector.shape_cast %1787 : vector<1xf32> to vector<1x1x1xf32>
    %1789 = vector.extract %1788[0, 0, 0] : f32 from vector<1x1x1xf32>
    %cst_801 = arith.constant 0.010416667 : f32
    %1790 = arith.mulf %1789, %cst_801 : f32
    %1791 = vector.broadcast %1790 : f32 to vector<4x128xf32>
    %1792 = arith.subf %1785, %1791 : vector<4x128xf32>
    %1793 = tpu.iota {dimensions = array<i32: 1>} : vector<1x128xi32>
    %c24_i32_802 = arith.constant 24 : i32
    %1794 = vector.broadcast %c24_i32_802 : i32 to vector<1x128xi32>
    %1795 = arith.cmpi slt, %1793, %1794 : vector<1x128xi32>
    %1796 = arith.extui %1795 : vector<1x128xi1> to vector<1x128xi32>
    %1797 = arith.sitofp %1796 : vector<1x128xi32> to vector<1x128xf32>
    %1798 = arith.mulf %1792, %1792 : vector<4x128xf32>
    %1799 = vector.broadcast %1797 : vector<1x128xf32> to vector<4x128xf32>
    %1800 = arith.mulf %1798, %1799 : vector<4x128xf32>
    %1801 = vector.shape_cast %1800 : vector<4x128xf32> to vector<1x4x128xf32>
    %cst_803 = arith.constant dense<0.000000e+00> : vector<1xf32>
    %1802 = vector.multi_reduction <add>, %1801, %cst_803 [1, 2] : vector<1x4x128xf32> to vector<1xf32>
    %1803 = vector.shape_cast %1802 : vector<1xf32> to vector<1x1x1xf32>
    %1804 = vector.extract %1803[0, 0, 0] : f32 from vector<1x1x1xf32>
    %cst_804 = arith.constant 0.010416667 : f32
    %1805 = arith.mulf %1804, %cst_804 : f32
    %cst_805 = arith.constant 9.99999993E-9 : f32
    %1806 = arith.addf %1805, %cst_805 : f32
    %1807 = math.rsqrt %1806 : f32
    %1808 = vector.broadcast %1807 : f32 to vector<4x128xf32>
    %1809 = arith.mulf %1792, %1808 : vector<4x128xf32>
    %c66_806 = arith.constant 66 : index
    %c0_807 = arith.constant 0 : index
    %1810 = vector.load %arg4[%c66_806, %c0_807] : memref<181x128xf32, #tpu.memory_space<vmem>>, vector<1x128xf32>
    %1811 = vector.broadcast %1810 : vector<1x128xf32> to vector<4x128xf32>
    %1812 = arith.mulf %1809, %1811 : vector<4x128xf32>
    %c67_808 = arith.constant 67 : index
    %c0_809 = arith.constant 0 : index
    %1813 = vector.load %arg4[%c67_808, %c0_809] : memref<181x128xf32, #tpu.memory_space<vmem>>, vector<1x128xf32>
    %1814 = vector.broadcast %1813 : vector<1x128xf32> to vector<4x128xf32>
    %1815 = arith.addf %1812, %1814 : vector<4x128xf32>
    %cst_810 = arith.constant 0.000000e+00 : f32
    %1816 = vector.broadcast %cst_810 : f32 to vector<4x128xf32>
    %1817 = arith.cmpf oge, %1815, %1816 : vector<4x128xf32>
    %c68_811 = arith.constant 68 : index
    %c0_812 = arith.constant 0 : index
    %1818 = vector.load %arg4[%c68_811, %c0_812] : memref<181x128xf32, #tpu.memory_space<vmem>>, vector<1x128xf32>
    %1819 = vector.broadcast %1818 : vector<1x128xf32> to vector<4x128xf32>
    %1820 = arith.mulf %1815, %1819 : vector<4x128xf32>
    %1821 = arith.select %1817, %1815, %1820 : vector<4x128xi1>, vector<4x128xf32>
    %1822 = tpu.iota {dimensions = array<i32: 0>} : vector<16x8xi32>
    %1823 = tpu.iota {dimensions = array<i32: 1>} : vector<16x8xi32>
    %c16_i32_813 = arith.constant 16 : i32
    %1824 = vector.broadcast %c16_i32_813 : i32 to vector<16x8xi32>
    %1825 = arith.muli %1823, %1824 : vector<16x8xi32>
    %c8_i32_814 = arith.constant 8 : i32
    %1826 = vector.broadcast %c8_i32_814 : i32 to vector<16x8xi32>
    %1827 = arith.muli %1822, %1826 : vector<16x8xi32>
    %1828 = arith.cmpi sle, %1825, %1827 : vector<16x8xi32>
    %c8_i32_815 = arith.constant 8 : i32
    %1829 = vector.broadcast %c8_i32_815 : i32 to vector<16x8xi32>
    %1830 = arith.muli %1822, %1829 : vector<16x8xi32>
    %c1_i32_816 = arith.constant 1 : i32
    %1831 = vector.broadcast %c1_i32_816 : i32 to vector<16x8xi32>
    %1832 = arith.addi %1823, %1831 : vector<16x8xi32>
    %c16_i32_817 = arith.constant 16 : i32
    %1833 = vector.broadcast %c16_i32_817 : i32 to vector<16x8xi32>
    %1834 = arith.muli %1832, %1833 : vector<16x8xi32>
    %1835 = arith.cmpi slt, %1830, %1834 : vector<16x8xi32>
    %1836 = arith.andi %1828, %1835 : vector<16x8xi1>
    %1837 = arith.extui %1836 : vector<16x8xi1> to vector<16x8xi32>
    %1838 = arith.sitofp %1837 : vector<16x8xi32> to vector<16x8xf32>
    %cst_818 = arith.constant dense<0.000000e+00> : vector<16x128xf32>
    %1839 = tpu.matmul %1838, %1711, %cst_818 {dimension_numbers = #tpu.dot_dimension_numbers<[1], [0], [0], [1], [0, 0, 1, 1], [], []>} : vector<16x8xf32>, vector<8x128xf32>, vector<16x128xf32> -> vector<16x128xf32>
    %1840 = tpu.iota {dimensions = array<i32: 0>} : vector<16x4xi32>
    %1841 = tpu.iota {dimensions = array<i32: 1>} : vector<16x4xi32>
    %c16_i32_819 = arith.constant 16 : i32
    %1842 = vector.broadcast %c16_i32_819 : i32 to vector<16x4xi32>
    %1843 = arith.muli %1841, %1842 : vector<16x4xi32>
    %c4_i32_820 = arith.constant 4 : i32
    %1844 = vector.broadcast %c4_i32_820 : i32 to vector<16x4xi32>
    %1845 = arith.muli %1840, %1844 : vector<16x4xi32>
    %1846 = arith.cmpi sle, %1843, %1845 : vector<16x4xi32>
    %c4_i32_821 = arith.constant 4 : i32
    %1847 = vector.broadcast %c4_i32_821 : i32 to vector<16x4xi32>
    %1848 = arith.muli %1840, %1847 : vector<16x4xi32>
    %c1_i32_822 = arith.constant 1 : i32
    %1849 = vector.broadcast %c1_i32_822 : i32 to vector<16x4xi32>
    %1850 = arith.addi %1841, %1849 : vector<16x4xi32>
    %c16_i32_823 = arith.constant 16 : i32
    %1851 = vector.broadcast %c16_i32_823 : i32 to vector<16x4xi32>
    %1852 = arith.muli %1850, %1851 : vector<16x4xi32>
    %1853 = arith.cmpi slt, %1848, %1852 : vector<16x4xi32>
    %1854 = arith.andi %1846, %1853 : vector<16x4xi1>
    %1855 = arith.extui %1854 : vector<16x4xi1> to vector<16x4xi32>
    %1856 = arith.sitofp %1855 : vector<16x4xi32> to vector<16x4xf32>
    %cst_824 = arith.constant dense<0.000000e+00> : vector<16x128xf32>
    %1857 = tpu.matmul %1856, %1821, %cst_824 {dimension_numbers = #tpu.dot_dimension_numbers<[1], [0], [0], [1], [0, 0, 1, 1], [], []>} : vector<16x4xf32>, vector<4x128xf32>, vector<16x128xf32> -> vector<16x128xf32>
    %1858 = arith.truncf %1578 : vector<16x128xf32> to vector<16x128xbf16>
    %c13_825 = arith.constant 13 : index
    %c0_826 = arith.constant 0 : index
    %c0_827 = arith.constant 0 : index
    %1859 = vector.load %arg3[%c13_825, %c0_826, %c0_827] : memref<41x128x128xbf16, #tpu.memory_space<vmem>>, vector<1x128x128xbf16>
    %1860 = vector.shape_cast %1859 : vector<1x128x128xbf16> to vector<128x128xbf16>
    %cst_828 = arith.constant dense<0.000000e+00> : vector<16x128xf32>
    %1861 = tpu.matmul %1858, %1860, %cst_828 {dimension_numbers = #tpu.dot_dimension_numbers<[1], [0], [0], [1], [0, 0, 1, 1], [], []>} : vector<16x128xbf16>, vector<128x128xbf16>, vector<16x128xf32> -> vector<16x128xf32>
    %1862 = arith.truncf %1839 : vector<16x128xf32> to vector<16x128xbf16>
    %c14_829 = arith.constant 14 : index
    %c0_830 = arith.constant 0 : index
    %c0_831 = arith.constant 0 : index
    %1863 = vector.load %arg3[%c14_829, %c0_830, %c0_831] : memref<41x128x128xbf16, #tpu.memory_space<vmem>>, vector<1x128x128xbf16>
    %1864 = vector.shape_cast %1863 : vector<1x128x128xbf16> to vector<128x128xbf16>
    %cst_832 = arith.constant dense<0.000000e+00> : vector<16x128xf32>
    %1865 = tpu.matmul %1862, %1864, %cst_832 {dimension_numbers = #tpu.dot_dimension_numbers<[1], [0], [0], [1], [0, 0, 1, 1], [], []>} : vector<16x128xbf16>, vector<128x128xbf16>, vector<16x128xf32> -> vector<16x128xf32>
    %1866 = arith.addf %1861, %1865 : vector<16x128xf32>
    %1867 = arith.truncf %1857 : vector<16x128xf32> to vector<16x128xbf16>
    %c15_833 = arith.constant 15 : index
    %c0_834 = arith.constant 0 : index
    %c0_835 = arith.constant 0 : index
    %1868 = vector.load %arg3[%c15_833, %c0_834, %c0_835] : memref<41x128x128xbf16, #tpu.memory_space<vmem>>, vector<1x128x128xbf16>
    %1869 = vector.shape_cast %1868 : vector<1x128x128xbf16> to vector<128x128xbf16>
    %cst_836 = arith.constant dense<0.000000e+00> : vector<16x128xf32>
    %1870 = tpu.matmul %1867, %1869, %cst_836 {dimension_numbers = #tpu.dot_dimension_numbers<[1], [0], [0], [1], [0, 0, 1, 1], [], []>} : vector<16x128xbf16>, vector<128x128xbf16>, vector<16x128xf32> -> vector<16x128xf32>
    %1871 = arith.addf %1866, %1870 : vector<16x128xf32>
    %c69_837 = arith.constant 69 : index
    %c0_838 = arith.constant 0 : index
    %1872 = vector.load %arg4[%c69_837, %c0_838] : memref<181x128xf32, #tpu.memory_space<vmem>>, vector<1x128xf32>
    %1873 = vector.broadcast %1872 : vector<1x128xf32> to vector<16x128xf32>
    %1874 = arith.addf %1871, %1873 : vector<16x128xf32>
    %1875 = vector.shape_cast %1874 : vector<16x128xf32> to vector<1x16x128xf32>
    %cst_839 = arith.constant dense<0.000000e+00> : vector<1xf32>
    %1876 = vector.multi_reduction <add>, %1875, %cst_839 [1, 2] : vector<1x16x128xf32> to vector<1xf32>
    %1877 = vector.shape_cast %1876 : vector<1xf32> to vector<1x1x1xf32>
    %1878 = vector.extract %1877[0, 0, 0] : f32 from vector<1x1x1xf32>
    %cst_840 = arith.constant 0.00260416674 : f32
    %1879 = arith.mulf %1878, %cst_840 : f32
    %1880 = vector.broadcast %1879 : f32 to vector<16x128xf32>
    %1881 = arith.subf %1874, %1880 : vector<16x128xf32>
    %1882 = tpu.iota {dimensions = array<i32: 1>} : vector<1x128xi32>
    %c24_i32_841 = arith.constant 24 : i32
    %1883 = vector.broadcast %c24_i32_841 : i32 to vector<1x128xi32>
    %1884 = arith.cmpi slt, %1882, %1883 : vector<1x128xi32>
    %1885 = arith.extui %1884 : vector<1x128xi1> to vector<1x128xi32>
    %1886 = arith.sitofp %1885 : vector<1x128xi32> to vector<1x128xf32>
    %1887 = arith.mulf %1881, %1881 : vector<16x128xf32>
    %1888 = vector.broadcast %1886 : vector<1x128xf32> to vector<16x128xf32>
    %1889 = arith.mulf %1887, %1888 : vector<16x128xf32>
    %1890 = vector.shape_cast %1889 : vector<16x128xf32> to vector<1x16x128xf32>
    %cst_842 = arith.constant dense<0.000000e+00> : vector<1xf32>
    %1891 = vector.multi_reduction <add>, %1890, %cst_842 [1, 2] : vector<1x16x128xf32> to vector<1xf32>
    %1892 = vector.shape_cast %1891 : vector<1xf32> to vector<1x1x1xf32>
    %1893 = vector.extract %1892[0, 0, 0] : f32 from vector<1x1x1xf32>
    %cst_843 = arith.constant 0.00260416674 : f32
    %1894 = arith.mulf %1893, %cst_843 : f32
    %cst_844 = arith.constant 9.99999993E-9 : f32
    %1895 = arith.addf %1894, %cst_844 : f32
    %1896 = math.rsqrt %1895 : f32
    %1897 = vector.broadcast %1896 : f32 to vector<16x128xf32>
    %1898 = arith.mulf %1881, %1897 : vector<16x128xf32>
    %c70_845 = arith.constant 70 : index
    %c0_846 = arith.constant 0 : index
    %1899 = vector.load %arg4[%c70_845, %c0_846] : memref<181x128xf32, #tpu.memory_space<vmem>>, vector<1x128xf32>
    %1900 = vector.broadcast %1899 : vector<1x128xf32> to vector<16x128xf32>
    %1901 = arith.mulf %1898, %1900 : vector<16x128xf32>
    %c71_847 = arith.constant 71 : index
    %c0_848 = arith.constant 0 : index
    %1902 = vector.load %arg4[%c71_847, %c0_848] : memref<181x128xf32, #tpu.memory_space<vmem>>, vector<1x128xf32>
    %1903 = vector.broadcast %1902 : vector<1x128xf32> to vector<16x128xf32>
    %1904 = arith.addf %1901, %1903 : vector<16x128xf32>
    %cst_849 = arith.constant 0.000000e+00 : f32
    %1905 = vector.broadcast %cst_849 : f32 to vector<16x128xf32>
    %1906 = arith.cmpf oge, %1904, %1905 : vector<16x128xf32>
    %c72_850 = arith.constant 72 : index
    %c0_851 = arith.constant 0 : index
    %1907 = vector.load %arg4[%c72_850, %c0_851] : memref<181x128xf32, #tpu.memory_space<vmem>>, vector<1x128xf32>
    %1908 = vector.broadcast %1907 : vector<1x128xf32> to vector<16x128xf32>
    %1909 = arith.mulf %1904, %1908 : vector<16x128xf32>
    %1910 = arith.select %1906, %1904, %1909 : vector<16x128xi1>, vector<16x128xf32>
    %1911 = arith.truncf %1910 : vector<16x128xf32> to vector<16x128xbf16>
    %c16_852 = arith.constant 16 : index
    %c0_853 = arith.constant 0 : index
    %c0_854 = arith.constant 0 : index
    %1912 = vector.load %arg3[%c16_852, %c0_853, %c0_854] : memref<41x128x128xbf16, #tpu.memory_space<vmem>>, vector<1x128x128xbf16>
    %1913 = vector.shape_cast %1912 : vector<1x128x128xbf16> to vector<128x128xbf16>
    %cst_855 = arith.constant dense<0.000000e+00> : vector<16x128xf32>
    %1914 = tpu.matmul %1911, %1913, %cst_855 {dimension_numbers = #tpu.dot_dimension_numbers<[1], [0], [0], [1], [0, 0, 1, 1], [], []>} : vector<16x128xbf16>, vector<128x128xbf16>, vector<16x128xf32> -> vector<16x128xf32>
    %c73_856 = arith.constant 73 : index
    %c0_857 = arith.constant 0 : index
    %1915 = vector.load %arg4[%c73_856, %c0_857] : memref<181x128xf32, #tpu.memory_space<vmem>>, vector<1x128xf32>
    %1916 = vector.broadcast %1915 : vector<1x128xf32> to vector<16x128xf32>
    %1917 = arith.addf %1914, %1916 : vector<16x128xf32>
    %1918 = arith.addf %1917, %1286 : vector<16x128xf32>
    %cst_858 = arith.constant 0.000000e+00 : f32
    %1919 = vector.broadcast %cst_858 : f32 to vector<16x128xf32>
    %1920 = arith.cmpf oge, %1918, %1919 : vector<16x128xf32>
    %c3_859 = arith.constant 3 : index
    %c0_860 = arith.constant 0 : index
    %1921 = vector.load %arg4[%c3_859, %c0_860] : memref<181x128xf32, #tpu.memory_space<vmem>>, vector<1x128xf32>
    %1922 = vector.broadcast %1921 : vector<1x128xf32> to vector<16x128xf32>
    %1923 = arith.mulf %1918, %1922 : vector<16x128xf32>
    %1924 = arith.select %1920, %1918, %1923 : vector<16x128xi1>, vector<16x128xf32>
    %1925 = arith.truncf %1924 : vector<16x128xf32> to vector<16x128xbf16>
    %c4_861 = arith.constant 4 : index
    %c0_862 = arith.constant 0 : index
    %c0_863 = arith.constant 0 : index
    %1926 = vector.load %arg3[%c4_861, %c0_862, %c0_863] : memref<41x128x128xbf16, #tpu.memory_space<vmem>>, vector<1x128x128xbf16>
    %1927 = vector.shape_cast %1926 : vector<1x128x128xbf16> to vector<128x128xbf16>
    %cst_864 = arith.constant dense<0.000000e+00> : vector<16x128xf32>
    %1928 = tpu.matmul %1925, %1927, %cst_864 {dimension_numbers = #tpu.dot_dimension_numbers<[1], [0], [0], [1], [0, 0, 1, 1], [], []>} : vector<16x128xbf16>, vector<128x128xbf16>, vector<16x128xf32> -> vector<16x128xf32>
    %c4_865 = arith.constant 4 : index
    %c0_866 = arith.constant 0 : index
    %1929 = vector.load %arg4[%c4_865, %c0_866] : memref<181x128xf32, #tpu.memory_space<vmem>>, vector<1x128xf32>
    %1930 = vector.broadcast %1929 : vector<1x128xf32> to vector<16x128xf32>
    %1931 = arith.addf %1928, %1930 : vector<16x128xf32>
    %cst_867 = arith.constant 0.000000e+00 : f32
    %1932 = vector.broadcast %cst_867 : f32 to vector<16x128xf32>
    %1933 = arith.maximumf %1931, %1932 : vector<16x128xf32>
    %c0_868 = arith.constant 0 : index
    %c0_869 = arith.constant 0 : index
    %c0_870 = arith.constant 0 : index
    %1934 = vector.load %arg5[%c0_868, %c0_869, %c0_870] : memref<1x16x128xf32, #tpu.memory_space<vmem>>, vector<1x16x128xf32>
    %1935 = vector.shape_cast %1934 : vector<1x16x128xf32> to vector<16x128xf32>
    %1936 = vector.shape_cast %1933 : vector<16x128xf32> to vector<1x16x128xf32>
    tpu.vector_store %arg5[%c0_868, %c0_869, %c0_870], %1936 {strides = array<i32>} : memref<1x16x128xf32, #tpu.memory_space<vmem>>, vector<1x16x128xf32>,
    return
  }
  func.func @transform_0(%arg0: i32) -> (i32, i32, i32) {
    %c0_i32 = arith.constant 0 : i32
    %c0_i32_0 = arith.constant 0 : i32
    %c0_i32_1 = arith.constant 0 : i32
    return %arg0, %c0_i32, %c0_i32_0 : i32, i32, i32
  }
  func.func @transform_1(%arg0: i32) -> (i32, i32, i32) {
    %c0_i32 = arith.constant 0 : i32
    %c0_i32_0 = arith.constant 0 : i32
    %c0_i32_1 = arith.constant 0 : i32
    return %arg0, %c0_i32, %c0_i32_0 : i32, i32, i32
  }
  func.func @transform_2(%arg0: i32) -> (i32, i32, i32) {
    %c0_i32 = arith.constant 0 : i32
    %c0_i32_0 = arith.constant 0 : i32
    %c0_i32_1 = arith.constant 0 : i32
    %c0_i32_2 = arith.constant 0 : i32
    return %c0_i32, %c0_i32_0, %c0_i32_1 : i32, i32, i32
  }
  func.func @transform_3(%arg0: i32) -> (i32, i32) {
    %c0_i32 = arith.constant 0 : i32
    %c0_i32_0 = arith.constant 0 : i32
    %c0_i32_1 = arith.constant 0 : i32
    return %c0_i32, %c0_i32_0 : i32, i32
  }
  func.func @transform_4(%arg0: i32) -> (i32, i32, i32) {
    %c0_i32 = arith.constant 0 : i32
    %c0_i32_0 = arith.constant 0 : i32
    %c0_i32_1 = arith.constant 0 : i32
    return %arg0, %c0_i32, %c0_i32_0 : i32, i32, i32
  }
}

</mosaic_0001>

<bundles_post_ra>
// kernel: fwd.1
= control target key start
LH: loop header
LB: loop body
LE: loop exit
PB: predicated region body
PF: predicated region fallthrough
CT: control target
= control target key end

     0   :  { %9 = vsyncpa [#allocation4], 0  ;;  %s9193_s0 = inlined_call_operand.vmem [shape: f32[2,16,128], index: 0, kind: input, shape index: {}]   ;;  %s9194_s1 = inlined_call_operand.vmem [shape: f32[2,8,128], index: 1, kind: input, shape index: {}]   ;;  %s9195_s2 = inlined_call_operand.hbm [shape: bf16[41,128,128], index: 2, kind: input, shape index: {}]   ;;  %s9196_s3 = inlined_call_operand.hbm [shape: f32[181,128], index: 3, kind: input, shape index: {}]   ;;  %s9197_s4 = inlined_call_operand.vmem [shape: f32[2,16,128], index: 4, kind: output, shape index: {}]  }
   0x1   :  { %10 = vsyncpa [#allocation6], 0  ;;  %s8677_s15 = smov 0  }
   0x2 LB: > { %s152_s18 = sshll.u32 %s9195_s2, 4  ;;  %s8686_s19 = sadd.s32 4294967295, %s8643_s15   ;;  %s8643_s15 = sphi %s8677_s15, %s16_s15   ;;  %s153_s18 = int_to_ptr.hbm [resolvable:$true] %s152_s18 }
   0x3   : > { %p6336_p0 = scmp.ge.s32.totalorder %s8643_s15, 1  ;;  %p141_p1 = scmp.lt.s32.totalorder %s8643_s15, 3 }
   0x4   : > { %p8307_p2 = scmp.eq.s32.totalorder %s8686_s19, 0  ;;  %s8645_s21 = smov [#allocation3]  }
   0x5   : > { %p8691_p3 = pnand %p6336_p0, %p141_p1  ;;  %s154_s22 = sshll.u32 %s8645_s21, 4  ;;  %s155_s22 = int_to_ptr.vmem [resolvable:$true] %s154_s22 }
   0x6   : > { %s166_s25 = sshll.u32 %s9196_s3, 4  ;;  %s8646_s26 = smov [#allocation5]   ;;  %s167_s25 = int_to_ptr.hbm [resolvable:$true] %s166_s25 }
   0x7   : > { %p8300_p4 = pneg %p8691_p3  ;;  %s168_s27 = sshll.u32 %s8646_s26, 4  ;;  %s169_s27 = int_to_ptr.vmem [resolvable:$true] %s168_s27 }
   0x8   : > { %s8647_s28 = smov 64   ;;  %s8648_s29 = smov 4  }
   0x9   : > { %p8301_p5 = pnand %p8307_p2, %p8300_p4  ;;  %s8649_s30 = smov 128  }
   0xa   : > { %s8650_s5 = smov 8   ;;  %199 = sbr.rel (%p8691_p3) target bundleno = 14908 (0x3a3c), region = 36 }
   0xb   : > { %8303 = dma.hbm_to_vmem [thread:$0]  (!%p8301_p5), %s153_s18, 41984, %s155_s22, [#allocation4], %s8647_s28, %s8647_s28, %s8648_s29  }
   0xc   : > { %8306 = dma.hbm_to_vmem [thread:$0]  (!%p8301_p5), %s167_s25, 2944, %s169_s27, [#allocation6], %s8649_s30, %s8649_s30, %s8650_s5  }
   0xf   : > { %8634 = dma.done.wait (%p8307_p2), [#allocation4], 41984  }
  0x10   : > { %8636 = vsyncadd (%p8307_p2), [#allocation4], 4294925312 }
  0x11   : > { %8638 = dma.done.wait (%p8307_p2), [#allocation6], 2944  }
  0x12   : > { %8640 = vsyncadd (%p8307_p2), [#allocation6], 4294964352  ;;  %p235_p6 = scmp.lt.s32.totalorder %s8686_s19, 1  ;;  %v7775_v0 = vld [vmem:[#allocation3 + $0x38] sm:$0xff]  ;;  %v7774_v4 = vld [vmem:[#allocation3 + $0x30] sm:$0xff]  ;;  %vm344_vm0 = vcmask 1040384   ;;  %v598_v55 = vlaneseq }
  0x13   : > { %v7783_v1 = vld [vmem:[#allocation3 + $0x78] sm:$0xff]  ;;  %327 = vmatpush.bf16.msra.mxu0 %v7775_v0  ;;  %v7782_v5 = vld [vmem:[#allocation3 + $0x70] sm:$0xff]  ;;  %v7773_v8 = vld [vmem:[#allocation3 + $0x28] sm:$0xff]  ;;  %vm349_vm3 = vcmask 1046528   ;;  %vm354_vm4 = vcmask 1045504   ;;  %v8651_v54 = vmov 0.0  }
  0x14   : > { %v7791_v2 = vld [vmem:[#allocation3 + $0xb8] sm:$0xff]  ;;  %559 = vmatpush.bf16.msra.mxu1 %v7783_v1  ;;  %s9214_s19 = smov (!%p235_p6, %s8686_s19), 1  ;;  %v7790_v6 = vld [vmem:[#allocation3 + $0xb0] sm:$0xff]  ;;  %v7781_v9 = vld [vmem:[#allocation3 + $0x68] sm:$0xff]  ;;  %1425 = vst [vmem:[#allocation2] sm:$0x3] %v8651_v54 }
  0x15   : > { %v7799_v3 = vld [vmem:[#allocation3 + $0xf8] sm:$0xff]  ;;  %572 = vmatpush.bf16.msra.mxu2 %v7791_v2  ;;  %v7798_v7 = vld [vmem:[#allocation3 + $0xf0] sm:$0xff]  ;;  %s7766_s6 = sshll.u32 %s9214_s19, 4  ;;  %s6345_s7 = sshll.u32 %s9214_s19, 3  ;;  %v7789_v10 = vld [vmem:[#allocation3 + $0xa8] sm:$0xff]  ;;  %v8747_v56 = vand.u32 127, %v598_v55 }
  0x16   : > { %585 = vmatpush.bf16.msra.mxu3 %v7799_v3  ;;  %v7797_v11 = vld [vmem:[#allocation3 + $0xe8] sm:$0xff]  ;;  %s239_s10 = scalar_lea.vmem %s9193_s0, %s7766_s6  ;;  %s243_s13 = scalar_lea.vmem %s9194_s1, %s6345_s7  ;;  %v7772_v12 = vld [vmem:[#allocation3 + $0x20] sm:$0xff]  ;;  %v7771_v16 = vld [vmem:[#allocation3 + $0x18] sm:$0xff]  ;;  %1426 = vst [vmem:[#allocation2 + $0x12] sm:$0x3] %v8651_v54  ;;  %v8749_v57 = vshrl.u32 %v598_v55, 7 }
  0x17   : > { %328 = vmatpush.bf16.msra.mxu0 %v7774_v4  ;;  %v7780_v13 = vld [vmem:[#allocation3 + $0x60] sm:$0xff]  ;;  %v7779_v17 = vld [vmem:[#allocation3 + $0x58] sm:$0xff]  ;;  %v249_v18 = vld [vmem:[%s239_s10] sm:$0xff]  ;;  %v8752_v58 = vadd.s32 1, %v8747_v56  ;;  %v8755_v62 = vmul.u32 16, %v8747_v56  ;;  %v602_v1 = vmul.u32 8, %v8747_v56 }
  0x18   : > { %560 = vmatpush.bf16.msra.mxu1 %v7782_v5  ;;  %v7788_v14 = vld [vmem:[#allocation3 + $0xa0] sm:$0xff]  ;;  %v251_v19 = vld [vmem:[%s243_s13] sm:$0xff]  ;;  %v7787_v20 = vld [vmem:[#allocation3 + $0x98] sm:$0xff]  ;;  %vm252_vm1 = vcmp.ge.f32.partialorder %v249_v18, 0.0  ;;  %v637_v63 = vmul.u32 8, %v8749_v57  ;;  %v603_v2 = vmul.u32 16, %v8749_v57 }
  0x19   : > { %573 = vmatpush.bf16.msra.mxu2 %v7790_v6  ;;  %v7796_v15 = vld [vmem:[#allocation3 + $0xe0] sm:$0xff]  ;;  %v7795_v21 = vld [vmem:[#allocation3 + $0xd8] sm:$0xff]  ;;  %v250_v22 = vld [vmem:[%s239_s10 + $0x8] sm:$0xff]  ;;  %v342_v23 = vrot.slane %v251_v19, 7  ;;  %v8759_v0 = vmul.u32 16, %v8752_v58  ;;  %v606_v3 = vmul.u32 8, %v8752_v58 }
  0x1a   : > { %586 = vmatpush.bf16.msra.mxu3 %v7798_v7  ;;  %v7770_v25 = vld [vmem:[#allocation3 + $0x10] sm:$0xff]  ;;  %vm253_vm2 = vcmp.ge.f32.partialorder %v250_v22, 0.0  ;;  %v8326_v27 = vld [vmem:[#allocation5] ss:$0 sm:$0xff]  ;;  %vm8729_vm5 = vmneg %vm344_vm0  ;;  %vm8765_vm7 = vcmp.le.s32.totalorder %v8755_v62, %v637_v63  ;;  %v8775_v7 = vadd.s32 8, %v8749_v57  ;;  %vm8779_vm9 = vcmp.le.s32.totalorder %v602_v1, %v603_v2 }
  0x1b   : > { %329 = vmatpush.bf16.msra.mxu0 %v7773_v8  ;;  %v345_v24 = vsel %vm344_vm0, 0.0, %v342_v23  ;;  %v7778_v26 = vld [vmem:[#allocation3 + $0x50] sm:$0xff]  ;;  %v346_v28 = vsel %vm344_vm0, %v342_v23, 0.0  ;;  %v7769_v36 = vld [vmem:[#allocation3 + $0x8] sm:$0xff]  ;;  %v256_v40 = vmul.f32 %v8326_v27, %v249_v18  ;;  %v257_v41 = vmul.f32 %v8326_v27, %v250_v22  ;;  %vm6478_vm6 = vmpackc.low %vm8729_vm5, %vm8729_vm5 }
  0x1c   : > { %561 = vmatpush.bf16.msra.mxu1 %v7781_v9  ;;  %v350_v29 = vrot.slane %v345_v24, 1  ;;  %v355_v30 = vrot.slane %v345_v24, 2  ;;  %v7786_v31 = vld [vmem:[#allocation3 + $0x90] sm:$0xff]  ;;  %v351_v34 = vrot.slane %v346_v28, 1  ;;  %v356_v35 = vrot.slane %v346_v28, 2  ;;  %v7777_v37 = vld [vmem:[#allocation3 + $0x48] sm:$0xff] }
  0x1d   : > { %574 = vmatpush.bf16.msra.mxu2 %v7789_v10  ;;  %v7794_v32 = vld [vmem:[#allocation3 + $0xd0] sm:$0xff]  ;;  %v7785_v38 = vld [vmem:[#allocation3 + $0x88] sm:$0xff]  ;;  %v7768_v42 = vld [vmem:[#allocation3] sm:$0xff]  ;;  %v258_v46 = vsel %vm252_vm1, %v249_v18, %v256_v40  ;;  %v259_v47 = vsel %vm253_vm2, %v250_v22, %v257_v41  ;;  %v6479_v51 = vpack.c.bf16 %v342_v23, %v342_v23  ;;  %vm8770_vm8 = vcmp.lt.s32.totalorder %v637_v63, %v8759_v0 }
  0x1e   : > { %587 = vmatpush.bf16.msra.mxu3 %v7797_v11  ;;  %v7793_v39 = vld [vmem:[#allocation3 + $0xc8] sm:$0xff]  ;;  %v7776_v43 = vld [vmem:[#allocation3 + $0x40] sm:$0xff]  ;;  %v352_v48 = vsel %vm349_vm3, %v350_v29, %v351_v34  ;;  %v357_v49 = vsel %vm354_vm4, %v355_v30, %v356_v35  ;;  %v260_v50 = vpack.c.bf16 %v259_v47, %v258_v46  ;;  %vm8785_vm10 = vcmp.lt.s32.totalorder %v603_v2, %v606_v3  ;;  %vm644_vm11 = vmand %vm8765_vm7, %vm8770_vm8 }
  0x1f   : > { %330 = vmatpush.bf16.msra.mxu0 %v7772_v12  ;;  %v7784_v44 = vld [vmem:[#allocation3 + $0x80] sm:$0xff]  ;;  %v360_v52 = vpack.c.bf16 %v352_v48, %v352_v48  ;;  %v361_v53 = vpack.c.bf16 %v357_v49, %v357_v49  ;;  %vm608_vm12 = vmand %vm8779_vm9, %vm8785_vm10  ;;  %vm650_vm13 = vcmask 64512   ;;  %vm611_vm14 = vcmask 130048   ;;  %v7831_v22 = vld [vmem:[#allocation3 + $0x938] sm:$0xff] }
  0x20   : > { %562 = vmatpush.bf16.msra.mxu1 %v7780_v13  ;;  %v7792_v45 = vld [vmem:[#allocation3 + $0xc0] sm:$0xff]  ;;  %v7830_v29 = vld [vmem:[#allocation3 + $0x930] sm:$0xff]  ;;  %v7829_v35 = vld [vmem:[#allocation3 + $0x928] sm:$0xff]  ;;  %vm858_vm5 = vcmp.lt.s32.totalorder %v8747_v56, 16 }
  0x21   : > { %575 = vmatpush.bf16.msra.mxu2 %v7788_v14  ;;  %v8328_v60 = vld [vmem:[#allocation5 + $0x2] ss:$0 sm:$0xff]  ;;  %v8327_v8 = vld [vmem:[#allocation5 + $0x1] ss:$0 sm:$0xff]  ;;  %v7806_v30 = vld [vmem:[#allocation3 + $0x870] sm:$0xff] }
  0x22   : > { %588 = vmatpush.bf16.msra.mxu3 %v7796_v15  ;;  %v7814_v34 = vld [vmem:[#allocation3 + $0x8b0] sm:$0xff]  ;;  %v7804_v40 = vld [vmem:[#allocation3 + $0x860] sm:$0xff]  ;;  %v7825_v49 = vld [vmem:[#allocation3 + $0x908] sm:$0xff] }
  0x23   : > { %331 = vmatpush.bf16.msra.mxu0 %v7771_v16  ;;  %v638_v16 = vmul.u32 8, %v8775_v7  ;;  %v7820_v41 = vld [vmem:[#allocation3 + $0x8e0] sm:$0xff]  ;;  %v7826_v46 = vld [vmem:[#allocation3 + $0x910] sm:$0xff]  ;;  %v7809_v2 = vld [vmem:[#allocation3 + $0x888] sm:$0xff] }
  0x24   : > { %563 = vmatpush.bf16.msra.mxu1 %v7779_v17  ;;  %v7802_v47 = vld [vmem:[#allocation3 + $0x850] sm:$0xff]  ;;  %v7879_v58 = vld [vmem:[#allocation3 + $0x2b8] sm:$0xff] }
  0x25   : > { %576 = vmatpush.bf16.msra.mxu2 %v7787_v20  ;;  %v8805_v20 = vsel %vm644_vm11, 1.0, %v8651_v54  ;;  %vm8811_vm15 = vcmp.le.s32.totalorder %v8755_v62, %v638_v16  ;;  %vm8816_vm1 = vcmp.lt.s32.totalorder %v638_v16, %v8759_v0  ;;  %v7818_v48 = vld [vmem:[#allocation3 + $0x8d0] sm:$0xff] }
  0x26   : > { %589 = vmatpush.bf16.msra.mxu3 %v7795_v21  ;;  %v6481_v21 = vsel %vm608_vm12, 1.0, %v8651_v54  ;;  %vm645_vm2 = vmand %vm8811_vm15, %vm8816_vm1  ;;  %v7810_v63 = vld [vmem:[#allocation3 + $0x890] sm:$0xff] }
  0x27   : > { %332 = vmatpush.bf16.msra.mxu0 %v7770_v25  ;;  %v7807_v25 = vld [vmem:[#allocation3 + $0x878] sm:$0xff]  ;;  %v8828_v33 = vsel %vm645_vm2, 1.0, %v8651_v54  ;;  %vm1233_vm2 = vcmp.lt.s32.totalorder %v8747_v56, 24 }
  0x28   : > { %564 = vmatpush.bf16.msra.mxu1 %v7778_v26  ;;  %v7823_v26 = vld [vmem:[#allocation3 + $0x8f8] sm:$0xff] }
  0x29   : > { %577 = vmatpush.bf16.msra.mxu2 %v7786_v31  ;;  %v7822_v31 = vld [vmem:[#allocation3 + $0x8f0] sm:$0xff] }
  0x2a   : > { %590 = vmatpush.bf16.msra.mxu3 %v7794_v32  ;;  %v7815_v32 = vld [vmem:[#allocation3 + $0x8b8] sm:$0xff] }
  0x2b   : > { %333 = vmatpush.bf16.msra.mxu0 %v7769_v36  ;;  %v7805_v36 = vld [vmem:[#allocation3 + $0x868] sm:$0xff] }
  0x2c   : > { %565 = vmatpush.bf16.msra.mxu1 %v7777_v37  ;;  %v7821_v37 = vld [vmem:[#allocation3 + $0x8e8] sm:$0xff] }
  0x2d   : > { %578 = vmatpush.bf16.msra.mxu2 %v7785_v38  ;;  %v7813_v38 = vld [vmem:[#allocation3 + $0x8a8] sm:$0xff] }
  0x2e   : > { %591 = vmatpush.bf16.msra.mxu3 %v7793_v39  ;;  %v7828_v39 = vld [vmem:[#allocation3 + $0x920] sm:$0xff] }
  0x2f   : > { %334 = vmatpush.bf16.msra.mxu0 %v7768_v42  ;;  %v7812_v42 = vld [vmem:[#allocation3 + $0x8a0] sm:$0xff] }
  0x30   : > { %566 = vmatpush.bf16.msra.mxu1 %v7776_v43  ;;  %v7827_v43 = vld [vmem:[#allocation3 + $0x918] sm:$0xff] }
  0x31   : > { %579 = vmatpush.bf16.msra.mxu2 %v7784_v44  ;;  %v7803_v44 = vld [vmem:[#allocation3 + $0x858] sm:$0xff] }
  0x32   : > { %592 = vmatpush.bf16.msra.mxu3 %v7792_v45  ;;  %335 = vmatmul.bf16.vlgmr.msra.gmra.mxu0 %v260_v50  ;;  %v7819_v45 = vld [vmem:[#allocation3 + $0x8d8] sm:$0xff]  ;;  %v7801_v50 = vld [vmem:[#allocation3 + $0x848] sm:$0xff] }
  0x33   : > { %6480 = vmatmul.msk.bf16.vlgmr.msra.gmra.mxu1 %vm6478_vm6, %v6479_v51  ;;  %v7817_v51 = vld [vmem:[#allocation3 + $0x8c8] sm:$0xff] }
  0x34   : > { %580 = vmatmul.bf16.vlgmr.msra.gmra.mxu2 %v360_v52  ;;  %1053 = vmatpush.bf16.msrb.mxu1 %v7823_v26  ;;  %v7824_v52 = vld [vmem:[#allocation3 + $0x900] sm:$0xff] }
  0x35   : > { %593 = vmatmul.bf16.vlgmr.msra.gmra.mxu3 %v361_v53  ;;  %v7800_v53 = vld [vmem:[#allocation3 + $0x840] sm:$0xff] }
  0x36   : > { %826 = vmatpush.bf16.msrb.mxu3 %v7807_v25  ;;  %v8330_v25 = vld [vmem:[#allocation5 + $0xa5] ss:$0 sm:$0xff] }
  0x38   : > { %1054 = vmatpush.bf16.msrb.mxu1 %v7822_v31 }
  0x3a   : > { %827 = vmatpush.bf16.msrb.mxu3 %v7806_v30 }
  0x3c   : > { %1055 = vmatpush.bf16.msrb.mxu1 %v7821_v37 }
  0x3e   : > { %828 = vmatpush.bf16.msrb.mxu3 %v7805_v36 }
  0x40   : > { %1056 = vmatpush.bf16.msrb.mxu1 %v7820_v41 }
  0x42   : > { %829 = vmatpush.bf16.msrb.mxu3 %v7804_v40 }
  0x44   : > { %1057 = vmatpush.bf16.msrb.mxu1 %v7819_v45 }
  0x46   : > { %830 = vmatpush.bf16.msrb.mxu3 %v7803_v44 }
  0x48   : > { %1058 = vmatpush.bf16.msrb.mxu1 %v7818_v48 }
  0x4a   : > { %831 = vmatpush.bf16.msrb.mxu3 %v7802_v47 }
  0x4c   : > { %1059 = vmatpush.bf16.msrb.mxu1 %v7817_v51 }
  0x4e   : > { %832 = vmatpush.bf16.msrb.mxu3 %v7801_v50 }
  0x52   : > { %833 = vmatpush.bf16.msrb.mxu3 %v7800_v53 }
  0xaf   : > { %v336_v59 = vpop.f32.mrf.mxu0 }
  0xb0   : > { %v568_v61 = vpop.f32.mrf.mxu1  ;;  %v8798_v17 = vadd.f32 %v8327_v8, %v336_v59 }
  0xb1   : > { %v569_v4 = vadd.f32 %v8328_v60, %v568_v61  ;;  %v7811_v60 = vld [vmem:[#allocation3 + $0x898] sm:$0xff]  ;;  %v7816_v61 = vld [vmem:[#allocation3 + $0x8c0] sm:$0xff] }
  0xb2   : > { %1060 = vmatpush.bf16.msrb.mxu1 %v7816_v61  ;;  %v7838_v61 = vld [vmem:[#allocation3 + $0x170] sm:$0xff] }
  0xb7   : > { %v581_v11 = vpop.f32.mrf.mxu2  ;;  %v338_v14 = vpop.f32.mrf.mxu0 }
  0xb8   : > { %v594_v12 = vpop.f32.mrf.mxu3  ;;  %v582_v13 = vadd.f32 %v581_v11, %v569_v4  ;;  %v570_v15 = vpop.f32.mrf.mxu1  ;;  %v8800_v18 = vadd.f32 %v8327_v8, %v338_v14  ;;  %v7808_v4 = vld [vmem:[#allocation3 + $0x880] sm:$0xff] }
  0xba   : > { %v8802_v19 = vadd.f32 %v594_v12, %v582_v13  ;;  %629 = vmatpush.msrb.mxu0 %v8800_v18  ;;  %v680_v55 = vpack.c.bf16 %v8800_v18, %v8798_v17  ;;  %v8329_v13 = vld [vmem:[#allocation5 + $0xa9] ss:$0 sm:$0xff] }
  0xbc   : > { %672 = vmatpush.msrb.mxu2 %v8802_v19  ;;  %630 = vmatpush.msrb.mxu0 %v8798_v17  ;;  %v926_v59 = vpack.c.bf16 %v8802_v19, %v8802_v19 }
  0xbd   : > { %6485 = vmatmul.msk.f32.vlgmr.msrb.gmra.mxu2 %vm650_vm13, %v8805_v20  ;;  %6482 = vmatmul.msk.f32.vlgmr.msrb.gmra.mxu0 %vm611_vm14, %v6481_v21 }
  0xbe   : > { %992 = vmatpush.bf16.msra.mxu0 %v7831_v22  ;;  %764 = vmatpush.bf16.msra.mxu2 %v7815_v32 }
  0xbf   : > { %v583_v27 = vpop.f32.mrf.mxu2  ;;  %834 = vmatmul.bf16.vlgmr.msrb.gmra.mxu3 %v680_v55 }
  0xc0   : > { %v596_v28 = vpop.f32.mrf.mxu3 }
  0xc2   : > { %993 = vmatpush.bf16.msra.mxu0 %v7830_v29  ;;  %765 = vmatpush.bf16.msra.mxu2 %v7814_v34 }
  0xc5   : > { %6486 = vmatmul.msk.f32.gmra.mxu2 %vm650_vm13, %v8828_v33 }
  0xc6   : > { %994 = vmatpush.bf16.msra.mxu0 %v7829_v35  ;;  %766 = vmatpush.bf16.msra.mxu2 %v7813_v38 }
  0xca   : > { %995 = vmatpush.bf16.msra.mxu0 %v7828_v39  ;;  %767 = vmatpush.bf16.msra.mxu2 %v7812_v42 }
  0xce   : > { %996 = vmatpush.bf16.msra.mxu0 %v7827_v43  ;;  %768 = vmatpush.bf16.msra.mxu2 %v7811_v60  ;;  %v8841_v43 = vsel %vm858_vm5, 1.0, %v8651_v54  ;;  %v7839_v60 = vld [vmem:[#allocation3 + $0x178] sm:$0xff] }
  0xd2   : > { %997 = vmatpush.bf16.msra.mxu0 %v7826_v46  ;;  %769 = vmatpush.bf16.msra.mxu2 %v7810_v63  ;;  %v7837_v63 = vld [vmem:[#allocation3 + $0x168] sm:$0xff] }
  0xd6   : > { %998 = vmatpush.bf16.msra.mxu0 %v7825_v49  ;;  %770 = vmatpush.bf16.msra.mxu2 %v7809_v2 }
  0xda   : > { %999 = vmatpush.bf16.msra.mxu0 %v7824_v52  ;;  %771 = vmatpush.bf16.msra.mxu2 %v7808_v4 }
  0xdd   : > { %1000 = vmatmul.bf16.vlgmr.msra.gmra.mxu0 %v926_v59 }
  0xde   : > { %1205 = vmatpush.bf16.msrb.mxu2 %v7839_v60 }
  0xe2   : > { %1206 = vmatpush.bf16.msrb.mxu2 %v7838_v61 }
  0xe6   : > { %1207 = vmatpush.bf16.msrb.mxu2 %v7837_v63 }
 0x13a   : > { %v632_v5 = vpop.f32.mrf.mxu0 }
 0x13b   : > { %v908_v6 = vpack.c.bf16 %v632_v5, %v632_v5 }
 0x13d   : > { %1061 = vmatmul.bf16.vlgmr.msrb.gmra.mxu1 %v908_v6 }
 0x140   : > { %v674_v8 = vpop.f32.mrf.mxu2 }
 0x142   : > { %v835_v22 = vpop.f32.mrf.mxu3 }
 0x148   : > { %v677_v9 = vpop.f32.mrf.mxu2 }
 0x149   : > { %v698_v10 = vpack.c.bf16 %v677_v9, %v674_v8 }
 0x14a   : > { %v837_v26 = vpop.f32.mrf.mxu3 }
 0x14b   : > { %772 = vmatmul.bf16.vlgmr.msra.gmra.mxu2 %v698_v10 }
 0x15a   : > { %v1001_v11 = vpop.f32.mrf.mxu0 }
 0x162   : > { %v1003_v12 = vpop.f32.mrf.mxu0 }
 0x1ba   : > { %v1062_v14 = vpop.f32.mrf.mxu1 }
 0x1bb   : > { %v1063_v15 = vadd.f32 %v1062_v14, %v1001_v11 }
 0x1bd   : > { %v8836_v16 = vadd.f32 %v8329_v13, %v1063_v15 }
 0x1bf   : > { %1069 = vadd.xlane.f32.xlu1 %v8836_v16 }
 0x1c2   : > { %v1064_v21 = vpop.f32.mrf.mxu1 }
 0x1ce   : > { %v773_v23 = vpop.f32.mrf.mxu2 }
 0x1cf   : > { %v836_v24 = vadd.f32 %v835_v22, %v773_v23 }
 0x1d1   : > { %v842_v29 = vadd.f32 %v8330_v25, %v836_v24  ;;  %v7836_v24 = vld [vmem:[#allocation3 + $0x160] sm:$0xff] }
 0x1d2   : > { %1208 = vmatpush.bf16.msrb.mxu2 %v7836_v24 }
 0x1d6   : > { %v775_v27 = vpop.f32.mrf.mxu2 }
 0x1d7   : > { %v838_v28 = vadd.f32 %v837_v26, %v775_v27  ;;  %v7834_v26 = vld [vmem:[#allocation3 + $0x150] sm:$0xff]  ;;  %v7833_v27 = vld [vmem:[#allocation3 + $0x148] sm:$0xff] }
 0x1d9   : > { %v843_v30 = vadd.f32 %v8330_v25, %v838_v28  ;;  %v7835_v25 = vld [vmem:[#allocation3 + $0x158] sm:$0xff]  ;;  %v7832_v28 = vld [vmem:[#allocation3 + $0x140] sm:$0xff] }
 0x1da   : > { %1209 = vmatpush.bf16.msrb.mxu2 %v7835_v25 }
 0x1db   : > { %v844_v31 = vadd.f32 %v843_v30, %v842_v29 }
 0x1dd   : > { %845 = vadd.xlane.f32.xlu0 %v844_v31 }
 0x1de   : > { %1210 = vmatpush.bf16.msrb.mxu2 %v7834_v26 }
 0x1e2   : > { %1211 = vmatpush.bf16.msrb.mxu2 %v7833_v27 }
 0x1e6   : > { %1212 = vmatpush.bf16.msrb.mxu2 %v7832_v28 }
 0x232   : > { %v1070_v2 = vpop.xlane.xlu1 %1069 }
 0x233   : > { %v1071_v4 = vrot.slane %v1070_v2, 4 }
 0x235   : > { %v1072_v6 = vadd.f32 %v1071_v4, %v1070_v2 }
 0x237   : > { %v1073_v8 = vrot.slane %v1072_v6, 2 }
 0x239   : > { %v1074_v12 = vadd.f32 %v1073_v8, %v1072_v6 }
 0x23b   : > { %v1075_v15 = vrot.slane %v1074_v12, 1 }
 0x23d   : > { %v1076_v23 = vadd.f32 %v1075_v15, %v1074_v12  ;;  %v8337_v15 = vld [vmem:[#allocation5 + $0x5] ss:$0 sm:$0xff] }
 0x250   : > { %v846_v32 = vpop.xlane.xlu0 %845 }
 0x251   : > { %v847_v34 = vrot.slane %v846_v32, 4 }
 0x253   : > { %v848_v35 = vadd.f32 %v847_v34, %v846_v32  ;;  %v8332_v34 = vld [vmem:[#allocation5 + $0xa7] ss:$0 sm:$0xff] }
 0x255   : > { %v849_v36 = vrot.slane %v848_v35, 2 }
 0x257   : > { %v850_v37 = vadd.f32 %v849_v36, %v848_v35 }
 0x259   : > { %v851_v38 = vrot.slane %v850_v37, 1 }
 0x25b   : > { %v852_v39 = vadd.f32 %v851_v38, %v850_v37  ;;  %v8333_v37 = vld [vmem:[#allocation5 + $0xa8] ss:$0 sm:$0xff] }
 0x25d   : > { %8112 = vpush %v852_v39 }
 0x28e   : > { %s8113_s14 = spop %8112 }
 0x28f   : > { %s854_s16 = smul.f32 0.00390625, %s8113_s14 }
 0x291   : > { %v855_v40 = vstv %s854_s16 }
 0x292   : > { %v856_v41 = vsub.f32 %v842_v29, %v855_v40  ;;  %v857_v42 = vsub.f32 %v843_v30, %v855_v40  ;;  %v8331_v29 = vld [vmem:[#allocation5 + $0xa6] ss:$0 sm:$0xff] }
 0x294   : > { %v861_v44 = vmul.f32 %v856_v41, %v856_v41  ;;  %v862_v45 = vmul.f32 %v857_v42, %v857_v42 }
 0x296   : > { %v863_v46 = vmul.f32 %v8841_v43, %v861_v44  ;;  %v864_v47 = vmul.f32 %v8841_v43, %v862_v45 }
 0x298   : > { %v865_v48 = vadd.f32 %v864_v47, %v863_v46 }
 0x29a   : > { %866 = vadd.xlane.f32.xlu0 %v865_v48 }
 0x30d   : > { %v867_v49 = vpop.xlane.xlu0 %866 }
 0x30e   : > { %v868_v50 = vrot.slane %v867_v49, 4 }
 0x310   : > { %v869_v51 = vadd.f32 %v868_v50, %v867_v49 }
 0x312   : > { %v870_v52 = vrot.slane %v869_v51, 2 }
 0x314   : > { %v871_v53 = vadd.f32 %v870_v52, %v869_v51 }
 0x316   : > { %v872_v55 = vrot.slane %v871_v53, 1 }
 0x318   : > { %v873_v59 = vadd.f32 %v872_v55, %v871_v53  ;;  %v8336_v55 = vld [vmem:[#allocation5 + $0x9e] ss:$0 sm:$0xff] }
 0x31a   : > { %8114 = vpush %v873_v59 }
 0x34b   : > { %s8115_s17 = spop %8114 }
 0x34c   : > { %s875_s18 = smul.f32 0.00390625, %s8115_s17 }
 0x34e   : > { %s876_s20 = sadd.f32 1e-08, %s875_s18 }
 0x350   : > { %v877_v5 = vstv %s876_s20 }
 0x351   : > { %8509 = vrsqrt.f32 %v877_v5  ;;  %vm884_vm7 = vweird.f32 %v877_v5 }
 0x357   : > { %v8510_v9 = vpop.eup %8509 }
 0x358   : > { %v879_v10 = vmul.f32 %v8510_v9, %v877_v5  ;;  %vm885_vm6 = vweird.f32 %v8510_v9 }
 0x359   : > { %vm886_vm8 = vmor %vm884_vm7, %vm885_vm6 }
 0x35a   : > { %v880_v11 = vmul.f32 %v8510_v9, %v879_v10 }
 0x35c   : > { %v881_v13 = vmul.f32 0.5, %v880_v11 }
 0x35e   : > { %v882_v14 = vsub.f32 1.5, %v881_v13 }
 0x360   : > { %v883_v21 = vmul.f32 %v8510_v9, %v882_v14 }
 0x362   : > { %v887_v22 = vsel %vm886_vm8, %v8510_v9, %v883_v21 }
 0x363   : > { %8116 = vpush %v887_v22 }
 0x364   : > { %8118 = vpush %v1076_v23 }
 0x394   : > { %s8117_s21 = spop %8116 }
 0x395   : > { %v889_v30 = vstv %s8117_s21  ;;  %s8119_s22 = spop %8118 }
 0x396   : > { %v890_v31 = vmul.f32 %v889_v30, %v856_v41  ;;  %v891_v32 = vmul.f32 %v889_v30, %v857_v42  ;;  %s1078_s23 = smul.f32 0.0078125, %s8119_s22  ;;  %v8334_v41 = vld [vmem:[#allocation5 + $0x9c] ss:$0 sm:$0xff] }
 0x398   : > { %v894_v35 = vmul.f32 %v8331_v29, %v890_v31  ;;  %v895_v36 = vmul.f32 %v8331_v29, %v891_v32  ;;  %v1079_v38 = vstv %s1078_s23 }
 0x399   : > { %v8846_v39 = vsub.f32 %v8836_v16, %v1079_v38  ;;  %v8335_v16 = vld [vmem:[#allocation5 + $0x9d] ss:$0 sm:$0xff] }
 0x39a   : > { %v898_v40 = vadd.f32 %v8332_v34, %v894_v35  ;;  %v899_v44 = vadd.f32 %v8332_v34, %v895_v36 }
 0x39b   : > { %v1081_v45 = vmul.f32 %v8846_v39, %v8846_v39 }
 0x39c   : > { %vm900_vm9 = vcmp.ge.f32.partialorder %v898_v40, 0.0  ;;  %vm901_vm10 = vcmp.ge.f32.partialorder %v899_v44, 0.0  ;;  %v904_v46 = vmul.f32 %v8333_v37, %v898_v40  ;;  %v905_v47 = vmul.f32 %v8333_v37, %v899_v44 }
 0x39d   : > { %v1082_v42 = vmul.f32 %v8841_v43, %v1081_v45 }
 0x39e   : > { %v906_v48 = vsel %vm900_vm9, %v898_v40, %v904_v46  ;;  %v907_v49 = vsel %vm901_vm10, %v899_v44, %v905_v47  ;;  %vm1285_vm10 = vcmask 1041408  }
 0x39f   : > { %v1119_v50 = vadd.f32 %v906_v48, %v8798_v17  ;;  %v1120_v51 = vadd.f32 %v907_v49, %v8800_v18  ;;  %1083 = vadd.xlane.f32.xlu1 %v1082_v42 }
 0x3a1   : > { %v1123_v52 = vmul.f32 %v8334_v41, %v1119_v50  ;;  %v1124_v53 = vmul.f32 %v8334_v41, %v1120_v51  ;;  %v8863_v41 = vsel %vm1233_vm2, 1.0, %v8651_v54 }
 0x3a3   : > { %v1127_v59 = vadd.f32 %v8335_v16, %v1123_v52  ;;  %v1128_v60 = vadd.f32 %v8335_v16, %v1124_v53 }
 0x3a5   : > { %vm1129_vm11 = vcmp.ge.f32.partialorder %v1127_v59, 0.0  ;;  %vm1130_vm12 = vcmp.ge.f32.partialorder %v1128_v60, 0.0  ;;  %v1133_v61 = vmul.f32 %v8336_v55, %v1127_v59  ;;  %v1134_v63 = vmul.f32 %v8336_v55, %v1128_v60 }
 0x3a7   : > { %v8853_v2 = vsel %vm1129_vm11, %v1127_v59, %v1133_v61  ;;  %v8855_v4 = vsel %vm1130_vm12, %v1128_v60, %v1134_v63  ;;  %vm1340_vm11 = vcmask 1044480   ;;  %vm1358_vm12 = vcmask 1043456  }
 0x3a8   : > { %v1137_v5 = vpack.c.bf16 %v8855_v4, %v8853_v2 }
 0x3aa   : > { %1213 = vmatmul.bf16.vlgmr.msrb.gmra.mxu2 %v1137_v5 }
 0x412   : > { %v1084_v6 = vpop.xlane.xlu1 %1083 }
 0x413   : > { %v1085_v8 = vrot.slane %v1084_v6, 4 }
 0x415   : > { %v1086_v9 = vadd.f32 %v1085_v8, %v1084_v6 }
 0x417   : > { %v1087_v10 = vrot.slane %v1086_v9, 2 }
 0x419   : > { %v1088_v11 = vadd.f32 %v1087_v10, %v1086_v9 }
 0x41b   : > { %v1089_v12 = vrot.slane %v1088_v11, 1 }
 0x41d   : > { %v1090_v13 = vadd.f32 %v1089_v12, %v1088_v11 }
 0x41f   : > { %8120 = vpush %v1090_v13  ;;  %v8342_v13 = vld [vmem:[#allocation5 + $0x6] ss:$0 sm:$0xff] }
 0x42d   : > { %v1214_v14 = vpop.f32.mrf.mxu2 }
 0x42e   : > { %v1215_v22 = vadd.f32 %v8337_v15, %v1214_v14 }
 0x435   : > { %v1216_v21 = vpop.f32.mrf.mxu2 }
 0x436   : > { %v1217_v23 = vadd.f32 %v8337_v15, %v1216_v21 }
 0x438   : > { %v1219_v24 = vadd.f32 %v1217_v23, %v1215_v22 }
 0x43a   : > { %1220 = vadd.xlane.f32.xlu2 %v1219_v24 }
 0x450   : > { %s8121_s24 = spop %8120 }
 0x451   : > { %s1092_s25 = smul.f32 0.0078125, %s8121_s24 }
 0x453   : > { %s1093_s26 = sadd.f32 1e-08, %s1092_s25 }
 0x455   : > { %v1094_v25 = vstv %s1093_s26 }
 0x456   : > { %8511 = vrsqrt.f32 %v1094_v25  ;;  %vm1101_vm15 = vweird.f32 %v1094_v25 }
 0x45c   : > { %v8512_v26 = vpop.eup %8511 }
 0x45d   : > { %v1096_v27 = vmul.f32 %v8512_v26, %v1094_v25  ;;  %vm1102_vm14 = vweird.f32 %v8512_v26  ;;  %v8344_v25 = vld [vmem:[#allocation5 + $0x8] ss:$0 sm:$0xff] }
 0x45e   : > { %vm1103_vm1 = vmor %vm1101_vm15, %vm1102_vm14 }
 0x45f   : > { %v1097_v28 = vmul.f32 %v8512_v26, %v1096_v27 }
 0x461   : > { %v1098_v29 = vmul.f32 0.5, %v1097_v28 }
 0x463   : > { %v1099_v30 = vsub.f32 1.5, %v1098_v29 }
 0x465   : > { %v1100_v31 = vmul.f32 %v8512_v26, %v1099_v30 }
 0x467   : > { %v1104_v32 = vsel %vm1103_vm1, %v8512_v26, %v1100_v31 }
 0x468   : > { %8122 = vpush %v1104_v32  ;;  %v8345_v32 = vld [vmem:[#allocation5 + $0xa] ss:$0 sm:$0xff] }
 0x499   : > { %s8859_s27 = spop %8122 }
 0x4ad   : > { %v1221_v34 = vpop.xlane.xlu2 %1220 }
 0x4ae   : > { %v1222_v35 = vrot.slane %v1221_v34, 4 }
 0x4b0   : > { %v1223_v36 = vadd.f32 %v1222_v35, %v1221_v34 }
 0x4b2   : > { %v1224_v37 = vrot.slane %v1223_v36, 2 }
 0x4b4   : > { %v1225_v38 = vadd.f32 %v1224_v37, %v1223_v36  ;;  %v8347_v36 = vld [vmem:[#allocation5 + $0xb] ss:$0 sm:$0xff]  ;;  %v8348_v37 = vld [vmem:[#allocation5 + $0xc] ss:$0 sm:$0xff] }
 0x4b6   : > { %v1226_v40 = vrot.slane %v1225_v38, 1 }
 0x4b8   : > { %v1227_v44 = vadd.f32 %v1226_v40, %v1225_v38 }
 0x4ba   : > { %8124 = vpush %v1227_v44 }
 0x4eb   : > { %s8125_s28 = spop %8124 }
 0x4ec   : > { %s1229_s29 = smul.f32 0.0026041667, %s8125_s28 }
 0x4ee   : > { %v1230_v45 = vstv %s1229_s29 }
 0x4ef   : > { %v1231_v46 = vsub.f32 %v1215_v22, %v1230_v45  ;;  %v1232_v47 = vsub.f32 %v1217_v23, %v1230_v45  ;;  %v8343_v22 = vld [vmem:[#allocation5 + $0x7] ss:$0 sm:$0xff] }
 0x4f1   : > { %v1236_v42 = vmul.f32 %v1231_v46, %v1231_v46  ;;  %v1237_v48 = vmul.f32 %v1232_v47, %v1232_v47 }
 0x4f3   : > { %v1238_v49 = vmul.f32 %v8863_v41, %v1236_v42  ;;  %v1239_v50 = vmul.f32 %v8863_v41, %v1237_v48  ;;  %v8349_v42 = vld [vmem:[#allocation5 + $0xd] ss:$0 sm:$0xff] }
 0x4f5   : > { %v1240_v51 = vadd.f32 %v1239_v50, %v1238_v49 }
 0x4f7   : > { %1241 = vadd.xlane.f32.xlu2 %v1240_v51 }
 0x56a   : > { %v1242_v16 = vpop.xlane.xlu2 %1241 }
 0x56b   : > { %v1243_v52 = vrot.slane %v1242_v16, 4 }
 0x56d   : > { %v1244_v53 = vadd.f32 %v1243_v52, %v1242_v16 }
 0x56f   : > { %v1245_v55 = vrot.slane %v1244_v53, 2 }
 0x571   : > { %v1246_v59 = vadd.f32 %v1245_v55, %v1244_v53 }
 0x573   : > { %v1247_v60 = vrot.slane %v1246_v59, 1 }
 0x575   : > { %v1248_v61 = vadd.f32 %v1247_v60, %v1246_v59 }
 0x577   : > { %8126 = vpush %v1248_v61 }
 0x5a8   : > { %s8127_s30 = spop %8126 }
 0x5a9   : > { %s1250_s5 = smul.f32 0.0026041667, %s8127_s30 }
 0x5ab   : > { %s1251_s7 = sadd.f32 1e-08, %s1250_s5 }
 0x5ad   : > { %v1252_v63 = vstv %s1251_s7 }
 0x5ae   : > { %8513 = vrsqrt.f32 %v1252_v63  ;;  %vm1259_vm6 = vweird.f32 %v1252_v63 }
 0x5b4   : > { %v8514_v5 = vpop.eup %8513 }
 0x5b5   : > { %v1254_v6 = vmul.f32 %v8514_v5, %v1252_v63  ;;  %vm1260_vm5 = vweird.f32 %v8514_v5 }
 0x5b6   : > { %vm1261_vm7 = vmor %vm1259_vm6, %vm1260_vm5 }
 0x5b7   : > { %v1255_v8 = vmul.f32 %v8514_v5, %v1254_v6 }
 0x5b9   : > { %v1256_v9 = vmul.f32 0.5, %v1255_v8 }
 0x5bb   : > { %v1257_v10 = vsub.f32 1.5, %v1256_v9 }
 0x5bd   : > { %v1258_v11 = vmul.f32 %v8514_v5, %v1257_v10 }
 0x5bf   : > { %v1262_v12 = vsel %vm1261_vm7, %v8514_v5, %v1258_v11 }
 0x5c0   : > { %8128 = vpush %v1262_v12 }
 0x5f1   : > { %s8129_s8 = spop %8128 }
 0x5f2   : > { %v1264_v14 = vstv %s8129_s8 }
 0x5f3   : > { %v1265_v15 = vmul.f32 %v1264_v14, %v1231_v46  ;;  %v1266_v21 = vmul.f32 %v1264_v14, %v1232_v47  ;;  %v8346_v46 = vld [vmem:[#allocation5 + $0x9] ss:$0 sm:$0xff] }
 0x5f5   : > { %v1269_v23 = vmul.f32 %v8342_v13, %v1265_v15  ;;  %v1270_v24 = vmul.f32 %v8342_v13, %v1266_v21 }
 0x5f7   : > { %v1273_v26 = vadd.f32 %v8343_v22, %v1269_v23  ;;  %v1274_v27 = vadd.f32 %v8343_v22, %v1270_v24 }
 0x5f9   : > { %vm1275_vm8 = vcmp.ge.f32.partialorder %v1273_v26, 0.0  ;;  %vm1276_vm9 = vcmp.ge.f32.partialorder %v1274_v27, 0.0  ;;  %v1279_v28 = vmul.f32 %v8344_v25, %v1273_v26  ;;  %v1280_v29 = vmul.f32 %v8344_v25, %v1274_v27 }
 0x5fb   : > { %v1281_v30 = vsel %vm1275_vm8, %v1273_v26, %v1279_v28  ;;  %v1282_v31 = vsel %vm1276_vm9, %v1274_v27, %v1280_v29 }
 0x5fc   : > { %v1286_v34 = vrot.slane %v1281_v30, 6  ;;  %v1287_v35 = vrot.slane %v1282_v31, 6 }
 0x5fe   : > { %v1288_v38 = vsel %vm1285_vm10, %v1286_v34, %v1287_v35  ;;  %v1292_v40 = vsel %vm1285_vm10, 0.0, %v1286_v34  ;;  %v1293_v44 = vsel %vm1285_vm10, %v1287_v35, 0.0 }
 0x5ff   : > { %v1302_v45 = vmul.f32 %v8345_v32, %v1293_v44  ;;  %v1300_v47 = vmul.f32 %v8345_v32, %v1292_v40  ;;  %v1301_v48 = vmul.f32 %v8345_v32, %v1288_v38  ;;  %v1317_v49 = vmul.f32 %v8347_v36, %v1292_v40 }
 0x600   : > { %v1318_v50 = vmul.f32 %v8347_v36, %v1288_v38  ;;  %v1319_v51 = vmul.f32 %v8347_v36, %v1293_v44  ;;  %v1334_v53 = vmul.f32 %v8348_v37, %v1292_v40  ;;  %v1335_v55 = vmul.f32 %v8348_v37, %v1288_v38  ;;  %v8350_v36 = vld [vmem:[#allocation5 + $0xe] ss:$0 sm:$0xff] }
 0x601   : > { %v1309_v16 = vrot.slane %v1302_v45, 1  ;;  %v1306_v52 = vrot.slane %v1300_v47, 1  ;;  %v1307_v59 = vrot.slane %v1301_v48, 1  ;;  %v1323_v60 = vrot.slane %v1317_v49, 2 }
 0x602   : > { %v1324_v61 = vrot.slane %v1318_v50, 2  ;;  %v1326_v63 = vrot.slane %v1319_v51, 2  ;;  %v1296_v5 = vmul.f32 %v8346_v46, %v1292_v40  ;;  %v1297_v6 = vmul.f32 %v8346_v46, %v1288_v38 }
 0x603   : > { %v1336_v8 = vmul.f32 %v8348_v37, %v1293_v44  ;;  %v1352_v9 = vmul.f32 %v8349_v42, %v1292_v40  ;;  %v1308_v10 = vsel %vm349_vm3, %v1306_v52, %v1307_v59  ;;  %v1310_v11 = vsel %vm349_vm3, %v1307_v59, %v1309_v16 }
 0x604   : > { %v1341_v12 = vrot.slane %v1334_v53, 3  ;;  %v1342_v13 = vrot.slane %v1335_v55, 3  ;;  %v1313_v14 = vadd.f32 %v1308_v10, %v1296_v5  ;;  %v1314_v15 = vadd.f32 %v1310_v11, %v1297_v6 }
 0x605   : > { %v1325_v21 = vsel %vm354_vm4, %v1323_v60, %v1324_v61  ;;  %v1344_v22 = vrot.slane %v1336_v8, 3  ;;  %v1327_v23 = vsel %vm354_vm4, %v1324_v61, %v1326_v63  ;;  %v1353_v24 = vmul.f32 %v8349_v42, %v1288_v38 }
 0x606   : > { %v1354_v25 = vmul.f32 %v8349_v42, %v1293_v44  ;;  %v1359_v26 = vrot.slane %v1352_v9, 4  ;;  %v1330_v27 = vadd.f32 %v1325_v21, %v1313_v14  ;;  %v1331_v28 = vadd.f32 %v1327_v23, %v1314_v15  ;;  %v7847_v15 = vld [vmem:[#allocation3 + $0x1b8] sm:$0xff]  ;;  %v7846_v21 = vld [vmem:[#allocation3 + $0x1b0] sm:$0xff]  ;;  %v7844_v23 = vld [vmem:[#allocation3 + $0x1a0] sm:$0xff] }
 0x607   : > { %v1343_v29 = vsel %vm1340_vm11, %v1341_v12, %v1342_v13  ;;  %v1345_v30 = vsel %vm1340_vm11, %v1342_v13, %v1344_v22  ;;  %v1360_v31 = vrot.slane %v1353_v24, 4  ;;  %1751 = vmatpush.bf16.msra.mxu1 %v7847_v15  ;;  %v7845_v22 = vld [vmem:[#allocation3 + $0x1a8] sm:$0xff] }
 0x608   : > { %v1362_v32 = vrot.slane %v1354_v25, 4  ;;  %v1348_v34 = vadd.f32 %v1343_v29, %v1330_v27  ;;  %v1349_v35 = vadd.f32 %v1345_v30, %v1331_v28  ;;  %v7843_v25 = vld [vmem:[#allocation3 + $0x198] sm:$0xff] }
 0x609   : > { %v1361_v37 = vsel %vm1358_vm12, %v1359_v26, %v1360_v31  ;;  %v7842_v26 = vld [vmem:[#allocation3 + $0x190] sm:$0xff] }
 0x60a   : > { %v1363_v40 = vsel %vm1358_vm12, %v1360_v31, %v1362_v32  ;;  %v1366_v45 = vadd.f32 %v1361_v37, %v1348_v34  ;;  %v8351_v37 = vld [vmem:[#allocation5 + $0xf] ss:$0 sm:$0xff] }
 0x60b   : > { %v1367_v38 = vadd.f32 %v1363_v40, %v1349_v35  ;;  %1752 = vmatpush.bf16.msra.mxu1 %v7846_v21  ;;  %v7841_v35 = vld [vmem:[#allocation3 + $0x188] sm:$0xff] }
 0x60c   : > { %v1370_v44 = vadd.f32 %v8350_v36, %v1366_v45 }
 0x60d   : > { %v1371_v46 = vadd.f32 %v8350_v36, %v1367_v38  ;;  %v7840_v36 = vld [vmem:[#allocation3 + $0x180] sm:$0xff] }
 0x60f   : > { %v1372_v47 = vadd.f32 %v1371_v46, %v1370_v44  ;;  %1753 = vmatpush.bf16.msra.mxu1 %v7845_v22 }
 0x611   : > { %1373 = vadd.xlane.f32.xlu0 %v1372_v47 }
 0x613   : > { %1754 = vmatpush.bf16.msra.mxu1 %v7844_v23 }
 0x617   : > { %1755 = vmatpush.bf16.msra.mxu1 %v7843_v25 }
 0x61b   : > { %1756 = vmatpush.bf16.msra.mxu1 %v7842_v26 }
 0x61f   : > { %1757 = vmatpush.bf16.msra.mxu1 %v7841_v35 }
 0x623   : > { %1758 = vmatpush.bf16.msra.mxu1 %v7840_v36 }
 0x684   : > { %v1374_v42 = vpop.xlane.xlu0 %1373 }
 0x685   : > { %v1375_v48 = vrot.slane %v1374_v42, 4 }
 0x687   : > { %v1376_v49 = vadd.f32 %v1375_v48, %v1374_v42 }
 0x689   : > { %v1377_v50 = vrot.slane %v1376_v49, 2 }
 0x68b   : > { %v1378_v51 = vadd.f32 %v1377_v50, %v1376_v49  ;;  %v8353_v50 = vld [vmem:[#allocation5 + $0x11] ss:$0 sm:$0xff] }
 0x68d   : > { %v1379_v16 = vrot.slane %v1378_v51, 1 }
 0x68f   : > { %v1380_v52 = vadd.f32 %v1379_v16, %v1378_v51  ;;  %v8354_v51 = vld [vmem:[#allocation5 + $0x12] ss:$0 sm:$0xff]  ;;  %v8355_v16 = vld [vmem:[#allocation5 + $0x13] ss:$0 sm:$0xff] }
 0x691   : > { %8130 = vpush %v1380_v52  ;;  %v8356_v52 = vld [vmem:[#allocation5 + $0x14] ss:$0 sm:$0xff] }
 0x6c2   : > { %s8131_s9 = spop %8130 }
 0x6c3   : > { %s1382_s10 = smul.f32 0.0026041667, %s8131_s9 }
 0x6c5   : > { %v1383_v53 = vstv %s1382_s10 }
 0x6c6   : > { %v1384_v55 = vsub.f32 %v1370_v44, %v1383_v53  ;;  %v1385_v59 = vsub.f32 %v1371_v46, %v1383_v53  ;;  %v8352_v44 = vld [vmem:[#allocation5 + $0x10] ss:$0 sm:$0xff] }
 0x6c8   : > { %v1386_v60 = vmul.f32 %v1384_v55, %v1384_v55  ;;  %v1387_v61 = vmul.f32 %v1385_v59, %v1385_v59 }
 0x6ca   : > { %v1388_v63 = vmul.f32 %v8863_v41, %v1386_v60  ;;  %v1389_v5 = vmul.f32 %v8863_v41, %v1387_v61 }
 0x6cc   : > { %v1390_v6 = vadd.f32 %v1389_v5, %v1388_v63 }
 0x6ce   : > { %1391 = vadd.xlane.f32.xlu1 %v1390_v6 }
 0x741   : > { %v1392_v8 = vpop.xlane.xlu1 %1391 }
 0x742   : > { %v1393_v9 = vrot.slane %v1392_v8, 4 }
 0x744   : > { %v1394_v10 = vadd.f32 %v1393_v9, %v1392_v8  ;;  %v8357_v9 = vld [vmem:[#allocation5 + $0x15] ss:$0 sm:$0xff] }
 0x746   : > { %v1395_v11 = vrot.slane %v1394_v10, 2 }
 0x748   : > { %v1396_v12 = vadd.f32 %v1395_v11, %v1394_v10 }
 0x74a   : > { %v1397_v13 = vrot.slane %v1396_v12, 1 }
 0x74c   : > { %v1398_v14 = vadd.f32 %v1397_v13, %v1396_v12 }
 0x74e   : > { %8132 = vpush %v1398_v14  ;;  %v8358_v14 = vld [vmem:[#allocation5 + $0x16] ss:$0 sm:$0xff] }
 0x77f   : > { %s8133_s11 = spop %8132 }
 0x780   : > { %s1400_s12 = smul.f32 0.0026041667, %s8133_s11 }
 0x782   : > { %s1401_s13 = sadd.f32 1e-08, %s1400_s12 }
 0x784   : > { %v1402_v24 = vstv %s1401_s13 }
 0x785   : > { %8515 = vrsqrt.f32 %v1402_v24  ;;  %vm1409_vm15 = vweird.f32 %v1402_v24 }
 0x78b   : > { %v8516_v27 = vpop.eup %8515 }
 0x78c   : > { %v1404_v28 = vmul.f32 %v8516_v27, %v1402_v24  ;;  %vm1410_vm14 = vweird.f32 %v8516_v27 }
 0x78d   : > { %vm1411_vm1 = vmor %vm1409_vm15, %vm1410_vm14 }
 0x78e   : > { %v1405_v29 = vmul.f32 %v8516_v27, %v1404_v28 }
 0x790   : > { %v1406_v30 = vmul.f32 0.5, %v1405_v29 }
 0x792   : > { %v1407_v31 = vsub.f32 1.5, %v1406_v30 }
 0x794   : > { %v1408_v32 = vmul.f32 %v8516_v27, %v1407_v31 }
 0x796   : > { %v1412_v34 = vsel %vm1411_vm1, %v8516_v27, %v1408_v32 }
 0x797   : > { %8134 = vpush %v1412_v34 }
 0x7c8   : > { %s8135_s14 = spop %8134 }
 0x7c9   : > { %v1414_v40 = vstv %s8135_s14 }
 0x7ca   : > { %v1415_v45 = vmul.f32 %v1414_v40, %v1384_v55  ;;  %v1416_v38 = vmul.f32 %v1414_v40, %v1385_v59 }
 0x7cc   : > { %v1419_v46 = vmul.f32 %v8351_v37, %v1415_v45  ;;  %v1420_v47 = vmul.f32 %v8351_v37, %v1416_v38 }
 0x7ce   : > { %v8880_v42 = vadd.f32 %v8352_v44, %v1419_v46  ;;  %v8882_v48 = vadd.f32 %v8352_v44, %v1420_v47  ;;  %v7871_v44 = vld [vmem:[#allocation3 + $0x278] sm:$0xff]  ;;  %v7870_v46 = vld [vmem:[#allocation3 + $0x270] sm:$0xff]  ;;  %v7869_v47 = vld [vmem:[#allocation3 + $0x268] sm:$0xff] }
 0x7cf   : > { %2023 = vmatpush.bf16.msra.mxu2 %v7871_v44 }
 0x7d0   : > { %1427 = vst [vmem:[#allocation2 + $0x2] sm:$0xff] %v8880_v42  ;;  %v1605_v49 = vpack.c.bf16 %v8882_v48, %v8880_v42 }
 0x7d1   : > { %1428 = vst [vmem:[#allocation2 + $0xa] sm:$0xff] %v8882_v48 }
 0x7d2   : > { %1759 = vmatmul.bf16.vlgmr.msra.gmra.mxu1 %v1605_v49  ;;  %v7868_v49 = vld [vmem:[#allocation3 + $0x260] sm:$0xff] }
 0x7d3   : > { %2024 = vmatpush.bf16.msra.mxu2 %v7870_v46 }
 0x7d7   : > { %2025 = vmatpush.bf16.msra.mxu2 %v7869_v47 }
 0x7d8   : > { %v1429_v53 = vld [vmem:[#allocation2] ss:$2 sm:$0xff]  ;;  %v1434_v55 = vld [vmem:[#allocation2 + $0x1] ss:$2 sm:$0xff] }
 0x7d9   : > { %v1440_v59 = vld [vmem:[#allocation2 + $0x2] ss:$2 sm:$0xff]  ;;  %v1446_v60 = vld [vmem:[#allocation2 + $0x3] ss:$2 sm:$0xff]  ;;  %1505 = vst [vmem:[#allocation2] sm:$0x3] %v8651_v54  ;;  %v1432_v63 = vmul.f32 %v8353_v50, %v1429_v53  ;;  %v1437_v5 = vmul.f32 %v8354_v51, %v1434_v55 }
 0x7da   : > { %v1452_v61 = vld [vmem:[#allocation2 + $0x4] ss:$2 sm:$0xff]  ;;  %v1443_v8 = vmul.f32 %v8355_v16, %v1440_v59  ;;  %v1449_v11 = vmul.f32 %v8356_v52, %v1446_v60 }
 0x7db   : > { %1506 = vst [vmem:[#allocation2 + $0xa] sm:$0x3] %v8651_v54  ;;  %v1438_v6 = vadd.f32 %v1437_v5, %v1432_v63  ;;  %v1455_v13 = vmul.f32 %v8357_v9, %v1452_v61  ;;  %2026 = vmatpush.bf16.msra.mxu2 %v7868_v49  ;;  %v7867_v51 = vld [vmem:[#allocation3 + $0x258] sm:$0xff]  ;;  %v7866_v16 = vld [vmem:[#allocation3 + $0x250] sm:$0xff]  ;;  %v7865_v5 = vld [vmem:[#allocation3 + $0x248] sm:$0xff] }
 0x7dc   : > { %1831 = vst [vmem:[#allocation2 + $0x12] sm:$0x3] %v8651_v54  ;;  %v7854_v9 = vld [vmem:[#allocation3 + $0x1f0] sm:$0xff]  ;;  %v8366_v49 = vld [vmem:[#allocation5 + $0x1e] ss:$0 sm:$0xff] }
 0x7dd   : > { %v1444_v10 = vadd.f32 %v1443_v8, %v1438_v6  ;;  %v7864_v6 = vld [vmem:[#allocation3 + $0x240] sm:$0xff]  ;;  %v7855_v8 = vld [vmem:[#allocation3 + $0x1f8] sm:$0xff] }
 0x7de   : > { %1689 = vmatpush.bf16.msrb.mxu0 %v7855_v8 }
 0x7df   : > { %v1450_v12 = vadd.f32 %v1449_v11, %v1444_v10  ;;  %2027 = vmatpush.bf16.msra.mxu2 %v7867_v51  ;;  %v8359_v10 = vld [vmem:[#allocation5 + $0x17] ss:$0 sm:$0xff] }
 0x7e1   : > { %v1456_v15 = vadd.f32 %v1455_v13, %v1450_v12  ;;  %v8360_v13 = vld [vmem:[#allocation5 + $0x18] ss:$0 sm:$0xff] }
 0x7e2   : > { %1690 = vmatpush.bf16.msrb.mxu0 %v7854_v9 }
 0x7e3   : > { %v1459_v21 = vadd.f32 %v8358_v14, %v1456_v15  ;;  %2028 = vmatpush.bf16.msra.mxu2 %v7866_v16  ;;  %v7853_v14 = vld [vmem:[#allocation3 + $0x1e8] sm:$0xff] }
 0x7e5   : > { %1460 = vadd.xlane.f32.xlu2 %v1459_v21 }
 0x7e6   : > { %1691 = vmatpush.bf16.msrb.mxu0 %v7853_v14 }
 0x7e7   : > { %2029 = vmatpush.bf16.msra.mxu2 %v7865_v5  ;;  %v7848_v5 = vld [vmem:[#allocation3 + $0x1c0] sm:$0xff] }
 0x7eb   : > { %2030 = vmatpush.bf16.msra.mxu2 %v7864_v6 }
 0x858   : > { %v1461_v22 = vpop.xlane.xlu2 %1460 }
 0x859   : > { %v1462_v23 = vrot.slane %v1461_v22, 4 }
 0x85b   : > { %v1463_v24 = vadd.f32 %v1462_v23, %v1461_v22  ;;  %v7852_v22 = vld [vmem:[#allocation3 + $0x1e0] sm:$0xff] }
 0x85c   : > { %1692 = vmatpush.bf16.msrb.mxu0 %v7852_v22 }
 0x85d   : > { %v1464_v25 = vrot.slane %v1463_v24, 2 }
 0x85f   : > { %v1465_v26 = vadd.f32 %v1464_v25, %v1463_v24  ;;  %v7851_v24 = vld [vmem:[#allocation3 + $0x1d8] sm:$0xff] }
 0x860   : > { %v8361_v25 = vld [vmem:[#allocation5 + $0x19] ss:$0 sm:$0xff]  ;;  %1693 = vmatpush.bf16.msrb.mxu0 %v7851_v24  ;;  %v8367_v24 = vld [vmem:[#allocation5 + $0x29] ss:$0 sm:$0xff] }
 0x861   : > { %v1466_v27 = vrot.slane %v1465_v26, 1 }
 0x863   : > { %v1467_v28 = vadd.f32 %v1466_v27, %v1465_v26  ;;  %v8362_v26 = vld [vmem:[#allocation5 + $0x1a] ss:$0 sm:$0xff]  ;;  %v8363_v27 = vld [vmem:[#allocation5 + $0x1b] ss:$0 sm:$0xff] }
 0x865   : > { %8136 = vpush %v1467_v28  ;;  %v8364_v28 = vld [vmem:[#allocation5 + $0x1c] ss:$0 sm:$0xff] }
 0x896   : > { %s8137_s16 = spop %8136 }
 0x897   : > { %s1469_s17 = smul.f32 0.0052083335, %s8137_s16 }
 0x899   : > { %v1470_v29 = vstv %s1469_s17 }
 0x89a   : > { %v1471_v30 = vsub.f32 %v1459_v21, %v1470_v29 }
 0x89c   : > { %v1472_v31 = vmul.f32 %v1471_v30, %v1471_v30 }
 0x89e   : > { %v1473_v32 = vmul.f32 %v8863_v41, %v1472_v31 }
 0x8a0   : > { %1474 = vadd.xlane.f32.xlu0 %v1473_v32 }
 0x913   : > { %v1475_v34 = vpop.xlane.xlu0 %1474 }
 0x914   : > { %v1476_v35 = vrot.slane %v1475_v34, 4 }
 0x916   : > { %v1477_v36 = vadd.f32 %v1476_v35, %v1475_v34 }
 0x918   : > { %v1478_v37 = vrot.slane %v1477_v36, 2 }
 0x91a   : > { %v1479_v40 = vadd.f32 %v1478_v37, %v1477_v36 }
 0x91c   : > { %v1480_v45 = vrot.slane %v1479_v40, 1 }
 0x91e   : > { %v1481_v38 = vadd.f32 %v1480_v45, %v1479_v40  ;;  %v8365_v45 = vld [vmem:[#allocation5 + $0x1d] ss:$0 sm:$0xff] }
 0x920   : > { %8138 = vpush %v1481_v38 }
 0x951   : > { %s8139_s18 = spop %8138 }
 0x952   : > { %s1483_s20 = smul.f32 0.0052083335, %s8139_s18 }
 0x954   : > { %s1484_s21 = sadd.f32 1e-08, %s1483_s20 }
 0x956   : > { %v1485_v50 = vstv %s1484_s21 }
 0x957   : > { %8517 = vrsqrt.f32 %v1485_v50  ;;  %vm1492_vm5 = vweird.f32 %v1485_v50 }
 0x95d   : > { %v8518_v52 = vpop.eup %8517 }
 0x95e   : > { %v1487_v53 = vmul.f32 %v8518_v52, %v1485_v50  ;;  %vm1493_vm2 = vweird.f32 %v8518_v52 }
 0x95f   : > { %vm1494_vm6 = vmor %vm1492_vm5, %vm1493_vm2 }
 0x960   : > { %v1488_v55 = vmul.f32 %v8518_v52, %v1487_v53 }
 0x962   : > { %v1489_v59 = vmul.f32 0.5, %v1488_v55 }
 0x964   : > { %v1490_v60 = vsub.f32 1.5, %v1489_v59 }
 0x966   : > { %v1491_v61 = vmul.f32 %v8518_v52, %v1490_v60 }
 0x968   : > { %v1495_v63 = vsel %vm1494_vm6, %v8518_v52, %v1491_v61  ;;  %v7850_v61 = vld [vmem:[#allocation3 + $0x1d0] sm:$0xff]  ;;  %vm1912_vm6 = vcmask 31744  }
 0x969   : > { %8140 = vpush %v1495_v63  ;;  %1694 = vmatpush.bf16.msrb.mxu0 %v7850_v61  ;;  %v7849_v63 = vld [vmem:[#allocation3 + $0x1c8] sm:$0xff] }
 0x96d   : > { %1695 = vmatpush.bf16.msrb.mxu0 %v7849_v63 }
 0x971   : > { %1696 = vmatpush.bf16.msrb.mxu0 %v7848_v5 }
 0x975   : > { %2163 = vmatpush.bf16.msra.mxu0 %v7879_v58 }
 0x99a   : > { %s8141_s22 = spop %8140 }
 0x99b   : > { %v1497_v11 = vstv %s8141_s22 }
 0x99c   : > { %v1498_v12 = vmul.f32 %v1497_v11, %v1471_v30 }
 0x99e   : > { %v1501_v15 = vmul.f32 %v8359_v10, %v1498_v12 }
 0x9a0   : > { %v1504_v21 = vadd.f32 %v8360_v13, %v1501_v15 }
 0x9a2   : > { %1507 = vst [vmem:[#allocation2 + $0x2] sm:$0xff] %v1504_v21  ;;  %1597 = vmatpush.msra.mxu3 %v1504_v21  ;;  %v1957_v23 = vpack.c.bf16 %v1504_v21, %v1504_v21 }
 0x9a3   : > { %6649 = vmatmul.msk.f32.vlgmr.msra.gmra.mxu3 %vm650_vm13, %v8805_v20 }
 0x9a4   : > { %2031 = vmatmul.bf16.vlgmr.msra.gmra.mxu2 %v1957_v23 }
 0x9a9   : > { %v1508_v29 = vld [vmem:[#allocation2] ss:$2 sm:$0xf]  ;;  %v1512_v30 = vld [vmem:[#allocation2 + $0x1] ss:$2 sm:$0xf] }
 0x9aa   : > { %v1511_v31 = vmul.f32 %v8361_v25, %v1508_v29  ;;  %v1515_v32 = vmul.f32 %v8362_v26, %v1512_v30  ;;  %v1517_v34 = vld [vmem:[#allocation2 + $0x2] ss:$2 sm:$0xf]  ;;  %v1522_v35 = vld [vmem:[#allocation2 + $0x3] ss:$2 sm:$0xf] }
 0x9ab   : > { %6650 = vmatmul.msk.f32.gmra.mxu3 %vm650_vm13, %v8828_v33  ;;  %v1527_v36 = vld [vmem:[#allocation2 + $0x4] ss:$2 sm:$0xf]  ;;  %1830 = vst [vmem:[#allocation2] sm:$0x3] %v8651_v54  ;;  %v1520_v40 = vmul.f32 %v8363_v27, %v1517_v34  ;;  %v1525_v44 = vmul.f32 %v8364_v28, %v1522_v35 }
 0x9ac   : > { %v1516_v37 = vadd.f32 %v1515_v32, %v1511_v31  ;;  %1833 = vst [vmem:[#allocation2 + $0xa] sm:$0xff] %v8882_v48  ;;  %v1530_v47 = vmul.f32 %v8365_v45, %v1527_v36  ;;  %v8368_v25 = vld [vmem:[#allocation5 + $0x2a] ss:$0 sm:$0xff]  ;;  %v8369_v28 = vld [vmem:[#allocation5 + $0x2b] ss:$0 sm:$0xff] }
 0x9ad   : > { %1832 = vst [vmem:[#allocation2 + $0x2] sm:$0xff] %v8880_v42  ;;  %v8370_v32 = vld [vmem:[#allocation5 + $0x2c] ss:$0 sm:$0xff] }
 0x9ae   : > { %v1521_v38 = vadd.f32 %v1520_v40, %v1516_v37  ;;  %v8371_v40 = vld [vmem:[#allocation5 + $0x2d] ss:$0 sm:$0xff] }
 0x9b0   : > { %v1526_v46 = vadd.f32 %v1525_v44, %v1521_v38 }
 0x9b2   : > { %v1531_v50 = vadd.f32 %v1530_v47, %v1526_v46 }
 0x9b4   : > { %v1534_v51 = vadd.f32 %v8366_v49, %v1531_v50  ;;  %v1834_v16 = vld [vmem:[#allocation2] ss:$2 sm:$0xff]  ;;  %v1838_v52 = vld [vmem:[#allocation2 + $0x1] ss:$2 sm:$0xff] }
 0x9b5   : > { %v1843_v53 = vld [vmem:[#allocation2 + $0x2] ss:$2 sm:$0xff]  ;;  %v1848_v55 = vld [vmem:[#allocation2 + $0x3] ss:$2 sm:$0xff]  ;;  %2230 = vst [vmem:[#allocation2] sm:$0x3] %v8651_v54  ;;  %v1837_v26 = vmul.f32 %v8367_v24, %v1834_v16  ;;  %v1841_v27 = vmul.f32 %v8368_v25, %v1838_v52 }
 0x9b6   : > { %v1853_v59 = vld [vmem:[#allocation2 + $0x4] ss:$2 sm:$0xff]  ;;  %v1535_v60 = vsel %vm1358_vm12, %v1534_v51, 0.0  ;;  %v1846_v31 = vmul.f32 %v8369_v28, %v1843_v53  ;;  %v1851_v37 = vmul.f32 %v8370_v32, %v1848_v55  ;;  %v8373_v53 = vld [vmem:[#allocation5 + $0x39] ss:$0 sm:$0xff] }
 0x9b7   : > { %2231 = vst [vmem:[#allocation2 + $0xa] sm:$0x3] %v8651_v54  ;;  %1536 = vadd.xlane.f32.xlu1 %v1535_v60  ;;  %v1842_v29 = vadd.f32 %v1841_v27, %v1837_v26  ;;  %v1856_v46 = vmul.f32 %v8371_v40, %v1853_v59  ;;  %v8372_v49 = vld [vmem:[#allocation5 + $0x2e] ss:$0 sm:$0xff]  ;;  %v7891_v25 = vld [vmem:[#allocation3 + $0x318] sm:$0xff]  ;;  %v7890_v26 = vld [vmem:[#allocation3 + $0x310] sm:$0xff] }
 0x9b8   : > { %2232 = vst [vmem:[#allocation2 + $0x2] sm:$0xff] %v1504_v21 }
 0x9b9   : > { %4642 = vst [vmem:[#allocation2 + $0x12] sm:$0x3] %v8651_v54  ;;  %v1847_v35 = vadd.f32 %v1846_v31, %v1842_v29 }
 0x9bb   : > { %v1852_v38 = vadd.f32 %v1851_v37, %v1847_v35 }
 0x9bd   : > { %v1857_v47 = vadd.f32 %v1856_v46, %v1852_v38 }
 0x9bf   : > { %v8903_v42 = vld [vmem:[#allocation2] ss:$2 sm:$0xf]  ;;  %v8905_v48 = vld [vmem:[#allocation2 + $0x3] ss:$2 sm:$0xf]  ;;  %v8918_v50 = vadd.f32 %v8372_v49, %v1857_v47 }
 0x9c0   : > { %3198 = vst [vmem:[#allocation2] sm:$0x1] %v8651_v54  ;;  %v7889_v47 = vld [vmem:[#allocation3 + $0x308] sm:$0xff]  ;;  %v7888_v49 = vld [vmem:[#allocation3 + $0x300] sm:$0xff] }
 0x9c1   : > { %3199 = vst [vmem:[#allocation2 + $0x9] sm:$0x1] %v8651_v54 }
 0x9c2   : > { %3500 = vst [vmem:[#allocation2 + $0x9] sm:$0x1] %v8651_v54 }
 0xa26   : > { %v1599_v6 = vpop.f32.mrf.mxu3 }
 0xa27   : > { %v8910_v8 = vpop.f32.mrf.mxu2 }
 0xa2a   : > { %v1537_v9 = vpop.xlane.xlu1 %1536 }
 0xa2b   : > { %v1538_v10 = vrot.slane %v1537_v9, 4 }
 0xa2d   : > { %v1539_v11 = vadd.f32 %v1538_v10, %v1537_v9 }
 0xa2e   : > { %v1602_v12 = vpop.f32.mrf.mxu3 }
 0xa2f   : > { %v1540_v13 = vrot.slane %v1539_v11, 2  ;;  %v1623_v14 = vpack.c.bf16 %v1602_v12, %v1599_v6  ;;  %v2034_v15 = vpop.f32.mrf.mxu2 }
 0xa30   : > { %v7895_v15 = vld [vmem:[#allocation3 + $0x338] sm:$0xff] }
 0xa31   : > { %1697 = vmatmul.bf16.vlgmr.msrb.gmra.mxu0 %v1623_v14  ;;  %v1541_v21 = vadd.f32 %v1540_v13, %v1539_v11  ;;  %2391 = vmatpush.bf16.msrb.mxu1 %v7895_v15 }
 0xa33   : > { %v1542_v22 = vrot.slane %v1541_v21, 1 }
 0xa35   : > { %v1543_v23 = vadd.f32 %v1542_v22, %v1541_v21  ;;  %v7894_v21 = vld [vmem:[#allocation3 + $0x330] sm:$0xff]  ;;  %v7893_v22 = vld [vmem:[#allocation3 + $0x328] sm:$0xff] }
 0xa36   : > { %2392 = vmatpush.bf16.msrb.mxu1 %v7894_v21 }
 0xa37   : > { %8142 = vpush %v1543_v23  ;;  %v7892_v23 = vld [vmem:[#allocation3 + $0x320] sm:$0xff] }
 0xa3a   : > { %2393 = vmatpush.bf16.msrb.mxu1 %v7893_v22 }
 0xa3e   : > { %2394 = vmatpush.bf16.msrb.mxu1 %v7892_v23 }
 0xa42   : > { %2395 = vmatpush.bf16.msrb.mxu1 %v7891_v25 }
 0xa46   : > { %2396 = vmatpush.bf16.msrb.mxu1 %v7890_v26 }
 0xa4a   : > { %2397 = vmatpush.bf16.msrb.mxu1 %v7889_v47  ;;  %v8379_v47 = vld [vmem:[#allocation5 + $0x31] ss:$0 sm:$0xff] }
 0xa4e   : > { %2398 = vmatpush.bf16.msrb.mxu1 %v7888_v49  ;;  %v8380_v49 = vld [vmem:[#allocation5 + $0x32] ss:$0 sm:$0xff] }
 0xa68   : > { %s8143_s23 = spop %8142 }
 0xa69   : > { %s1545_s24 = smul.f32 0.010416667, %s8143_s23 }
 0xa6b   : > { %v1546_v30 = vstv %s1545_s24 }
 0xa6c   : > { %v8912_v34 = vsub.f32 %v1534_v51, %v1546_v30  ;;  %v1760_v51 = vpop.f32.mrf.mxu1 }
 0xa6e   : > { %v1548_v36 = vmul.f32 %v8912_v34, %v8912_v34 }
 0xa70   : > { %v1549_v45 = vmul.f32 %v8863_v41, %v1548_v36 }
 0xa72   : > { %v1550_v44 = vsel %vm1358_vm12, %v1549_v45, 0.0 }
 0xa73   : > { %1551 = vadd.xlane.f32.xlu2 %v1550_v44 }
 0xa74   : > { %v1762_v60 = vpop.f32.mrf.mxu1 }
 0xa7b   : > { %1861 = vadd.xlane.f32.xlu2 %v8918_v50 }
 0xaae   : > { %v1698_v16 = vpop.f32.mrf.mxu0 }
 0xaaf   : > { %v1761_v52 = vadd.f32 %v1760_v51, %v1698_v16  ;;  %v8374_v51 = vld [vmem:[#allocation5 + $0x1f] ss:$0 sm:$0xff] }
 0xab1   : > { %v1767_v63 = vadd.f32 %v8373_v53, %v1761_v52 }
 0xab6   : > { %v1700_v55 = vpop.f32.mrf.mxu0 }
 0xab7   : > { %v1763_v61 = vadd.f32 %v1762_v60, %v1700_v55 }
 0xab9   : > { %v1768_v5 = vadd.f32 %v8373_v53, %v1763_v61  ;;  %v8375_v53 = vld [vmem:[#allocation5 + $0x20] ss:$0 sm:$0xff] }
 0xabb   : > { %v1769_v6 = vadd.f32 %v1768_v5, %v1767_v63 }
 0xabd   : > { %1770 = vadd.xlane.f32.xlu0 %v1769_v6 }
 0xae6   : > { %v1552_v9 = vpop.xlane.xlu2 %1551 }
 0xae7   : > { %v1553_v10 = vrot.slane %v1552_v9, 4 }
 0xae9   : > { %v1554_v59 = vadd.f32 %v1553_v10, %v1552_v9 }
 0xaeb   : > { %v1555_v11 = vrot.slane %v1554_v59, 2 }
 0xaed   : > { %v1556_v12 = vadd.f32 %v1555_v11, %v1554_v59 }
 0xaee   : > { %v1862_v26 = vpop.xlane.xlu2 %1861 }
 0xaef   : > { %v1557_v13 = vrot.slane %v1556_v12, 1 }
 0xaf1   : > { %v1558_v14 = vadd.f32 %v1557_v13, %v1556_v12 }
 0xaf3   : > { %8144 = vpush %v1558_v14 }
 0xb24   : > { %s8145_s25 = spop %8144 }
 0xb25   : > { %s1560_s26 = smul.f32 0.010416667, %s8145_s25 }
 0xb27   : > { %s1561_s28 = sadd.f32 1e-08, %s1560_s26 }
 0xb29   : > { %v1562_v24 = vstv %s1561_s28 }
 0xb2a   : > { %8519 = vrsqrt.f32 %v1562_v24  ;;  %vm1569_vm8 = vweird.f32 %v1562_v24 }
 0xb30   : > { %v8520_v27 = vpop.eup %8519  ;;  %v1771_v28 = vpop.xlane.xlu0 %1770 }
 0xb31   : > { %v1564_v29 = vmul.f32 %v8520_v27, %v1562_v24  ;;  %v1772_v30 = vrot.slane %v1771_v28, 4  ;;  %vm1570_vm7 = vweird.f32 %v8520_v27 }
 0xb32   : > { %vm1571_vm9 = vmor %vm1569_vm8, %vm1570_vm7 }
 0xb33   : > { %v1565_v31 = vmul.f32 %v8520_v27, %v1564_v29  ;;  %v1773_v32 = vadd.f32 %v1772_v30, %v1771_v28 }
 0xb35   : > { %v1566_v35 = vmul.f32 0.5, %v1565_v31  ;;  %v1774_v36 = vrot.slane %v1773_v32, 2 }
 0xb37   : > { %v1567_v37 = vsub.f32 1.5, %v1566_v35  ;;  %v1775_v40 = vadd.f32 %v1774_v36, %v1773_v32 }
 0xb39   : > { %v1568_v45 = vmul.f32 %v8520_v27, %v1567_v37  ;;  %v1776_v38 = vrot.slane %v1775_v40, 1 }
 0xb3b   : > { %v1572_v44 = vsel %vm1571_vm9, %v8520_v27, %v1568_v45  ;;  %v1777_v46 = vadd.f32 %v1776_v38, %v1775_v40  ;;  %v1863_v27 = vrot.slane %v1862_v26, 4 }
 0xb3c   : > { %8146 = vpush %v1572_v44 }
 0xb3d   : > { %8148 = vpush %v1777_v46  ;;  %v1864_v29 = vadd.f32 %v1863_v27, %v1862_v26 }
 0xb3f   : > { %v1865_v30 = vrot.slane %v1864_v29, 2 }
 0xb41   : > { %v1866_v36 = vadd.f32 %v1865_v30, %v1864_v29 }
 0xb43   : > { %v1867_v45 = vrot.slane %v1866_v36, 1 }
 0xb45   : > { %v1868_v46 = vadd.f32 %v1867_v45, %v1866_v36  ;;  %v7860_v36 = vld [vmem:[#allocation3 + $0x220] sm:$0xff]  ;;  %v7859_v45 = vld [vmem:[#allocation3 + $0x218] sm:$0xff] }
 0xb6d   : > { %s8147_s29 = spop %8146 }
 0xb6e   : > { %v1574_v16 = vstv %s8147_s29  ;;  %s8149_s30 = spop %8148 }
 0xb6f   : > { %v1575_v52 = vmul.f32 %v1574_v16, %v8912_v34  ;;  %s1779_s5 = smul.f32 0.0026041667, %s8149_s30  ;;  %v2236_v16 = vmul.f32 %v8379_v47, %v8903_v42 }
 0xb71   : > { %v1578_v60 = vmul.f32 %v8374_v51, %v1575_v52  ;;  %v1780_v55 = vstv %s1779_s5  ;;  %v2237_v51 = vld [vmem:[#allocation2 + $0x1] ss:$2 sm:$0xf] }
 0xb72   : > { %v8922_v61 = vsub.f32 %v1767_v63, %v1780_v55  ;;  %v8924_v6 = vsub.f32 %v1768_v5, %v1780_v55  ;;  %v2240_v52 = vmul.f32 %v8380_v49, %v2237_v51 }
 0xb73   : > { %v1581_v9 = vadd.f32 %v8375_v53, %v1578_v60  ;;  %v8381_v53 = vld [vmem:[#allocation5 + $0x33] ss:$0 sm:$0xff]  ;;  %v2242_v60 = vld [vmem:[#allocation2 + $0x2] ss:$2 sm:$0xf] }
 0xb74   : > { %v1783_v10 = vmul.f32 %v8922_v61, %v8922_v61  ;;  %v1784_v59 = vmul.f32 %v8924_v6, %v8924_v6  ;;  %v2241_v55 = vadd.f32 %v2240_v52, %v2236_v16 }
 0xb75   : > { %6716 = vmatpush.msk.msrb.mxu3 %vm1358_vm12, %v1581_v9  ;;  %v2325_v11 = vpack.c.bf16 %v1581_v9, %v1581_v9  ;;  %v2245_v9 = vmul.f32 %v8381_v53, %v2242_v60 }
 0xb76   : > { %v1785_v34 = vmul.f32 %v8863_v41, %v1783_v10  ;;  %v1786_v12 = vmul.f32 %v8863_v41, %v1784_v59  ;;  %v8382_v10 = vld [vmem:[#allocation5 + $0x34] ss:$0 sm:$0xff] }
 0xb77   : > { %2399 = vmatmul.bf16.vlgmr.msrb.gmra.mxu1 %v2325_v11  ;;  %v2246_v59 = vadd.f32 %v2245_v9, %v2241_v55  ;;  %v7857_v55 = vld [vmem:[#allocation3 + $0x208] sm:$0xff] }
 0xb78   : > { %v1787_v13 = vadd.f32 %v1786_v12, %v1785_v34  ;;  %v2250_v34 = vmul.f32 %v8382_v10, %v8905_v48  ;;  %v8383_v12 = vld [vmem:[#allocation5 + $0x35] ss:$0 sm:$0xff]  ;;  %v7873_v9 = vld [vmem:[#allocation3 + $0x288] sm:$0xff]  ;;  %v7856_v10 = vld [vmem:[#allocation3 + $0x200] sm:$0xff] }
 0xb7a   : > { %1788 = vadd.xlane.f32.xlu1 %v1787_v13  ;;  %v2251_v42 = vadd.f32 %v2250_v34, %v2246_v59  ;;  %v7872_v59 = vld [vmem:[#allocation3 + $0x280] sm:$0xff] }
 0xbed   : > { %v1789_v63 = vpop.xlane.xlu1 %1788 }
 0xbee   : > { %v1790_v5 = vrot.slane %v1789_v63, 4 }
 0xbf0   : > { %v1791_v14 = vadd.f32 %v1790_v5, %v1789_v63  ;;  %v2252_v63 = vld [vmem:[#allocation2 + $0x4] ss:$2 sm:$0xf] }
 0xbf2   : > { %v1792_v15 = vrot.slane %v1791_v14, 2 }
 0xbf4   : > { %v8933_v21 = vpop.f32.mrf.mxu1  ;;  %v1793_v22 = vadd.f32 %v1792_v15, %v1791_v14  ;;  %v2255_v14 = vmul.f32 %v8383_v12, %v2252_v63  ;;  %v8385_v12 = vld [vmem:[#allocation5 + $0x2f] ss:$0 sm:$0xff] }
 0xbf6   : > { %v1794_v23 = vrot.slane %v1793_v22, 1 }
 0xbf8   : > { %v1795_v24 = vadd.f32 %v1794_v23, %v1793_v22  ;;  %v2256_v22 = vadd.f32 %v2255_v14, %v2251_v42  ;;  %v8384_v23 = vld [vmem:[#allocation5 + $0x36] ss:$0 sm:$0xff] }
 0xbfa   : > { %8150 = vpush %v1795_v24  ;;  %v8945_v24 = vadd.f32 %v8384_v23, %v2256_v22 }
 0xbfc   : > { %v2402_v25 = vpop.f32.mrf.mxu1  ;;  %v2260_v48 = vsel %vm1358_vm12, %v8945_v24, 0.0 }
 0xc2b   : > { %s8151_s7 = spop %8150 }
 0xc2c   : > { %s1797_s8 = smul.f32 0.0026041667, %s8151_s7 }
 0xc2e   : > { %s1798_s9 = sadd.f32 1e-08, %s1797_s8 }
 0xc30   : > { %v1799_v28 = vstv %s1798_s9 }
 0xc31   : > { %8521 = vrsqrt.f32 %v1799_v28  ;;  %vm1806_vm15 = vweird.f32 %v1799_v28 }
 0xc37   : > { %v8522_v31 = vpop.eup %8521 }
 0xc38   : > { %v1801_v32 = vmul.f32 %v8522_v31, %v1799_v28  ;;  %vm1807_vm14 = vweird.f32 %v8522_v31 }
 0xc39   : > { %vm1808_vm1 = vmor %vm1806_vm15, %vm1807_vm14 }
 0xc3a   : > { %v1802_v35 = vmul.f32 %v8522_v31, %v1801_v32  ;;  %v7861_v32 = vld [vmem:[#allocation3 + $0x228] sm:$0xff] }
 0xc3c   : > { %v1803_v37 = vmul.f32 0.5, %v1802_v35  ;;  %v7877_v35 = vld [vmem:[#allocation3 + $0x2a8] sm:$0xff] }
 0xc3e   : > { %v1804_v40 = vsub.f32 1.5, %v1803_v37  ;;  %v7876_v37 = vld [vmem:[#allocation3 + $0x2a0] sm:$0xff] }
 0xc40   : > { %v1805_v38 = vmul.f32 %v8522_v31, %v1804_v40 }
 0xc42   : > { %v1809_v44 = vsel %vm1808_vm1, %v8522_v31, %v1805_v38  ;;  %v7878_v31 = vld [vmem:[#allocation3 + $0x2b0] sm:$0xff]  ;;  %v7875_v38 = vld [vmem:[#allocation3 + $0x298] sm:$0xff] }
 0xc43   : > { %8152 = vpush %v1809_v44  ;;  %2164 = vmatpush.bf16.msra.mxu0 %v7878_v31  ;;  %v7858_v44 = vld [vmem:[#allocation3 + $0x210] sm:$0xff] }
 0xc44   : > { %8154 = vpush %v1868_v46  ;;  %v7874_v46 = vld [vmem:[#allocation3 + $0x290] sm:$0xff] }
 0xc47   : > { %2165 = vmatpush.bf16.msra.mxu0 %v7877_v35 }
 0xc4b   : > { %2166 = vmatpush.bf16.msra.mxu0 %v7876_v37 }
 0xc4f   : > { %2167 = vmatpush.bf16.msra.mxu0 %v7875_v38 }
 0xc53   : > { %2168 = vmatpush.bf16.msra.mxu0 %v7874_v46 }
 0xc57   : > { %2169 = vmatpush.bf16.msra.mxu0 %v7873_v9 }
 0xc5b   : > { %2170 = vmatpush.bf16.msra.mxu0 %v7872_v59 }
 0xc74   : > { %s8936_s10 = spop %8152 }
 0xc75   : > { %s8155_s11 = spop %8154 }
 0xc76   : > { %s1870_s12 = smul.f32 0.0052083335, %s8155_s11 }
 0xc78   : > { %v1871_v11 = vstv %s1870_s12 }
 0xc79   : > { %v8940_v13 = vsub.f32 %v8918_v50, %v1871_v11  ;;  %v8950_v50 = vmul.u32 4, %v8749_v57 }
 0xc7b   : > { %v1873_v5 = vmul.f32 %v8940_v13, %v8940_v13  ;;  %vm1907_vm2 = vcmp.le.s32.totalorder %v602_v1, %v8950_v50  ;;  %vm1908_vm5 = vcmp.lt.s32.totalorder %v8950_v50, %v606_v3  ;;  %v7863_v1 = vld [vmem:[#allocation3 + $0x238] sm:$0xff]  ;;  %v7862_v3 = vld [vmem:[#allocation3 + $0x230] sm:$0xff] }
 0xc7c   : > { %vm1909_vm7 = vmand %vm1907_vm2, %vm1908_vm5  ;;  %2084 = vmatpush.bf16.msra.mxu3 %v7863_v1 }
 0xc7d   : > { %v1874_v15 = vmul.f32 %v8863_v41, %v1873_v5  ;;  %v8959_v25 = vsel %vm1909_vm7, 1.0, %v8651_v54  ;;  %v8386_v5 = vld [vmem:[#allocation5 + $0x30] ss:$0 sm:$0xff] }
 0xc7e   : > { %6717 = vmatmul.msk.f32.vlgmr.msrb.gmra.mxu3 %vm1912_vm6, %v8959_v25 }
 0xc7f   : > { %1875 = vadd.xlane.f32.xlu0 %v1874_v15 }
 0xc80   : > { %2085 = vmatpush.bf16.msra.mxu3 %v7862_v3 }
 0xc84   : > { %2086 = vmatpush.bf16.msra.mxu3 %v7861_v32 }
 0xc87   : > { %2261 = vadd.xlane.f32.xlu0 %v2260_v48 }
 0xc88   : > { %2087 = vmatpush.bf16.msra.mxu3 %v7860_v36 }
 0xc8c   : > { %2088 = vmatpush.bf16.msra.mxu3 %v7859_v45 }
 0xc90   : > { %2089 = vmatpush.bf16.msra.mxu3 %v7858_v44 }
 0xc94   : > { %2090 = vmatpush.bf16.msra.mxu3 %v7857_v55 }
 0xc98   : > { %2091 = vmatpush.bf16.msra.mxu3 %v7856_v10 }
 0xcf2   : > { %v1876_v26 = vpop.xlane.xlu0 %1875 }
 0xcf3   : > { %v1877_v27 = vrot.slane %v1876_v26, 4 }
 0xcf5   : > { %v1878_v57 = vadd.f32 %v1877_v27, %v1876_v26 }
 0xcf7   : > { %v1879_v28 = vrot.slane %v1878_v57, 2 }
 0xcf9   : > { %v1880_v29 = vadd.f32 %v1879_v28, %v1878_v57  ;;  %v8387_v57 = vld [vmem:[#allocation5 + $0x3d] ss:$0 sm:$0xff] }
 0xcfb   : > { %v1881_v30 = vrot.slane %v1880_v29, 1 }
 0xcfd   : > { %v1882_v56 = vadd.f32 %v1881_v30, %v1880_v29 }
 0xcff   : > { %8156 = vpush %v1882_v56 }
 0xd01   : > { %v1936_v11 = vpop.f32.mrf.mxu3 }
 0xd02   : > { %v2097_v34 = vpack.c.bf16 %v1936_v11, %v1936_v11 }
 0xd04   : > { %2171 = vmatmul.bf16.vlgmr.msra.gmra.mxu0 %v2097_v34 }
 0xd30   : > { %s8157_s13 = spop %8156 }
 0xd31   : > { %s1884_s14 = smul.f32 0.0052083335, %s8157_s13 }
 0xd33   : > { %s1885_s16 = sadd.f32 1e-08, %s1884_s14 }
 0xd35   : > { %v1886_v40 = vstv %s1885_s16 }
 0xd36   : > { %8523 = vrsqrt.f32 %v1886_v40  ;;  %vm1893_vm9 = vweird.f32 %v1886_v40 }
 0xd3c   : > { %v8524_v47 = vpop.eup %8523 }
 0xd3d   : > { %v1888_v49 = vmul.f32 %v8524_v47, %v1886_v40  ;;  %vm1894_vm8 = vweird.f32 %v8524_v47 }
 0xd3e   : > { %vm1895_vm14 = vmor %vm1893_vm9, %vm1894_vm8 }
 0xd3f   : > { %v1889_v51 = vmul.f32 %v8524_v47, %v1888_v49 }
 0xd41   : > { %v1890_v16 = vmul.f32 0.5, %v1889_v51  ;;  %v2262_v51 = vpop.xlane.xlu0 %2261 }
 0xd43   : > { %v1891_v52 = vsub.f32 1.5, %v1890_v16  ;;  %v2263_v16 = vrot.slane %v2262_v51, 4 }
 0xd45   : > { %v1892_v53 = vmul.f32 %v8524_v47, %v1891_v52 }
 0xd47   : > { %v1896_v60 = vsel %vm1895_vm14, %v8524_v47, %v1892_v53  ;;  %v2264_v53 = vadd.f32 %v2263_v16, %v2262_v51  ;;  %v8377_v51 = vld [vmem:[#allocation5 + $0x3b] ss:$0 sm:$0xff]  ;;  %v7898_v16 = vld [vmem:[#allocation3 + $0x350] sm:$0xff] }
 0xd48   : > { %8158 = vpush %v1896_v60 }
 0xd49   : > { %v2265_v60 = vrot.slane %v2264_v53, 2 }
 0xd4b   : > { %v2266_v59 = vadd.f32 %v2265_v60, %v2264_v53  ;;  %v8378_v60 = vld [vmem:[#allocation5 + $0x3c] ss:$0 sm:$0xff] }
 0xd79   : > { %s8159_s17 = spop %8158 }
 0xd7a   : > { %v1898_v63 = vstv %s8159_s17 }
 0xd7b   : > { %v1899_v42 = vmul.f32 %v1898_v63, %v8940_v13 }
 0xd7d   : > { %v1902_v14 = vmul.f32 %v8385_v12, %v1899_v42  ;;  %v2267_v12 = vrot.slane %v2266_v59, 1 }
 0xd7f   : > { %v1905_v15 = vadd.f32 %v8386_v5, %v1902_v14  ;;  %v2268_v5 = vadd.f32 %v2267_v12, %v2266_v59  ;;  %v8388_v14 = vld [vmem:[#allocation5 + $0x3e] ss:$0 sm:$0xff]  ;;  %v7905_v12 = vld [vmem:[#allocation3 + $0x388] sm:$0xff] }
 0xd81   : > { %v1939_v22 = vpack.c.bf16 %v1905_v15, %v1905_v15  ;;  %v2172_v23 = vpop.f32.mrf.mxu0 }
 0xd83   : > { %2092 = vmatmul.bf16.vlgmr.msra.gmra.mxu3 %v1939_v22 }
 0xd89   : > { %v2174_v48 = vpop.f32.mrf.mxu0 }
 0xe06   : > { %v2093_v26 = vpop.f32.mrf.mxu3 }
 0xe07   : > { %v2094_v27 = vadd.f32 %v2093_v26, %v8910_v8 }
 0xe09   : > { %v2176_v28 = vadd.f32 %v2172_v23, %v2094_v27  ;;  %v8389_v23 = vld [vmem:[#allocation5 + $0x3f] ss:$0 sm:$0xff]  ;;  %v8390_v27 = vld [vmem:[#allocation5 + $0x40] ss:$0 sm:$0xff] }
 0xe0b   : > { %v2179_v29 = vadd.f32 %v8387_v57, %v2176_v28 }
 0xe0d   : > { %2180 = vadd.xlane.f32.xlu1 %v2179_v29 }
 0xe0e   : > { %v2095_v30 = vpop.f32.mrf.mxu3 }
 0xe80   : > { %v2181_v56 = vpop.xlane.xlu1 %2180 }
 0xe81   : > { %v2182_v1 = vrot.slane %v2181_v56, 4 }
 0xe83   : > { %v2183_v58 = vadd.f32 %v2182_v1, %v2181_v56  ;;  %v7903_v1 = vld [vmem:[#allocation3 + $0x378] sm:$0xff] }
 0xe85   : > { %v2184_v3 = vrot.slane %v2183_v58, 2 }
 0xe87   : > { %v2185_v13 = vadd.f32 %v2184_v3, %v2183_v58 }
 0xe89   : > { %v2186_v31 = vrot.slane %v2185_v13, 1 }
 0xe8b   : > { %v2187_v32 = vadd.f32 %v2186_v31, %v2185_v13  ;;  %v7902_v13 = vld [vmem:[#allocation3 + $0x370] sm:$0xff] }
 0xe8c   : > { %v7910_v31 = vld [vmem:[#allocation3 + $0x3b0] sm:$0xff] }
 0xe8d   : > { %8160 = vpush %v2187_v32  ;;  %v7901_v32 = vld [vmem:[#allocation3 + $0x368] sm:$0xff] }
 0xebe   : > { %s8161_s18 = spop %8160 }
 0xebf   : > { %s2189_s20 = smul.f32 0.0052083335, %s8161_s18 }
 0xec1   : > { %v2190_v35 = vstv %s2189_s20 }
 0xec2   : > { %v2191_v36 = vsub.f32 %v2179_v29, %v2190_v35  ;;  %v7909_v35 = vld [vmem:[#allocation3 + $0x3a8] sm:$0xff] }
 0xec4   : > { %v2192_v37 = vmul.f32 %v2191_v36, %v2191_v36 }
 0xec6   : > { %v2193_v8 = vmul.f32 %v8863_v41, %v2192_v37  ;;  %v7900_v37 = vld [vmem:[#allocation3 + $0x360] sm:$0xff] }
 0xec8   : > { %2194 = vadd.xlane.f32.xlu2 %v2193_v8  ;;  %v7908_v8 = vld [vmem:[#allocation3 + $0x3a0] sm:$0xff] }
 0xf3b   : > { %v2195_v40 = vpop.xlane.xlu2 %2194 }
 0xf3c   : > { %v2196_v45 = vrot.slane %v2195_v40, 4 }
 0xf3e   : > { %v2197_v38 = vadd.f32 %v2196_v45, %v2195_v40 }
 0xf40   : > { %v2198_v44 = vrot.slane %v2197_v38, 2 }
 0xf42   : > { %v2199_v46 = vadd.f32 %v2198_v44, %v2197_v38  ;;  %v8376_v38 = vld [vmem:[#allocation5 + $0x3a] ss:$0 sm:$0xff] }
 0xf43   : > { %v7899_v44 = vld [vmem:[#allocation3 + $0x358] sm:$0xff] }
 0xf44   : > { %v2200_v47 = vrot.slane %v2199_v46, 1 }
 0xf46   : > { %v2201_v49 = vadd.f32 %v2200_v47, %v2199_v46  ;;  %v7907_v46 = vld [vmem:[#allocation3 + $0x398] sm:$0xff] }
 0xf48   : > { %8162 = vpush %v2201_v49 }
 0xf79   : > { %s8163_s21 = spop %8162 }
 0xf7a   : > { %s2203_s22 = smul.f32 0.0052083335, %s8163_s21 }
 0xf7c   : > { %s2204_s23 = sadd.f32 1e-08, %s2203_s22 }
 0xf7e   : > { %v2205_v52 = vstv %s2204_s23 }
 0xf7f   : > { %8525 = vrsqrt.f32 %v2205_v52  ;;  %vm2212_vm1 = vweird.f32 %v2205_v52 }
 0xf85   : > { %v8526_v55 = vpop.eup %8525 }
 0xf86   : > { %v2207_v9 = vmul.f32 %v8526_v55, %v2205_v52  ;;  %vm2213_vm15 = vweird.f32 %v8526_v55 }
 0xf87   : > { %vm2214_vm2 = vmor %vm2212_vm1, %vm2213_vm15 }
 0xf88   : > { %v2208_v10 = vmul.f32 %v8526_v55, %v2207_v9 }
 0xf8a   : > { %v2209_v11 = vmul.f32 0.5, %v2208_v10 }
 0xf8c   : > { %v2210_v34 = vsub.f32 1.5, %v2209_v11 }
 0xf8e   : > { %v2211_v63 = vmul.f32 %v8526_v55, %v2210_v34  ;;  %v7906_v34 = vld [vmem:[#allocation3 + $0x390] sm:$0xff] }
 0xf90   : > { %v2215_v42 = vsel %vm2214_vm2, %v8526_v55, %v2211_v63  ;;  %v7897_v55 = vld [vmem:[#allocation3 + $0x348] sm:$0xff]  ;;  %v7904_v63 = vld [vmem:[#allocation3 + $0x380] sm:$0xff] }
 0xf91   : > { %8164 = vpush %v2215_v42  ;;  %v7935_v42 = vld [vmem:[#allocation3 + $0x678] sm:$0xff] }
 0xf92   : > { %8166 = vpush %v2268_v5  ;;  %v7934_v5 = vld [vmem:[#allocation3 + $0x670] sm:$0xff] }
 0xfc2   : > { %s8165_s24 = spop %8164 }
 0xfc3   : > { %v2217_v15 = vstv %s8165_s24  ;;  %s8167_s25 = spop %8166 }
 0xfc4   : > { %v2218_v22 = vmul.f32 %v2217_v15, %v2191_v36  ;;  %s2270_s26 = smul.f32 0.010416667, %s8167_s25  ;;  %v1811_v36 = vstv %s8936_s10  ;;  %v7932_v15 = vld [vmem:[#allocation3 + $0x660] sm:$0xff] }
 0xfc5   : > { %v1812_v40 = vmul.f32 %v1811_v36, %v8922_v61  ;;  %v1813_v45 = vmul.f32 %v1811_v36, %v8924_v6  ;;  %v7896_v6 = vld [vmem:[#allocation3 + $0x340] sm:$0xff] }
 0xfc6   : > { %v2221_v48 = vmul.f32 %v8388_v14, %v2218_v22  ;;  %v2271_v26 = vstv %s2270_s26  ;;  %v7933_v14 = vld [vmem:[#allocation3 + $0x668] sm:$0xff]  ;;  %v7931_v22 = vld [vmem:[#allocation3 + $0x658] sm:$0xff] }
 0xfc7   : > { %v8967_v57 = vsub.f32 %v8945_v24, %v2271_v26  ;;  %v7911_v24 = vld [vmem:[#allocation3 + $0x3b8] sm:$0xff]  ;;  %v1816_v47 = vmul.f32 %v8376_v38, %v1812_v40  ;;  %v1817_v49 = vmul.f32 %v8376_v38, %v1813_v45  ;;  %v7930_v26 = vld [vmem:[#allocation3 + $0x650] sm:$0xff]  ;;  %v8341_v45 = vld [vmem:[#allocation5 + $0xa2] ss:$0 sm:$0xff] }
 0xfc8   : > { %v2224_v28 = vadd.f32 %v8389_v23, %v2221_v48  ;;  %2670 = vmatpush.bf16.msra.mxu1 %v7911_v24  ;;  %v1106_v23 = vstv %s8859_s27 }
 0xfc9   : > { %v2273_v29 = vmul.f32 %v8967_v57, %v8967_v57  ;;  %v1820_v52 = vadd.f32 %v8377_v51, %v1816_v47  ;;  %v1821_v53 = vadd.f32 %v8377_v51, %v1817_v49  ;;  %v8391_v47 = vld [vmem:[#allocation5 + $0xa3] ss:$0 sm:$0xff]  ;;  %v8392_v51 = vld [vmem:[#allocation5 + $0xa4] ss:$0 sm:$0xff] }
 0xfca   : > { %vm2225_vm5 = vcmp.ge.f32.partialorder %v2224_v28, 0.0  ;;  %v2228_v30 = vmul.f32 %v8390_v27, %v2224_v28 }
 0xfcb   : > { %v2274_v56 = vmul.f32 %v8863_v41, %v2273_v29  ;;  %v1826_v9 = vmul.f32 %v8378_v60, %v1820_v52  ;;  %v1827_v61 = vmul.f32 %v8378_v60, %v1821_v53  ;;  %vm1822_vm7 = vcmp.ge.f32.partialorder %v1820_v52, 0.0  ;;  %v8338_v29 = vld [vmem:[#allocation5 + $0xaa] ss:$0 sm:$0xff]  ;;  %v7887_v60 = vld [vmem:[#allocation3 + $0x2f8] sm:$0xff] }
 0xfcc   : > { %v2229_v58 = vsel %vm2225_vm5, %v2224_v28, %v2228_v30  ;;  %2671 = vmatpush.bf16.msra.mxu1 %v7910_v31  ;;  %vm1823_vm8 = vcmp.ge.f32.partialorder %v1821_v53, 0.0  ;;  %v1107_v28 = vmul.f32 %v1106_v23, %v8846_v39  ;;  %2452 = vmatpush.bf16.msrb.mxu2 %v7887_v60 }
 0xfcd   : > { %2535 = vmatpush.msrb.mxu3 %v2229_v58  ;;  %v2275_v3 = vsel %vm1358_vm12, %v2274_v56, 0.0  ;;  %v1828_v10 = vsel %vm1822_vm7, %v1820_v52, %v1826_v9  ;;  %v1829_v59 = vsel %vm1823_vm8, %v1821_v53, %v1827_v61  ;;  %v7929_v56 = vld [vmem:[#allocation3 + $0x648] sm:$0xff] }
 0xfce   : > { %2276 = vadd.xlane.f32.xlu1 %v2275_v3  ;;  %6878 = vmatmul.msk.f32.vlgmr.msrb.gmra.mxu3 %vm650_vm13, %v8805_v20  ;;  %v2586_v11 = vpack.c.bf16 %v1829_v59, %v1828_v10  ;;  %v1110_v58 = vmul.f32 %v8338_v29, %v1107_v28  ;;  %v8339_v3 = vld [vmem:[#allocation5 + $0xab] ss:$0 sm:$0xff]  ;;  %v7882_v10 = vld [vmem:[#allocation3 + $0x2d0] sm:$0xff] }
 0xfcf   : > { %2732 = vmatpush.bf16.msra.mxu3 %v7903_v1  ;;  %v7885_v9 = vld [vmem:[#allocation3 + $0x2e8] sm:$0xff] }
 0xfd0   : > { %2672 = vmatpush.bf16.msra.mxu1 %v7909_v35  ;;  %v8340_v35 = vld [vmem:[#allocation5 + $0xac] ss:$0 sm:$0xff] }
 0xfd3   : > { %2733 = vmatpush.bf16.msra.mxu3 %v7902_v13  ;;  %v7928_v13 = vld [vmem:[#allocation3 + $0x640] sm:$0xff] }
 0xfd4   : > { %2673 = vmatpush.bf16.msra.mxu1 %v7908_v8 }
 0xfd6   : > { %6879 = vmatmul.msk.f32.gmra.mxu3 %vm650_vm13, %v8828_v33 }
 0xfd7   : > { %2734 = vmatpush.bf16.msra.mxu3 %v7901_v32  ;;  %v1113_v32 = vadd.f32 %v8339_v3, %v1110_v58  ;;  %v8396_v3 = vld [vmem:[#allocation5 + $0x41] ss:$0 sm:$0xff] }
 0xfd8   : > { %2674 = vmatpush.bf16.msra.mxu1 %v7907_v46 }
 0xfd9   : > { %vm1114_vm9 = vcmp.ge.f32.partialorder %v1113_v32, 0.0 }
 0xfdb   : > { %2735 = vmatpush.bf16.msra.mxu3 %v7900_v37  ;;  %v1117_v37 = vmul.f32 %v8340_v35, %v1113_v32 }
 0xfdc   : > { %2675 = vmatpush.bf16.msra.mxu1 %v7906_v34 }
 0xfdd   : > { %v1118_v39 = vsel %vm1114_vm9, %v1113_v32, %v1117_v37  ;;  %vm2544_vm9 = vcmp.le.s32.totalorder %v8755_v62, %v8950_v50 }
 0xfde   : > { %v2977_v40 = vadd.f32 %v1118_v39, %v8802_v19  ;;  %v7884_v19 = vld [vmem:[#allocation3 + $0x2e0] sm:$0xff] }
 0xfdf   : > { %2736 = vmatpush.bf16.msra.mxu3 %v7899_v44 }
 0xfe0   : > { %2676 = vmatpush.bf16.msra.mxu1 %v7905_v12  ;;  %v2980_v46 = vmul.f32 %v8341_v45, %v2977_v40 }
 0xfe2   : > { %v2983_v49 = vadd.f32 %v8391_v47, %v2980_v46 }
 0xfe3   : > { %2737 = vmatpush.bf16.msra.mxu3 %v7898_v16 }
 0xfe4   : > { %2677 = vmatpush.bf16.msra.mxu1 %v7904_v63  ;;  %v2987_v16 = vmul.f32 %v8392_v51, %v2983_v49  ;;  %vm2984_vm14 = vcmp.ge.f32.partialorder %v2983_v49, 0.0 }
 0xfe6   : > { %v2988_v52 = vsel %vm2984_vm14, %v2983_v49, %v2987_v16  ;;  %v8395_v49 = vld [vmem:[#allocation5 + $0x73] ss:$0 sm:$0xff]  ;;  %vm2546_vm14 = vcmp.lt.s32.totalorder %v8950_v50, %v8759_v0 }
 0xfe7   : > { %2738 = vmatpush.bf16.msra.mxu3 %v7897_v55  ;;  %v2989_v53 = vpack.c.bf16 %v2988_v52, %v2988_v52  ;;  %v7886_v55 = vld [vmem:[#allocation3 + $0x2f0] sm:$0xff] }
 0xfe8   : > { %3057 = vmatpush.bf16.msrb.mxu1 %v7935_v42  ;;  %2453 = vmatpush.bf16.msrb.mxu2 %v7886_v55  ;;  %v7918_v50 = vld [vmem:[#allocation3 + $0x3f0] sm:$0xff] }
 0xfeb   : > { %2739 = vmatpush.bf16.msra.mxu3 %v7896_v6  ;;  %v7883_v6 = vld [vmem:[#allocation3 + $0x2d8] sm:$0xff] }
 0xfec   : > { %3058 = vmatpush.bf16.msrb.mxu1 %v7934_v5  ;;  %2454 = vmatpush.bf16.msrb.mxu2 %v7885_v9 }
 0xfee   : > { %2740 = vmatmul.bf16.vlgmr.msra.gmra.mxu3 %v2586_v11 }
 0xff0   : > { %3059 = vmatpush.bf16.msrb.mxu1 %v7933_v14  ;;  %2455 = vmatpush.bf16.msrb.mxu2 %v7884_v19  ;;  %v7881_v14 = vld [vmem:[#allocation3 + $0x2c8] sm:$0xff] }
 0xff4   : > { %3060 = vmatpush.bf16.msrb.mxu1 %v7932_v15  ;;  %2456 = vmatpush.bf16.msrb.mxu2 %v7883_v6  ;;  %v7880_v15 = vld [vmem:[#allocation3 + $0x2c0] sm:$0xff] }
 0xff8   : > { %3061 = vmatpush.bf16.msrb.mxu1 %v7931_v22  ;;  %2457 = vmatpush.bf16.msrb.mxu2 %v7882_v10  ;;  %v8393_v22 = vld [vmem:[#allocation5 + $0x37] ss:$0 sm:$0xff] }
 0xffc   : > { %3062 = vmatpush.bf16.msrb.mxu1 %v7930_v26  ;;  %2458 = vmatpush.bf16.msrb.mxu2 %v7881_v14  ;;  %v8394_v26 = vld [vmem:[#allocation5 + $0x38] ss:$0 sm:$0xff] }
0x1000   : > { %3063 = vmatpush.bf16.msrb.mxu1 %v7929_v56  ;;  %2459 = vmatpush.bf16.msrb.mxu2 %v7880_v15  ;;  %v8398_v15 = vld [vmem:[#allocation5 + $0x43] ss:$0 sm:$0xff] }
0x1004   : > { %3064 = vmatpush.bf16.msrb.mxu1 %v7928_v13 }
0x1041   : > { %v2277_v48 = vpop.xlane.xlu1 %2276 }
0x1042   : > { %v2278_v27 = vrot.slane %v2277_v48, 4 }
0x1044   : > { %v2279_v30 = vadd.f32 %v2278_v27, %v2277_v48 }
0x1046   : > { %v2280_v1 = vrot.slane %v2279_v30, 2 }
0x1048   : > { %v2281_v24 = vadd.f32 %v2280_v1, %v2279_v30 }
0x104a   : > { %v2282_v31 = vrot.slane %v2281_v24, 1 }
0x104c   : > { %v2283_v36 = vadd.f32 %v2282_v31, %v2281_v24 }
0x104e   : > { %8168 = vpush %v2283_v36 }
0x1051   : > { %v2537_v8 = vpop.f32.mrf.mxu3 }
0x1059   : > { %v2540_v38 = vpop.f32.mrf.mxu3 }
0x105a   : > { %v2604_v44 = vpack.c.bf16 %v2540_v38, %v2537_v8 }
0x105c   : > { %2678 = vmatmul.bf16.vlgmr.msra.gmra.mxu1 %v2604_v44 }
0x106c   : > { %3065 = vmatmul.bf16.vlgmr.msrb.gmra.mxu1 %v2989_v53 }
0x107f   : > { %s8169_s27 = spop %8168 }
0x1080   : > { %s2285_s28 = smul.f32 0.010416667, %s8169_s27 }
0x1082   : > { %s2286_s29 = sadd.f32 1e-08, %s2285_s28 }
0x1084   : > { %v2287_v61 = vstv %s2286_s29 }
0x1085   : > { %8527 = vrsqrt.f32 %v2287_v61  ;;  %vm2294_vm1 = vweird.f32 %v2287_v61 }
0x108b   : > { %v8528_v59 = vpop.eup %8527 }
0x108c   : > { %v2289_v11 = vmul.f32 %v8528_v59, %v2287_v61  ;;  %vm2295_vm15 = vweird.f32 %v8528_v59 }
0x108d   : > { %vm2296_vm2 = vmor %vm2294_vm1, %vm2295_vm15 }
0x108e   : > { %v2290_v34 = vmul.f32 %v8528_v59, %v2289_v11  ;;  %vm2548_vm15 = vmand %vm2544_vm9, %vm2546_vm14 }
0x1090   : > { %v2291_v12 = vmul.f32 0.5, %v2290_v34 }
0x1092   : > { %v2292_v63 = vsub.f32 1.5, %v2291_v12 }
0x1094   : > { %v2293_v42 = vmul.f32 %v8528_v59, %v2292_v63 }
0x1096   : > { %v2297_v5 = vsel %vm2296_vm2, %v8528_v59, %v2293_v42  ;;  %v8397_v42 = vld [vmem:[#allocation5 + $0x42] ss:$0 sm:$0xff] }
0x1097   : > { %8170 = vpush %v2297_v5 }
0x10c8   : > { %s8171_s30 = spop %8170 }
0x10c9   : > { %v2299_v23 = vstv %s8171_s30 }
0x10ca   : > { %v2300_v48 = vmul.f32 %v2299_v23, %v8967_v57  ;;  %v8399_v23 = vld [vmem:[#allocation5 + $0x44] ss:$0 sm:$0xff] }
0x10cc   : > { %v2303_v27 = vmul.f32 %v8393_v22, %v2300_v48 }
0x10ce   : > { %v2306_v28 = vadd.f32 %v8394_v26, %v2303_v27  ;;  %v2543_v26 = vmul.u32 4, %v8775_v7 }
0x10d0   : > { %v2307_v29 = vpack.c.bf16 %v2306_v28, %v2306_v28  ;;  %v9001_v28 = vsel %vm2548_vm15, 1.0, %v8651_v54  ;;  %vm2545_vm2 = vcmp.le.s32.totalorder %v8755_v62, %v2543_v26  ;;  %v7915_v62 = vld [vmem:[#allocation3 + $0x3d8] sm:$0xff] }
0x10d2   : > { %2460 = vmatmul.bf16.vlgmr.msrb.gmra.mxu2 %v2307_v29  ;;  %v7919_v29 = vld [vmem:[#allocation3 + $0x3f8] sm:$0xff] }
0x10d9   : > { %v8984_v30 = vpop.f32.mrf.mxu1 }
0x10e1   : > { %v8986_v56 = vpop.f32.mrf.mxu1 }
0x10e9   : > { %v3066_v1 = vpop.f32.mrf.mxu1 }
0x10ea   : > { %v8992_v51 = vadd.f32 %v8395_v49, %v3066_v1 }
0x10f1   : > { %v3068_v58 = vpop.f32.mrf.mxu1 }
0x10f2   : > { %v7917_v58 = vld [vmem:[#allocation3 + $0x3e8] sm:$0xff] }
0x1155   : > { %v2461_v24 = vpop.f32.mrf.mxu2 }
0x1156   : > { %v2462_v13 = vadd.f32 %v2461_v24, %v8933_v21  ;;  %v7913_v24 = vld [vmem:[#allocation3 + $0x3c8] sm:$0xff] }
0x1158   : > { %v2467_v31 = vadd.f32 %v8396_v3, %v2462_v13  ;;  %v7916_v3 = vld [vmem:[#allocation3 + $0x3e0] sm:$0xff] }
0x1159   : > { %v7912_v13 = vld [vmem:[#allocation3 + $0x3c0] sm:$0xff] }
0x115a   : > { %v2468_v32 = vsel %vm1358_vm12, %v2467_v31, 0.0 }
0x115b   : > { %2469 = vadd.xlane.f32.xlu2 %v2468_v32 }
0x115d   : > { %v2463_v57 = vpop.f32.mrf.mxu2 }
0x11ce   : > { %v2470_v35 = vpop.xlane.xlu2 %2469 }
0x11cf   : > { %v2471_v36 = vrot.slane %v2470_v35, 4 }
0x11d1   : > { %v2472_v37 = vadd.f32 %v2471_v36, %v2470_v35  ;;  %v2741_v35 = vpop.f32.mrf.mxu3 }
0x11d3   : > { %v2473_v8 = vrot.slane %v2472_v37, 2 }
0x11d5   : > { %v2474_v39 = vadd.f32 %v2473_v8, %v2472_v37  ;;  %v2742_v37 = vadd.f32 %v2741_v35, %v8984_v30 }
0x11d7   : > { %v2475_v40 = vrot.slane %v2474_v39, 1 }
0x11d9   : > { %v2476_v45 = vadd.f32 %v2475_v40, %v2474_v39  ;;  %v2743_v8 = vpop.f32.mrf.mxu3 }
0x11da   : > { %v2744_v39 = vadd.f32 %v2743_v8, %v8986_v56  ;;  %v7922_v8 = vld [vmem:[#allocation3 + $0x410] sm:$0xff] }
0x11db   : > { %8172 = vpush %v2476_v45  ;;  %v8400_v45 = vld [vmem:[#allocation5 + $0x45] ss:$0 sm:$0xff] }
0x120c   : > { %s8173_s5 = spop %8172 }
0x120d   : > { %s2478_s7 = smul.f32 0.010416667, %s8173_s5 }
0x120f   : > { %v2479_v38 = vstv %s2478_s7 }
0x1210   : > { %v2480_v44 = vsub.f32 %v2467_v31, %v2479_v38 }
0x1212   : > { %v2481_v46 = vmul.f32 %v2480_v44, %v2480_v44 }
0x1214   : > { %v2482_v21 = vmul.f32 %v8863_v41, %v2481_v46 }
0x1216   : > { %v2483_v47 = vsel %vm1358_vm12, %v2482_v21, 0.0 }
0x1217   : > { %2484 = vadd.xlane.f32.xlu0 %v2483_v47 }
0x121f   : > { %3070 = vadd.xlane.f32.xlu0 %v8992_v51 }
0x128a   : > { %v2485_v16 = vpop.xlane.xlu0 %2484 }
0x128b   : > { %v2486_v52 = vrot.slane %v2485_v16, 4 }
0x128d   : > { %v2487_v53 = vadd.f32 %v2486_v52, %v2485_v16 }
0x128f   : > { %v2488_v60 = vrot.slane %v2487_v53, 2 }
0x1291   : > { %v2489_v55 = vadd.f32 %v2488_v60, %v2487_v53 }
0x1293   : > { %v2490_v9 = vrot.slane %v2489_v55, 1 }
0x1295   : > { %v2491_v19 = vadd.f32 %v2490_v9, %v2489_v55 }
0x1297   : > { %8174 = vpush %v2491_v19 }
0x12c8   : > { %s8175_s8 = spop %8174 }
0x12c9   : > { %s2493_s9 = smul.f32 0.010416667, %s8175_s8 }
0x12cb   : > { %s2494_s10 = sadd.f32 1e-08, %s2493_s9 }
0x12cd   : > { %v2495_v61 = vstv %s2494_s10 }
0x12ce   : > { %8529 = vrsqrt.f32 %v2495_v61  ;;  %vm2502_vm7 = vweird.f32 %v2495_v61 }
0x12d4   : > { %v8530_v6 = vpop.eup %8529 }
0x12d5   : > { %v2497_v10 = vmul.f32 %v8530_v6, %v2495_v61  ;;  %vm2503_vm5 = vweird.f32 %v8530_v6 }
0x12d6   : > { %vm2504_vm8 = vmor %vm2502_vm7, %vm2503_vm5  ;;  %vm2547_vm5 = vcmp.lt.s32.totalorder %v2543_v26, %v8759_v0  ;;  %v7914_v0 = vld [vmem:[#allocation3 + $0x3d0] sm:$0xff]  ;;  %v3071_v26 = vpop.xlane.xlu0 %3070 }
0x12d7   : > { %v2498_v59 = vmul.f32 %v8530_v6, %v2497_v10  ;;  %vm2549_vm7 = vmand %vm2545_vm2, %vm2547_vm5 }
0x12d8   : > { %v9009_v7 = vsel %vm2549_vm7, 1.0, %v8651_v54 }
0x12d9   : > { %v2499_v11 = vmul.f32 0.5, %v2498_v59 }
0x12db   : > { %v2500_v34 = vsub.f32 1.5, %v2499_v11 }
0x12dd   : > { %v2501_v12 = vmul.f32 %v8530_v6, %v2500_v34 }
0x12df   : > { %v2505_v63 = vsel %vm2504_vm8, %v8530_v6, %v2501_v12 }
0x12e0   : > { %8176 = vpush %v2505_v63 }
0x1311   : > { %s8177_s11 = spop %8176 }
0x1312   : > { %v2507_v5 = vstv %s8177_s11 }
0x1313   : > { %v2508_v14 = vmul.f32 %v2507_v5, %v2480_v44 }
0x1315   : > { %v2511_v22 = vmul.f32 %v8397_v42, %v2508_v14 }
0x1317   : > { %v2514_v48 = vadd.f32 %v8398_v15, %v2511_v22  ;;  %v7927_v22 = vld [vmem:[#allocation3 + $0x438] sm:$0xff] }
0x1318   : > { %2961 = vmatpush.bf16.msra.mxu2 %v7927_v22 }
0x1319   : > { %v2518_v27 = vmul.f32 %v8399_v23, %v2514_v48  ;;  %vm2515_vm1 = vcmp.ge.f32.partialorder %v2514_v48, 0.0  ;;  %v7926_v23 = vld [vmem:[#allocation3 + $0x430] sm:$0xff] }
0x131b   : > { %v2519_v1 = vsel %vm2515_vm1, %v2514_v48, %v2518_v27  ;;  %v7925_v48 = vld [vmem:[#allocation3 + $0x428] sm:$0xff]  ;;  %v3072_v27 = vrot.slane %v3071_v26, 4 }
0x131c   : > { %6882 = vmatpush.msk.msrb.mxu0 %vm1358_vm12, %v2519_v1  ;;  %2962 = vmatpush.bf16.msra.mxu2 %v7926_v23 }
0x131d   : > { %6883 = vmatmul.msk.f32.vlgmr.msrb.gmra.mxu0 %vm1912_vm6, %v9001_v28 }
0x131e   : > { %2812 = vmatpush.bf16.msra.mxu0 %v7919_v29  ;;  %v7924_v29 = vld [vmem:[#allocation3 + $0x420] sm:$0xff] }
0x1320   : > { %2963 = vmatpush.bf16.msra.mxu2 %v7925_v48 }
0x1322   : > { %2813 = vmatpush.bf16.msra.mxu0 %v7918_v50  ;;  %v3073_v50 = vadd.f32 %v3072_v27, %v3071_v26 }
0x1324   : > { %2964 = vmatpush.bf16.msra.mxu2 %v7924_v29  ;;  %v8405_v29 = vld [vmem:[#allocation5 + $0x74] ss:$0 sm:$0xff] }
0x1325   : > { %6884 = vmatmul.msk.f32.gmra.mxu0 %vm1912_vm6, %v9009_v7 }
0x1326   : > { %2814 = vmatpush.bf16.msra.mxu0 %v7917_v58  ;;  %v7923_v58 = vld [vmem:[#allocation3 + $0x418] sm:$0xff] }
0x1328   : > { %2965 = vmatpush.bf16.msra.mxu2 %v7923_v58  ;;  %v8406_v58 = vld [vmem:[#allocation5 + $0x75] ss:$0 sm:$0xff] }
0x132a   : > { %2815 = vmatpush.bf16.msra.mxu0 %v7916_v3  ;;  %v3074_v3 = vrot.slane %v3073_v50, 2 }
0x132c   : > { %2966 = vmatpush.bf16.msra.mxu2 %v7922_v8 }
0x132e   : > { %2816 = vmatpush.bf16.msra.mxu0 %v7915_v62 }
0x1332   : > { %2817 = vmatpush.bf16.msra.mxu0 %v7914_v0 }
0x1336   : > { %2818 = vmatpush.bf16.msra.mxu0 %v7913_v24 }
0x133a   : > { %2819 = vmatpush.bf16.msra.mxu0 %v7912_v13  ;;  %v3075_v13 = vadd.f32 %v3074_v3, %v3073_v50 }
0x139a   : > { %v2580_v31 = vpop.f32.mrf.mxu0 }
0x13a2   : > { %v2583_v32 = vpop.f32.mrf.mxu0 }
0x13a3   : > { %v2746_v57 = vpack.c.bf16 %v2583_v32, %v2580_v31 }
0x13a5   : > { %2820 = vmatmul.bf16.vlgmr.msra.gmra.mxu0 %v2746_v57  ;;  %v3076_v57 = vrot.slane %v3075_v13, 1 }
0x1422   : > { %v2821_v36 = vpop.f32.mrf.mxu0 }
0x1423   : > { %v2826_v40 = vadd.f32 %v2821_v36, %v2742_v37  ;;  %v3077_v37 = vadd.f32 %v3076_v57, %v3075_v13 }
0x1425   : > { %v2830_v46 = vadd.f32 %v8400_v45, %v2826_v40  ;;  %v7920_v40 = vld [vmem:[#allocation3 + $0x400] sm:$0xff] }
0x142a   : > { %v2823_v38 = vpop.f32.mrf.mxu0 }
0x142b   : > { %v2827_v44 = vadd.f32 %v2823_v38, %v2744_v39  ;;  %v7921_v39 = vld [vmem:[#allocation3 + $0x408] sm:$0xff] }
0x142c   : > { %2967 = vmatpush.bf16.msra.mxu2 %v7921_v39 }
0x142d   : > { %v2831_v21 = vadd.f32 %v8400_v45, %v2827_v44  ;;  %v8401_v45 = vld [vmem:[#allocation5 + $0x46] ss:$0 sm:$0xff] }
0x142f   : > { %v2832_v47 = vadd.f32 %v2831_v21, %v2830_v46 }
0x1430   : > { %2968 = vmatpush.bf16.msra.mxu2 %v7920_v40 }
0x1431   : > { %2833 = vadd.xlane.f32.xlu1 %v2832_v47 }
0x14a4   : > { %v2834_v49 = vpop.xlane.xlu1 %2833 }
0x14a5   : > { %v2835_v16 = vrot.slane %v2834_v49, 4 }
0x14a7   : > { %v2836_v52 = vadd.f32 %v2835_v16, %v2834_v49  ;;  %v8403_v16 = vld [vmem:[#allocation5 + $0x48] ss:$0 sm:$0xff] }
0x14a9   : > { %v2837_v53 = vrot.slane %v2836_v52, 2 }
0x14ab   : > { %v2838_v60 = vadd.f32 %v2837_v53, %v2836_v52 }
0x14ad   : > { %v2839_v55 = vrot.slane %v2838_v60, 1 }
0x14af   : > { %v2840_v9 = vadd.f32 %v2839_v55, %v2838_v60 }
0x14b1   : > { %8178 = vpush %v2840_v9 }
0x14e2   : > { %s8179_s12 = spop %8178 }
0x14e3   : > { %s2842_s13 = smul.f32 0.0026041667, %s8179_s12 }
0x14e5   : > { %v2843_v30 = vstv %s2842_s13 }
0x14e6   : > { %v2844_v56 = vsub.f32 %v2830_v46, %v2843_v30  ;;  %v2845_v19 = vsub.f32 %v2831_v21, %v2843_v30  ;;  %v8402_v21 = vld [vmem:[#allocation5 + $0x47] ss:$0 sm:$0xff] }
0x14e8   : > { %v2846_v61 = vmul.f32 %v2844_v56, %v2844_v56  ;;  %v2847_v6 = vmul.f32 %v2845_v19, %v2845_v19 }
0x14ea   : > { %v2848_v10 = vmul.f32 %v8863_v41, %v2846_v61  ;;  %v2849_v59 = vmul.f32 %v8863_v41, %v2847_v6 }
0x14ec   : > { %v2850_v11 = vadd.f32 %v2849_v59, %v2848_v10 }
0x14ee   : > { %2851 = vadd.xlane.f32.xlu2 %v2850_v11 }
0x1561   : > { %v2852_v34 = vpop.xlane.xlu2 %2851 }
0x1562   : > { %v2853_v12 = vrot.slane %v2852_v34, 4 }
0x1564   : > { %v2854_v63 = vadd.f32 %v2853_v12, %v2852_v34 }
0x1566   : > { %v2855_v42 = vrot.slane %v2854_v63, 2 }
0x1568   : > { %v2856_v5 = vadd.f32 %v2855_v42, %v2854_v63 }
0x156a   : > { %v2857_v14 = vrot.slane %v2856_v5, 1 }
0x156c   : > { %v2858_v15 = vadd.f32 %v2857_v14, %v2856_v5 }
0x156e   : > { %8180 = vpush %v2858_v15 }
0x159f   : > { %s8181_s14 = spop %8180 }
0x15a0   : > { %s2860_s16 = smul.f32 0.0026041667, %s8181_s14 }
0x15a2   : > { %s2861_s17 = sadd.f32 1e-08, %s2860_s16 }
0x15a4   : > { %v2862_v1 = vstv %s2861_s17 }
0x15a5   : > { %8531 = vrsqrt.f32 %v2862_v1  ;;  %vm2869_vm9 = vweird.f32 %v2862_v1 }
0x15ab   : > { %v8532_v62 = vpop.eup %8531 }
0x15ac   : > { %v2864_v0 = vmul.f32 %v8532_v62, %v2862_v1  ;;  %vm2870_vm8 = vweird.f32 %v8532_v62 }
0x15ad   : > { %vm2871_vm14 = vmor %vm2869_vm9, %vm2870_vm8 }
0x15ae   : > { %v2865_v24 = vmul.f32 %v8532_v62, %v2864_v0 }
0x15b0   : > { %v2866_v31 = vmul.f32 0.5, %v2865_v24 }
0x15b2   : > { %v2867_v32 = vsub.f32 1.5, %v2866_v31  ;;  %v8409_v31 = vld [vmem:[#allocation5 + $0x78] ss:$0 sm:$0xff] }
0x15b4   : > { %v2868_v35 = vmul.f32 %v8532_v62, %v2867_v32  ;;  %v8410_v32 = vld [vmem:[#allocation5 + $0x79] ss:$0 sm:$0xff] }
0x15b6   : > { %v2872_v36 = vsel %vm2871_vm14, %v8532_v62, %v2868_v35  ;;  %v8407_v62 = vld [vmem:[#allocation5 + $0x76] ss:$0 sm:$0xff] }
0x15b7   : > { %8182 = vpush %v2872_v36 }
0x15b8   : > { %8184 = vpush %v3077_v37  ;;  %v8408_v37 = vld [vmem:[#allocation5 + $0x77] ss:$0 sm:$0xff] }
0x15e8   : > { %s8183_s18 = spop %8182 }
0x15e9   : > { %v2874_v38 = vstv %s8183_s18  ;;  %s8185_s20 = spop %8184 }
0x15ea   : > { %v2875_v44 = vmul.f32 %v2874_v38, %v2844_v56  ;;  %v2876_v46 = vmul.f32 %v2874_v38, %v2845_v19  ;;  %s3079_s21 = smul.f32 0.0052083335, %s8185_s20 }
0x15ec   : > { %v2879_v47 = vmul.f32 %v8401_v45, %v2875_v44  ;;  %v2880_v49 = vmul.f32 %v8401_v45, %v2876_v46  ;;  %v3080_v52 = vstv %s3079_s21 }
0x15ed   : > { %v3081_v53 = vsub.f32 %v8992_v51, %v3080_v52  ;;  %v8411_v52 = vld [vmem:[#allocation5 + $0x7a] ss:$0 sm:$0xff] }
0x15ee   : > { %v2883_v60 = vadd.f32 %v8402_v21, %v2879_v47  ;;  %v2884_v55 = vadd.f32 %v8402_v21, %v2880_v49 }
0x15ef   : > { %v3082_v9 = vmul.f32 %v3081_v53, %v3081_v53 }
0x15f0   : > { %vm2885_vm15 = vcmp.ge.f32.partialorder %v2883_v60, 0.0  ;;  %vm2886_vm1 = vcmp.ge.f32.partialorder %v2884_v55, 0.0  ;;  %v2889_v30 = vmul.f32 %v8403_v16, %v2883_v60  ;;  %v2890_v61 = vmul.f32 %v8403_v16, %v2884_v55 }
0x15f1   : > { %v3083_v6 = vmul.f32 %v8863_v41, %v3082_v9 }
0x15f2   : > { %v2891_v10 = vsel %vm2885_vm15, %v2883_v60, %v2889_v30  ;;  %v2892_v56 = vsel %vm2886_vm1, %v2884_v55, %v2890_v61 }
0x15f3   : > { %3084 = vadd.xlane.f32.xlu1 %v3083_v6  ;;  %v2893_v19 = vpack.c.bf16 %v2892_v56, %v2891_v10 }
0x15f5   : > { %2969 = vmatmul.bf16.vlgmr.msra.gmra.mxu2 %v2893_v19 }
0x1666   : > { %v3085_v59 = vpop.xlane.xlu1 %3084 }
0x1667   : > { %v3086_v11 = vrot.slane %v3085_v59, 4 }
0x1669   : > { %v3087_v34 = vadd.f32 %v3086_v11, %v3085_v59 }
0x166b   : > { %v3088_v12 = vrot.slane %v3087_v34, 2 }
0x166d   : > { %v3089_v63 = vadd.f32 %v3088_v12, %v3087_v34 }
0x166f   : > { %v3090_v51 = vrot.slane %v3089_v63, 1 }
0x1671   : > { %v3091_v42 = vadd.f32 %v3090_v51, %v3089_v63 }
0x1673   : > { %8186 = vpush %v3091_v42 }
0x16a4   : > { %s8187_s22 = spop %8186 }
0x16a5   : > { %s3093_s23 = smul.f32 0.0052083335, %s8187_s22 }
0x16a7   : > { %s3094_s24 = sadd.f32 1e-08, %s3093_s23 }
0x16a9   : > { %v3095_v5 = vstv %s3094_s24 }
0x16aa   : > { %8533 = vrsqrt.f32 %v3095_v5  ;;  %vm3102_vm5 = vweird.f32 %v3095_v5 }
0x16b0   : > { %v8534_v14 = vpop.eup %8533 }
0x16b1   : > { %v3097_v15 = vmul.f32 %v8534_v14, %v3095_v5  ;;  %vm3103_vm2 = vweird.f32 %v8534_v14 }
0x16b2   : > { %vm3104_vm7 = vmor %vm3102_vm5, %vm3103_vm2 }
0x16b3   : > { %v3098_v22 = vmul.f32 %v8534_v14, %v3097_v15 }
0x16b5   : > { %v3099_v23 = vmul.f32 0.5, %v3098_v22 }
0x16b7   : > { %v3100_v48 = vsub.f32 1.5, %v3099_v23  ;;  %v7943_v23 = vld [vmem:[#allocation3 + $0x6b8] sm:$0xff] }
0x16b8   : > { %3433 = vmatpush.bf16.msrb.mxu2 %v7943_v23 }
0x16b9   : > { %v3101_v26 = vmul.f32 %v8534_v14, %v3100_v48  ;;  %v7942_v48 = vld [vmem:[#allocation3 + $0x6b0] sm:$0xff] }
0x16bb   : > { %v3105_v27 = vsel %vm3104_vm7, %v8534_v14, %v3101_v26  ;;  %v7941_v26 = vld [vmem:[#allocation3 + $0x6a8] sm:$0xff] }
0x16bc   : > { %8188 = vpush %v3105_v27  ;;  %3434 = vmatpush.bf16.msrb.mxu2 %v7942_v48  ;;  %v7940_v27 = vld [vmem:[#allocation3 + $0x6a0] sm:$0xff] }
0x16c0   : > { %3435 = vmatpush.bf16.msrb.mxu2 %v7941_v26 }
0x16c4   : > { %3436 = vmatpush.bf16.msrb.mxu2 %v7940_v27 }
0x16ed   : > { %s8189_s25 = spop %8188 }
0x16ee   : > { %v3107_v1 = vstv %s8189_s25 }
0x16ef   : > { %v3108_v50 = vmul.f32 %v3107_v1, %v3081_v53  ;;  %v7939_v1 = vld [vmem:[#allocation3 + $0x698] sm:$0xff] }
0x16f0   : > { %3437 = vmatpush.bf16.msrb.mxu2 %v7939_v1 }
0x16f1   : > { %v3111_v3 = vmul.f32 %v8405_v29, %v3108_v50  ;;  %v7938_v50 = vld [vmem:[#allocation3 + $0x690] sm:$0xff] }
0x16f3   : > { %v3114_v0 = vadd.f32 %v8406_v58, %v3111_v3 }
0x16f4   : > { %3438 = vmatpush.bf16.msrb.mxu2 %v7938_v50 }
0x16f5   : > { %vm3115_vm8 = vcmp.ge.f32.partialorder %v3114_v0, 0.0  ;;  %v3118_v24 = vmul.f32 %v8407_v62, %v3114_v0 }
0x16f7   : > { %v3119_v13 = vsel %vm3115_vm8, %v3114_v0, %v3118_v24 }
0x16f8   : > { %v3121_v57 = vrot.slane %v3119_v13, 7 }
0x16fa   : > { %v3123_v35 = vsel %vm344_vm0, 0.0, %v3121_v57  ;;  %v3124_v36 = vsel %vm344_vm0, %v3121_v57, 0.0  ;;  %v7936_v57 = vld [vmem:[#allocation3 + $0x680] sm:$0xff] }
0x16fb   : > { %v3130_v8 = vmul.f32 %v8409_v31, %v3123_v35  ;;  %v3131_v39 = vmul.f32 %v8409_v31, %v3124_v36  ;;  %v3141_v40 = vmul.f32 %v8410_v32, %v3123_v35  ;;  %v3142_v45 = vmul.f32 %v8410_v32, %v3124_v36  ;;  %v7937_v32 = vld [vmem:[#allocation3 + $0x688] sm:$0xff] }
0x16fc   : > { %v3127_v21 = vmul.f32 %v8408_v37, %v3123_v35  ;;  %3439 = vmatpush.bf16.msrb.mxu2 %v7937_v32  ;;  %v8412_v35 = vld [vmem:[#allocation5 + $0x7b] ss:$0 sm:$0xff] }
0x16fd   : > { %v3134_v38 = vrot.slane %v3130_v8, 1  ;;  %v3135_v44 = vrot.slane %v3131_v39, 1  ;;  %v3145_v46 = vrot.slane %v3141_v40, 2  ;;  %v3146_v47 = vrot.slane %v3142_v45, 2  ;;  %v8413_v8 = vld [vmem:[#allocation5 + $0x7c] ss:$0 sm:$0xff] }
0x16ff   : > { %v3136_v49 = vsel %vm349_vm3, %v3134_v38, %v3135_v44  ;;  %v3147_v53 = vsel %vm354_vm4, %v3145_v46, %v3146_v47  ;;  %v8414_v38 = vld [vmem:[#allocation5 + $0x7d] ss:$0 sm:$0xff]  ;;  %v8415_v44 = vld [vmem:[#allocation5 + $0x7e] ss:$0 sm:$0xff]  ;;  %v8416_v46 = vld [vmem:[#allocation5 + $0x7f] ss:$0 sm:$0xff] }
0x1700   : > { %v3138_v16 = vadd.f32 %v3136_v49, %v3127_v21  ;;  %3440 = vmatpush.bf16.msrb.mxu2 %v7936_v57 }
0x1702   : > { %v3149_v60 = vadd.f32 %v3147_v53, %v3138_v16 }
0x1704   : > { %v3152_v55 = vadd.f32 %v8411_v52, %v3149_v60 }
0x1706   : > { %3153 = vadd.xlane.f32.xlu2 %v3152_v55 }
0x1779   : > { %v3154_v9 = vpop.xlane.xlu2 %3153 }
0x177a   : > { %v3155_v30 = vrot.slane %v3154_v9, 4 }
0x177c   : > { %v3156_v61 = vadd.f32 %v3155_v30, %v3154_v9 }
0x177e   : > { %v3157_v6 = vrot.slane %v3156_v61, 2 }
0x1780   : > { %v3158_v10 = vadd.f32 %v3157_v6, %v3156_v61 }
0x1782   : > { %v3159_v56 = vrot.slane %v3158_v10, 1 }
0x1784   : > { %v3160_v19 = vadd.f32 %v3159_v56, %v3158_v10  ;;  %v9027_v56 = vpop.f32.mrf.mxu2 }
0x1786   : > { %8190 = vpush %v3160_v19 }
0x178c   : > { %v9029_v19 = vpop.f32.mrf.mxu2 }
0x17b7   : > { %s8191_s26 = spop %8190 }
0x17b8   : > { %s3162_s27 = smul.f32 0.0052083335, %s8191_s26 }
0x17ba   : > { %v3163_v59 = vstv %s3162_s27 }
0x17bb   : > { %v3164_v11 = vsub.f32 %v3152_v55, %v3163_v59  ;;  %v8417_v55 = vld [vmem:[#allocation5 + $0x80] ss:$0 sm:$0xff] }
0x17bd   : > { %v3165_v34 = vmul.f32 %v3164_v11, %v3164_v11 }
0x17bf   : > { %v3166_v12 = vmul.f32 %v8863_v41, %v3165_v34 }
0x17c1   : > { %3167 = vadd.xlane.f32.xlu0 %v3166_v12 }
0x1834   : > { %v3168_v63 = vpop.xlane.xlu0 %3167 }
0x1835   : > { %v3169_v51 = vrot.slane %v3168_v63, 4 }
0x1837   : > { %v3170_v42 = vadd.f32 %v3169_v51, %v3168_v63 }
0x1839   : > { %v3171_v5 = vrot.slane %v3170_v42, 2 }
0x183b   : > { %v3172_v14 = vadd.f32 %v3171_v5, %v3170_v42 }
0x183d   : > { %v3173_v15 = vrot.slane %v3172_v14, 1 }
0x183f   : > { %v3174_v22 = vadd.f32 %v3173_v15, %v3172_v14  ;;  %v8418_v15 = vld [vmem:[#allocation5 + $0x89] ss:$0 sm:$0xff] }
0x1841   : > { %8192 = vpush %v3174_v22  ;;  %v8419_v22 = vld [vmem:[#allocation5 + $0x8a] ss:$0 sm:$0xff] }
0x1872   : > { %s8193_s28 = spop %8192 }
0x1873   : > { %s3176_s29 = smul.f32 0.0052083335, %s8193_s28 }
0x1875   : > { %s3177_s30 = sadd.f32 1e-08, %s3176_s29 }
0x1877   : > { %v3178_v29 = vstv %s3177_s30 }
0x1878   : > { %8535 = vrsqrt.f32 %v3178_v29  ;;  %vm3185_vm9 = vweird.f32 %v3178_v29 }
0x187e   : > { %v8536_v58 = vpop.eup %8535 }
0x187f   : > { %v3180_v3 = vmul.f32 %v8536_v58, %v3178_v29  ;;  %vm3186_vm0 = vweird.f32 %v8536_v58  ;;  %v8420_v29 = vld [vmem:[#allocation5 + $0x8b] ss:$0 sm:$0xff] }
0x1880   : > { %vm3187_vm14 = vmor %vm3185_vm9, %vm3186_vm0 }
0x1881   : > { %v3181_v62 = vmul.f32 %v8536_v58, %v3180_v3 }
0x1883   : > { %v3182_v0 = vmul.f32 0.5, %v3181_v62 }
0x1885   : > { %v3183_v24 = vsub.f32 1.5, %v3182_v0 }
0x1887   : > { %v3184_v13 = vmul.f32 %v8536_v58, %v3183_v24 }
0x1889   : > { %v3188_v31 = vsel %vm3187_vm14, %v8536_v58, %v3184_v13  ;;  %v8421_v13 = vld [vmem:[#allocation5 + $0x8c] ss:$0 sm:$0xff] }
0x188a   : > { %8194 = vpush %v3188_v31 }
0x18bb   : > { %s8195_s5 = spop %8194 }
0x18bc   : > { %v3190_v36 = vstv %s8195_s5 }
0x18bd   : > { %v3191_v37 = vmul.f32 %v3190_v36, %v3164_v11 }
0x18bf   : > { %v3194_v39 = vmul.f32 %v8412_v35, %v3191_v37 }
0x18c1   : > { %v3197_v40 = vadd.f32 %v8413_v8, %v3194_v39 }
0x18c3   : > { %3200 = vst [vmem:[#allocation2 + $0x1] sm:$0xff] %v3197_v40  ;;  %v3288_v45 = vpack.c.bf16 %v3197_v40, %v3197_v40 }
0x18c5   : > { %3441 = vmatmul.bf16.vlgmr.msrb.gmra.mxu2 %v3288_v45 }
0x18ca   : > { %v3201_v21 = vld [vmem:[#allocation2] ss:$2 sm:$0xf]  ;;  %v3205_v47 = vld [vmem:[#allocation2 + $0x1] ss:$2 sm:$0xf] }
0x18cb   : > { %v3204_v49 = vmul.f32 %v8414_v38, %v3201_v21  ;;  %v3208_v16 = vmul.f32 %v8415_v44, %v3205_v47  ;;  %v3210_v52 = vld [vmem:[#allocation2 + $0x2] ss:$2 sm:$0xf]  ;;  %3499 = vst [vmem:[#allocation2] sm:$0x1] %v8651_v54 }
0x18cc   : > { %3501 = vst [vmem:[#allocation2 + $0x1] sm:$0xff] %v3197_v40  ;;  %v3213_v60 = vmul.f32 %v8416_v46, %v3210_v52  ;;  %v8422_v52 = vld [vmem:[#allocation5 + $0x81] ss:$0 sm:$0xff] }
0x18cd   : > { %v3209_v53 = vadd.f32 %v3208_v16, %v3204_v49 }
0x18cf   : > { %v3214_v9 = vadd.f32 %v3213_v60, %v3209_v53 }
0x18d1   : > { %v3217_v30 = vadd.f32 %v8417_v55, %v3214_v9  ;;  %v8423_v55 = vld [vmem:[#allocation5 + $0x82] ss:$0 sm:$0xff] }
0x18d3   : > { %v3218_v61 = vsel %vm1358_vm12, %v3217_v30, 0.0  ;;  %v3502_v6 = vld [vmem:[#allocation2] ss:$2 sm:$0xf] }
0x18d4   : > { %3219 = vadd.xlane.f32.xlu1 %v3218_v61  ;;  %v3506_v10 = vld [vmem:[#allocation2 + $0x1] ss:$2 sm:$0xf]  ;;  %v3505_v23 = vmul.f32 %v8418_v15, %v3502_v6  ;;  %v3511_v1 = vld [vmem:[#allocation2 + $0x2] ss:$2 sm:$0xf] }
0x18d5   : > { %4641 = vst [vmem:[#allocation2] sm:$0x3] %v8651_v54  ;;  %v3509_v48 = vmul.f32 %v8419_v22, %v3506_v10  ;;  %v3514_v62 = vmul.f32 %v8420_v29, %v3511_v1  ;;  %v7967_v61 = vld [vmem:[#allocation3 + $0x778] sm:$0xff]  ;;  %v7966_v10 = vld [vmem:[#allocation3 + $0x770] sm:$0xff]  ;;  %v7961_v22 = vld [vmem:[#allocation3 + $0x748] sm:$0xff] }
0x18d6   : > { %v7951_v6 = vld [vmem:[#allocation3 + $0x6f8] sm:$0xff]  ;;  %v7946_v15 = vld [vmem:[#allocation3 + $0x6d0] sm:$0xff] }
0x18d7   : > { %v3510_v58 = vadd.f32 %v3509_v48, %v3505_v23  ;;  %3372 = vmatpush.bf16.msrb.mxu0 %v7951_v6  ;;  %v7945_v23 = vld [vmem:[#allocation3 + $0x6c8] sm:$0xff]  ;;  %v7960_v48 = vld [vmem:[#allocation3 + $0x740] sm:$0xff] }
0x18d9   : > { %v3515_v24 = vadd.f32 %v3514_v62, %v3510_v58 }
0x18db   : > { %v9035_v31 = vadd.f32 %v8421_v13, %v3515_v24 }
0x18dd   : > { %v3519_v32 = vsel %vm1358_vm12, %v9035_v31, 0.0 }
0x1947   : > { %v3220_v59 = vpop.xlane.xlu1 %3219 }
0x1948   : > { %v3221_v11 = vrot.slane %v3220_v59, 4  ;;  %v9031_v34 = vpop.f32.mrf.mxu2 }
0x194a   : > { %v3222_v12 = vadd.f32 %v3221_v11, %v3220_v59  ;;  %v7950_v59 = vld [vmem:[#allocation3 + $0x6f0] sm:$0xff]  ;;  %v7965_v11 = vld [vmem:[#allocation3 + $0x768] sm:$0xff] }
0x194b   : > { %3373 = vmatpush.bf16.msrb.mxu0 %v7950_v59  ;;  %v7971_v59 = vld [vmem:[#allocation3 + $0x798] sm:$0xff] }
0x194c   : > { %v3223_v63 = vrot.slane %v3222_v12, 2 }
0x194e   : > { %v3224_v51 = vadd.f32 %v3223_v63, %v3222_v12  ;;  %v7949_v12 = vld [vmem:[#allocation3 + $0x6e8] sm:$0xff]  ;;  %v7964_v63 = vld [vmem:[#allocation3 + $0x760] sm:$0xff] }
0x194f   : > { %3374 = vmatpush.bf16.msrb.mxu0 %v7949_v12 }
0x1950   : > { %v3444_v42 = vpop.f32.mrf.mxu2  ;;  %v3225_v5 = vrot.slane %v3224_v51, 1 }
0x1951   : > { %v7963_v42 = vld [vmem:[#allocation3 + $0x758] sm:$0xff] }
0x1952   : > { %v3226_v14 = vadd.f32 %v3225_v5, %v3224_v51  ;;  %v7948_v51 = vld [vmem:[#allocation3 + $0x6e0] sm:$0xff]  ;;  %v7947_v5 = vld [vmem:[#allocation3 + $0x6d8] sm:$0xff] }
0x1953   : > { %3375 = vmatpush.bf16.msrb.mxu0 %v7948_v51 }
0x1954   : > { %8196 = vpush %v3226_v14  ;;  %v7962_v14 = vld [vmem:[#allocation3 + $0x750] sm:$0xff] }
0x1957   : > { %3376 = vmatpush.bf16.msrb.mxu0 %v7947_v5 }
0x195b   : > { %3377 = vmatpush.bf16.msrb.mxu0 %v7946_v15 }
0x195f   : > { %3378 = vmatpush.bf16.msrb.mxu0 %v7945_v23 }
0x1985   : > { %s8197_s7 = spop %8196 }
0x1986   : > { %s3228_s8 = smul.f32 0.010416667, %s8197_s7 }
0x1988   : > { %v3229_v26 = vstv %s3228_s8 }
0x1989   : > { %v3230_v27 = vsub.f32 %v3217_v30, %v3229_v26 }
0x198b   : > { %v3231_v50 = vmul.f32 %v3230_v27, %v3230_v27 }
0x198d   : > { %v3232_v3 = vmul.f32 %v8863_v41, %v3231_v50 }
0x198f   : > { %v3233_v0 = vsel %vm1358_vm12, %v3232_v3, 0.0  ;;  %v8424_v3 = vld [vmem:[#allocation5 + $0x8f] ss:$0 sm:$0xff] }
0x1990   : > { %3234 = vadd.xlane.f32.xlu2 %v3233_v0 }
0x1998   : > { %3520 = vadd.xlane.f32.xlu2 %v3519_v32 }
0x1a03   : > { %v3235_v57 = vpop.xlane.xlu2 %3234 }
0x1a04   : > { %v3236_v35 = vrot.slane %v3235_v57, 4 }
0x1a06   : > { %v3237_v36 = vadd.f32 %v3236_v35, %v3235_v57 }
0x1a08   : > { %v3238_v37 = vrot.slane %v3237_v36, 2 }
0x1a0a   : > { %v3239_v8 = vadd.f32 %v3238_v37, %v3237_v36 }
0x1a0c   : > { %v3240_v39 = vrot.slane %v3239_v8, 1 }
0x1a0e   : > { %v3241_v40 = vadd.f32 %v3240_v39, %v3239_v8 }
0x1a10   : > { %8198 = vpush %v3241_v40 }
0x1a41   : > { %s8199_s9 = spop %8198 }
0x1a42   : > { %s3243_s10 = smul.f32 0.010416667, %s8199_s9 }
0x1a44   : > { %s3244_s11 = sadd.f32 1e-08, %s3243_s10 }
0x1a46   : > { %v3245_v45 = vstv %s3244_s11 }
0x1a47   : > { %8537 = vrsqrt.f32 %v3245_v45  ;;  %vm3252_vm1 = vweird.f32 %v3245_v45 }
0x1a4d   : > { %v8538_v38 = vpop.eup %8537 }
0x1a4e   : > { %v3247_v44 = vmul.f32 %v8538_v38, %v3245_v45  ;;  %vm3253_vm15 = vweird.f32 %v8538_v38 }
0x1a4f   : > { %vm3254_vm2 = vmor %vm3252_vm1, %vm3253_vm15 }
0x1a50   : > { %v3248_v46 = vmul.f32 %v8538_v38, %v3247_v44 }
0x1a52   : > { %v3249_v21 = vmul.f32 0.5, %v3248_v46 }
0x1a54   : > { %v3250_v47 = vsub.f32 1.5, %v3249_v21 }
0x1a56   : > { %v3251_v49 = vmul.f32 %v8538_v38, %v3250_v47 }
0x1a58   : > { %v3255_v16 = vsel %vm3254_vm2, %v8538_v38, %v3251_v49 }
0x1a59   : > { %8200 = vpush %v3255_v16 }
0x1a8a   : > { %s8201_s12 = spop %8200 }
0x1a8b   : > { %v3257_v53 = vstv %s8201_s12 }
0x1a8c   : > { %v3258_v60 = vmul.f32 %v3257_v53, %v3230_v27  ;;  %v7944_v27 = vld [vmem:[#allocation3 + $0x6c0] sm:$0xff]  ;;  %v7975_v53 = vld [vmem:[#allocation3 + $0x7b8] sm:$0xff] }
0x1a8d   : > { %3379 = vmatpush.bf16.msrb.mxu0 %v7944_v27  ;;  %v7969_v27 = vld [vmem:[#allocation3 + $0x788] sm:$0xff] }
0x1a8e   : > { %v3261_v9 = vmul.f32 %v8422_v52, %v3258_v60  ;;  %v7974_v60 = vld [vmem:[#allocation3 + $0x7b0] sm:$0xff] }
0x1a90   : > { %v3264_v30 = vadd.f32 %v8423_v55, %v3261_v9  ;;  %v7973_v55 = vld [vmem:[#allocation3 + $0x7a8] sm:$0xff]  ;;  %v3521_v9 = vpop.xlane.xlu2 %3520 }
0x1a92   : > { %7045 = vmatpush.msk.msrb.mxu3 %vm1358_vm12, %v3264_v30  ;;  %v3584_v26 = vpack.c.bf16 %v3264_v30, %v3264_v30  ;;  %v3522_v30 = vrot.slane %v3521_v9, 4 }
0x1a93   : > { %7046 = vmatmul.msk.f32.vlgmr.msrb.gmra.mxu3 %vm1912_vm6, %v8959_v25 }
0x1a94   : > { %3650 = vmatpush.bf16.msra.mxu3 %v7967_v61  ;;  %v7972_v61 = vld [vmem:[#allocation3 + $0x7a0] sm:$0xff] }
0x1a98   : > { %3651 = vmatpush.bf16.msra.mxu3 %v7966_v10  ;;  %v3523_v10 = vadd.f32 %v3522_v30, %v3521_v9  ;;  %v7955_v9 = vld [vmem:[#allocation3 + $0x718] sm:$0xff]  ;;  %v7954_v30 = vld [vmem:[#allocation3 + $0x710] sm:$0xff] }
0x1a9c   : > { %3652 = vmatpush.bf16.msra.mxu3 %v7965_v11  ;;  %v3524_v11 = vrot.slane %v3523_v10, 2 }
0x1aa0   : > { %3653 = vmatpush.bf16.msra.mxu3 %v7964_v63 }
0x1aa4   : > { %3654 = vmatpush.bf16.msra.mxu3 %v7963_v42  ;;  %v3525_v42 = vadd.f32 %v3524_v11, %v3523_v10 }
0x1aa6   : > { %v3526_v15 = vrot.slane %v3525_v42, 1 }
0x1aa8   : > { %3655 = vmatpush.bf16.msra.mxu3 %v7962_v14 }
0x1aac   : > { %3656 = vmatpush.bf16.msra.mxu3 %v7961_v22 }
0x1ab0   : > { %3657 = vmatpush.bf16.msra.mxu3 %v7960_v48  ;;  %v3527_v48 = vadd.f32 %v3526_v15, %v3525_v42  ;;  %v7952_v42 = vld [vmem:[#allocation3 + $0x700] sm:$0xff] }
0x1ab3   : > { %3658 = vmatmul.bf16.vlgmr.msra.gmra.mxu3 %v3584_v26  ;;  %v7970_v26 = vld [vmem:[#allocation3 + $0x790] sm:$0xff] }
0x1ab4   : > { %3947 = vmatpush.bf16.msrb.mxu3 %v7975_v53  ;;  %v7957_v53 = vld [vmem:[#allocation3 + $0x728] sm:$0xff] }
0x1ab8   : > { %3948 = vmatpush.bf16.msrb.mxu3 %v7974_v60  ;;  %v7956_v60 = vld [vmem:[#allocation3 + $0x720] sm:$0xff] }
0x1abc   : > { %3949 = vmatpush.bf16.msrb.mxu3 %v7973_v55 }
0x1ac0   : > { %3950 = vmatpush.bf16.msrb.mxu3 %v7972_v61 }
0x1ac4   : > { %3951 = vmatpush.bf16.msrb.mxu3 %v7971_v59 }
0x1ac8   : > { %3952 = vmatpush.bf16.msrb.mxu3 %v7970_v26 }
0x1acc   : > { %3953 = vmatpush.bf16.msrb.mxu3 %v7969_v27  ;;  %v8430_v27 = vld [vmem:[#allocation5 + $0x93] ss:$0 sm:$0xff] }
0x1b16   : > { %v3285_v29 = vpop.f32.mrf.mxu3 }
0x1b17   : > { %v3306_v1 = vpack.c.bf16 %v3285_v29, %v3285_v29  ;;  %v7968_v29 = vld [vmem:[#allocation3 + $0x780] sm:$0xff] }
0x1b18   : > { %3954 = vmatpush.bf16.msrb.mxu3 %v7968_v29 }
0x1b19   : > { %3380 = vmatmul.bf16.vlgmr.msrb.gmra.mxu0 %v3306_v1  ;;  %v8425_v1 = vld [vmem:[#allocation5 + $0x90] ss:$0 sm:$0xff] }
0x1b36   : > { %v9042_v50 = vpop.f32.mrf.mxu3 }
0x1b3e   : > { %v3661_v58 = vpop.f32.mrf.mxu3 }
0x1b96   : > { %v3381_v62 = vpop.f32.mrf.mxu0 }
0x1b97   : > { %v3443_v0 = vadd.f32 %v9031_v34, %v3381_v62  ;;  %v8426_v62 = vld [vmem:[#allocation5 + $0x91] ss:$0 sm:$0xff] }
0x1b99   : > { %v3448_v24 = vadd.f32 %v8424_v3, %v3443_v0 }
0x1b9b   : > { %3449 = vadd.xlane.f32.xlu0 %v3448_v24 }
0x1b9e   : > { %v3383_v13 = vpop.f32.mrf.mxu0 }
0x1c0e   : > { %v3450_v32 = vpop.xlane.xlu0 %3449 }
0x1c0f   : > { %v3451_v57 = vrot.slane %v3450_v32, 4 }
0x1c11   : > { %v3452_v35 = vadd.f32 %v3451_v57, %v3450_v32 }
0x1c13   : > { %v3453_v36 = vrot.slane %v3452_v35, 2 }
0x1c15   : > { %v3454_v37 = vadd.f32 %v3453_v36, %v3452_v35 }
0x1c17   : > { %v3455_v8 = vrot.slane %v3454_v37, 1 }
0x1c19   : > { %v3456_v39 = vadd.f32 %v3455_v8, %v3454_v37 }
0x1c1b   : > { %8202 = vpush %v3456_v39 }
0x1c4c   : > { %s8203_s13 = spop %8202 }
0x1c4d   : > { %s3458_s14 = smul.f32 0.0052083335, %s8203_s13 }
0x1c4f   : > { %v3459_v40 = vstv %s3458_s14 }
0x1c50   : > { %v3460_v45 = vsub.f32 %v3448_v24, %v3459_v40  ;;  %v8427_v24 = vld [vmem:[#allocation5 + $0x92] ss:$0 sm:$0xff] }
0x1c52   : > { %v3461_v38 = vmul.f32 %v3460_v45, %v3460_v45 }
0x1c54   : > { %v3462_v44 = vmul.f32 %v8863_v41, %v3461_v38 }
0x1c56   : > { %3463 = vadd.xlane.f32.xlu1 %v3462_v44 }
0x1cc9   : > { %v3464_v34 = vpop.xlane.xlu1 %3463 }
0x1cca   : > { %v3465_v46 = vrot.slane %v3464_v34, 4 }
0x1ccc   : > { %v3466_v21 = vadd.f32 %v3465_v46, %v3464_v34 }
0x1cce   : > { %v3467_v47 = vrot.slane %v3466_v21, 2 }
0x1cd0   : > { %v3468_v49 = vadd.f32 %v3467_v47, %v3466_v21 }
0x1cd2   : > { %v3469_v16 = vrot.slane %v3468_v49, 1 }
0x1cd4   : > { %v3470_v52 = vadd.f32 %v3469_v16, %v3468_v49  ;;  %v7959_v16 = vld [vmem:[#allocation3 + $0x738] sm:$0xff] }
0x1cd5   : > { %3711 = vmatpush.bf16.msra.mxu1 %v7959_v16 }
0x1cd6   : > { %8204 = vpush %v3470_v52  ;;  %v7958_v52 = vld [vmem:[#allocation3 + $0x730] sm:$0xff] }
0x1cd9   : > { %3712 = vmatpush.bf16.msra.mxu1 %v7958_v52 }
0x1cdd   : > { %3713 = vmatpush.bf16.msra.mxu1 %v7957_v53 }
0x1ce1   : > { %3714 = vmatpush.bf16.msra.mxu1 %v7956_v60 }
0x1ce5   : > { %3715 = vmatpush.bf16.msra.mxu1 %v7955_v9 }
0x1ce9   : > { %3716 = vmatpush.bf16.msra.mxu1 %v7954_v30 }
0x1d07   : > { %s8205_s16 = spop %8204 }
0x1d08   : > { %s3472_s17 = smul.f32 0.0052083335, %s8205_s16 }
0x1d0a   : > { %s3473_s18 = sadd.f32 1e-08, %s3472_s17 }
0x1d0c   : > { %v3474_v6 = vstv %s3473_s18 }
0x1d0d   : > { %8539 = vrsqrt.f32 %v3474_v6  ;;  %vm3481_vm7 = vweird.f32 %v3474_v6 }
0x1d13   : > { %v8540_v12 = vpop.eup %8539 }
0x1d14   : > { %v3476_v63 = vmul.f32 %v8540_v12, %v3474_v6  ;;  %vm3482_vm5 = vweird.f32 %v8540_v12 }
0x1d15   : > { %vm3483_vm8 = vmor %vm3481_vm7, %vm3482_vm5 }
0x1d16   : > { %v3477_v51 = vmul.f32 %v8540_v12, %v3476_v63 }
0x1d18   : > { %v3478_v5 = vmul.f32 0.5, %v3477_v51  ;;  %v7953_v51 = vld [vmem:[#allocation3 + $0x708] sm:$0xff] }
0x1d19   : > { %3717 = vmatpush.bf16.msra.mxu1 %v7953_v51 }
0x1d1a   : > { %v3479_v14 = vsub.f32 1.5, %v3478_v5  ;;  %v8428_v5 = vld [vmem:[#allocation5 + $0x8d] ss:$0 sm:$0xff] }
0x1d1c   : > { %v3480_v22 = vmul.f32 %v8540_v12, %v3479_v14 }
0x1d1d   : > { %3718 = vmatpush.bf16.msra.mxu1 %v7952_v42 }
0x1d1e   : > { %v3484_v23 = vsel %vm3483_vm8, %v8540_v12, %v3480_v22  ;;  %v8429_v22 = vld [vmem:[#allocation5 + $0x8e] ss:$0 sm:$0xff] }
0x1d1f   : > { %8206 = vpush %v3484_v23 }
0x1d20   : > { %8208 = vpush %v3527_v48 }
0x1d50   : > { %s8207_s20 = spop %8206 }
0x1d51   : > { %v3486_v58 = vstv %s8207_s20  ;;  %s8209_s21 = spop %8208 }
0x1d52   : > { %v3487_v3 = vmul.f32 %v3486_v58, %v3460_v45  ;;  %s3529_s22 = smul.f32 0.010416667, %s8209_s21 }
0x1d54   : > { %v3490_v0 = vmul.f32 %v8425_v1, %v3487_v3  ;;  %v3530_v13 = vstv %s3529_s22 }
0x1d55   : > { %v3531_v32 = vsub.f32 %v9035_v31, %v3530_v13 }
0x1d56   : > { %v3493_v57 = vadd.f32 %v8426_v62, %v3490_v0 }
0x1d57   : > { %v3532_v35 = vmul.f32 %v3531_v32, %v3531_v32 }
0x1d58   : > { %v3497_v36 = vmul.f32 %v8427_v24, %v3493_v57  ;;  %vm3494_vm0 = vcmp.ge.f32.partialorder %v3493_v57, 0.0 }
0x1d59   : > { %v3533_v37 = vmul.f32 %v8863_v41, %v3532_v35 }
0x1d5a   : > { %v3498_v8 = vsel %vm3494_vm0, %v3493_v57, %v3497_v36 }
0x1d5b   : > { %v3534_v39 = vsel %vm1358_vm12, %v3533_v37, 0.0  ;;  %v3802_v40 = vpack.c.bf16 %v3498_v8, %v3498_v8 }
0x1d5c   : > { %3535 = vadd.xlane.f32.xlu0 %v3534_v39 }
0x1d5d   : > { %3955 = vmatmul.bf16.vlgmr.msrb.gmra.mxu3 %v3802_v40 }
0x1dcf   : > { %v3536_v45 = vpop.xlane.xlu0 %3535 }
0x1dd0   : > { %v3537_v38 = vrot.slane %v3536_v45, 4 }
0x1dd2   : > { %v3538_v44 = vadd.f32 %v3537_v38, %v3536_v45 }
0x1dd4   : > { %v3539_v34 = vrot.slane %v3538_v44, 2 }
0x1dd6   : > { %v3540_v46 = vadd.f32 %v3539_v34, %v3538_v44 }
0x1dd8   : > { %v3541_v21 = vrot.slane %v3540_v46, 1 }
0x1dda   : > { %v3542_v47 = vadd.f32 %v3541_v21, %v3540_v46 }
0x1ddc   : > { %8210 = vpush %v3542_v47 }
0x1de0   : > { %v9049_v31 = vpop.f32.mrf.mxu3 }
0x1de8   : > { %v3958_v49 = vpop.f32.mrf.mxu3 }
0x1e0d   : > { %s8211_s23 = spop %8210 }
0x1e0e   : > { %s3544_s24 = smul.f32 0.010416667, %s8211_s23 }
0x1e10   : > { %s3545_s25 = sadd.f32 1e-08, %s3544_s24 }
0x1e12   : > { %v3546_v55 = vstv %s3545_s25 }
0x1e13   : > { %8541 = vrsqrt.f32 %v3546_v55  ;;  %vm3553_vm14 = vweird.f32 %v3546_v55 }
0x1e19   : > { %v8542_v61 = vpop.eup %8541 }
0x1e1a   : > { %v3548_v6 = vmul.f32 %v8542_v61, %v3546_v55  ;;  %vm3554_vm9 = vweird.f32 %v8542_v61 }
0x1e1b   : > { %vm3555_vm15 = vmor %vm3553_vm14, %vm3554_vm9 }
0x1e1c   : > { %v3549_v10 = vmul.f32 %v8542_v61, %v3548_v6  ;;  %v7982_v6 = vld [vmem:[#allocation3 + $0x7f0] sm:$0xff] }
0x1e1e   : > { %v3550_v59 = vmul.f32 0.5, %v3549_v10  ;;  %v7981_v10 = vld [vmem:[#allocation3 + $0x7e8] sm:$0xff] }
0x1e20   : > { %v3551_v11 = vsub.f32 1.5, %v3550_v59  ;;  %v7980_v59 = vld [vmem:[#allocation3 + $0x7e0] sm:$0xff] }
0x1e22   : > { %v3552_v12 = vmul.f32 %v8542_v61, %v3551_v11  ;;  %v7979_v11 = vld [vmem:[#allocation3 + $0x7d8] sm:$0xff] }
0x1e24   : > { %v3556_v63 = vsel %vm3555_vm15, %v8542_v61, %v3552_v12  ;;  %v7983_v61 = vld [vmem:[#allocation3 + $0x7f8] sm:$0xff]  ;;  %v7978_v12 = vld [vmem:[#allocation3 + $0x7d0] sm:$0xff] }
0x1e25   : > { %8212 = vpush %v3556_v63  ;;  %3886 = vmatpush.bf16.msra.mxu2 %v7983_v61  ;;  %v8431_v63 = vld [vmem:[#allocation5 + $0x94] ss:$0 sm:$0xff] }
0x1e29   : > { %3887 = vmatpush.bf16.msra.mxu2 %v7982_v6 }
0x1e2d   : > { %3888 = vmatpush.bf16.msra.mxu2 %v7981_v10  ;;  %v7991_v10 = vld [vmem:[#allocation3 + $0x838] sm:$0xff] }
0x1e31   : > { %3889 = vmatpush.bf16.msra.mxu2 %v7980_v59  ;;  %v7990_v59 = vld [vmem:[#allocation3 + $0x830] sm:$0xff] }
0x1e35   : > { %3890 = vmatpush.bf16.msra.mxu2 %v7979_v11  ;;  %v7989_v11 = vld [vmem:[#allocation3 + $0x828] sm:$0xff] }
0x1e39   : > { %3891 = vmatpush.bf16.msra.mxu2 %v7978_v12  ;;  %v7988_v12 = vld [vmem:[#allocation3 + $0x820] sm:$0xff] }
0x1e56   : > { %s8213_s26 = spop %8212 }
0x1e57   : > { %v3558_v14 = vstv %s8213_s26 }
0x1e58   : > { %v3559_v15 = vmul.f32 %v3558_v14, %v3531_v32  ;;  %v7977_v14 = vld [vmem:[#allocation3 + $0x7c8] sm:$0xff] }
0x1e59   : > { %3892 = vmatpush.bf16.msra.mxu2 %v7977_v14 }
0x1e5a   : > { %v3562_v23 = vmul.f32 %v8428_v5, %v3559_v15  ;;  %v8432_v5 = vld [vmem:[#allocation5 + $0x95] ss:$0 sm:$0xff] }
0x1e5c   : > { %v3565_v48 = vadd.f32 %v8429_v22, %v3562_v23  ;;  %v8433_v22 = vld [vmem:[#allocation5 + $0x96] ss:$0 sm:$0xff] }
0x1e5e   : > { %v3566_v26 = vpack.c.bf16 %v3565_v48, %v3565_v48  ;;  %v7976_v48 = vld [vmem:[#allocation3 + $0x7c0] sm:$0xff] }
0x1e5f   : > { %3893 = vmatpush.bf16.msra.mxu2 %v7976_v48 }
0x1e60   : > { %3719 = vmatmul.bf16.vlgmr.msra.gmra.mxu1 %v3566_v26  ;;  %v7999_v26 = vld [vmem:[#allocation3 + $0x978] sm:$0xff] }
0x1e63   : > { %4263 = vmatpush.bf16.msrb.mxu2 %v7999_v26  ;;  %v7986_v26 = vld [vmem:[#allocation3 + $0x810] sm:$0xff] }
0x1edd   : > { %v3720_v29 = vpop.f32.mrf.mxu1 }
0x1ede   : > { %v3721_v1 = vadd.f32 %v3720_v29, %v9042_v50 }
0x1ee0   : > { %v3726_v58 = vadd.f32 %v8430_v27, %v3721_v1  ;;  %v7998_v1 = vld [vmem:[#allocation3 + $0x970] sm:$0xff] }
0x1ee1   : > { %4264 = vmatpush.bf16.msrb.mxu2 %v7998_v1  ;;  %v8435_v1 = vld [vmem:[#allocation5 + $0x98] ss:$0 sm:$0xff] }
0x1ee2   : > { %v3727_v3 = vsel %vm1358_vm12, %v3726_v58, 0.0 }
0x1ee3   : > { %3728 = vadd.xlane.f32.xlu1 %v3727_v3  ;;  %v7996_v3 = vld [vmem:[#allocation3 + $0x960] sm:$0xff] }
0x1ee5   : > { %v3722_v62 = vpop.f32.mrf.mxu1 }
0x1ee6   : > { %v7995_v62 = vld [vmem:[#allocation3 + $0x958] sm:$0xff] }
0x1f56   : > { %v3729_v0 = vpop.xlane.xlu1 %3728 }
0x1f57   : > { %v3730_v24 = vrot.slane %v3729_v0, 4 }
0x1f59   : > { %v3731_v13 = vadd.f32 %v3730_v24, %v3729_v0  ;;  %v7994_v0 = vld [vmem:[#allocation3 + $0x950] sm:$0xff]  ;;  %v7993_v24 = vld [vmem:[#allocation3 + $0x948] sm:$0xff] }
0x1f5b   : > { %v3732_v57 = vrot.slane %v3731_v13, 2 }
0x1f5d   : > { %v3733_v35 = vadd.f32 %v3732_v57, %v3731_v13  ;;  %v7992_v13 = vld [vmem:[#allocation3 + $0x940] sm:$0xff] }
0x1f5f   : > { %v3734_v32 = vrot.slane %v3733_v35, 1 }
0x1f61   : > { %v3735_v36 = vadd.f32 %v3734_v32, %v3733_v35  ;;  %v8404_v32 = vld [vmem:[#allocation5 + $0x49] ss:$0 sm:$0xff] }
0x1f63   : > { %8214 = vpush %v3735_v36  ;;  %v2973_v36 = vadd.f32 %v8404_v32, %v9029_v19 }
0x1f94   : > { %s8215_s27 = spop %8214 }
0x1f95   : > { %s3737_s28 = smul.f32 0.010416667, %s8215_s27 }
0x1f97   : > { %v3738_v37 = vstv %s3737_s28 }
0x1f98   : > { %v3739_v8 = vsub.f32 %v3726_v58, %v3738_v37  ;;  %v7997_v58 = vld [vmem:[#allocation3 + $0x968] sm:$0xff]  ;;  %v2971_v37 = vadd.f32 %v8404_v32, %v9027_v56 }
0x1f99   : > { %4265 = vmatpush.bf16.msrb.mxu2 %v7997_v58 }
0x1f9a   : > { %v3740_v39 = vmul.f32 %v3739_v8, %v3739_v8 }
0x1f9c   : > { %v3741_v50 = vmul.f32 %v8863_v41, %v3740_v39  ;;  %v2975_v39 = vadd.f32 %v2971_v37, %v8853_v2 }
0x1f9d   : > { %4266 = vmatpush.bf16.msrb.mxu2 %v7996_v3 }
0x1f9e   : > { %v3742_v40 = vsel %vm1358_vm12, %v3741_v50, 0.0 }
0x1f9f   : > { %3743 = vadd.xlane.f32.xlu2 %v3742_v40  ;;  %v8434_v40 = vld [vmem:[#allocation5 + $0x97] ss:$0 sm:$0xff] }
0x1fa1   : > { %4267 = vmatpush.bf16.msrb.mxu2 %v7995_v62  ;;  %v8436_v62 = vld [vmem:[#allocation5 + $0x99] ss:$0 sm:$0xff] }
0x1fa5   : > { %4268 = vmatpush.bf16.msrb.mxu2 %v7994_v0 }
0x1fa9   : > { %4269 = vmatpush.bf16.msrb.mxu2 %v7993_v24  ;;  %v8437_v24 = vld [vmem:[#allocation5 + $0x9a] ss:$0 sm:$0xff] }
0x1fad   : > { %4270 = vmatpush.bf16.msrb.mxu2 %v7992_v13 }
0x2012   : > { %v3744_v45 = vpop.xlane.xlu2 %3743 }
0x2013   : > { %v3745_v38 = vrot.slane %v3744_v45, 4 }
0x2015   : > { %v3746_v44 = vadd.f32 %v3745_v38, %v3744_v45 }
0x2017   : > { %v3747_v34 = vrot.slane %v3746_v44, 2 }
0x2019   : > { %v3748_v46 = vadd.f32 %v3747_v34, %v3746_v44 }
0x201b   : > { %v3749_v21 = vrot.slane %v3748_v46, 1 }
0x201d   : > { %v3750_v47 = vadd.f32 %v3749_v21, %v3748_v46 }
0x201f   : > { %8216 = vpush %v3750_v47 }
0x2050   : > { %s8217_s29 = spop %8216 }
0x2051   : > { %s3752_s30 = smul.f32 0.010416667, %s8217_s29 }
0x2053   : > { %s3753_s5 = sadd.f32 1e-08, %s3752_s30 }
0x2055   : > { %v3754_v49 = vstv %s3753_s5 }
0x2056   : > { %8543 = vrsqrt.f32 %v3754_v49  ;;  %vm3761_vm2 = vweird.f32 %v3754_v49 }
0x205c   : > { %v8544_v16 = vpop.eup %8543 }
0x205d   : > { %v3756_v52 = vmul.f32 %v8544_v16, %v3754_v49  ;;  %vm3762_vm1 = vweird.f32 %v8544_v16 }
0x205e   : > { %vm3763_vm5 = vmor %vm3761_vm2, %vm3762_vm1 }
0x205f   : > { %v3757_v53 = vmul.f32 %v8544_v16, %v3756_v52 }
0x2061   : > { %v3758_v60 = vmul.f32 0.5, %v3757_v53 }
0x2063   : > { %v3759_v55 = vsub.f32 1.5, %v3758_v60 }
0x2065   : > { %v3760_v9 = vmul.f32 %v8544_v16, %v3759_v55 }
0x2067   : > { %v3764_v30 = vsel %vm3763_vm5, %v8544_v16, %v3760_v9 }
0x2068   : > { %8218 = vpush %v3764_v30 }
0x2099   : > { %s8219_s7 = spop %8218 }
0x209a   : > { %v3766_v51 = vstv %s8219_s7 }
0x209b   : > { %v3767_v42 = vmul.f32 %v3766_v51, %v3739_v8  ;;  %v2976_v8 = vadd.f32 %v2973_v36, %v8855_v4  ;;  %v7987_v51 = vld [vmem:[#allocation3 + $0x818] sm:$0xff] }
0x209c   : > { %v8438_v36 = vld [vmem:[#allocation5 + $0x9b] ss:$0 sm:$0xff] }
0x209d   : > { %v3770_v15 = vmul.f32 %v8431_v63, %v3767_v42  ;;  %v4117_v50 = vpack.c.bf16 %v2976_v8, %v2975_v39  ;;  %v8007_v39 = vld [vmem:[#allocation3 + $0x9b8] sm:$0xff] }
0x209f   : > { %v3773_v23 = vadd.f32 %v8432_v5, %v3770_v15 }
0x20a1   : > { %v3777_v27 = vmul.f32 %v8433_v22, %v3773_v23  ;;  %vm3774_vm7 = vcmp.ge.f32.partialorder %v3773_v23, 0.0 }
0x20a3   : > { %v3778_v29 = vsel %vm3774_vm7, %v3773_v23, %v3777_v27  ;;  %v7985_v27 = vld [vmem:[#allocation3 + $0x808] sm:$0xff] }
0x20a4   : > { %7175 = vmatpush.msk.msra.mxu0 %vm1358_vm12, %v3778_v29  ;;  %v7984_v29 = vld [vmem:[#allocation3 + $0x800] sm:$0xff] }
0x20a5   : > { %7176 = vmatmul.msk.f32.vlgmr.msra.gmra.mxu0 %vm1912_vm6, %v8959_v25 }
0x20a6   : > { %4081 = vmatpush.bf16.msrb.mxu0 %v7991_v10 }
0x20aa   : > { %4082 = vmatpush.bf16.msrb.mxu0 %v7990_v59 }
0x20ae   : > { %4083 = vmatpush.bf16.msrb.mxu0 %v7989_v11 }
0x20b2   : > { %4084 = vmatpush.bf16.msrb.mxu0 %v7988_v12 }
0x20b6   : > { %4085 = vmatpush.bf16.msrb.mxu0 %v7987_v51 }
0x20ba   : > { %4086 = vmatpush.bf16.msrb.mxu0 %v7986_v26 }
0x20be   : > { %4087 = vmatpush.bf16.msrb.mxu0 %v7985_v27 }
0x20c2   : > { %4088 = vmatpush.bf16.msrb.mxu0 %v7984_v29 }
0x2122   : > { %v3799_v57 = vpop.f32.mrf.mxu0 }
0x2123   : > { %v3820_v35 = vpack.c.bf16 %v3799_v57, %v3799_v57 }
0x2125   : > { %3894 = vmatmul.bf16.vlgmr.msra.gmra.mxu2 %v3820_v35 }
0x2135   : > { %4271 = vmatmul.bf16.vlgmr.msrb.gmra.mxu2 %v4117_v50  ;;  %v8006_v50 = vld [vmem:[#allocation3 + $0x9b0] sm:$0xff] }
0x21a8   : > { %v3895_v45 = vpop.f32.mrf.mxu2 }
0x21a9   : > { %v3957_v38 = vadd.f32 %v9049_v31, %v3895_v45  ;;  %v8005_v45 = vld [vmem:[#allocation3 + $0x9a8] sm:$0xff] }
0x21ab   : > { %v3962_v44 = vadd.f32 %v8434_v40, %v3957_v38  ;;  %v8004_v38 = vld [vmem:[#allocation3 + $0x9a0] sm:$0xff] }
0x21ad   : > { %3963 = vadd.xlane.f32.xlu0 %v3962_v44 }
0x21b0   : > { %v3897_v34 = vpop.f32.mrf.mxu2 }
0x21b1   : > { %v8002_v34 = vld [vmem:[#allocation3 + $0x990] sm:$0xff] }
0x2220   : > { %v3964_v46 = vpop.xlane.xlu0 %3963 }
0x2221   : > { %v3965_v21 = vrot.slane %v3964_v46, 4 }
0x2223   : > { %v3966_v47 = vadd.f32 %v3965_v21, %v3964_v46  ;;  %v8001_v46 = vld [vmem:[#allocation3 + $0x988] sm:$0xff]  ;;  %v8000_v21 = vld [vmem:[#allocation3 + $0x980] sm:$0xff] }
0x2225   : > { %v3967_v49 = vrot.slane %v3966_v47, 2 }
0x2227   : > { %v3968_v19 = vadd.f32 %v3967_v49, %v3966_v47 }
0x2229   : > { %v3969_v16 = vrot.slane %v3968_v19, 1 }
0x222b   : > { %v3970_v56 = vadd.f32 %v3969_v16, %v3968_v19  ;;  %v4272_v16 = vpop.f32.mrf.mxu2 }
0x222d   : > { %8220 = vpush %v3970_v56 }
0x225e   : > { %s8221_s8 = spop %8220 }
0x225f   : > { %s3972_s9 = smul.f32 0.0052083335, %s8221_s8 }
0x2261   : > { %v3973_v2 = vstv %s3972_s9 }
0x2262   : > { %v3974_v4 = vsub.f32 %v3962_v44, %v3973_v2  ;;  %v8003_v44 = vld [vmem:[#allocation3 + $0x998] sm:$0xff] }
0x2264   : > { %v3975_v52 = vmul.f32 %v3974_v4, %v3974_v4 }
0x2266   : > { %v3976_v53 = vmul.f32 %v8863_v41, %v3975_v52  ;;  %v4274_v52 = vpop.f32.mrf.mxu2 }
0x2268   : > { %3977 = vadd.xlane.f32.xlu1 %v3976_v53 }
0x22db   : > { %v3978_v31 = vpop.xlane.xlu1 %3977 }
0x22dc   : > { %v3979_v60 = vrot.slane %v3978_v31, 4 }
0x22de   : > { %v3980_v55 = vadd.f32 %v3979_v60, %v3978_v31 }
0x22e0   : > { %v3981_v9 = vrot.slane %v3980_v55, 2 }
0x22e2   : > { %v3982_v30 = vadd.f32 %v3981_v9, %v3980_v55 }
0x22e4   : > { %v3983_v61 = vrot.slane %v3982_v30, 1 }
0x22e6   : > { %v3984_v6 = vadd.f32 %v3983_v61, %v3982_v30 }
0x22e8   : > { %8222 = vpush %v3984_v6 }
0x2319   : > { %s8223_s10 = spop %8222 }
0x231a   : > { %s3986_s11 = smul.f32 0.0052083335, %s8223_s10 }
0x231c   : > { %s3987_s12 = sadd.f32 1e-08, %s3986_s11 }
0x231e   : > { %v3988_v63 = vstv %s3987_s12 }
0x231f   : > { %8545 = vrsqrt.f32 %v3988_v63  ;;  %vm3995_vm0 = vweird.f32 %v3988_v63 }
0x2325   : > { %v8546_v42 = vpop.eup %8545 }
0x2326   : > { %v3990_v5 = vmul.f32 %v8546_v42, %v3988_v63  ;;  %vm3996_vm8 = vweird.f32 %v8546_v42 }
0x2327   : > { %vm3997_vm9 = vmor %vm3995_vm0, %vm3996_vm8 }
0x2328   : > { %v3991_v14 = vmul.f32 %v8546_v42, %v3990_v5 }
0x232a   : > { %v3992_v15 = vmul.f32 0.5, %v3991_v14 }
0x232c   : > { %v3993_v22 = vsub.f32 1.5, %v3992_v15 }
0x232e   : > { %v3994_v23 = vmul.f32 %v8546_v42, %v3993_v22 }
0x2330   : > { %v3998_v48 = vsel %vm3997_vm9, %v8546_v42, %v3994_v23 }
0x2331   : > { %8224 = vpush %v3998_v48 }
0x2362   : > { %s8225_s13 = spop %8224 }
0x2363   : > { %v4000_v58 = vstv %s8225_s13 }
0x2364   : > { %v4001_v3 = vmul.f32 %v4000_v58, %v3974_v4  ;;  %v8439_v4 = vld [vmem:[#allocation5 + $0xad] ss:$0 sm:$0xff] }
0x2366   : > { %v4004_v0 = vmul.f32 %v8435_v1, %v4001_v3 }
0x2368   : > { %v4007_v13 = vadd.f32 %v8436_v62, %v4004_v0  ;;  %v8015_v62 = vld [vmem:[#allocation3 + $0x178] sm:$0xff]  ;;  %v8014_v0 = vld [vmem:[#allocation3 + $0x170] sm:$0xff] }
0x2369   : > { %4427 = vmatpush.bf16.msra.mxu3 %v8015_v62 }
0x236a   : > { %v4011_v57 = vmul.f32 %v8437_v24, %v4007_v13  ;;  %vm4008_vm14 = vcmp.ge.f32.partialorder %v4007_v13, 0.0  ;;  %v8013_v24 = vld [vmem:[#allocation3 + $0x168] sm:$0xff] }
0x236c   : > { %v4012_v35 = vsel %vm4008_vm14, %v4007_v13, %v4011_v57 }
0x236d   : > { %v4013_v32 = vpack.c.bf16 %v4012_v35, %v4012_v35  ;;  %4428 = vmatpush.bf16.msra.mxu3 %v8014_v0 }
0x236f   : > { %4089 = vmatmul.bf16.vlgmr.msrb.gmra.mxu0 %v4013_v32 }
0x2371   : > { %4429 = vmatpush.bf16.msra.mxu3 %v8013_v24 }
0x23ec   : > { %v4090_v37 = vpop.f32.mrf.mxu0 }
0x23ed   : > { %v4091_v8 = vadd.f32 %v8438_v36, %v4090_v37 }
0x23ef   : > { %4109 = vmatpush.msrb.mxu1 %v4091_v8 }
0x23f0   : > { %7273 = vmatmul.msk.f32.vlgmr.msrb.gmra.mxu1 %vm650_vm13, %v8805_v20 }
0x23f1   : > { %4201 = vmatpush.bf16.msra.mxu1 %v8007_v39  ;;  %v8012_v39 = vld [vmem:[#allocation3 + $0x160] sm:$0xff] }
0x23f2   : > { %4430 = vmatpush.bf16.msra.mxu3 %v8012_v39 }
0x23f4   : > { %v4092_v40 = vpop.f32.mrf.mxu0 }
0x23f5   : > { %4202 = vmatpush.bf16.msra.mxu1 %v8006_v50  ;;  %v8011_v50 = vld [vmem:[#allocation3 + $0x158] sm:$0xff]  ;;  %v8010_v40 = vld [vmem:[#allocation3 + $0x150] sm:$0xff] }
0x23f6   : > { %4431 = vmatpush.bf16.msra.mxu3 %v8011_v50 }
0x23f8   : > { %7274 = vmatmul.msk.f32.gmra.mxu1 %vm650_vm13, %v8828_v33 }
0x23f9   : > { %4203 = vmatpush.bf16.msra.mxu1 %v8005_v45  ;;  %v8009_v45 = vld [vmem:[#allocation3 + $0x148] sm:$0xff] }
0x23fa   : > { %4432 = vmatpush.bf16.msra.mxu3 %v8010_v40 }
0x23fd   : > { %4204 = vmatpush.bf16.msra.mxu1 %v8004_v38  ;;  %v8008_v38 = vld [vmem:[#allocation3 + $0x140] sm:$0xff] }
0x23fe   : > { %4433 = vmatpush.bf16.msra.mxu3 %v8009_v45 }
0x2401   : > { %4205 = vmatpush.bf16.msra.mxu1 %v8003_v44  ;;  %v8440_v44 = vld [vmem:[#allocation5 + $0xae] ss:$0 sm:$0xff] }
0x2402   : > { %4434 = vmatpush.bf16.msra.mxu3 %v8008_v38 }
0x2405   : > { %4206 = vmatpush.bf16.msra.mxu1 %v8002_v34 }
0x2409   : > { %4207 = vmatpush.bf16.msra.mxu1 %v8001_v46 }
0x240d   : > { %4208 = vmatpush.bf16.msra.mxu1 %v8000_v21 }
0x246d   : > { %v4111_v47 = vpop.f32.mrf.mxu1 }
0x2475   : > { %v4114_v49 = vpop.f32.mrf.mxu1 }
0x2476   : > { %v4135_v19 = vpack.c.bf16 %v4114_v49, %v4111_v47  ;;  %v8441_v47 = vld [vmem:[#allocation5 + $0xaf] ss:$0 sm:$0xff] }
0x2478   : > { %4209 = vmatmul.bf16.vlgmr.msra.gmra.mxu1 %v4135_v19 }
0x24f5   : > { %v4210_v56 = vpop.f32.mrf.mxu1 }
0x24f6   : > { %v4273_v2 = vadd.f32 %v4272_v16, %v4210_v56  ;;  %v8442_v16 = vld [vmem:[#allocation5 + $0xb0] ss:$0 sm:$0xff] }
0x24f8   : > { %v4279_v60 = vadd.f32 %v8439_v4, %v4273_v2 }
0x24fd   : > { %v4212_v53 = vpop.f32.mrf.mxu1 }
0x24fe   : > { %v4275_v31 = vadd.f32 %v4274_v52, %v4212_v53  ;;  %v8443_v53 = vld [vmem:[#allocation5 + $0x9c] ss:$0 sm:$0xff] }
0x2500   : > { %v4280_v55 = vadd.f32 %v8439_v4, %v4275_v31 }
0x2502   : > { %v4281_v9 = vadd.f32 %v4280_v55, %v4279_v60 }
0x2504   : > { %4282 = vadd.xlane.f32.xlu2 %v4281_v9 }
0x2577   : > { %v4283_v30 = vpop.xlane.xlu2 %4282 }
0x2578   : > { %v4284_v61 = vrot.slane %v4283_v30, 4 }
0x257a   : > { %v4285_v6 = vadd.f32 %v4284_v61, %v4283_v30  ;;  %v8444_v30 = vld [vmem:[#allocation5 + $0x9d] ss:$0 sm:$0xff] }
0x257c   : > { %v4286_v10 = vrot.slane %v4285_v6, 2 }
0x257e   : > { %v4287_v59 = vadd.f32 %v4286_v10, %v4285_v6  ;;  %v8445_v10 = vld [vmem:[#allocation5 + $0x9e] ss:$0 sm:$0xff] }
0x2580   : > { %v4288_v11 = vrot.slane %v4287_v59, 1 }
0x2582   : > { %v4289_v12 = vadd.f32 %v4288_v11, %v4287_v59 }
0x2584   : > { %8226 = vpush %v4289_v12 }
0x25b5   : > { %s8227_s14 = spop %8226 }
0x25b6   : > { %s4291_s16 = smul.f32 0.00390625, %s8227_s14 }
0x25b8   : > { %v4292_v63 = vstv %s4291_s16 }
0x25b9   : > { %v4293_v51 = vsub.f32 %v4279_v60, %v4292_v63  ;;  %v4294_v42 = vsub.f32 %v4280_v55, %v4292_v63 }
0x25bb   : > { %v4295_v5 = vmul.f32 %v4293_v51, %v4293_v51  ;;  %v4296_v14 = vmul.f32 %v4294_v42, %v4294_v42 }
0x25bd   : > { %v4297_v15 = vmul.f32 %v8841_v43, %v4295_v5  ;;  %v4298_v22 = vmul.f32 %v8841_v43, %v4296_v14 }
0x25bf   : > { %v4299_v23 = vadd.f32 %v4298_v22, %v4297_v15 }
0x25c1   : > { %4300 = vadd.xlane.f32.xlu0 %v4299_v23 }
0x2634   : > { %v4301_v48 = vpop.xlane.xlu0 %4300 }
0x2635   : > { %v4302_v26 = vrot.slane %v4301_v48, 4 }
0x2637   : > { %v4303_v27 = vadd.f32 %v4302_v26, %v4301_v48 }
0x2639   : > { %v4304_v29 = vrot.slane %v4303_v27, 2 }
0x263b   : > { %v4305_v1 = vadd.f32 %v4304_v29, %v4303_v27 }
0x263d   : > { %v4306_v58 = vrot.slane %v4305_v1, 1 }
0x263f   : > { %v4307_v3 = vadd.f32 %v4306_v58, %v4305_v1 }
0x2641   : > { %8228 = vpush %v4307_v3 }
0x2672   : > { %s8229_s17 = spop %8228 }
0x2673   : > { %s4309_s18 = smul.f32 0.00390625, %s8229_s17 }
0x2675   : > { %s4310_s20 = sadd.f32 1e-08, %s4309_s18 }
0x2677   : > { %v4311_v43 = vstv %s4310_s20 }
0x2678   : > { %8547 = vrsqrt.f32 %v4311_v43  ;;  %vm4318_vm1 = vweird.f32 %v4311_v43 }
0x267e   : > { %v8548_v13 = vpop.eup %8547 }
0x267f   : > { %v4313_v57 = vmul.f32 %v8548_v13, %v4311_v43  ;;  %vm4319_vm15 = vweird.f32 %v8548_v13 }
0x2680   : > { %vm4320_vm2 = vmor %vm4318_vm1, %vm4319_vm15 }
0x2681   : > { %v4314_v35 = vmul.f32 %v8548_v13, %v4313_v57 }
0x2683   : > { %v4315_v32 = vmul.f32 0.5, %v4314_v35 }
0x2685   : > { %v4316_v36 = vsub.f32 1.5, %v4315_v32 }
0x2687   : > { %v4317_v37 = vmul.f32 %v8548_v13, %v4316_v36 }
0x2689   : > { %v4321_v8 = vsel %vm4320_vm2, %v8548_v13, %v4317_v37 }
0x268a   : > { %8230 = vpush %v4321_v8 }
0x26bb   : > { %s8231_s21 = spop %8230 }
0x26bc   : > { %v4323_v34 = vstv %s8231_s21 }
0x26bd   : > { %v4324_v46 = vmul.f32 %v4323_v34, %v4293_v51  ;;  %v4325_v21 = vmul.f32 %v4323_v34, %v4294_v42 }
0x26bf   : > { %v4328_v49 = vmul.f32 %v8440_v44, %v4324_v46  ;;  %v4329_v19 = vmul.f32 %v8440_v44, %v4325_v21 }
0x26c1   : > { %v4332_v56 = vadd.f32 %v8441_v47, %v4328_v49  ;;  %v4333_v2 = vadd.f32 %v8441_v47, %v4329_v19 }
0x26c3   : > { %vm4334_vm5 = vcmp.ge.f32.partialorder %v4332_v56, 0.0  ;;  %vm4335_vm7 = vcmp.ge.f32.partialorder %v4333_v2, 0.0  ;;  %v4338_v4 = vmul.f32 %v8442_v16, %v4332_v56  ;;  %v4339_v52 = vmul.f32 %v8442_v16, %v4333_v2  ;;  %v8447_v16 = vld [vmem:[#allocation5 + $0x6] ss:$0 sm:$0xff] }
0x26c5   : > { %v4340_v31 = vsel %vm4334_vm5, %v4332_v56, %v4338_v4  ;;  %v4341_v60 = vsel %vm4335_vm7, %v4333_v2, %v4339_v52  ;;  %v8448_v52 = vld [vmem:[#allocation5 + $0x7] ss:$0 sm:$0xff] }
0x26c6   : > { %v4342_v55 = vadd.f32 %v4340_v31, %v8798_v17  ;;  %v4343_v9 = vadd.f32 %v4341_v60, %v8800_v18  ;;  %v8446_v18 = vld [vmem:[#allocation5 + $0x5] ss:$0 sm:$0xff]  ;;  %v8449_v60 = vld [vmem:[#allocation5 + $0x8] ss:$0 sm:$0xff] }
0x26c8   : > { %v4346_v61 = vmul.f32 %v8443_v53, %v4342_v55  ;;  %v4347_v6 = vmul.f32 %v8443_v53, %v4343_v9 }
0x26ca   : > { %v4350_v59 = vadd.f32 %v8444_v30, %v4346_v61  ;;  %v4351_v11 = vadd.f32 %v8444_v30, %v4347_v6 }
0x26cc   : > { %vm4352_vm8 = vcmp.ge.f32.partialorder %v4350_v59, 0.0  ;;  %vm4353_vm0 = vcmp.ge.f32.partialorder %v4351_v11, 0.0  ;;  %v4356_v12 = vmul.f32 %v8445_v10, %v4350_v59  ;;  %v4357_v63 = vmul.f32 %v8445_v10, %v4351_v11 }
0x26ce   : > { %v9072_v51 = vsel %vm4352_vm8, %v4350_v59, %v4356_v12  ;;  %v9074_v42 = vsel %vm4353_vm0, %v4351_v11, %v4357_v63  ;;  %v8450_v59 = vld [vmem:[#allocation5 + $0xa] ss:$0 sm:$0xff]  ;;  %v8452_v63 = vld [vmem:[#allocation5 + $0xb] ss:$0 sm:$0xff] }
0x26cf   : > { %v4360_v5 = vpack.c.bf16 %v9074_v42, %v9072_v51 }
0x26d1   : > { %4435 = vmatmul.bf16.vlgmr.msra.gmra.mxu3 %v4360_v5  ;;  %v8453_v5 = vld [vmem:[#allocation5 + $0xc] ss:$0 sm:$0xff] }
0x2754   : > { %v4436_v17 = vpop.f32.mrf.mxu3 }
0x2755   : > { %v4437_v15 = vadd.f32 %v8446_v18, %v4436_v17 }
0x275c   : > { %v4438_v14 = vpop.f32.mrf.mxu3 }
0x275d   : > { %v4439_v22 = vadd.f32 %v8446_v18, %v4438_v14 }
0x275f   : > { %v4441_v23 = vadd.f32 %v4439_v22, %v4437_v15 }
0x2761   : > { %4442 = vadd.xlane.f32.xlu1 %v4441_v23 }
0x27d4   : > { %v4443_v48 = vpop.xlane.xlu1 %4442 }
0x27d5   : > { %v4444_v26 = vrot.slane %v4443_v48, 4 }
0x27d7   : > { %v4445_v27 = vadd.f32 %v4444_v26, %v4443_v48  ;;  %v8454_v48 = vld [vmem:[#allocation5 + $0xd] ss:$0 sm:$0xff] }
0x27d9   : > { %v4446_v29 = vrot.slane %v4445_v27, 2 }
0x27db   : > { %v4447_v1 = vadd.f32 %v4446_v29, %v4445_v27 }
0x27dd   : > { %v4448_v58 = vrot.slane %v4447_v1, 1 }
0x27df   : > { %v4449_v3 = vadd.f32 %v4448_v58, %v4447_v1 }
0x27e1   : > { %8232 = vpush %v4449_v3 }
0x2812   : > { %s8233_s22 = spop %8232 }
0x2813   : > { %s4451_s23 = smul.f32 0.0026041667, %s8233_s22 }
0x2815   : > { %v4452_v62 = vstv %s4451_s23 }
0x2816   : > { %v4453_v0 = vsub.f32 %v4437_v15, %v4452_v62  ;;  %v4454_v24 = vsub.f32 %v4439_v22, %v4452_v62  ;;  %v8451_v22 = vld [vmem:[#allocation5 + $0x9] ss:$0 sm:$0xff] }
0x2818   : > { %v4455_v43 = vmul.f32 %v4453_v0, %v4453_v0  ;;  %v4456_v13 = vmul.f32 %v4454_v24, %v4454_v24 }
0x281a   : > { %v4457_v57 = vmul.f32 %v8863_v41, %v4455_v43  ;;  %v4458_v35 = vmul.f32 %v8863_v41, %v4456_v13 }
0x281c   : > { %v4459_v32 = vadd.f32 %v4458_v35, %v4457_v57 }
0x281e   : > { %4460 = vadd.xlane.f32.xlu2 %v4459_v32 }
0x2891   : > { %v4461_v36 = vpop.xlane.xlu2 %4460 }
0x2892   : > { %v4462_v37 = vrot.slane %v4461_v36, 4 }
0x2894   : > { %v4463_v8 = vadd.f32 %v4462_v37, %v4461_v36 }
0x2896   : > { %v4464_v39 = vrot.slane %v4463_v8, 2 }
0x2898   : > { %v4465_v50 = vadd.f32 %v4464_v39, %v4463_v8 }
0x289a   : > { %v4466_v40 = vrot.slane %v4465_v50, 1 }
0x289c   : > { %v4467_v45 = vadd.f32 %v4466_v40, %v4465_v50 }
0x289e   : > { %8234 = vpush %v4467_v45 }
0x28cf   : > { %s8235_s24 = spop %8234 }
0x28d0   : > { %s4469_s25 = smul.f32 0.0026041667, %s8235_s24 }
0x28d2   : > { %s4470_s26 = sadd.f32 1e-08, %s4469_s25 }
0x28d4   : > { %v4471_v38 = vstv %s4470_s26 }
0x28d5   : > { %8549 = vrsqrt.f32 %v4471_v38  ;;  %vm4478_vm14 = vweird.f32 %v4471_v38 }
0x28db   : > { %v8550_v44 = vpop.eup %8549 }
0x28dc   : > { %v4473_v34 = vmul.f32 %v8550_v44, %v4471_v38  ;;  %vm4479_vm9 = vweird.f32 %v8550_v44 }
0x28dd   : > { %vm4480_vm15 = vmor %vm4478_vm14, %vm4479_vm9 }
0x28de   : > { %v4474_v46 = vmul.f32 %v8550_v44, %v4473_v34 }
0x28e0   : > { %v4475_v21 = vmul.f32 0.5, %v4474_v46 }
0x28e2   : > { %v4476_v47 = vsub.f32 1.5, %v4475_v21 }
0x28e4   : > { %v4477_v49 = vmul.f32 %v8550_v44, %v4476_v47 }
0x28e6   : > { %v4481_v19 = vsel %vm4480_vm15, %v8550_v44, %v4477_v49 }
0x28e7   : > { %8236 = vpush %v4481_v19 }
0x2918   : > { %s8237_s27 = spop %8236 }
0x2919   : > { %v4483_v56 = vstv %s8237_s27 }
0x291a   : > { %v4484_v2 = vmul.f32 %v4483_v56, %v4453_v0  ;;  %v4485_v4 = vmul.f32 %v4483_v56, %v4454_v24 }
0x291c   : > { %v4488_v53 = vmul.f32 %v8447_v16, %v4484_v2  ;;  %v4489_v31 = vmul.f32 %v8447_v16, %v4485_v4 }
0x291e   : > { %v4492_v55 = vadd.f32 %v8448_v52, %v4488_v53  ;;  %v4493_v9 = vadd.f32 %v8448_v52, %v4489_v31 }
0x2920   : > { %vm4494_vm1 = vcmp.ge.f32.partialorder %v4492_v55, 0.0  ;;  %vm4495_vm2 = vcmp.ge.f32.partialorder %v4493_v9, 0.0  ;;  %v4498_v30 = vmul.f32 %v8449_v60, %v4492_v55  ;;  %v4499_v61 = vmul.f32 %v8449_v60, %v4493_v9  ;;  %v8455_v60 = vld [vmem:[#allocation5 + $0xe] ss:$0 sm:$0xff] }
0x2922   : > { %v4500_v6 = vsel %vm4494_vm1, %v4492_v55, %v4498_v30  ;;  %v4501_v10 = vsel %vm4495_vm2, %v4493_v9, %v4499_v61 }
0x2923   : > { %v4504_v11 = vrot.slane %v4500_v6, 6  ;;  %v4505_v12 = vrot.slane %v4501_v10, 6 }
0x2925   : > { %v4506_v17 = vsel %vm1285_vm10, %v4504_v11, %v4505_v12  ;;  %v4510_v18 = vsel %vm1285_vm10, 0.0, %v4504_v11  ;;  %v4511_v14 = vsel %vm1285_vm10, %v4505_v12, 0.0 }
0x2926   : > { %v4520_v15 = vmul.f32 %v8450_v59, %v4511_v14  ;;  %v4518_v23 = vmul.f32 %v8450_v59, %v4510_v18  ;;  %v4519_v26 = vmul.f32 %v8450_v59, %v4506_v17  ;;  %v4535_v27 = vmul.f32 %v8452_v63, %v4510_v18 }
0x2927   : > { %v4536_v29 = vmul.f32 %v8452_v63, %v4506_v17  ;;  %v4537_v1 = vmul.f32 %v8452_v63, %v4511_v14  ;;  %v4552_v62 = vmul.f32 %v8453_v5, %v4510_v18  ;;  %v4553_v0 = vmul.f32 %v8453_v5, %v4506_v17 }
0x2928   : > { %v4527_v58 = vrot.slane %v4520_v15, 1  ;;  %v4524_v3 = vrot.slane %v4518_v23, 1  ;;  %v4525_v24 = vrot.slane %v4519_v26, 1  ;;  %v4541_v43 = vrot.slane %v4535_v27, 2 }
0x2929   : > { %v4542_v13 = vrot.slane %v4536_v29, 2  ;;  %v4544_v57 = vrot.slane %v4537_v1, 2  ;;  %v4514_v35 = vmul.f32 %v8451_v22, %v4510_v18  ;;  %v4515_v32 = vmul.f32 %v8451_v22, %v4506_v17 }
0x292a   : > { %v4554_v36 = vmul.f32 %v8453_v5, %v4511_v14  ;;  %v4569_v37 = vmul.f32 %v8454_v48, %v4510_v18  ;;  %v4526_v8 = vsel %vm349_vm3, %v4524_v3, %v4525_v24  ;;  %v4528_v39 = vsel %vm349_vm3, %v4525_v24, %v4527_v58 }
0x292b   : > { %v4558_v50 = vrot.slane %v4552_v62, 3  ;;  %v4559_v40 = vrot.slane %v4553_v0, 3  ;;  %v4531_v45 = vadd.f32 %v4526_v8, %v4514_v35  ;;  %v4532_v38 = vadd.f32 %v4528_v39, %v4515_v32  ;;  %v8022_v35 = vld [vmem:[#allocation3 + $0x1b0] sm:$0xff]  ;;  %v8021_v32 = vld [vmem:[#allocation3 + $0x1a8] sm:$0xff]  ;;  %v8019_v8 = vld [vmem:[#allocation3 + $0x198] sm:$0xff] }
0x292c   : > { %v4543_v44 = vsel %vm354_vm4, %v4541_v43, %v4542_v13  ;;  %v4561_v34 = vrot.slane %v4554_v36, 3  ;;  %v4545_v46 = vsel %vm354_vm4, %v4542_v13, %v4544_v57  ;;  %v4570_v21 = vmul.f32 %v8454_v48, %v4506_v17  ;;  %v8023_v57 = vld [vmem:[#allocation3 + $0x1b8] sm:$0xff]  ;;  %v8020_v36 = vld [vmem:[#allocation3 + $0x1a0] sm:$0xff]  ;;  %v8018_v39 = vld [vmem:[#allocation3 + $0x190] sm:$0xff] }
0x292d   : > { %v4571_v47 = vmul.f32 %v8454_v48, %v4511_v14  ;;  %v4575_v49 = vrot.slane %v4569_v37, 4  ;;  %v4548_v19 = vadd.f32 %v4543_v44, %v4531_v45  ;;  %v4549_v16 = vadd.f32 %v4545_v46, %v4532_v38  ;;  %4961 = vmatpush.bf16.msrb.mxu1 %v8023_v57 }
0x292e   : > { %v4560_v56 = vsel %vm1340_vm11, %v4558_v50, %v4559_v40  ;;  %v4562_v2 = vsel %vm1340_vm11, %v4559_v40, %v4561_v34  ;;  %v4576_v4 = vrot.slane %v4570_v21, 4  ;;  %v8017_v21 = vld [vmem:[#allocation3 + $0x188] sm:$0xff] }
0x292f   : > { %v4578_v52 = vrot.slane %v4571_v47, 4  ;;  %v4565_v53 = vadd.f32 %v4560_v56, %v4548_v19  ;;  %v4566_v31 = vadd.f32 %v4562_v2, %v4549_v16  ;;  %v8016_v47 = vld [vmem:[#allocation3 + $0x180] sm:$0xff]  ;;  %v8457_v2 = vld [vmem:[#allocation5 + $0x10] ss:$0 sm:$0xff] }
0x2930   : > { %v4577_v55 = vsel %vm1358_vm12, %v4575_v49, %v4576_v4  ;;  %v8456_v49 = vld [vmem:[#allocation5 + $0xf] ss:$0 sm:$0xff] }
0x2931   : > { %v4579_v9 = vsel %vm1358_vm12, %v4576_v4, %v4578_v52  ;;  %v4582_v30 = vadd.f32 %v4577_v55, %v4565_v53  ;;  %4962 = vmatpush.bf16.msrb.mxu1 %v8022_v35  ;;  %v8458_v55 = vld [vmem:[#allocation5 + $0x11] ss:$0 sm:$0xff] }
0x2932   : > { %v4583_v61 = vadd.f32 %v4579_v9, %v4566_v31  ;;  %v8459_v9 = vld [vmem:[#allocation5 + $0x12] ss:$0 sm:$0xff] }
0x2933   : > { %v4586_v6 = vadd.f32 %v8455_v60, %v4582_v30  ;;  %v8460_v30 = vld [vmem:[#allocation5 + $0x13] ss:$0 sm:$0xff] }
0x2934   : > { %v4587_v10 = vadd.f32 %v8455_v60, %v4583_v61 }
0x2935   : > { %4963 = vmatpush.bf16.msrb.mxu1 %v8021_v32 }
0x2936   : > { %v4588_v59 = vadd.f32 %v4587_v10, %v4586_v6 }
0x2938   : > { %4589 = vadd.xlane.f32.xlu0 %v4588_v59 }
0x2939   : > { %4964 = vmatpush.bf16.msrb.mxu1 %v8020_v36 }
0x293d   : > { %4965 = vmatpush.bf16.msrb.mxu1 %v8019_v8 }
0x2941   : > { %4966 = vmatpush.bf16.msrb.mxu1 %v8018_v39 }
0x2945   : > { %4967 = vmatpush.bf16.msrb.mxu1 %v8017_v21 }
0x2949   : > { %4968 = vmatpush.bf16.msrb.mxu1 %v8016_v47  ;;  %v8043_v47 = vld [vmem:[#allocation3 + $0x258] sm:$0xff] }
0x29ab   : > { %v4590_v11 = vpop.xlane.xlu0 %4589 }
0x29ac   : > { %v4591_v12 = vrot.slane %v4590_v11, 4 }
0x29ae   : > { %v4592_v63 = vadd.f32 %v4591_v12, %v4590_v11  ;;  %v8461_v12 = vld [vmem:[#allocation5 + $0x14] ss:$0 sm:$0xff] }
0x29b0   : > { %v4593_v5 = vrot.slane %v4592_v63, 2 }
0x29b2   : > { %v4594_v17 = vadd.f32 %v4593_v5, %v4592_v63 }
0x29b4   : > { %v4595_v18 = vrot.slane %v4594_v17, 1 }
0x29b6   : > { %v4596_v14 = vadd.f32 %v4595_v18, %v4594_v17 }
0x29b8   : > { %8238 = vpush %v4596_v14  ;;  %v8462_v14 = vld [vmem:[#allocation5 + $0x15] ss:$0 sm:$0xff] }
0x29e9   : > { %s8239_s28 = spop %8238 }
0x29ea   : > { %s4598_s29 = smul.f32 0.0026041667, %s8239_s28 }
0x29ec   : > { %v4599_v15 = vstv %s4598_s29 }
0x29ed   : > { %v4600_v22 = vsub.f32 %v4586_v6, %v4599_v15  ;;  %v4601_v23 = vsub.f32 %v4587_v10, %v4599_v15 }
0x29ef   : > { %v4602_v48 = vmul.f32 %v4600_v22, %v4600_v22  ;;  %v4603_v26 = vmul.f32 %v4601_v23, %v4601_v23 }
0x29f1   : > { %v4604_v27 = vmul.f32 %v8863_v41, %v4602_v48  ;;  %v4605_v29 = vmul.f32 %v8863_v41, %v4603_v26  ;;  %v8463_v26 = vld [vmem:[#allocation5 + $0x16] ss:$0 sm:$0xff] }
0x29f3   : > { %v4606_v1 = vadd.f32 %v4605_v29, %v4604_v27 }
0x29f5   : > { %4607 = vadd.xlane.f32.xlu1 %v4606_v1 }
0x2a68   : > { %v4608_v58 = vpop.xlane.xlu1 %4607 }
0x2a69   : > { %v4609_v3 = vrot.slane %v4608_v58, 4 }
0x2a6b   : > { %v4610_v62 = vadd.f32 %v4609_v3, %v4608_v58 }
0x2a6d   : > { %v4611_v0 = vrot.slane %v4610_v62, 2 }
0x2a6f   : > { %v4612_v24 = vadd.f32 %v4611_v0, %v4610_v62 }
0x2a71   : > { %v4613_v43 = vrot.slane %v4612_v24, 1 }
0x2a73   : > { %v4614_v13 = vadd.f32 %v4613_v43, %v4612_v24 }
0x2a75   : > { %8240 = vpush %v4614_v13 }
0x2aa6   : > { %s8241_s30 = spop %8240 }
0x2aa7   : > { %s4616_s5 = smul.f32 0.0026041667, %s8241_s30 }
0x2aa9   : > { %s4617_s7 = sadd.f32 1e-08, %s4616_s5 }
0x2aab   : > { %v4618_v37 = vstv %s4617_s7 }
0x2aac   : > { %8551 = vrsqrt.f32 %v4618_v37  ;;  %vm4625_vm4 = vweird.f32 %v4618_v37 }
0x2ab2   : > { %v8552_v50 = vpop.eup %8551 }
0x2ab3   : > { %v4620_v40 = vmul.f32 %v8552_v50, %v4618_v37  ;;  %vm4626_vm3 = vweird.f32 %v8552_v50 }
0x2ab4   : > { %vm4627_vm10 = vmor %vm4625_vm4, %vm4626_vm3 }
0x2ab5   : > { %v4621_v45 = vmul.f32 %v8552_v50, %v4620_v40 }
0x2ab7   : > { %v4622_v38 = vmul.f32 0.5, %v4621_v45 }
0x2ab9   : > { %v4623_v44 = vsub.f32 1.5, %v4622_v38  ;;  %v8047_v38 = vld [vmem:[#allocation3 + $0x278] sm:$0xff] }
0x2aba   : > { %5221 = vmatpush.bf16.msrb.mxu3 %v8047_v38 }
0x2abb   : > { %v4624_v34 = vmul.f32 %v8552_v50, %v4623_v44  ;;  %v8046_v44 = vld [vmem:[#allocation3 + $0x270] sm:$0xff] }
0x2abd   : > { %v4628_v46 = vsel %vm4627_vm10, %v8552_v50, %v4624_v34  ;;  %v8045_v34 = vld [vmem:[#allocation3 + $0x268] sm:$0xff] }
0x2abe   : > { %8242 = vpush %v4628_v46  ;;  %5222 = vmatpush.bf16.msrb.mxu3 %v8046_v44  ;;  %v8044_v46 = vld [vmem:[#allocation3 + $0x260] sm:$0xff] }
0x2ac2   : > { %5223 = vmatpush.bf16.msrb.mxu3 %v8045_v34 }
0x2ac6   : > { %5224 = vmatpush.bf16.msrb.mxu3 %v8044_v46 }
0x2aca   : > { %5225 = vmatpush.bf16.msrb.mxu3 %v8043_v47 }
0x2aef   : > { %s8243_s8 = spop %8242 }
0x2af0   : > { %v4630_v19 = vstv %s8243_s8 }
0x2af1   : > { %v4631_v16 = vmul.f32 %v4630_v19, %v4600_v22  ;;  %v4632_v56 = vmul.f32 %v4630_v19, %v4601_v23 }
0x2af3   : > { %v4635_v4 = vmul.f32 %v8456_v49, %v4631_v16  ;;  %v4636_v52 = vmul.f32 %v8456_v49, %v4632_v56  ;;  %v8042_v49 = vld [vmem:[#allocation3 + $0x250] sm:$0xff] }
0x2af4   : > { %5226 = vmatpush.bf16.msrb.mxu3 %v8042_v49 }
0x2af5   : > { %v9093_v53 = vadd.f32 %v8457_v2, %v4635_v4  ;;  %v9095_v31 = vadd.f32 %v8457_v2, %v4636_v52 }
0x2af7   : > { %4643 = vst [vmem:[#allocation2 + $0x2] sm:$0xff] %v9093_v53  ;;  %v4817_v60 = vpack.c.bf16 %v9095_v31, %v9093_v53 }
0x2af8   : > { %4644 = vst [vmem:[#allocation2 + $0xa] sm:$0xff] %v9095_v31 }
0x2af9   : > { %4969 = vmatmul.bf16.vlgmr.msrb.gmra.mxu1 %v4817_v60 }
0x2aff   : > { %v4645_v61 = vld [vmem:[#allocation2] ss:$2 sm:$0xff]  ;;  %v4649_v6 = vld [vmem:[#allocation2 + $0x1] ss:$2 sm:$0xff] }
0x2b00   : > { %v4654_v10 = vld [vmem:[#allocation2 + $0x2] ss:$2 sm:$0xff]  ;;  %v4648_v59 = vmul.f32 %v8458_v55, %v4645_v61  ;;  %v4652_v11 = vmul.f32 %v8459_v9, %v4649_v6  ;;  %4717 = vst [vmem:[#allocation2] sm:$0x3] %v8651_v54  ;;  %v4659_v5 = vld [vmem:[#allocation2 + $0x3] ss:$2 sm:$0xff] }
0x2b01   : > { %v4664_v63 = vld [vmem:[#allocation2 + $0x4] ss:$2 sm:$0xff]  ;;  %v4657_v18 = vmul.f32 %v8460_v30, %v4654_v10  ;;  %v4662_v22 = vmul.f32 %v8461_v12, %v4659_v5  ;;  %v8040_v9 = vld [vmem:[#allocation3 + $0x240] sm:$0xff]  ;;  %v8464_v30 = vld [vmem:[#allocation5 + $0x17] ss:$0 sm:$0xff] }
0x2b02   : > { %5041 = vst [vmem:[#allocation2 + $0x12] sm:$0x3] %v8651_v54  ;;  %v4653_v17 = vadd.f32 %v4652_v11, %v4648_v59  ;;  %v4667_v48 = vmul.f32 %v8462_v14, %v4664_v63  ;;  %v8041_v55 = vld [vmem:[#allocation3 + $0x248] sm:$0xff]  ;;  %v8465_v10 = vld [vmem:[#allocation5 + $0x18] ss:$0 sm:$0xff]  ;;  %v8030_v5 = vld [vmem:[#allocation3 + $0x1f0] sm:$0xff] }
0x2b03   : > { %4718 = vst [vmem:[#allocation2 + $0xa] sm:$0x3] %v8651_v54  ;;  %5227 = vmatpush.bf16.msrb.mxu3 %v8041_v55  ;;  %v8031_v12 = vld [vmem:[#allocation3 + $0x1f8] sm:$0xff]  ;;  %v8026_v55 = vld [vmem:[#allocation3 + $0x1d0] sm:$0xff] }
0x2b04   : > { %v4658_v15 = vadd.f32 %v4657_v18, %v4653_v17  ;;  %v8466_v17 = vld [vmem:[#allocation5 + $0x19] ss:$0 sm:$0xff]  ;;  %v8467_v18 = vld [vmem:[#allocation5 + $0x1a] ss:$0 sm:$0xff]  ;;  %v8468_v14 = vld [vmem:[#allocation5 + $0x1b] ss:$0 sm:$0xff] }
0x2b06   : > { %v4663_v23 = vadd.f32 %v4662_v22, %v4658_v15  ;;  %v8469_v15 = vld [vmem:[#allocation5 + $0x1c] ss:$0 sm:$0xff]  ;;  %v8029_v22 = vld [vmem:[#allocation3 + $0x1e8] sm:$0xff] }
0x2b07   : > { %5228 = vmatpush.bf16.msrb.mxu3 %v8040_v9  ;;  %v8025_v9 = vld [vmem:[#allocation3 + $0x1c8] sm:$0xff] }
0x2b08   : > { %v4668_v27 = vadd.f32 %v4667_v48, %v4663_v23 }
0x2b0a   : > { %v4671_v29 = vadd.f32 %v8463_v26, %v4668_v27 }
0x2b0c   : > { %4672 = vadd.xlane.f32.xlu2 %v4671_v29 }
0x2b7f   : > { %v4673_v1 = vpop.xlane.xlu2 %4672 }
0x2b80   : > { %v4674_v58 = vrot.slane %v4673_v1, 4 }
0x2b82   : > { %v4675_v3 = vadd.f32 %v4674_v58, %v4673_v1 }
0x2b84   : > { %v4676_v62 = vrot.slane %v4675_v3, 2 }
0x2b86   : > { %v4677_v0 = vadd.f32 %v4676_v62, %v4675_v3 }
0x2b88   : > { %v4678_v24 = vrot.slane %v4677_v0, 1 }
0x2b8a   : > { %v4679_v43 = vadd.f32 %v4678_v24, %v4677_v0  ;;  %v8470_v0 = vld [vmem:[#allocation5 + $0x1d] ss:$0 sm:$0xff]  ;;  %v8028_v24 = vld [vmem:[#allocation3 + $0x1e0] sm:$0xff] }
0x2b8c   : > { %8244 = vpush %v4679_v43 }
0x2bbd   : > { %s8245_s9 = spop %8244 }
0x2bbe   : > { %s4681_s10 = smul.f32 0.0052083335, %s8245_s9 }
0x2bc0   : > { %v4682_v13 = vstv %s4681_s10 }
0x2bc1   : > { %v4683_v57 = vsub.f32 %v4671_v29, %v4682_v13 }
0x2bc3   : > { %v4684_v35 = vmul.f32 %v4683_v57, %v4683_v57 }
0x2bc5   : > { %v4685_v32 = vmul.f32 %v8863_v41, %v4684_v35 }
0x2bc7   : > { %4686 = vadd.xlane.f32.xlu0 %v4685_v32  ;;  %v8471_v32 = vld [vmem:[#allocation5 + $0x1e] ss:$0 sm:$0xff] }
0x2c3a   : > { %v4687_v36 = vpop.xlane.xlu0 %4686 }
0x2c3b   : > { %v4688_v37 = vrot.slane %v4687_v36, 4 }
0x2c3d   : > { %v4689_v8 = vadd.f32 %v4688_v37, %v4687_v36  ;;  %v8027_v36 = vld [vmem:[#allocation3 + $0x1d8] sm:$0xff]  ;;  %v8472_v37 = vld [vmem:[#allocation5 + $0x29] ss:$0 sm:$0xff] }
0x2c3f   : > { %v4690_v39 = vrot.slane %v4689_v8, 2 }
0x2c41   : > { %v4691_v50 = vadd.f32 %v4690_v39, %v4689_v8  ;;  %v8473_v8 = vld [vmem:[#allocation5 + $0x2a] ss:$0 sm:$0xff] }
0x2c43   : > { %v4692_v40 = vrot.slane %v4691_v50, 1 }
0x2c45   : > { %v4693_v45 = vadd.f32 %v4692_v40, %v4691_v50  ;;  %v8474_v50 = vld [vmem:[#allocation5 + $0x2b] ss:$0 sm:$0xff]  ;;  %v8475_v40 = vld [vmem:[#allocation5 + $0x2c] ss:$0 sm:$0xff] }
0x2c47   : > { %8246 = vpush %v4693_v45 }
0x2c78   : > { %s8247_s11 = spop %8246 }
0x2c79   : > { %s4695_s12 = smul.f32 0.0052083335, %s8247_s11 }
0x2c7b   : > { %s4696_s13 = sadd.f32 1e-08, %s4695_s12 }
0x2c7d   : > { %v4697_v21 = vstv %s4696_s13 }
0x2c7e   : > { %8553 = vrsqrt.f32 %v4697_v21  ;;  %vm4704_vm5 = vweird.f32 %v4697_v21 }
0x2c84   : > { %v8554_v19 = vpop.eup %8553 }
0x2c85   : > { %v4699_v16 = vmul.f32 %v8554_v19, %v4697_v21  ;;  %vm4705_vm11 = vweird.f32 %v8554_v19 }
0x2c86   : > { %vm4706_vm7 = vmor %vm4704_vm5, %vm4705_vm11 }
0x2c87   : > { %v4700_v56 = vmul.f32 %v8554_v19, %v4699_v16  ;;  %v8476_v16 = vld [vmem:[#allocation5 + $0x2d] ss:$0 sm:$0xff] }
0x2c89   : > { %v4701_v2 = vmul.f32 0.5, %v4700_v56 }
0x2c8b   : > { %v4702_v4 = vsub.f32 1.5, %v4701_v2 }
0x2c8d   : > { %v4703_v52 = vmul.f32 %v8554_v19, %v4702_v4 }
0x2c8f   : > { %v4707_v60 = vsel %vm4706_vm7, %v8554_v19, %v4703_v52 }
0x2c90   : > { %8248 = vpush %v4707_v60 }
0x2cc1   : > { %s8249_s14 = spop %8248 }
0x2cc2   : > { %v4709_v61 = vstv %s8249_s14 }
0x2cc3   : > { %v4710_v6 = vmul.f32 %v4709_v61, %v4683_v57 }
0x2cc5   : > { %v4713_v59 = vmul.f32 %v8464_v30, %v4710_v6  ;;  %v8024_v30 = vld [vmem:[#allocation3 + $0x1c0] sm:$0xff] }
0x2cc7   : > { %v4716_v11 = vadd.f32 %v8465_v10, %v4713_v59 }
0x2cc9   : > { %4719 = vst [vmem:[#allocation2 + $0x2] sm:$0xff] %v4716_v11  ;;  %4809 = vmatpush.msra.mxu0 %v4716_v11  ;;  %v5156_v63 = vpack.c.bf16 %v4716_v11, %v4716_v11 }
0x2cca   : > { %7371 = vmatmul.msk.f32.vlgmr.msra.gmra.mxu0 %vm650_vm13, %v8805_v20 }
0x2ccb   : > { %5229 = vmatmul.bf16.vlgmr.msrb.gmra.mxu3 %v5156_v63  ;;  %4899 = vmatpush.bf16.msrb.mxu0 %v8031_v12 }
0x2ccf   : > { %4900 = vmatpush.bf16.msrb.mxu0 %v8030_v5 }
0x2cd0   : > { %v4720_v23 = vld [vmem:[#allocation2] ss:$2 sm:$0xf]  ;;  %v4724_v48 = vld [vmem:[#allocation2 + $0x1] ss:$2 sm:$0xf] }
0x2cd1   : > { %v4723_v26 = vmul.f32 %v8466_v17, %v4720_v23  ;;  %v4727_v27 = vmul.f32 %v8467_v18, %v4724_v48  ;;  %v4729_v29 = vld [vmem:[#allocation2 + $0x2] ss:$2 sm:$0xf]  ;;  %v4734_v1 = vld [vmem:[#allocation2 + $0x3] ss:$2 sm:$0xf] }
0x2cd2   : > { %7372 = vmatmul.msk.f32.gmra.mxu0 %vm650_vm13, %v8828_v33  ;;  %v4739_v58 = vld [vmem:[#allocation2 + $0x4] ss:$2 sm:$0xf]  ;;  %5040 = vst [vmem:[#allocation2] sm:$0x3] %v8651_v54  ;;  %v4732_v62 = vmul.f32 %v8468_v14, %v4729_v29  ;;  %v4737_v13 = vmul.f32 %v8469_v15, %v4734_v1  ;;  %v4970_v1 = vpop.f32.mrf.mxu1 }
0x2cd3   : > { %v4728_v3 = vadd.f32 %v4727_v27, %v4723_v26  ;;  %5042 = vst [vmem:[#allocation2 + $0x2] sm:$0xff] %v9093_v53  ;;  %4901 = vmatpush.bf16.msrb.mxu0 %v8029_v22  ;;  %v4742_v35 = vmul.f32 %v8470_v0, %v4739_v58  ;;  %v8477_v27 = vld [vmem:[#allocation5 + $0x2e] ss:$0 sm:$0xff] }
0x2cd4   : > { %5043 = vst [vmem:[#allocation2 + $0xa] sm:$0xff] %v9095_v31 }
0x2cd5   : > { %v4733_v43 = vadd.f32 %v4732_v62, %v4728_v3  ;;  %v8478_v62 = vld [vmem:[#allocation5 + $0x39] ss:$0 sm:$0xff] }
0x2cd7   : > { %v4738_v57 = vadd.f32 %v4737_v13, %v4733_v43  ;;  %4902 = vmatpush.bf16.msrb.mxu0 %v8028_v24 }
0x2cd9   : > { %v4743_v39 = vadd.f32 %v4742_v35, %v4738_v57 }
0x2cda   : > { %v4972_v0 = vpop.f32.mrf.mxu1 }
0x2cdb   : > { %v4746_v45 = vadd.f32 %v8471_v32, %v4743_v39  ;;  %4903 = vmatpush.bf16.msrb.mxu0 %v8027_v36  ;;  %v5044_v38 = vld [vmem:[#allocation2] ss:$2 sm:$0xff]  ;;  %v5048_v53 = vld [vmem:[#allocation2 + $0x1] ss:$2 sm:$0xff] }
0x2cdc   : > { %v5053_v44 = vld [vmem:[#allocation2 + $0x2] ss:$2 sm:$0xff]  ;;  %v5047_v34 = vmul.f32 %v8472_v37, %v5044_v38  ;;  %v5051_v46 = vmul.f32 %v8473_v8, %v5048_v53  ;;  %v5058_v31 = vld [vmem:[#allocation2 + $0x3] ss:$2 sm:$0xff]  ;;  %5427 = vst [vmem:[#allocation2] sm:$0x3] %v8651_v54 }
0x2cdd   : > { %v5063_v21 = vld [vmem:[#allocation2 + $0x4] ss:$2 sm:$0xff]  ;;  %v4747_v47 = vsel %vm1358_vm12, %v4746_v45, 0.0  ;;  %v5056_v19 = vmul.f32 %v8474_v50, %v5053_v44  ;;  %v5061_v2 = vmul.f32 %v8475_v40, %v5058_v31  ;;  %v8068_v44 = vld [vmem:[#allocation3 + $0x320] sm:$0xff] }
0x2cde   : > { %5428 = vst [vmem:[#allocation2 + $0xa] sm:$0x3] %v8651_v54  ;;  %4748 = vadd.xlane.f32.xlu1 %v4747_v47  ;;  %v5052_v49 = vadd.f32 %v5051_v46, %v5047_v34  ;;  %v5066_v52 = vmul.f32 %v8476_v16, %v5063_v21  ;;  %v8070_v38 = vld [vmem:[#allocation3 + $0x330] sm:$0xff]  ;;  %v8069_v53 = vld [vmem:[#allocation3 + $0x328] sm:$0xff]  ;;  %v8067_v21 = vld [vmem:[#allocation3 + $0x318] sm:$0xff] }
0x2cdf   : > { %5429 = vst [vmem:[#allocation2 + $0x2] sm:$0xff] %v4716_v11  ;;  %4904 = vmatpush.bf16.msrb.mxu0 %v8026_v55 }
0x2ce0   : > { %v5057_v56 = vadd.f32 %v5056_v19, %v5052_v49  ;;  %v8066_v19 = vld [vmem:[#allocation3 + $0x310] sm:$0xff] }
0x2ce2   : > { %v5062_v4 = vadd.f32 %v5061_v2, %v5057_v56 }
0x2ce3   : > { %4905 = vmatpush.bf16.msrb.mxu0 %v8025_v9 }
0x2ce4   : > { %v5067_v60 = vadd.f32 %v5066_v52, %v5062_v4 }
0x2ce6   : > { %v9123_v29 = vadd.f32 %v8477_v27, %v5067_v60 }
0x2ce7   : > { %4906 = vmatpush.bf16.msrb.mxu0 %v8024_v30 }
0x2d47   : > { %v4811_v61 = vpop.f32.mrf.mxu0 }
0x2d4e   : > { %v9115_v6 = vpop.f32.mrf.mxu3 }
0x2d4f   : > { %v4814_v54 = vpop.f32.mrf.mxu0 }
0x2d50   : > { %v4834_v10 = vpack.c.bf16 %v4814_v54, %v4811_v61  ;;  %v8065_v54 = vld [vmem:[#allocation3 + $0x308] sm:$0xff] }
0x2d51   : > { %v4749_v59 = vpop.xlane.xlu1 %4748 }
0x2d52   : > { %v4750_v12 = vrot.slane %v4749_v59, 4  ;;  %4907 = vmatmul.bf16.vlgmr.msrb.gmra.mxu0 %v4834_v10  ;;  %v8064_v10 = vld [vmem:[#allocation3 + $0x300] sm:$0xff] }
0x2d54   : > { %v4751_v11 = vadd.f32 %v4750_v12, %v4749_v59  ;;  %v8479_v59 = vld [vmem:[#allocation5 + $0x1f] ss:$0 sm:$0xff] }
0x2d56   : > { %v4752_v63 = vrot.slane %v4751_v11, 2  ;;  %v5232_v5 = vpop.f32.mrf.mxu3 }
0x2d58   : > { %v4753_v17 = vadd.f32 %v4752_v63, %v4751_v11  ;;  %v8480_v63 = vld [vmem:[#allocation5 + $0x20] ss:$0 sm:$0xff] }
0x2d5a   : > { %v4754_v18 = vrot.slane %v4753_v17, 1 }
0x2d5c   : > { %v4755_v14 = vadd.f32 %v4754_v18, %v4753_v17 }
0x2d5e   : > { %8250 = vpush %v4755_v14 }
0x2d8f   : > { %s8251_s16 = spop %8250 }
0x2d90   : > { %s4757_s17 = smul.f32 0.010416667, %s8251_s16 }
0x2d92   : > { %v4758_v15 = vstv %s4757_s17 }
0x2d93   : > { %v9117_v22 = vsub.f32 %v4746_v45, %v4758_v15  ;;  %v8071_v45 = vld [vmem:[#allocation3 + $0x338] sm:$0xff] }
0x2d94   : > { %5586 = vmatpush.bf16.msra.mxu1 %v8071_v45 }
0x2d95   : > { %v4760_v23 = vmul.f32 %v9117_v22, %v9117_v22 }
0x2d97   : > { %v4761_v48 = vmul.f32 %v8863_v41, %v4760_v23 }
0x2d98   : > { %5587 = vmatpush.bf16.msra.mxu1 %v8070_v38 }
0x2d99   : > { %v4762_v26 = vsel %vm1358_vm12, %v4761_v48, 0.0 }
0x2d9a   : > { %4763 = vadd.xlane.f32.xlu2 %v4762_v26 }
0x2d9c   : > { %5588 = vmatpush.bf16.msra.mxu1 %v8069_v53 }
0x2da0   : > { %5589 = vmatpush.bf16.msra.mxu1 %v8068_v44 }
0x2da2   : > { %5071 = vadd.xlane.f32.xlu2 %v9123_v29 }
0x2da4   : > { %5590 = vmatpush.bf16.msra.mxu1 %v8067_v21  ;;  %v8484_v21 = vld [vmem:[#allocation5 + $0x31] ss:$0 sm:$0xff] }
0x2da8   : > { %5591 = vmatpush.bf16.msra.mxu1 %v8066_v19  ;;  %v5434_v19 = vld [vmem:[#allocation2 + $0x1] ss:$2 sm:$0xf] }
0x2dac   : > { %5592 = vmatpush.bf16.msra.mxu1 %v8065_v54 }
0x2db0   : > { %5593 = vmatpush.bf16.msra.mxu1 %v8064_v10  ;;  %v8488_v10 = vld [vmem:[#allocation5 + $0x35] ss:$0 sm:$0xff] }
0x2dcf   : > { %v4908_v58 = vpop.f32.mrf.mxu0 }
0x2dd0   : > { %v4971_v3 = vadd.f32 %v4970_v1, %v4908_v58 }
0x2dd2   : > { %v4977_v13 = vadd.f32 %v8478_v62, %v4971_v3 }
0x2dd7   : > { %v4910_v24 = vpop.f32.mrf.mxu0 }
0x2dd8   : > { %v4973_v43 = vadd.f32 %v4972_v0, %v4910_v24 }
0x2dda   : > { %v4978_v57 = vadd.f32 %v8478_v62, %v4973_v43 }
0x2ddc   : > { %v4979_v35 = vadd.f32 %v4978_v57, %v4977_v13 }
0x2dde   : > { %4980 = vadd.xlane.f32.xlu0 %v4979_v35 }
0x2e0d   : > { %v4764_v32 = vpop.xlane.xlu2 %4763 }
0x2e0e   : > { %v4765_v36 = vrot.slane %v4764_v32, 4 }
0x2e10   : > { %v4766_v37 = vadd.f32 %v4765_v36, %v4764_v32 }
0x2e12   : > { %v4767_v8 = vrot.slane %v4766_v37, 2 }
0x2e14   : > { %v4768_v39 = vadd.f32 %v4767_v8, %v4766_v37 }
0x2e15   : > { %v5072_v32 = vpop.xlane.xlu2 %5071 }
0x2e16   : > { %v4769_v50 = vrot.slane %v4768_v39, 1  ;;  %v5073_v36 = vrot.slane %v5072_v32, 4 }
0x2e18   : > { %v4770_v40 = vadd.f32 %v4769_v50, %v4768_v39  ;;  %v5074_v37 = vadd.f32 %v5073_v36, %v5072_v32  ;;  %v8053_v32 = vld [vmem:[#allocation3 + $0x2a8] sm:$0xff]  ;;  %v8036_v36 = vld [vmem:[#allocation3 + $0x220] sm:$0xff] }
0x2e1a   : > { %8252 = vpush %v4770_v40  ;;  %v5075_v8 = vrot.slane %v5074_v37, 2 }
0x2e1c   : > { %v5076_v45 = vadd.f32 %v5075_v8, %v5074_v37  ;;  %v8035_v8 = vld [vmem:[#allocation3 + $0x218] sm:$0xff] }
0x2e1e   : > { %v5077_v44 = vrot.slane %v5076_v45, 1 }
0x2e4b   : > { %s8253_s18 = spop %8252 }
0x2e4c   : > { %s4772_s20 = smul.f32 0.010416667, %s8253_s18 }
0x2e4e   : > { %s4773_s21 = sadd.f32 1e-08, %s4772_s20 }
0x2e50   : > { %v4774_v34 = vstv %s4773_s21 }
0x2e51   : > { %8555 = vrsqrt.f32 %v4774_v34  ;;  %v4981_v46 = vpop.xlane.xlu0 %4980  ;;  %vm4781_vm0 = vweird.f32 %v4774_v34 }
0x2e52   : > { %v4982_v31 = vrot.slane %v4981_v46, 4 }
0x2e54   : > { %v4983_v47 = vadd.f32 %v4982_v31, %v4981_v46  ;;  %v5078_v31 = vadd.f32 %v5077_v44, %v5076_v45 }
0x2e56   : > { %v4984_v49 = vrot.slane %v4983_v47, 2 }
0x2e57   : > { %v8556_v16 = vpop.eup %8555 }
0x2e58   : > { %v4776_v56 = vmul.f32 %v8556_v16, %v4774_v34  ;;  %v4985_v4 = vadd.f32 %v4984_v49, %v4983_v47  ;;  %vm4782_vm8 = vweird.f32 %v8556_v16  ;;  %v8485_v47 = vld [vmem:[#allocation5 + $0x32] ss:$0 sm:$0xff]  ;;  %v5430_v49 = vld [vmem:[#allocation2] ss:$2 sm:$0xf] }
0x2e59   : > { %vm4783_vm9 = vmor %vm4781_vm0, %vm4782_vm8 }
0x2e5a   : > { %v4777_v2 = vmul.f32 %v8556_v16, %v4776_v56  ;;  %v4986_v55 = vrot.slane %v4985_v4, 1  ;;  %v5437_v56 = vmul.f32 %v8485_v47, %v5434_v19  ;;  %v8049_v47 = vld [vmem:[#allocation3 + $0x288] sm:$0xff]  ;;  %v8032_v19 = vld [vmem:[#allocation3 + $0x200] sm:$0xff] }
0x2e5c   : > { %v4778_v52 = vmul.f32 0.5, %v4777_v2  ;;  %v4987_v61 = vadd.f32 %v4986_v55, %v4985_v4  ;;  %v8486_v2 = vld [vmem:[#allocation5 + $0x33] ss:$0 sm:$0xff]  ;;  %v5439_v4 = vld [vmem:[#allocation2 + $0x2] ss:$2 sm:$0xf] }
0x2e5d   : > { %v8487_v55 = vld [vmem:[#allocation5 + $0x34] ss:$0 sm:$0xff] }
0x2e5e   : > { %v4779_v60 = vsub.f32 1.5, %v4778_v52 }
0x2e60   : > { %v4780_v9 = vmul.f32 %v8556_v16, %v4779_v60  ;;  %v5442_v60 = vmul.f32 %v8486_v2, %v5439_v4  ;;  %v8490_v2 = vld [vmem:[#allocation5 + $0x2f] ss:$0 sm:$0xff] }
0x2e62   : > { %v4784_v30 = vsel %vm4783_vm9, %v8556_v16, %v4780_v9  ;;  %v5433_v16 = vmul.f32 %v8484_v21, %v5430_v49  ;;  %v5444_v9 = vld [vmem:[#allocation2 + $0x3] ss:$2 sm:$0xf] }
0x2e63   : > { %8254 = vpush %v4784_v30  ;;  %v5447_v54 = vmul.f32 %v8487_v55, %v5444_v9  ;;  %v8033_v21 = vld [vmem:[#allocation3 + $0x208] sm:$0xff] }
0x2e64   : > { %8256 = vpush %v4987_v61  ;;  %v5438_v52 = vadd.f32 %v5437_v56, %v5433_v16  ;;  %v8048_v16 = vld [vmem:[#allocation3 + $0x280] sm:$0xff] }
0x2e66   : > { %v5443_v30 = vadd.f32 %v5442_v60, %v5438_v52  ;;  %v8491_v60 = vld [vmem:[#allocation5 + $0x30] ss:$0 sm:$0xff] }
0x2e94   : > { %s8255_s22 = spop %8254 }
0x2e95   : > { %v4786_v12 = vstv %s8255_s22  ;;  %s8257_s23 = spop %8256 }
0x2e96   : > { %v4787_v11 = vmul.f32 %v4786_v12, %v9117_v22  ;;  %s4989_s24 = smul.f32 0.0026041667, %s8257_s23  ;;  %v5449_v12 = vld [vmem:[#allocation2 + $0x4] ss:$2 sm:$0xf] }
0x2e98   : > { %v4790_v5 = vmul.f32 %v8479_v59, %v4787_v11  ;;  %v4990_v17 = vstv %s4989_s24  ;;  %v5448_v11 = vadd.f32 %v5447_v54, %v5443_v30 }
0x2e99   : > { %v9127_v18 = vsub.f32 %v4977_v13, %v4990_v17  ;;  %v9129_v14 = vsub.f32 %v4978_v57, %v4990_v17 }
0x2e9a   : > { %v4793_v15 = vadd.f32 %v8480_v63, %v4790_v5  ;;  %v5452_v5 = vmul.f32 %v8488_v10, %v5449_v12 }
0x2e9b   : > { %v4993_v23 = vmul.f32 %v9127_v18, %v9127_v18  ;;  %v4994_v48 = vmul.f32 %v9129_v14, %v9129_v14 }
0x2e9c   : > { %7437 = vmatpush.msk.msra.mxu2 %vm1358_vm12, %v4793_v15  ;;  %v5521_v26 = vpack.c.bf16 %v4793_v15, %v4793_v15  ;;  %v5453_v15 = vadd.f32 %v5452_v5, %v5448_v11  ;;  %v8492_v11 = vld [vmem:[#allocation5 + $0x3d] ss:$0 sm:$0xff] }
0x2e9d   : > { %v4995_v22 = vmul.f32 %v8863_v41, %v4993_v23  ;;  %v4996_v27 = vmul.f32 %v8863_v41, %v4994_v48  ;;  %7438 = vmatmul.msk.f32.vlgmr.msra.gmra.mxu2 %vm1912_vm6, %v8959_v25  ;;  %v8489_v23 = vld [vmem:[#allocation5 + $0x36] ss:$0 sm:$0xff] }
0x2e9e   : > { %5594 = vmatmul.bf16.vlgmr.msra.gmra.mxu1 %v5521_v26  ;;  %v9150_v48 = vadd.f32 %v8489_v23, %v5453_v15 }
0x2e9f   : > { %v4997_v1 = vadd.f32 %v4996_v27, %v4995_v22 }
0x2ea0   : > { %v5457_v26 = vsel %vm1358_vm12, %v9150_v48, 0.0 }
0x2ea1   : > { %4998 = vadd.xlane.f32.xlu1 %v4997_v1 }
0x2f14   : > { %v4999_v58 = vpop.xlane.xlu1 %4998 }
0x2f15   : > { %v5000_v3 = vrot.slane %v4999_v58, 4 }
0x2f17   : > { %v5001_v62 = vadd.f32 %v5000_v3, %v4999_v58 }
0x2f19   : > { %v5002_v0 = vrot.slane %v5001_v62, 2 }
0x2f1b   : > { %v9140_v24 = vpop.f32.mrf.mxu1  ;;  %v5003_v43 = vadd.f32 %v5002_v0, %v5001_v62  ;;  %v8039_v0 = vld [vmem:[#allocation3 + $0x238] sm:$0xff] }
0x2f1c   : > { %5282 = vmatpush.bf16.msrb.mxu2 %v8039_v0 }
0x2f1d   : > { %v5004_v13 = vrot.slane %v5003_v43, 1 }
0x2f1f   : > { %v5005_v57 = vadd.f32 %v5004_v13, %v5003_v43  ;;  %v8055_v43 = vld [vmem:[#allocation3 + $0x2b8] sm:$0xff]  ;;  %v8038_v13 = vld [vmem:[#allocation3 + $0x230] sm:$0xff] }
0x2f20   : > { %5360 = vmatpush.bf16.msra.mxu0 %v8055_v43  ;;  %5283 = vmatpush.bf16.msrb.mxu2 %v8038_v13  ;;  %v5136_v49 = vpop.f32.mrf.mxu2 }
0x2f21   : > { %8258 = vpush %v5005_v57  ;;  %v8054_v57 = vld [vmem:[#allocation3 + $0x2b0] sm:$0xff]  ;;  %v5295_v56 = vpack.c.bf16 %v5136_v49, %v5136_v49 }
0x2f23   : > { %v5597_v35 = vpop.f32.mrf.mxu1 }
0x2f24   : > { %5361 = vmatpush.bf16.msra.mxu0 %v8054_v57  ;;  %v8037_v35 = vld [vmem:[#allocation3 + $0x228] sm:$0xff] }
0x2f25   : > { %5284 = vmatpush.bf16.msrb.mxu2 %v8037_v35 }
0x2f28   : > { %5362 = vmatpush.bf16.msra.mxu0 %v8053_v32 }
0x2f29   : > { %5285 = vmatpush.bf16.msrb.mxu2 %v8036_v36 }
0x2f2d   : > { %5286 = vmatpush.bf16.msrb.mxu2 %v8035_v8 }
0x2f52   : > { %s8259_s25 = spop %8258 }
0x2f53   : > { %s5007_s26 = smul.f32 0.0026041667, %s8259_s25 }
0x2f55   : > { %s5008_s27 = sadd.f32 1e-08, %s5007_s26 }
0x2f57   : > { %v5009_v25 = vstv %s5008_s27 }
0x2f58   : > { %8557 = vrsqrt.f32 %v5009_v25  ;;  %vm5016_vm15 = vweird.f32 %v5009_v25 }
0x2f5e   : > { %v8558_v39 = vpop.eup %8557 }
0x2f5f   : > { %v5011_v50 = vmul.f32 %v8558_v39, %v5009_v25  ;;  %vm5017_vm14 = vweird.f32 %v8558_v39  ;;  %v8052_v25 = vld [vmem:[#allocation3 + $0x2a0] sm:$0xff] }
0x2f60   : > { %vm5018_vm1 = vmor %vm5016_vm15, %vm5017_vm14  ;;  %5363 = vmatpush.bf16.msra.mxu0 %v8052_v25 }
0x2f61   : > { %v5012_v40 = vmul.f32 %v8558_v39, %v5011_v50  ;;  %v8034_v50 = vld [vmem:[#allocation3 + $0x210] sm:$0xff] }
0x2f62   : > { %5287 = vmatpush.bf16.msrb.mxu2 %v8034_v50 }
0x2f63   : > { %v5013_v38 = vmul.f32 0.5, %v5012_v40  ;;  %v8050_v40 = vld [vmem:[#allocation3 + $0x290] sm:$0xff] }
0x2f65   : > { %v5014_v53 = vsub.f32 1.5, %v5013_v38 }
0x2f66   : > { %5288 = vmatpush.bf16.msrb.mxu2 %v8033_v21 }
0x2f67   : > { %v5015_v34 = vmul.f32 %v8558_v39, %v5014_v53 }
0x2f69   : > { %v5019_v46 = vsel %vm5018_vm1, %v8558_v39, %v5015_v34  ;;  %v8051_v39 = vld [vmem:[#allocation3 + $0x298] sm:$0xff] }
0x2f6a   : > { %8260 = vpush %v5019_v46  ;;  %5364 = vmatpush.bf16.msra.mxu0 %v8051_v39  ;;  %5289 = vmatpush.bf16.msrb.mxu2 %v8032_v19 }
0x2f6b   : > { %8262 = vpush %v5078_v31 }
0x2f6e   : > { %5365 = vmatpush.bf16.msra.mxu0 %v8050_v40 }
0x2f72   : > { %5366 = vmatpush.bf16.msra.mxu0 %v8049_v47  ;;  %v8493_v47 = vld [vmem:[#allocation5 + $0x3e] ss:$0 sm:$0xff] }
0x2f76   : > { %5367 = vmatpush.bf16.msra.mxu0 %v8048_v16  ;;  %v8494_v16 = vld [vmem:[#allocation5 + $0x3f] ss:$0 sm:$0xff] }
0x2f79   : > { %5368 = vmatmul.bf16.vlgmr.msra.gmra.mxu0 %v5295_v56 }
0x2f9b   : > { %s9142_s28 = spop %8260 }
0x2f9c   : > { %s8263_s29 = spop %8262 }
0x2f9d   : > { %s5080_s30 = smul.f32 0.0052083335, %s8263_s29 }
0x2f9f   : > { %v5081_v61 = vstv %s5080_s30 }
0x2fa0   : > { %v9145_v59 = vsub.f32 %v9123_v29, %v5081_v61 }
0x2fa2   : > { %v5083_v63 = vmul.f32 %v9145_v59, %v9145_v59 }
0x2fa4   : > { %v5084_v17 = vmul.f32 %v8863_v41, %v5083_v63 }
0x2fa6   : > { %5085 = vadd.xlane.f32.xlu0 %v5084_v17 }
0x2fae   : > { %5458 = vadd.xlane.f32.xlu0 %v5457_v26 }
0x2ff6   : > { %v5369_v61 = vpop.f32.mrf.mxu0 }
0x2ffe   : > { %v5371_v54 = vpop.f32.mrf.mxu0 }
0x3019   : > { %v5086_v22 = vpop.xlane.xlu0 %5085 }
0x301a   : > { %v5087_v29 = vrot.slane %v5086_v22, 4 }
0x301c   : > { %v5088_v27 = vadd.f32 %v5087_v29, %v5086_v22 }
0x301e   : > { %v5089_v1 = vrot.slane %v5088_v27, 2 }
0x3020   : > { %v5090_v58 = vadd.f32 %v5089_v1, %v5088_v27 }
0x3021   : > { %v5459_v36 = vpop.xlane.xlu0 %5458 }
0x3022   : > { %v5091_v3 = vrot.slane %v5090_v58, 1  ;;  %v5460_v25 = vrot.slane %v5459_v36, 4 }
0x3024   : > { %v5092_v62 = vadd.f32 %v5091_v3, %v5090_v58  ;;  %v5461_v8 = vadd.f32 %v5460_v25, %v5459_v36  ;;  %v8081_v36 = vld [vmem:[#allocation3 + $0x388] sm:$0xff]  ;;  %v8080_v25 = vld [vmem:[#allocation3 + $0x380] sm:$0xff] }
0x3026   : > { %8264 = vpush %v5092_v62  ;;  %v5462_v39 = vrot.slane %v5461_v8, 2 }
0x3057   : > { %s8265_s5 = spop %8264 }
0x3058   : > { %s5094_s7 = smul.f32 0.0052083335, %s8265_s5 }
0x305a   : > { %s5095_s8 = sadd.f32 1e-08, %s5094_s7 }
0x305c   : > { %v5096_v37 = vstv %s5095_s8 }
0x305d   : > { %8559 = vrsqrt.f32 %v5096_v37  ;;  %vm5103_vm3 = vweird.f32 %v5096_v37 }
0x3063   : > { %v8560_v45 = vpop.eup %8559 }
0x3064   : > { %v5098_v38 = vmul.f32 %v8560_v45, %v5096_v37  ;;  %vm5104_vm2 = vweird.f32 %v8560_v45 }
0x3065   : > { %vm5105_vm4 = vmor %vm5103_vm3, %vm5104_vm2 }
0x3066   : > { %v5099_v53 = vmul.f32 %v8560_v45, %v5098_v38  ;;  %v5463_v38 = vadd.f32 %v5462_v39, %v5461_v8 }
0x3068   : > { %v5100_v44 = vmul.f32 0.5, %v5099_v53 }
0x306a   : > { %v5101_v34 = vsub.f32 1.5, %v5100_v44 }
0x306c   : > { %v5102_v46 = vmul.f32 %v8560_v45, %v5101_v34  ;;  %v5464_v34 = vrot.slane %v5463_v38, 1 }
0x306e   : > { %v5106_v31 = vsel %vm5105_vm4, %v8560_v45, %v5102_v46  ;;  %v5465_v21 = vadd.f32 %v5464_v34, %v5463_v38 }
0x306f   : > { %8266 = vpush %v5106_v31 }
0x30a0   : > { %s8267_s9 = spop %8266 }
0x30a1   : > { %v5108_v4 = vstv %s8267_s9 }
0x30a2   : > { %v5109_v52 = vmul.f32 %v5108_v4, %v9145_v59  ;;  %v8495_v4 = vld [vmem:[#allocation5 + $0x40] ss:$0 sm:$0xff] }
0x30a4   : > { %v5112_v55 = vmul.f32 %v8490_v2, %v5109_v52 }
0x30a6   : > { %v5115_v9 = vadd.f32 %v8491_v60, %v5112_v55 }
0x30a8   : > { %v5139_v30 = vpack.c.bf16 %v5115_v9, %v5115_v9 }
0x30aa   : > { %5290 = vmatmul.bf16.vlgmr.msrb.gmra.mxu2 %v5139_v30 }
0x312d   : > { %v5291_v10 = vpop.f32.mrf.mxu2 }
0x312e   : > { %v5292_v12 = vadd.f32 %v5291_v10, %v9115_v6 }
0x3130   : > { %v5373_v63 = vadd.f32 %v5369_v61, %v5292_v12  ;;  %v8079_v61 = vld [vmem:[#allocation3 + $0x378] sm:$0xff]  ;;  %v8078_v12 = vld [vmem:[#allocation3 + $0x370] sm:$0xff] }
0x3132   : > { %v5376_v5 = vadd.f32 %v8492_v11, %v5373_v63  ;;  %v8077_v11 = vld [vmem:[#allocation3 + $0x368] sm:$0xff]  ;;  %v5021_v63 = vstv %s9142_s28 }
0x3134   : > { %5377 = vadd.xlane.f32.xlu1 %v5376_v5 }
0x3135   : > { %v5293_v17 = vpop.f32.mrf.mxu2 }
0x3136   : > { %v5022_v17 = vmul.f32 %v5021_v63, %v9127_v18  ;;  %v8072_v18 = vld [vmem:[#allocation3 + $0x340] sm:$0xff] }
0x31a7   : > { %v5378_v15 = vpop.xlane.xlu1 %5377 }
0x31a8   : > { %v5379_v23 = vrot.slane %v5378_v15, 4 }
0x31aa   : > { %v5380_v26 = vadd.f32 %v5379_v23, %v5378_v15  ;;  %v5023_v15 = vmul.f32 %v5021_v63, %v9129_v14  ;;  %v8481_v23 = vld [vmem:[#allocation5 + $0x3a] ss:$0 sm:$0xff] }
0x31ac   : > { %v5381_v22 = vrot.slane %v5380_v26, 2 }
0x31ae   : > { %v5382_v59 = vadd.f32 %v5381_v22, %v5380_v26  ;;  %v8075_v26 = vld [vmem:[#allocation3 + $0x358] sm:$0xff]  ;;  %v5027_v22 = vmul.f32 %v8481_v23, %v5023_v15  ;;  %v8498_v15 = vld [vmem:[#allocation5 + $0x41] ss:$0 sm:$0xff] }
0x31b0   : > { %v5383_v29 = vrot.slane %v5382_v59, 1 }
0x31b2   : > { %v5384_v27 = vadd.f32 %v5383_v29, %v5382_v59  ;;  %v8482_v59 = vld [vmem:[#allocation5 + $0x3b] ss:$0 sm:$0xff]  ;;  %v8074_v29 = vld [vmem:[#allocation3 + $0x350] sm:$0xff] }
0x31b4   : > { %8268 = vpush %v5384_v27 }
0x31e5   : > { %s8269_s10 = spop %8268 }
0x31e6   : > { %s5386_s11 = smul.f32 0.0052083335, %s8269_s10 }
0x31e8   : > { %v5387_v1 = vstv %s5386_s11 }
0x31e9   : > { %v5388_v58 = vsub.f32 %v5376_v5, %v5387_v1  ;;  %v8076_v5 = vld [vmem:[#allocation3 + $0x360] sm:$0xff]  ;;  %v5031_v1 = vadd.f32 %v8482_v59, %v5027_v22 }
0x31eb   : > { %v5389_v3 = vmul.f32 %v5388_v58, %v5388_v58  ;;  %vm5033_vm8 = vcmp.ge.f32.partialorder %v5031_v1, 0.0 }
0x31ed   : > { %v5390_v6 = vmul.f32 %v8863_v41, %v5389_v3  ;;  %v8073_v3 = vld [vmem:[#allocation3 + $0x348] sm:$0xff] }
0x31ef   : > { %5391 = vadd.xlane.f32.xlu2 %v5390_v6 }
0x3262   : > { %v5392_v62 = vpop.xlane.xlu2 %5391 }
0x3263   : > { %v5393_v0 = vrot.slane %v5392_v62, 4 }
0x3265   : > { %v5394_v43 = vadd.f32 %v5393_v0, %v5392_v62 }
0x3267   : > { %v5395_v13 = vrot.slane %v5394_v43, 2 }
0x3269   : > { %v5396_v57 = vadd.f32 %v5395_v13, %v5394_v43  ;;  %v8086_v43 = vld [vmem:[#allocation3 + $0x3b0] sm:$0xff]  ;;  %v8085_v13 = vld [vmem:[#allocation3 + $0x3a8] sm:$0xff] }
0x326b   : > { %v5397_v35 = vrot.slane %v5396_v57, 1 }
0x326d   : > { %v5398_v32 = vadd.f32 %v5397_v35, %v5396_v57  ;;  %v8084_v57 = vld [vmem:[#allocation3 + $0x3a0] sm:$0xff]  ;;  %v8083_v35 = vld [vmem:[#allocation3 + $0x398] sm:$0xff] }
0x326f   : > { %8270 = vpush %v5398_v32  ;;  %v8082_v32 = vld [vmem:[#allocation3 + $0x390] sm:$0xff] }
0x32a0   : > { %s8271_s12 = spop %8270 }
0x32a1   : > { %s5400_s13 = smul.f32 0.0052083335, %s8271_s12 }
0x32a3   : > { %s5401_s14 = sadd.f32 1e-08, %s5400_s13  ;;  %s248_s13 = scalar_lea.vmem %s9197_s4, %s7766_s6 }
0x32a5   : > { %v5402_v37 = vstv %s5401_s14 }
0x32a6   : > { %8561 = vrsqrt.f32 %v5402_v37  ;;  %vm5409_vm11 = vweird.f32 %v5402_v37 }
0x32ac   : > { %v8562_v50 = vpop.eup %8561 }
0x32ad   : > { %v5404_v40 = vmul.f32 %v8562_v50, %v5402_v37  ;;  %vm5410_vm10 = vweird.f32 %v8562_v50 }
0x32ae   : > { %vm5411_vm5 = vmor %vm5409_vm11, %vm5410_vm10 }
0x32af   : > { %v5405_v45 = vmul.f32 %v8562_v50, %v5404_v40 }
0x32b1   : > { %v5406_v53 = vmul.f32 0.5, %v5405_v45 }
0x32b3   : > { %v5407_v44 = vsub.f32 1.5, %v5406_v53 }
0x32b5   : > { %v5408_v46 = vmul.f32 %v8562_v50, %v5407_v44 }
0x32b7   : > { %v5412_v31 = vsel %vm5411_vm5, %v8562_v50, %v5408_v46  ;;  %v8063_v46 = vld [vmem:[#allocation3 + $0x2f8] sm:$0xff] }
0x32b8   : > { %8272 = vpush %v5412_v31  ;;  %5647 = vmatpush.bf16.msra.mxu3 %v8063_v46  ;;  %v8062_v31 = vld [vmem:[#allocation3 + $0x2f0] sm:$0xff]  ;;  %v8092_v46 = vld [vmem:[#allocation3 + $0x3e0] sm:$0xff] }
0x32b9   : > { %8274 = vpush %v5465_v21  ;;  %v8061_v21 = vld [vmem:[#allocation3 + $0x2e8] sm:$0xff] }
0x32bc   : > { %5648 = vmatpush.bf16.msra.mxu3 %v8062_v31  ;;  %v8499_v31 = vld [vmem:[#allocation5 + $0x42] ss:$0 sm:$0xff] }
0x32c0   : > { %5649 = vmatpush.bf16.msra.mxu3 %v8061_v21 }
0x32e9   : > { %s8273_s16 = spop %8272 }
0x32ea   : > { %v5414_v49 = vstv %s8273_s16  ;;  %s8275_s17 = spop %8274 }
0x32eb   : > { %v5415_v19 = vmul.f32 %v5414_v49, %v5388_v58  ;;  %s5467_s18 = smul.f32 0.010416667, %s8275_s17  ;;  %v8483_v58 = vld [vmem:[#allocation5 + $0x3c] ss:$0 sm:$0xff] }
0x32ec   : > { %v5037_v6 = vmul.f32 %v8483_v58, %v5031_v1 }
0x32ed   : > { %v5418_v56 = vmul.f32 %v8493_v47, %v5415_v19  ;;  %v5468_v2 = vstv %s5467_s18  ;;  %v8060_v47 = vld [vmem:[#allocation3 + $0x2e0] sm:$0xff]  ;;  %v8059_v19 = vld [vmem:[#allocation3 + $0x2d8] sm:$0xff] }
0x32ee   : > { %v9158_v52 = vsub.f32 %v9150_v48, %v5468_v2  ;;  %v8087_v48 = vld [vmem:[#allocation3 + $0x3b8] sm:$0xff]  ;;  %v5039_v62 = vsel %vm5033_vm8, %v5031_v1, %v5037_v6  ;;  %5650 = vmatpush.bf16.msra.mxu3 %v8060_v47 }
0x32ef   : > { %v5421_v60 = vadd.f32 %v8494_v16, %v5418_v56  ;;  %5846 = vmatpush.bf16.msrb.mxu1 %v8087_v48  ;;  %v8058_v16 = vld [vmem:[#allocation3 + $0x2d0] sm:$0xff] }
0x32f0   : > { %v5470_v55 = vmul.f32 %v9158_v52, %v9158_v52 }
0x32f1   : > { %vm5422_vm7 = vcmp.ge.f32.partialorder %v5421_v60, 0.0  ;;  %v5425_v9 = vmul.f32 %v8495_v4, %v5421_v60 }
0x32f2   : > { %v5471_v30 = vmul.f32 %v8863_v41, %v5470_v55  ;;  %5651 = vmatpush.bf16.msra.mxu3 %v8059_v19  ;;  %v8091_v19 = vld [vmem:[#allocation3 + $0x3d8] sm:$0xff] }
0x32f3   : > { %v5426_v54 = vsel %vm5422_vm7, %v5421_v60, %v5425_v9  ;;  %5847 = vmatpush.bf16.msrb.mxu1 %v8086_v43 }
0x32f4   : > { %5730 = vmatpush.msra.mxu2 %v5426_v54  ;;  %v5472_v10 = vsel %vm1358_vm12, %v5471_v30, 0.0  ;;  %v8056_v54 = vld [vmem:[#allocation3 + $0x2c0] sm:$0xff] }
0x32f5   : > { %5473 = vadd.xlane.f32.xlu1 %v5472_v10  ;;  %7599 = vmatmul.msk.f32.vlgmr.msra.gmra.mxu2 %vm650_vm13, %v8805_v20  ;;  %v5026_v20 = vmul.f32 %v8481_v23, %v5022_v17  ;;  %v8496_v10 = vld [vmem:[#allocation5 + $0x37] ss:$0 sm:$0xff] }
0x32f6   : > { %5908 = vmatpush.bf16.msrb.mxu2 %v8079_v61  ;;  %5652 = vmatpush.bf16.msra.mxu3 %v8058_v16  ;;  %v8057_v61 = vld [vmem:[#allocation3 + $0x2c8] sm:$0xff] }
0x32f7   : > { %v5030_v27 = vadd.f32 %v8482_v59, %v5026_v20  ;;  %5848 = vmatpush.bf16.msrb.mxu1 %v8085_v13 }
0x32fa   : > { %5909 = vmatpush.bf16.msrb.mxu2 %v8078_v12  ;;  %5653 = vmatpush.bf16.msra.mxu3 %v8057_v61 }
0x32fb   : > { %5849 = vmatpush.bf16.msrb.mxu1 %v8084_v57 }
0x32fd   : > { %7600 = vmatmul.msk.f32.gmra.mxu2 %vm650_vm13, %v8828_v33  ;;  %v5036_v33 = vmul.f32 %v8483_v58, %v5030_v27  ;;  %vm5032_vm13 = vcmp.ge.f32.partialorder %v5030_v27, 0.0 }
0x32fe   : > { %5910 = vmatpush.bf16.msrb.mxu2 %v8077_v11  ;;  %5654 = vmatpush.bf16.msra.mxu3 %v8056_v54  ;;  %v8497_v11 = vld [vmem:[#allocation5 + $0x38] ss:$0 sm:$0xff] }
0x32ff   : > { %v5038_v14 = vsel %vm5032_vm13, %v5030_v27, %v5036_v33  ;;  %5850 = vmatpush.bf16.msrb.mxu1 %v8083_v35 }
0x3300   : > { %v5764_v0 = vpack.c.bf16 %v5039_v62, %v5038_v14 }
0x3302   : > { %5911 = vmatpush.bf16.msrb.mxu2 %v8076_v5 }
0x3303   : > { %5851 = vmatpush.bf16.msrb.mxu1 %v8082_v32 }
0x3306   : > { %5912 = vmatpush.bf16.msrb.mxu2 %v8075_v26 }
0x3307   : > { %5852 = vmatpush.bf16.msrb.mxu1 %v8081_v36 }
0x330a   : > { %5913 = vmatpush.bf16.msrb.mxu2 %v8074_v29 }
0x330b   : > { %5853 = vmatpush.bf16.msrb.mxu1 %v8080_v25 }
0x330e   : > { %5914 = vmatpush.bf16.msrb.mxu2 %v8073_v3 }
0x3312   : > { %5915 = vmatpush.bf16.msrb.mxu2 %v8072_v18 }
0x3315   : > { %5916 = vmatmul.bf16.vlgmr.msrb.gmra.mxu2 %v5764_v0 }
0x3368   : > { %v5474_v37 = vpop.xlane.xlu1 %5473 }
0x3369   : > { %v5475_v8 = vrot.slane %v5474_v37, 4 }
0x336b   : > { %v5476_v39 = vadd.f32 %v5475_v8, %v5474_v37 }
0x336d   : > { %v5477_v50 = vrot.slane %v5476_v39, 2 }
0x336f   : > { %v5478_v40 = vadd.f32 %v5477_v50, %v5476_v39 }
0x3371   : > { %v5479_v45 = vrot.slane %v5478_v40, 1 }
0x3373   : > { %v5480_v38 = vadd.f32 %v5479_v45, %v5478_v40 }
0x3375   : > { %8276 = vpush %v5480_v38 }
0x3378   : > { %v5732_v53 = vpop.f32.mrf.mxu2 }
0x3380   : > { %v5735_v44 = vpop.f32.mrf.mxu2 }
0x3381   : > { %v5781_v34 = vpack.c.bf16 %v5735_v44, %v5732_v53  ;;  %v8095_v53 = vld [vmem:[#allocation3 + $0x3f8] sm:$0xff]  ;;  %v8094_v44 = vld [vmem:[#allocation3 + $0x3f0] sm:$0xff] }
0x3382   : > { %5987 = vmatpush.bf16.msrb.mxu3 %v8095_v53 }
0x3383   : > { %5854 = vmatmul.bf16.vlgmr.msrb.gmra.mxu1 %v5781_v34  ;;  %v8093_v34 = vld [vmem:[#allocation3 + $0x3e8] sm:$0xff] }
0x3386   : > { %5988 = vmatpush.bf16.msrb.mxu3 %v8094_v44 }
0x338a   : > { %5989 = vmatpush.bf16.msrb.mxu3 %v8093_v34 }
0x338e   : > { %5990 = vmatpush.bf16.msrb.mxu3 %v8092_v46 }
0x3392   : > { %5991 = vmatpush.bf16.msrb.mxu3 %v8091_v19  ;;  %v8097_v19 = vld [vmem:[#allocation3 + $0x408] sm:$0xff] }
0x33a6   : > { %s8277_s20 = spop %8276 }
0x33a7   : > { %s5482_s21 = smul.f32 0.010416667, %s8277_s20 }
0x33a9   : > { %s5483_s22 = sadd.f32 1e-08, %s5482_s21 }
0x33ab   : > { %v5484_v49 = vstv %s5483_s22 }
0x33ac   : > { %8563 = vrsqrt.f32 %v5484_v49  ;;  %vm5491_vm9 = vweird.f32 %v5484_v49 }
0x33b2   : > { %v8564_v56 = vpop.eup %8563 }
0x33b3   : > { %v5486_v2 = vmul.f32 %v8564_v56, %v5484_v49  ;;  %vm5492_vm0 = vweird.f32 %v8564_v56  ;;  %v8500_v49 = vld [vmem:[#allocation5 + $0x43] ss:$0 sm:$0xff] }
0x33b4   : > { %vm5493_vm14 = vmor %vm5491_vm9, %vm5492_vm0 }
0x33b5   : > { %v5487_v4 = vmul.f32 %v8564_v56, %v5486_v2 }
0x33b7   : > { %v5488_v60 = vmul.f32 0.5, %v5487_v4 }
0x33b9   : > { %v5489_v55 = vsub.f32 1.5, %v5488_v60 }
0x33bb   : > { %v5490_v9 = vmul.f32 %v8564_v56, %v5489_v55  ;;  %v8090_v55 = vld [vmem:[#allocation3 + $0x3d0] sm:$0xff] }
0x33bc   : > { %5992 = vmatpush.bf16.msrb.mxu3 %v8090_v55  ;;  %v8503_v55 = vld [vmem:[#allocation5 + $0x46] ss:$0 sm:$0xff] }
0x33bd   : > { %v5494_v30 = vsel %vm5493_vm14, %v8564_v56, %v5490_v9  ;;  %v8501_v56 = vld [vmem:[#allocation5 + $0x44] ss:$0 sm:$0xff]  ;;  %v8089_v9 = vld [vmem:[#allocation3 + $0x3c8] sm:$0xff] }
0x33be   : > { %8278 = vpush %v5494_v30  ;;  %v8088_v30 = vld [vmem:[#allocation3 + $0x3c0] sm:$0xff] }
0x33c0   : > { %5993 = vmatpush.bf16.msrb.mxu3 %v8089_v9 }
0x33c4   : > { %5994 = vmatpush.bf16.msrb.mxu3 %v8088_v30 }
0x33ef   : > { %s8279_s23 = spop %8278 }
0x33f0   : > { %v5496_v48 = vstv %s8279_s23 }
0x33f1   : > { %v5497_v12 = vmul.f32 %v5496_v48, %v9158_v52 }
0x33f3   : > { %v5500_v63 = vmul.f32 %v8496_v10, %v5497_v12  ;;  %v5917_v12 = vpop.f32.mrf.mxu2 }
0x33f5   : > { %v5503_v5 = vadd.f32 %v8497_v11, %v5500_v63 }
0x33f7   : > { %v5504_v17 = vpack.c.bf16 %v5503_v5, %v5503_v5 }
0x33f9   : > { %5655 = vmatmul.bf16.vlgmr.msra.gmra.mxu3 %v5504_v17 }
0x33fb   : > { %v5919_v17 = vpop.f32.mrf.mxu2 }
0x3400   : > { %v5855_v48 = vpop.f32.mrf.mxu1 }
0x3401   : > { %v5918_v5 = vadd.f32 %v5917_v12, %v5855_v48  ;;  %v8505_v12 = vld [vmem:[#allocation5 + $0x48] ss:$0 sm:$0xff] }
0x3408   : > { %v5857_v63 = vpop.f32.mrf.mxu1 }
0x347c   : > { %v5656_v23 = vpop.f32.mrf.mxu3 }
0x347d   : > { %v5657_v26 = vadd.f32 %v5656_v23, %v9140_v24  ;;  %v8502_v23 = vld [vmem:[#allocation5 + $0x45] ss:$0 sm:$0xff] }
0x347f   : > { %v5662_v20 = vadd.f32 %v8498_v15, %v5657_v26 }
0x3481   : > { %v5663_v22 = vsel %vm1358_vm12, %v5662_v20, 0.0 }
0x3482   : > { %5664 = vadd.xlane.f32.xlu2 %v5663_v22 }
0x3484   : > { %v5658_v59 = vpop.f32.mrf.mxu3 }
0x34f5   : > { %v5665_v29 = vpop.xlane.xlu2 %5664 }
0x34f6   : > { %v5666_v27 = vrot.slane %v5665_v29, 4 }
0x34f8   : > { %v5667_v1 = vadd.f32 %v5666_v27, %v5665_v29 }
0x34fa   : > { %v5668_v58 = vrot.slane %v5667_v1, 2 }
0x34fc   : > { %v5669_v3 = vadd.f32 %v5668_v58, %v5667_v1 }
0x34fe   : > { %v5670_v52 = vrot.slane %v5669_v3, 1 }
0x3500   : > { %v5671_v33 = vadd.f32 %v5670_v52, %v5669_v3 }
0x3502   : > { %8280 = vpush %v5671_v33 }
0x3533   : > { %s8281_s24 = spop %8280 }
0x3534   : > { %s5673_s25 = smul.f32 0.010416667, %s8281_s24 }
0x3536   : > { %v5674_v6 = vstv %s5673_s25 }
0x3537   : > { %v5675_v18 = vsub.f32 %v5662_v20, %v5674_v6 }
0x3539   : > { %v5676_v14 = vmul.f32 %v5675_v18, %v5675_v18 }
0x353b   : > { %v5677_v24 = vmul.f32 %v8863_v41, %v5676_v14 }
0x353d   : > { %v5678_v62 = vsel %vm1358_vm12, %v5677_v24, 0.0 }
0x353e   : > { %5679 = vadd.xlane.f32.xlu0 %v5678_v62 }
0x35b1   : > { %v5680_v0 = vpop.xlane.xlu0 %5679 }
0x35b2   : > { %v5681_v43 = vrot.slane %v5680_v0, 4 }
0x35b4   : > { %v5682_v13 = vadd.f32 %v5681_v43, %v5680_v0 }
0x35b6   : > { %v5683_v57 = vrot.slane %v5682_v13, 2 }
0x35b8   : > { %v5684_v35 = vadd.f32 %v5683_v57, %v5682_v13 }
0x35ba   : > { %v5685_v32 = vrot.slane %v5684_v35, 1 }
0x35bc   : > { %v5686_v36 = vadd.f32 %v5685_v32, %v5684_v35 }
0x35be   : > { %8282 = vpush %v5686_v36 }
0x35ef   : > { %s8283_s26 = spop %8282 }
0x35f0   : > { %s5688_s27 = smul.f32 0.010416667, %s8283_s26 }
0x35f2   : > { %s5689_s28 = sadd.f32 1e-08, %s5688_s27 }
0x35f4   : > { %v5690_v25 = vstv %s5689_s28 }
0x35f5   : > { %8565 = vrsqrt.f32 %v5690_v25  ;;  %vm5697_vm1 = vweird.f32 %v5690_v25 }
0x35fb   : > { %v8566_v37 = vpop.eup %8565 }
0x35fc   : > { %v5692_v8 = vmul.f32 %v8566_v37, %v5690_v25  ;;  %vm5698_vm15 = vweird.f32 %v8566_v37 }
0x35fd   : > { %vm5699_vm2 = vmor %vm5697_vm1, %vm5698_vm15 }
0x35fe   : > { %v5693_v39 = vmul.f32 %v8566_v37, %v5692_v8 }
0x3600   : > { %v5694_v50 = vmul.f32 0.5, %v5693_v39  ;;  %v8103_v39 = vld [vmem:[#allocation3 + $0x438] sm:$0xff] }
0x3602   : > { %v5695_v40 = vsub.f32 1.5, %v5694_v50  ;;  %v8102_v50 = vld [vmem:[#allocation3 + $0x430] sm:$0xff] }
0x3604   : > { %v5696_v45 = vmul.f32 %v8566_v37, %v5695_v40  ;;  %v8101_v40 = vld [vmem:[#allocation3 + $0x428] sm:$0xff] }
0x3606   : > { %v5700_v38 = vsel %vm5699_vm2, %v8566_v37, %v5696_v45  ;;  %v8100_v45 = vld [vmem:[#allocation3 + $0x420] sm:$0xff] }
0x3607   : > { %8284 = vpush %v5700_v38  ;;  %v8099_v38 = vld [vmem:[#allocation3 + $0x418] sm:$0xff] }
0x3638   : > { %s8285_s29 = spop %8284 }
0x3639   : > { %v5702_v21 = vstv %s8285_s29 }
0x363a   : > { %v5703_v47 = vmul.f32 %v5702_v21, %v5675_v18 }
0x363c   : > { %v5706_v16 = vmul.f32 %v8499_v31, %v5703_v47 }
0x363e   : > { %v5709_v2 = vadd.f32 %v8500_v49, %v5706_v16  ;;  %v8098_v49 = vld [vmem:[#allocation3 + $0x410] sm:$0xff]  ;;  %v8096_v16 = vld [vmem:[#allocation3 + $0x400] sm:$0xff] }
0x3640   : > { %v5713_v4 = vmul.f32 %v8501_v56, %v5709_v2  ;;  %vm5710_vm3 = vcmp.ge.f32.partialorder %v5709_v2, 0.0  ;;  %v8111_v56 = vld [vmem:[#allocation3 + $0x138] sm:$0xff] }
0x3641   : > { %6227 = vmatpush.bf16.msra.mxu1 %v8111_v56 }
0x3642   : > { %v5714_v60 = vsel %vm5710_vm3, %v5709_v2, %v5713_v4  ;;  %v8110_v2 = vld [vmem:[#allocation3 + $0x130] sm:$0xff]  ;;  %v8109_v4 = vld [vmem:[#allocation3 + $0x128] sm:$0xff] }
0x3643   : > { %7601 = vmatpush.msk.msrb.mxu0 %vm1358_vm12, %v5714_v60  ;;  %v8108_v60 = vld [vmem:[#allocation3 + $0x120] sm:$0xff] }
0x3644   : > { %7602 = vmatmul.msk.f32.vlgmr.msrb.gmra.mxu0 %vm1912_vm6, %v9001_v28  ;;  %v5920_v28 = vadd.f32 %v5919_v17, %v5857_v63 }
0x3645   : > { %6135 = vmatpush.bf16.msra.mxu0 %v8103_v39  ;;  %6228 = vmatpush.bf16.msra.mxu1 %v8110_v2 }
0x3649   : > { %6136 = vmatpush.bf16.msra.mxu0 %v8102_v50  ;;  %6229 = vmatpush.bf16.msra.mxu1 %v8109_v4 }
0x364c   : > { %7603 = vmatmul.msk.f32.gmra.mxu0 %vm1912_vm6, %v9009_v7 }
0x364d   : > { %6137 = vmatpush.bf16.msra.mxu0 %v8101_v40  ;;  %6230 = vmatpush.bf16.msra.mxu1 %v8108_v60 }
0x3651   : > { %6138 = vmatpush.bf16.msra.mxu0 %v8100_v45 }
0x3655   : > { %6139 = vmatpush.bf16.msra.mxu0 %v8099_v38 }
0x3659   : > { %6140 = vmatpush.bf16.msra.mxu0 %v8098_v49 }
0x365d   : > { %6141 = vmatpush.bf16.msra.mxu0 %v8097_v19 }
0x3661   : > { %6142 = vmatpush.bf16.msra.mxu0 %v8096_v16 }
0x36c1   : > { %v5758_v61 = vpop.f32.mrf.mxu0 }
0x36c9   : > { %v5761_v54 = vpop.f32.mrf.mxu0 }
0x36ca   : > { %v5922_v10 = vpack.c.bf16 %v5761_v54, %v5758_v61  ;;  %v8504_v54 = vld [vmem:[#allocation5 + $0x47] ss:$0 sm:$0xff] }
0x36cc   : > { %5995 = vmatmul.bf16.vlgmr.msrb.gmra.mxu3 %v5922_v10 }
0x374f   : > { %v5996_v11 = vpop.f32.mrf.mxu3 }
0x3750   : > { %v6001_v15 = vadd.f32 %v5996_v11, %v5918_v5 }
0x3752   : > { %v6005_v20 = vadd.f32 %v8502_v23, %v6001_v15 }
0x3757   : > { %v5998_v7 = vpop.f32.mrf.mxu3 }
0x3758   : > { %v6002_v26 = vadd.f32 %v5998_v7, %v5920_v28  ;;  %v8107_v7 = vld [vmem:[#allocation3 + $0x118] sm:$0xff] }
0x3759   : > { %6231 = vmatpush.bf16.msra.mxu1 %v8107_v7 }
0x375a   : > { %v6006_v22 = vadd.f32 %v8502_v23, %v6002_v26  ;;  %v8106_v26 = vld [vmem:[#allocation3 + $0x110] sm:$0xff] }
0x375c   : > { %v6007_v59 = vadd.f32 %v6006_v22, %v6005_v20 }
0x375d   : > { %6232 = vmatpush.bf16.msra.mxu1 %v8106_v26 }
0x375e   : > { %6008 = vadd.xlane.f32.xlu1 %v6007_v59  ;;  %v8506_v59 = vld [vmem:[#allocation5 + $0x49] ss:$0 sm:$0xff] }
0x37d1   : > { %v6009_v29 = vpop.xlane.xlu1 %6008 }
0x37d2   : > { %v6010_v27 = vrot.slane %v6009_v29, 4 }
0x37d4   : > { %v6011_v1 = vadd.f32 %v6010_v27, %v6009_v29 }
0x37d6   : > { %v6012_v58 = vrot.slane %v6011_v1, 2 }
0x37d8   : > { %v6013_v3 = vadd.f32 %v6012_v58, %v6011_v1  ;;  %v8507_v58 = vld [vmem:[#allocation5 + $0x3] ss:$0 sm:$0xff] }
0x37da   : > { %v6014_v52 = vrot.slane %v6013_v3, 1 }
0x37dc   : > { %v6015_v33 = vadd.f32 %v6014_v52, %v6013_v3 }
0x37de   : > { %8286 = vpush %v6015_v33 }
0x380f   : > { %s8287_s30 = spop %8286 }
0x3810   : > { %s6017_s5 = smul.f32 0.0026041667, %s8287_s30 }
0x3812   : > { %v6018_v6 = vstv %s6017_s5 }
0x3813   : > { %v6019_v18 = vsub.f32 %v6005_v20, %v6018_v6  ;;  %v6020_v14 = vsub.f32 %v6006_v22, %v6018_v6  ;;  %v8105_v20 = vld [vmem:[#allocation3 + $0x108] sm:$0xff]  ;;  %v8104_v22 = vld [vmem:[#allocation3 + $0x100] sm:$0xff] }
0x3814   : > { %6233 = vmatpush.bf16.msra.mxu1 %v8105_v20 }
0x3815   : > { %v6021_v24 = vmul.f32 %v6019_v18, %v6019_v18  ;;  %v6022_v62 = vmul.f32 %v6020_v14, %v6020_v14 }
0x3817   : > { %v6023_v0 = vmul.f32 %v8863_v41, %v6021_v24  ;;  %v6024_v43 = vmul.f32 %v8863_v41, %v6022_v62 }
0x3818   : > { %6234 = vmatpush.bf16.msra.mxu1 %v8104_v22 }
0x3819   : > { %v6025_v13 = vadd.f32 %v6024_v43, %v6023_v0  ;;  %v8508_v0 = vld [vmem:[#allocation5 + $0x4] ss:$0 sm:$0xff] }
0x381b   : > { %6026 = vadd.xlane.f32.xlu2 %v6025_v13 }
0x388e   : > { %v6027_v57 = vpop.xlane.xlu2 %6026 }
0x388f   : > { %v6028_v35 = vrot.slane %v6027_v57, 4 }
0x3891   : > { %v6029_v32 = vadd.f32 %v6028_v35, %v6027_v57 }
0x3893   : > { %v6030_v36 = vrot.slane %v6029_v32, 2 }
0x3895   : > { %v6031_v25 = vadd.f32 %v6030_v36, %v6029_v32 }
0x3897   : > { %v6032_v37 = vrot.slane %v6031_v25, 1 }
0x3899   : > { %v6033_v8 = vadd.f32 %v6032_v37, %v6031_v25 }
0x389b   : > { %8288 = vpush %v6033_v8 }
0x38cc   : > { %s8289_s7 = spop %8288 }
0x38cd   : > { %s6035_s8 = smul.f32 0.0026041667, %s8289_s7 }
0x38cf   : > { %s6036_s9 = sadd.f32 1e-08, %s6035_s8 }
0x38d1   : > { %v6037_v41 = vstv %s6036_s9 }
0x38d2   : > { %8567 = vrsqrt.f32 %v6037_v41  ;;  %vm6044_vm6 = vweird.f32 %v6037_v41 }
0x38d8   : > { %v8568_v53 = vpop.eup %8567 }
0x38d9   : > { %v6039_v44 = vmul.f32 %v8568_v53, %v6037_v41  ;;  %vm6045_vm12 = vweird.f32 %v8568_v53 }
0x38da   : > { %vm6046_vm4 = vmor %vm6044_vm6, %vm6045_vm12 }
0x38db   : > { %v6040_v34 = vmul.f32 %v8568_v53, %v6039_v44 }
0x38dd   : > { %v6041_v46 = vmul.f32 0.5, %v6040_v34 }
0x38df   : > { %v6042_v31 = vsub.f32 1.5, %v6041_v46 }
0x38e1   : > { %v6043_v21 = vmul.f32 %v8568_v53, %v6042_v31 }
0x38e3   : > { %v6047_v47 = vsel %vm6046_vm4, %v8568_v53, %v6043_v21 }
0x38e4   : > { %8290 = vpush %v6047_v47 }
0x3915   : > { %s8291_s10 = spop %8290 }
0x3916   : > { %v6049_v9 = vstv %s8291_s10 }
0x3917   : > { %v6050_v30 = vmul.f32 %v6049_v9, %v6019_v18  ;;  %v6051_v61 = vmul.f32 %v6049_v9, %v6020_v14 }
0x3919   : > { %v6054_v10 = vmul.f32 %v8503_v55, %v6050_v30  ;;  %v6055_v48 = vmul.f32 %v8503_v55, %v6051_v61 }
0x391b   : > { %v6058_v11 = vadd.f32 %v8504_v54, %v6054_v10  ;;  %v6059_v63 = vadd.f32 %v8504_v54, %v6055_v48 }
0x391d   : > { %vm6060_vm10 = vcmp.ge.f32.partialorder %v6058_v11, 0.0  ;;  %vm6061_vm11 = vcmp.ge.f32.partialorder %v6059_v63, 0.0  ;;  %v6064_v5 = vmul.f32 %v8505_v12, %v6058_v11  ;;  %v6065_v17 = vmul.f32 %v8505_v12, %v6059_v63 }
0x391f   : > { %v6066_v28 = vsel %vm6060_vm10, %v6058_v11, %v6064_v5  ;;  %v6067_v15 = vsel %vm6061_vm11, %v6059_v63, %v6065_v17 }
0x3920   : > { %v6068_v23 = vpack.c.bf16 %v6067_v15, %v6066_v28 }
0x3922   : > { %6143 = vmatmul.bf16.vlgmr.msra.gmra.mxu0 %v6068_v23 }
0x399f   : > { %v6144_v29 = vpop.f32.mrf.mxu0 }
0x39a0   : > { %v6145_v27 = vadd.f32 %v8506_v59, %v6144_v29 }
0x39a2   : > { %v6149_v1 = vadd.f32 %v6145_v27, %v9072_v51 }
0x39a4   : > { %v6155_v33 = vmul.f32 %v8507_v58, %v6149_v1  ;;  %vm6151_vm5 = vcmp.ge.f32.partialorder %v6149_v1, 0.0 }
0x39a6   : > { %v6157_v14 = vsel %vm6151_vm5, %v6149_v1, %v6155_v33 }
0x39a7   : > { %v6146_v3 = vpop.f32.mrf.mxu0 }
0x39a8   : > { %v6147_v52 = vadd.f32 %v8506_v59, %v6146_v3 }
0x39aa   : > { %v6150_v6 = vadd.f32 %v6147_v52, %v9074_v42 }
0x39ac   : > { %vm6152_vm7 = vcmp.ge.f32.partialorder %v6150_v6, 0.0  ;;  %v6156_v18 = vmul.f32 %v8507_v58, %v6150_v6 }
0x39ae   : > { %v6158_v24 = vsel %vm6152_vm7, %v6150_v6, %v6156_v18 }
0x39af   : > { %v6159_v62 = vpack.c.bf16 %v6158_v24, %v6157_v14 }
0x39b1   : > { %6235 = vmatmul.bf16.vlgmr.msra.gmra.mxu1 %v6159_v62 }
0x3a2e   : > { %v6236_v43 = vpop.f32.mrf.mxu1 }
0x3a2f   : > { %v6237_v13 = vadd.f32 %v8508_v0, %v6236_v43 }
0x3a31   : > { %v6241_v51 = vmax.f32 %v6237_v13, 0.0 }
0x3a33   : > { %6243 = vst [vmem:[%s248_s13] sm:$0xff] %v6241_v51 }
0x3a36   : > { %v6238_v57 = vpop.f32.mrf.mxu1 }
0x3a37   : > { %v6239_v35 = vadd.f32 %v8508_v0, %v6238_v57 }
0x3a39   : > { %v6242_v42 = vmax.f32 %v6239_v35, 0.0 }
0x3a3b   : > { %6244 = vst [vmem:[%s248_s13 + $0x8] sm:$0xff] %v6242_v42 }
0x3a3c PF: > { %s16_s15 = sadd.s32 1, %s8643_s15  }
0x3a3d   : > { %p13_p7 = scmp.ge.s32.totalorder %s16_s15, 4  }
0x3a3f   :  { %15 = sbr.rel (!%p13_p7) target bundleno = 2 (0x2), region = 112 }
0x3a44   :  { %6266 = vsyncpa [#allocation4], 1 }
0x3a45   :  { %6268 = vsyncpa [#allocation4 + $0x1], 1 }
0x3a46   :  { %6269 = vsyncpa [#allocation6], 1 }

</bundles_post_ra>
